<compile_context>
chip_gen: v5e
topology: v5e:2x2
jax: 0.10.0
libtpu: 0.0.40
codegen_flags: <defaults>
</compile_context>

<pallas_src>
import functools

import jax
import jax.numpy as jnp
from jax.experimental import pallas as pl
from jax.experimental.pallas import tpu as pltpu

_EPS = 1e-5


# ---------------------------------------------------------------------------
# Kernel 1: fused backbone + (upsample ∘ up1.up) transposed-conv matmul.
# ---------------------------------------------------------------------------
def _backbone_kernel(x_ref,
                     w0_ref, b0_ref, g0_ref, be0_ref,
                     r1w1_ref, r1b1_ref, r1w2_ref, r1b2_ref, g1_ref, be1_ref,
                     r2w1_ref, r2b1_ref, r2w2_ref, r2b2_ref, g2_ref, be2_ref,
                     wl_ref, bl_ref,
                     wup_ref, bup_ref,
                     o_ref, *, eps):
    def dot(a, w_ref):  # bf16 MXU operands, f32 accumulation
        return jnp.dot(a.astype(jnp.bfloat16), w_ref[...],
                       preferred_element_type=jnp.float32)

    def bn(y, g_ref, b_ref):  # training-mode BatchNorm1d over the row axis
        mean = jnp.mean(y, axis=0, keepdims=True)
        var = jnp.mean(jnp.square(y - mean), axis=0, keepdims=True)
        return (y - mean) * jax.lax.rsqrt(var + eps) * g_ref[...] + b_ref[...]

    relu = lambda v: jnp.maximum(v, 0.0)

    x = x_ref[...]
    h = relu(bn(dot(x, w0_ref) + b0_ref[...], g0_ref, be0_ref))
    # residual block 1 (assumed x + fc2(relu(fc1(x)))), then BN -> ReLU
    t = relu(dot(h, r1w1_ref) + r1b1_ref[...])
    h = relu(bn(h + dot(t, r1w2_ref) + r1b2_ref[...], g1_ref, be1_ref))
    # residual block 2, then BN -> ReLU
    t = relu(dot(h, r2w1_ref) + r2b1_ref[...])
    h = relu(bn(h + dot(t, r2w2_ref) + r2b2_ref[...], g2_ref, be2_ref))
    # final Linear
    h = dot(h, wl_ref) + bl_ref[...]
    # composed (upsample ∘ up1.up) transposed conv; lanes ordered (t, k, cout)
    o_ref[...] = dot(h, wup_ref) + bup_ref[...]


# ---------------------------------------------------------------------------
# Kernels 2..5: double_conv (2x [k=3 conv + BN + ReLU]) fused with a trailing
# matmul (next ConvTranspose1d, or the final 1x1 out-conv).
# The k=3, padding=1 conv is 3 row-shifted matmuls: shifts are sublane rolls
# (XLU) with per-row masks at sequence/batch boundaries.
# ---------------------------------------------------------------------------
def _double_conv_tail_kernel(x_ref,
                             w1a_ref, w1b_ref, w1c_ref, g1_ref, be1_ref,
                             w2a_ref, w2b_ref, w2c_ref, g2_ref, be2_ref,
                             wt_ref, bt_ref,
                             o_ref, *, L, eps):
    R = x_ref.shape[0]
    l_idx = jax.lax.broadcasted_iota(jnp.int32, (R, 1), 0) % L
    not_first = (l_idx != 0).astype(jnp.float32)        # zero-pad at l == 0
    not_last = (l_idx != (L - 1)).astype(jnp.float32)   # zero-pad at l == L-1

    def dot(a, w_ref):
        return jnp.dot(a.astype(jnp.bfloat16), w_ref[...],
                       preferred_element_type=jnp.float32)

    def conv3_bn_relu(h, wa_ref, wb_ref, wc_ref, g_ref, b_ref):
        h_prev = pltpu.roll(h, 1, 0) * not_first         # h[l-1]
        h_next = pltpu.roll(h, R - 1, 0) * not_last      # h[l+1]
        y = dot(h_prev, wa_ref) + dot(h, wb_ref) + dot(h_next, wc_ref)
        mean = jnp.mean(y, axis=0, keepdims=True)        # train-mode BN
        var = jnp.mean(jnp.square(y - mean), axis=0, keepdims=True)
        y = (y - mean) * jax.lax.rsqrt(var + eps) * g_ref[...] + b_ref[...]
        return jnp.maximum(y, 0.0)

    h = conv3_bn_relu(x_ref[...], w1a_ref, w1b_ref, w1c_ref, g1_ref, be1_ref)
    h = conv3_bn_relu(h, w2a_ref, w2b_ref, w2c_ref, g2_ref, be2_ref)
    # tail: next ConvTranspose1d (lanes ordered (k, cout)) or 1x1 out-conv
    o_ref[...] = dot(h, wt_ref) + bt_ref[...]


# ---------------------------------------------------------------------------
# Host-side weight re-packing (tiny, runs under jit, outside the kernels)
# ---------------------------------------------------------------------------
def _vmem_specs(n):
    return [pl.BlockSpec(memory_space=pltpu.MemorySpace.VMEM)] * n


def _bf16(w):
    return w.astype(jnp.bfloat16)


def _row(v):
    return v.reshape(1, -1).astype(jnp.float32)


def _conv3_taps(W):
    """PyTorch Conv1d weight (Cout, Cin, 3) -> three (Cin, Cout) tap matrices."""
    return _bf16(W[:, :, 0].T), _bf16(W[:, :, 1].T), _bf16(W[:, :, 2].T)


def _ct_weight(W):
    """ConvTranspose1d weight (Cin, Cout, K) -> (Cin, K*Cout), lanes (k, co)."""
    Ci, Co, K = W.shape
    return _bf16(W.transpose(0, 2, 1).reshape(Ci, K * Co))


def _ct_bias(b, K):
    return jnp.tile(b, (K,)).reshape(1, -1).astype(jnp.float32)


def _compose_upsample_up1(Wu, bu, W1, b1):
    """Compose `upsample` (ConvTranspose1d on length-1 input) with up1's
    ConvTranspose1d (stride == kernel_size) into one matmul.
    Returns (mid1, T1*K*mid3) weight and (1, T1*K*mid3) bias, lanes (t,k,c)."""
    mid1, mid2, T1 = Wu.shape
    _, mid3, K = W1.shape
    Wc = jnp.einsum('abt,bck->atkc', Wu, W1).reshape(mid1, T1 * K * mid3)
    bc = (jnp.einsum('b,bck->kc', bu, W1) + b1[None, :]).reshape(-1)  # (K*mid3,)
    bc = jnp.tile(bc, (T1,)).reshape(1, T1 * K * mid3)
    return _bf16(Wc), bc.astype(jnp.float32)


def _to_rows(y, B, cout, target_len):
    """(B*L_prev, K*cout) [lanes (k, co)] -> (B*target_len, cout).
    Row-major layout is preserved (free reshape); applies the up_fourier
    zero-padding along the length dim when out_shape > L_prev*K."""
    R, W = y.shape
    m_raw = (R // B) * (W // cout)
    y = y.reshape(B, m_raw, cout)
    diff = target_len - m_raw
    if diff > 0:
        y = jnp.pad(y, ((0, 0), (diff // 2, diff - diff // 2), (0, 0)))
    return y.reshape(B * target_len, cout)


# ---------------------------------------------------------------------------
# pallas_call wrappers
# ---------------------------------------------------------------------------
def _backbone_call(x, bb, wup, bup, eps=_EPS):
    B = x.shape[0]
    out_w = wup.shape[1]
    args = (x.astype(jnp.float32),
            _bf16(bb["w0"]), _row(bb["b0"]), _row(bb["g0"]), _row(bb["be0"]),
            _bf16(bb["r1w1"]), _row(bb["r1b1"]),
            _bf16(bb["r1w2"]), _row(bb["r1b2"]),
            _row(bb["g1"]), _row(bb["be1"]),
            _bf16(bb["r2w1"]), _row(bb["r2b1"]),
            _bf16(bb["r2w2"]), _row(bb["r2b2"]),
            _row(bb["g2"]), _row(bb["be2"]),
            _bf16(bb["wl"]), _row(bb["bl"]),
            wup, bup)
    return pl.pallas_call(
        functools.partial(_backbone_kernel, eps=eps),
        out_shape=jax.ShapeDtypeStruct((B, out_w), jnp.float32),
        in_specs=_vmem_specs(len(args)),
        out_specs=pl.BlockSpec(memory_space=pltpu.MemorySpace.VMEM),
    )(*args)


def _double_conv_tail_call(x2d, L, c1W, bn1g, bn1b, c2W, bn2g, bn2b, wt, bt,
                           eps=_EPS):
    R = x2d.shape[0]
    Q = wt.shape[1]
    w1a, w1b, w1c = _conv3_taps(c1W)
    w2a, w2b, w2c = _conv3_taps(c2W)
    args = (x2d, w1a, w1b, w1c, _row(bn1g), _row(bn1b),
            w2a, w2b, w2c, _row(bn2g), _row(bn2b), wt, bt)
    return pl.pallas_call(
        functools.partial(_double_conv_tail_kernel, L=L, eps=eps),
        out_shape=jax.ShapeDtypeStruct((R, Q), jnp.float32),
        in_specs=_vmem_specs(len(args)),
        out_specs=pl.BlockSpec(memory_space=pltpu.MemorySpace.VMEM),
    )(*args)


# ---------------------------------------------------------------------------
# Full forward pass (5 pallas_calls)
# ---------------------------------------------------------------------------
def unet_fourier_fwd(x, params, cfg, eps=_EPS):
    B = x.shape[0]
    ks = cfg["ks"]
    up1, up2, up3, up4 = (params["up1"], params["up2"],
                          params["up3"], params["up4"])
    mid3 = up1["tW"].shape[1]
    mid4 = up2["tW"].shape[1]
    mid5 = up3["tW"].shape[1]
    mid6 = up4["tW"].shape[1]

    # K1: backbone + (upsample ∘ up1.up)
    wup, bup = _compose_upsample_up1(params["upW"], params["upb"],
                                     up1["tW"], up1["tb"])
    h = _backbone_call(x, params["backbone"], wup, bup, eps)
    h = _to_rows(h, B, mid3, cfg["transconv2_shape"])

    # K2: up1 double_conv + up2.up
    h = _double_conv_tail_call(h, cfg["transconv2_shape"],
                               up1["c1W"], up1["bn1g"], up1["bn1b"],
                               up1["c2W"], up1["bn2g"], up1["bn2b"],
                               _ct_weight(up2["tW"]), _ct_bias(up2["tb"], ks[2]),
                               eps)
    h = _to_rows(h, B, mid4, cfg["transconv3_shape"])

    # K3: up2 double_conv + up3.up
    h = _double_conv_tail_call(h, cfg["transconv3_shape"],
                               up2["c1W"], up2["bn1g"], up2["bn1b"],
                               up2["c2W"], up2["bn2g"], up2["bn2b"],
                               _ct_weight(up3["tW"]), _ct_bias(up3["tb"], ks[1]),
                               eps)
    h = _to_rows(h, B, mid5, cfg["transconv4_shape"])

    # K4: up3 double_conv + up4.up
    h = _double_conv_tail_call(h, cfg["transconv4_shape"],
                               up3["c1W"], up3["bn1g"], up3["bn1b"],
                               up3["c2W"], up3["bn2g"], up3["bn2b"],
                               _ct_weight(up4["tW"]), _ct_bias(up4["tb"], ks[0]),
                               eps)
    h = _to_rows(h, B, mid6, cfg["out_channels"])

    # K5: up4 double_conv + 1x1 out-conv (mid6 -> 1), then squeeze
    out_w = _bf16(params["outW"].reshape(1, mid6).T)          # (mid6, 1)
    out_b = params["outb"].reshape(1, 1).astype(jnp.float32)
    h = _double_conv_tail_call(h, cfg["out_channels"],
                               up4["c1W"], up4["bn1g"], up4["bn1b"],
                               up4["c2W"], up4["bn2g"], up4["bn2b"],
                               out_w, out_b, eps)
    return h.reshape(B, cfg["out_channels"])


# ---------------------------------------------------------------------------
# Deterministic parameter construction (shapes follow the PyTorch __init__)
# ---------------------------------------------------------------------------
def init_params(key, in_channels, mid, out_channels, kernel_sizes):
    keys = iter(jax.random.split(key, 64))

    def w(*shape):
        return jax.random.normal(next(keys), shape, jnp.float32) * 0.1

    def zeros(*shape):
        return jnp.zeros(shape, jnp.float32)

    def ones(*shape):
        return jnp.ones(shape, jnp.float32)

    backbone = dict(
        w0=w(in_channels, mid[0]), b0=zeros(mid[0]),
        g0=ones(mid[0]), be0=zeros(mid[0]),
        r1w1=w(mid[0], mid[0]), r1b1=zeros(mid[0]),
        r1w2=w(mid[0], mid[0]), r1b2=zeros(mid[0]),
        g1=ones(mid[0]), be1=zeros(mid[0]),
        r2w1=w(mid[0], mid[0]), r2b1=zeros(mid[0]),
        r2w2=w(mid[0], mid[0]), r2b2=zeros(mid[0]),
        g2=ones(mid[0]), be2=zeros(mid[0]),
        wl=w(mid[0], mid[1]), bl=zeros(mid[1]),
    )

    tc1 = (out_channels // kernel_sizes[0] // kernel_sizes[1]
           // kernel_sizes[2] // kernel_sizes[3])

    def up_block(cin, cout, K):
        return dict(
            tW=w(cin, cout, K), tb=zeros(cout),
            c1W=w(cout, cout, 3), bn1g=ones(cout), bn1b=zeros(cout),
            c2W=w(cout, cout, 3), bn2g=ones(cout), bn2b=zeros(cout),
        )

    return dict(
        backbone=backbone,
        upW=w(mid[1], mid[2], tc1), upb=zeros(mid[2]),   # ConvTranspose1d (Cin,Cout,K)
        up1=up_block(mid[2], mid[3], kernel_sizes[3]),
        up2=up_block(mid[3], mid[4], kernel_sizes[2]),
        up3=up_block(mid[4], mid[5], kernel_sizes[1]),
        up4=up_block(mid[5], mid[6], kernel_sizes[0]),
        outW=w(1, mid[6], 1), outb=zeros(1),
    )


if __name__ == "__main__":
    B = 4
    in_channels = 8
    mid_channels = [32, 16, 8, 8, 8, 8, 8]
    out_channels = 64
    kernel_sizes = [2, 2, 2, 2]

    transconv4 = out_channels // kernel_sizes[0]      # 32
    transconv3 = transconv4 // kernel_sizes[1]        # 16
    transconv2 = transconv3 // kernel_sizes[2]        # 8
    transconv1 = transconv2 // kernel_sizes[3]        # 4

    cfg = dict(out_channels=out_channels, ks=kernel_sizes,
               transconv1_shape=transconv1, transconv2_shape=transconv2,
               transconv3_shape=transconv3, transconv4_shape=transconv4)

    key = jax.random.PRNGKey(0)
    k_param, k_x = jax.random.split(key)
    params = init_params(k_param, in_channels, mid_channels, out_channels,
                         kernel_sizes)
    x = jax.random.normal(k_x, (B, in_channels), jnp.float32)

    fwd = jax.jit(lambda xx, pp: unet_fourier_fwd(xx, pp, cfg))
    y = fwd(x, params)
    jax.block_until_ready(y)
    assert y.shape == (B, out_channels), y.shape
    print("KERNEL_OK")
</pallas_src>

<mosaic_0001>
module attributes {stable_mosaic.version = 11 : i64} {
  func.func @_backbone_kernel(%arg0: memref<4x8xf32, #tpu.memory_space<vmem>>, %arg1: memref<8x32xbf16, #tpu.memory_space<vmem>>, %arg2: memref<1x32xf32, #tpu.memory_space<vmem>>, %arg3: memref<1x32xf32, #tpu.memory_space<vmem>>, %arg4: memref<1x32xf32, #tpu.memory_space<vmem>>, %arg5: memref<32x32xbf16, #tpu.memory_space<vmem>>, %arg6: memref<1x32xf32, #tpu.memory_space<vmem>>, %arg7: memref<32x32xbf16, #tpu.memory_space<vmem>>, %arg8: memref<1x32xf32, #tpu.memory_space<vmem>>, %arg9: memref<1x32xf32, #tpu.memory_space<vmem>>, %arg10: memref<1x32xf32, #tpu.memory_space<vmem>>, %arg11: memref<32x32xbf16, #tpu.memory_space<vmem>>, %arg12: memref<1x32xf32, #tpu.memory_space<vmem>>, %arg13: memref<32x32xbf16, #tpu.memory_space<vmem>>, %arg14: memref<1x32xf32, #tpu.memory_space<vmem>>, %arg15: memref<1x32xf32, #tpu.memory_space<vmem>>, %arg16: memref<1x32xf32, #tpu.memory_space<vmem>>, %arg17: memref<32x16xbf16, #tpu.memory_space<vmem>>, %arg18: memref<1x16xf32, #tpu.memory_space<vmem>>, %arg19: memref<16x64xbf16, #tpu.memory_space<vmem>>, %arg20: memref<1x64xf32, #tpu.memory_space<vmem>>, %arg21: memref<4x64xf32, #tpu.memory_space<vmem>>) attributes {dimension_semantics = [], scalar_prefetch = 0 : i64, scratch_operands = 0 : i64, tpu.core_type = #tpu.core_type<tc>} {
    %c0 = arith.constant 0 : index
    %c0_0 = arith.constant 0 : index
    %0 = vector.load %arg0[%c0, %c0_0] : memref<4x8xf32, #tpu.memory_space<vmem>>, vector<4x8xf32>
    %1 = arith.truncf %0 : vector<4x8xf32> to vector<4x8xbf16>
    %c0_1 = arith.constant 0 : index
    %c0_2 = arith.constant 0 : index
    %2 = vector.load %arg1[%c0_1, %c0_2] : memref<8x32xbf16, #tpu.memory_space<vmem>>, vector<8x32xbf16>
    %cst = arith.constant dense<0.000000e+00> : vector<4x32xf32>
    %3 = tpu.matmul %1, %2, %cst {dimension_numbers = #tpu.dot_dimension_numbers<[1], [0], [0], [1], [0, 0, 1, 1], [], []>} : vector<4x8xbf16>, vector<8x32xbf16>, vector<4x32xf32> -> vector<4x32xf32>
    %c0_3 = arith.constant 0 : index
    %c0_4 = arith.constant 0 : index
    %4 = vector.load %arg2[%c0_3, %c0_4] : memref<1x32xf32, #tpu.memory_space<vmem>>, vector<1x32xf32>
    %5 = vector.broadcast %4 : vector<1x32xf32> to vector<4x32xf32>
    %6 = arith.addf %3, %5 : vector<4x32xf32>
    %cst_5 = arith.constant dense<0.000000e+00> : vector<32xf32>
    %7 = vector.multi_reduction <add>, %6, %cst_5 [0] : vector<4x32xf32> to vector<32xf32>
    %8 = vector.shape_cast %7 : vector<32xf32> to vector<1x32xf32>
    %cst_6 = arith.constant 4.000000e+00 : f32
    %9 = vector.broadcast %cst_6 : f32 to vector<1x32xf32>
    %10 = arith.divf %8, %9 : vector<1x32xf32>
    %11 = vector.broadcast %10 : vector<1x32xf32> to vector<4x32xf32>
    %12 = arith.subf %6, %11 : vector<4x32xf32>
    %13 = arith.mulf %12, %12 : vector<4x32xf32>
    %cst_7 = arith.constant dense<0.000000e+00> : vector<32xf32>
    %14 = vector.multi_reduction <add>, %13, %cst_7 [0] : vector<4x32xf32> to vector<32xf32>
    %15 = vector.shape_cast %14 : vector<32xf32> to vector<1x32xf32>
    %cst_8 = arith.constant 4.000000e+00 : f32
    %16 = vector.broadcast %cst_8 : f32 to vector<1x32xf32>
    %17 = arith.divf %15, %16 : vector<1x32xf32>
    %18 = vector.broadcast %10 : vector<1x32xf32> to vector<4x32xf32>
    %19 = arith.subf %6, %18 : vector<4x32xf32>
    %cst_9 = arith.constant 9.99999974E-6 : f32
    %20 = vector.broadcast %cst_9 : f32 to vector<1x32xf32>
    %21 = arith.addf %17, %20 : vector<1x32xf32>
    %22 = math.rsqrt %21 : vector<1x32xf32>
    %23 = vector.broadcast %22 : vector<1x32xf32> to vector<4x32xf32>
    %24 = arith.mulf %19, %23 : vector<4x32xf32>
    %c0_10 = arith.constant 0 : index
    %c0_11 = arith.constant 0 : index
    %25 = vector.load %arg3[%c0_10, %c0_11] : memref<1x32xf32, #tpu.memory_space<vmem>>, vector<1x32xf32>
    %26 = vector.broadcast %25 : vector<1x32xf32> to vector<4x32xf32>
    %27 = arith.mulf %24, %26 : vector<4x32xf32>
    %c0_12 = arith.constant 0 : index
    %c0_13 = arith.constant 0 : index
    %28 = vector.load %arg4[%c0_12, %c0_13] : memref<1x32xf32, #tpu.memory_space<vmem>>, vector<1x32xf32>
    %29 = vector.broadcast %28 : vector<1x32xf32> to vector<4x32xf32>
    %30 = arith.addf %27, %29 : vector<4x32xf32>
    %cst_14 = arith.constant 0.000000e+00 : f32
    %31 = vector.broadcast %cst_14 : f32 to vector<4x32xf32>
    %32 = arith.maximumf %30, %31 : vector<4x32xf32>
    %33 = arith.truncf %32 : vector<4x32xf32> to vector<4x32xbf16>
    %c0_15 = arith.constant 0 : index
    %c0_16 = arith.constant 0 : index
    %34 = vector.load %arg5[%c0_15, %c0_16] : memref<32x32xbf16, #tpu.memory_space<vmem>>, vector<32x32xbf16>
    %cst_17 = arith.constant dense<0.000000e+00> : vector<4x32xf32>
    %35 = tpu.matmul %33, %34, %cst_17 {dimension_numbers = #tpu.dot_dimension_numbers<[1], [0], [0], [1], [0, 0, 1, 1], [], []>} : vector<4x32xbf16>, vector<32x32xbf16>, vector<4x32xf32> -> vector<4x32xf32>
    %c0_18 = arith.constant 0 : index
    %c0_19 = arith.constant 0 : index
    %36 = vector.load %arg6[%c0_18, %c0_19] : memref<1x32xf32, #tpu.memory_space<vmem>>, vector<1x32xf32>
    %37 = vector.broadcast %36 : vector<1x32xf32> to vector<4x32xf32>
    %38 = arith.addf %35, %37 : vector<4x32xf32>
    %cst_20 = arith.constant 0.000000e+00 : f32
    %39 = vector.broadcast %cst_20 : f32 to vector<4x32xf32>
    %40 = arith.maximumf %38, %39 : vector<4x32xf32>
    %41 = arith.truncf %40 : vector<4x32xf32> to vector<4x32xbf16>
    %c0_21 = arith.constant 0 : index
    %c0_22 = arith.constant 0 : index
    %42 = vector.load %arg7[%c0_21, %c0_22] : memref<32x32xbf16, #tpu.memory_space<vmem>>, vector<32x32xbf16>
    %cst_23 = arith.constant dense<0.000000e+00> : vector<4x32xf32>
    %43 = tpu.matmul %41, %42, %cst_23 {dimension_numbers = #tpu.dot_dimension_numbers<[1], [0], [0], [1], [0, 0, 1, 1], [], []>} : vector<4x32xbf16>, vector<32x32xbf16>, vector<4x32xf32> -> vector<4x32xf32>
    %44 = arith.addf %32, %43 : vector<4x32xf32>
    %c0_24 = arith.constant 0 : index
    %c0_25 = arith.constant 0 : index
    %45 = vector.load %arg8[%c0_24, %c0_25] : memref<1x32xf32, #tpu.memory_space<vmem>>, vector<1x32xf32>
    %46 = vector.broadcast %45 : vector<1x32xf32> to vector<4x32xf32>
    %47 = arith.addf %44, %46 : vector<4x32xf32>
    %cst_26 = arith.constant dense<0.000000e+00> : vector<32xf32>
    %48 = vector.multi_reduction <add>, %47, %cst_26 [0] : vector<4x32xf32> to vector<32xf32>
    %49 = vector.shape_cast %48 : vector<32xf32> to vector<1x32xf32>
    %cst_27 = arith.constant 4.000000e+00 : f32
    %50 = vector.broadcast %cst_27 : f32 to vector<1x32xf32>
    %51 = arith.divf %49, %50 : vector<1x32xf32>
    %52 = vector.broadcast %51 : vector<1x32xf32> to vector<4x32xf32>
    %53 = arith.subf %47, %52 : vector<4x32xf32>
    %54 = arith.mulf %53, %53 : vector<4x32xf32>
    %cst_28 = arith.constant dense<0.000000e+00> : vector<32xf32>
    %55 = vector.multi_reduction <add>, %54, %cst_28 [0] : vector<4x32xf32> to vector<32xf32>
    %56 = vector.shape_cast %55 : vector<32xf32> to vector<1x32xf32>
    %cst_29 = arith.constant 4.000000e+00 : f32
    %57 = vector.broadcast %cst_29 : f32 to vector<1x32xf32>
    %58 = arith.divf %56, %57 : vector<1x32xf32>
    %59 = vector.broadcast %51 : vector<1x32xf32> to vector<4x32xf32>
    %60 = arith.subf %47, %59 : vector<4x32xf32>
    %cst_30 = arith.constant 9.99999974E-6 : f32
    %61 = vector.broadcast %cst_30 : f32 to vector<1x32xf32>
    %62 = arith.addf %58, %61 : vector<1x32xf32>
    %63 = math.rsqrt %62 : vector<1x32xf32>
    %64 = vector.broadcast %63 : vector<1x32xf32> to vector<4x32xf32>
    %65 = arith.mulf %60, %64 : vector<4x32xf32>
    %c0_31 = arith.constant 0 : index
    %c0_32 = arith.constant 0 : index
    %66 = vector.load %arg9[%c0_31, %c0_32] : memref<1x32xf32, #tpu.memory_space<vmem>>, vector<1x32xf32>
    %67 = vector.broadcast %66 : vector<1x32xf32> to vector<4x32xf32>
    %68 = arith.mulf %65, %67 : vector<4x32xf32>
    %c0_33 = arith.constant 0 : index
    %c0_34 = arith.constant 0 : index
    %69 = vector.load %arg10[%c0_33, %c0_34] : memref<1x32xf32, #tpu.memory_space<vmem>>, vector<1x32xf32>
    %70 = vector.broadcast %69 : vector<1x32xf32> to vector<4x32xf32>
    %71 = arith.addf %68, %70 : vector<4x32xf32>
    %cst_35 = arith.constant 0.000000e+00 : f32
    %72 = vector.broadcast %cst_35 : f32 to vector<4x32xf32>
    %73 = arith.maximumf %71, %72 : vector<4x32xf32>
    %74 = arith.truncf %73 : vector<4x32xf32> to vector<4x32xbf16>
    %c0_36 = arith.constant 0 : index
    %c0_37 = arith.constant 0 : index
    %75 = vector.load %arg11[%c0_36, %c0_37] : memref<32x32xbf16, #tpu.memory_space<vmem>>, vector<32x32xbf16>
    %cst_38 = arith.constant dense<0.000000e+00> : vector<4x32xf32>
    %76 = tpu.matmul %74, %75, %cst_38 {dimension_numbers = #tpu.dot_dimension_numbers<[1], [0], [0], [1], [0, 0, 1, 1], [], []>} : vector<4x32xbf16>, vector<32x32xbf16>, vector<4x32xf32> -> vector<4x32xf32>
    %c0_39 = arith.constant 0 : index
    %c0_40 = arith.constant 0 : index
    %77 = vector.load %arg12[%c0_39, %c0_40] : memref<1x32xf32, #tpu.memory_space<vmem>>, vector<1x32xf32>
    %78 = vector.broadcast %77 : vector<1x32xf32> to vector<4x32xf32>
    %79 = arith.addf %76, %78 : vector<4x32xf32>
    %cst_41 = arith.constant 0.000000e+00 : f32
    %80 = vector.broadcast %cst_41 : f32 to vector<4x32xf32>
    %81 = arith.maximumf %79, %80 : vector<4x32xf32>
    %82 = arith.truncf %81 : vector<4x32xf32> to vector<4x32xbf16>
    %c0_42 = arith.constant 0 : index
    %c0_43 = arith.constant 0 : index
    %83 = vector.load %arg13[%c0_42, %c0_43] : memref<32x32xbf16, #tpu.memory_space<vmem>>, vector<32x32xbf16>
    %cst_44 = arith.constant dense<0.000000e+00> : vector<4x32xf32>
    %84 = tpu.matmul %82, %83, %cst_44 {dimension_numbers = #tpu.dot_dimension_numbers<[1], [0], [0], [1], [0, 0, 1, 1], [], []>} : vector<4x32xbf16>, vector<32x32xbf16>, vector<4x32xf32> -> vector<4x32xf32>
    %85 = arith.addf %73, %84 : vector<4x32xf32>
    %c0_45 = arith.constant 0 : index
    %c0_46 = arith.constant 0 : index
    %86 = vector.load %arg14[%c0_45, %c0_46] : memref<1x32xf32, #tpu.memory_space<vmem>>, vector<1x32xf32>
    %87 = vector.broadcast %86 : vector<1x32xf32> to vector<4x32xf32>
    %88 = arith.addf %85, %87 : vector<4x32xf32>
    %cst_47 = arith.constant dense<0.000000e+00> : vector<32xf32>
    %89 = vector.multi_reduction <add>, %88, %cst_47 [0] : vector<4x32xf32> to vector<32xf32>
    %90 = vector.shape_cast %89 : vector<32xf32> to vector<1x32xf32>
    %cst_48 = arith.constant 4.000000e+00 : f32
    %91 = vector.broadcast %cst_48 : f32 to vector<1x32xf32>
    %92 = arith.divf %90, %91 : vector<1x32xf32>
    %93 = vector.broadcast %92 : vector<1x32xf32> to vector<4x32xf32>
    %94 = arith.subf %88, %93 : vector<4x32xf32>
    %95 = arith.mulf %94, %94 : vector<4x32xf32>
    %cst_49 = arith.constant dense<0.000000e+00> : vector<32xf32>
    %96 = vector.multi_reduction <add>, %95, %cst_49 [0] : vector<4x32xf32> to vector<32xf32>
    %97 = vector.shape_cast %96 : vector<32xf32> to vector<1x32xf32>
    %cst_50 = arith.constant 4.000000e+00 : f32
    %98 = vector.broadcast %cst_50 : f32 to vector<1x32xf32>
    %99 = arith.divf %97, %98 : vector<1x32xf32>
    %100 = vector.broadcast %92 : vector<1x32xf32> to vector<4x32xf32>
    %101 = arith.subf %88, %100 : vector<4x32xf32>
    %cst_51 = arith.constant 9.99999974E-6 : f32
    %102 = vector.broadcast %cst_51 : f32 to vector<1x32xf32>
    %103 = arith.addf %99, %102 : vector<1x32xf32>
    %104 = math.rsqrt %103 : vector<1x32xf32>
    %105 = vector.broadcast %104 : vector<1x32xf32> to vector<4x32xf32>
    %106 = arith.mulf %101, %105 : vector<4x32xf32>
    %c0_52 = arith.constant 0 : index
    %c0_53 = arith.constant 0 : index
    %107 = vector.load %arg15[%c0_52, %c0_53] : memref<1x32xf32, #tpu.memory_space<vmem>>, vector<1x32xf32>
    %108 = vector.broadcast %107 : vector<1x32xf32> to vector<4x32xf32>
    %109 = arith.mulf %106, %108 : vector<4x32xf32>
    %c0_54 = arith.constant 0 : index
    %c0_55 = arith.constant 0 : index
    %110 = vector.load %arg16[%c0_54, %c0_55] : memref<1x32xf32, #tpu.memory_space<vmem>>, vector<1x32xf32>
    %111 = vector.broadcast %110 : vector<1x32xf32> to vector<4x32xf32>
    %112 = arith.addf %109, %111 : vector<4x32xf32>
    %cst_56 = arith.constant 0.000000e+00 : f32
    %113 = vector.broadcast %cst_56 : f32 to vector<4x32xf32>
    %114 = arith.maximumf %112, %113 : vector<4x32xf32>
    %115 = arith.truncf %114 : vector<4x32xf32> to vector<4x32xbf16>
    %c0_57 = arith.constant 0 : index
    %c0_58 = arith.constant 0 : index
    %116 = vector.load %arg17[%c0_57, %c0_58] : memref<32x16xbf16, #tpu.memory_space<vmem>>, vector<32x16xbf16>
    %cst_59 = arith.constant dense<0.000000e+00> : vector<4x16xf32>
    %117 = tpu.matmul %115, %116, %cst_59 {dimension_numbers = #tpu.dot_dimension_numbers<[1], [0], [0], [1], [0, 0, 1, 1], [], []>} : vector<4x32xbf16>, vector<32x16xbf16>, vector<4x16xf32> -> vector<4x16xf32>
    %c0_60 = arith.constant 0 : index
    %c0_61 = arith.constant 0 : index
    %118 = vector.load %arg18[%c0_60, %c0_61] : memref<1x16xf32, #tpu.memory_space<vmem>>, vector<1x16xf32>
    %119 = vector.broadcast %118 : vector<1x16xf32> to vector<4x16xf32>
    %120 = arith.addf %117, %119 : vector<4x16xf32>
    %121 = arith.truncf %120 : vector<4x16xf32> to vector<4x16xbf16>
    %c0_62 = arith.constant 0 : index
    %c0_63 = arith.constant 0 : index
    %122 = vector.load %arg19[%c0_62, %c0_63] : memref<16x64xbf16, #tpu.memory_space<vmem>>, vector<16x64xbf16>
    %cst_64 = arith.constant dense<0.000000e+00> : vector<4x64xf32>
    %123 = tpu.matmul %121, %122, %cst_64 {dimension_numbers = #tpu.dot_dimension_numbers<[1], [0], [0], [1], [0, 0, 1, 1], [], []>} : vector<4x16xbf16>, vector<16x64xbf16>, vector<4x64xf32> -> vector<4x64xf32>
    %c0_65 = arith.constant 0 : index
    %c0_66 = arith.constant 0 : index
    %124 = vector.load %arg20[%c0_65, %c0_66] : memref<1x64xf32, #tpu.memory_space<vmem>>, vector<1x64xf32>
    %125 = vector.broadcast %124 : vector<1x64xf32> to vector<4x64xf32>
    %126 = arith.addf %123, %125 : vector<4x64xf32>
    %c0_67 = arith.constant 0 : index
    %c0_68 = arith.constant 0 : index
    %127 = vector.load %arg21[%c0_67, %c0_68] : memref<4x64xf32, #tpu.memory_space<vmem>>, vector<4x64xf32>
    tpu.vector_store %arg21[%c0_67, %c0_68], %126 {strides = array<i32>} : memref<4x64xf32, #tpu.memory_space<vmem>>, vector<4x64xf32>,
    return
  }
}

module attributes {stable_mosaic.version = 11 : i64} {
  func.func @_double_conv_tail_kernel(%arg0: memref<64x8xf32, #tpu.memory_space<vmem>>, %arg1: memref<8x8xbf16, #tpu.memory_space<vmem>>, %arg2: memref<8x8xbf16, #tpu.memory_space<vmem>>, %arg3: memref<8x8xbf16, #tpu.memory_space<vmem>>, %arg4: memref<1x8xf32, #tpu.memory_space<vmem>>, %arg5: memref<1x8xf32, #tpu.memory_space<vmem>>, %arg6: memref<8x8xbf16, #tpu.memory_space<vmem>>, %arg7: memref<8x8xbf16, #tpu.memory_space<vmem>>, %arg8: memref<8x8xbf16, #tpu.memory_space<vmem>>, %arg9: memref<1x8xf32, #tpu.memory_space<vmem>>, %arg10: memref<1x8xf32, #tpu.memory_space<vmem>>, %arg11: memref<8x16xbf16, #tpu.memory_space<vmem>>, %arg12: memref<1x16xf32, #tpu.memory_space<vmem>>, %arg13: memref<64x16xf32, #tpu.memory_space<vmem>>) attributes {dimension_semantics = [], scalar_prefetch = 0 : i64, scratch_operands = 0 : i64, tpu.core_type = #tpu.core_type<tc>} {
    %0 = tpu.iota {dimensions = array<i32: 0>} : vector<64x1xi32>
    %c16_i32 = arith.constant 16 : i32
    %c0_i32 = arith.constant 0 : i32
    %1 = arith.cmpi eq, %c16_i32, %c0_i32 : i32
    %c1_i32 = arith.constant 1 : i32
    %2 = arith.select %1, %c1_i32, %c16_i32 : i32
    %3 = vector.broadcast %2 : i32 to vector<64x1xi32>
    %4 = arith.remsi %0, %3 : vector<64x1xi32>
    %c0_i32_0 = arith.constant 0 : i32
    %5 = vector.broadcast %c0_i32_0 : i32 to vector<64x1xi32>
    %6 = arith.cmpi ne, %4, %5 : vector<64x1xi32>
    %c0_i32_1 = arith.constant 0 : i32
    %7 = vector.broadcast %c0_i32_1 : i32 to vector<64x1xi32>
    %8 = arith.cmpi slt, %4, %7 : vector<64x1xi32>
    %c0_i32_2 = arith.constant 0 : i32
    %9 = arith.cmpi slt, %2, %c0_i32_2 : i32
    %10 = vector.broadcast %9 : i1 to vector<64x1xi1>
    %11 = vector.broadcast %10 : vector<64x1xi1> to vector<64x1xi1>
    %12 = arith.xori %8, %11 : vector<64x1xi1>
    %13 = arith.andi %12, %6 : vector<64x1xi1>
    %14 = vector.broadcast %2 : i32 to vector<64x1xi32>
    %15 = arith.addi %4, %14 : vector<64x1xi32>
    %16 = arith.select %13, %15, %4 : vector<64x1xi1>, vector<64x1xi32>
    %c0_i32_3 = arith.constant 0 : i32
    %17 = vector.broadcast %c0_i32_3 : i32 to vector<64x1xi32>
    %18 = arith.cmpi ne, %16, %17 : vector<64x1xi32>
    %19 = arith.extui %18 : vector<64x1xi1> to vector<64x1xi32>
    %20 = arith.sitofp %19 : vector<64x1xi32> to vector<64x1xf32>
    %c15_i32 = arith.constant 15 : i32
    %21 = vector.broadcast %c15_i32 : i32 to vector<64x1xi32>
    %22 = arith.cmpi ne, %16, %21 : vector<64x1xi32>
    %23 = arith.extui %22 : vector<64x1xi1> to vector<64x1xi32>
    %24 = arith.sitofp %23 : vector<64x1xi32> to vector<64x1xf32>
    %c0 = arith.constant 0 : index
    %c0_4 = arith.constant 0 : index
    %25 = vector.load %arg0[%c0, %c0_4] : memref<64x8xf32, #tpu.memory_space<vmem>>, vector<64x8xf32>
    %c1_i32_5 = arith.constant 1 : i32
    %26 = tpu.dynamic_rotate %25 by %c1_i32_5 dim 0 : vector<64x8xf32>, i32 -> vector<64x8xf32>
    %27 = vector.broadcast %20 : vector<64x1xf32> to vector<64x8xf32>
    %28 = arith.mulf %26, %27 : vector<64x8xf32>
    %c63_i32 = arith.constant 63 : i32
    %29 = tpu.dynamic_rotate %25 by %c63_i32 dim 0 : vector<64x8xf32>, i32 -> vector<64x8xf32>
    %30 = vector.broadcast %24 : vector<64x1xf32> to vector<64x8xf32>
    %31 = arith.mulf %29, %30 : vector<64x8xf32>
    %32 = arith.truncf %28 : vector<64x8xf32> to vector<64x8xbf16>
    %c0_6 = arith.constant 0 : index
    %c0_7 = arith.constant 0 : index
    %33 = vector.load %arg1[%c0_6, %c0_7] : memref<8x8xbf16, #tpu.memory_space<vmem>>, vector<8x8xbf16>
    %cst = arith.constant dense<0.000000e+00> : vector<64x8xf32>
    %34 = tpu.matmul %32, %33, %cst {dimension_numbers = #tpu.dot_dimension_numbers<[1], [0], [0], [1], [0, 0, 1, 1], [], []>} : vector<64x8xbf16>, vector<8x8xbf16>, vector<64x8xf32> -> vector<64x8xf32>
    %35 = arith.truncf %25 : vector<64x8xf32> to vector<64x8xbf16>
    %c0_8 = arith.constant 0 : index
    %c0_9 = arith.constant 0 : index
    %36 = vector.load %arg2[%c0_8, %c0_9] : memref<8x8xbf16, #tpu.memory_space<vmem>>, vector<8x8xbf16>
    %cst_10 = arith.constant dense<0.000000e+00> : vector<64x8xf32>
    %37 = tpu.matmul %35, %36, %cst_10 {dimension_numbers = #tpu.dot_dimension_numbers<[1], [0], [0], [1], [0, 0, 1, 1], [], []>} : vector<64x8xbf16>, vector<8x8xbf16>, vector<64x8xf32> -> vector<64x8xf32>
    %38 = arith.addf %34, %37 : vector<64x8xf32>
    %39 = arith.truncf %31 : vector<64x8xf32> to vector<64x8xbf16>
    %c0_11 = arith.constant 0 : index
    %c0_12 = arith.constant 0 : index
    %40 = vector.load %arg3[%c0_11, %c0_12] : memref<8x8xbf16, #tpu.memory_space<vmem>>, vector<8x8xbf16>
    %cst_13 = arith.constant dense<0.000000e+00> : vector<64x8xf32>
    %41 = tpu.matmul %39, %40, %cst_13 {dimension_numbers = #tpu.dot_dimension_numbers<[1], [0], [0], [1], [0, 0, 1, 1], [], []>} : vector<64x8xbf16>, vector<8x8xbf16>, vector<64x8xf32> -> vector<64x8xf32>
    %42 = arith.addf %38, %41 : vector<64x8xf32>
    %cst_14 = arith.constant dense<0.000000e+00> : vector<8xf32>
    %43 = vector.multi_reduction <add>, %42, %cst_14 [0] : vector<64x8xf32> to vector<8xf32>
    %44 = vector.shape_cast %43 : vector<8xf32> to vector<1x8xf32>
    %cst_15 = arith.constant 6.400000e+01 : f32
    %45 = vector.broadcast %cst_15 : f32 to vector<1x8xf32>
    %46 = arith.divf %44, %45 : vector<1x8xf32>
    %47 = vector.broadcast %46 : vector<1x8xf32> to vector<64x8xf32>
    %48 = arith.subf %42, %47 : vector<64x8xf32>
    %49 = arith.mulf %48, %48 : vector<64x8xf32>
    %cst_16 = arith.constant dense<0.000000e+00> : vector<8xf32>
    %50 = vector.multi_reduction <add>, %49, %cst_16 [0] : vector<64x8xf32> to vector<8xf32>
    %51 = vector.shape_cast %50 : vector<8xf32> to vector<1x8xf32>
    %cst_17 = arith.constant 6.400000e+01 : f32
    %52 = vector.broadcast %cst_17 : f32 to vector<1x8xf32>
    %53 = arith.divf %51, %52 : vector<1x8xf32>
    %54 = vector.broadcast %46 : vector<1x8xf32> to vector<64x8xf32>
    %55 = arith.subf %42, %54 : vector<64x8xf32>
    %cst_18 = arith.constant 9.99999974E-6 : f32
    %56 = vector.broadcast %cst_18 : f32 to vector<1x8xf32>
    %57 = arith.addf %53, %56 : vector<1x8xf32>
    %58 = math.rsqrt %57 : vector<1x8xf32>
    %59 = vector.broadcast %58 : vector<1x8xf32> to vector<64x8xf32>
    %60 = arith.mulf %55, %59 : vector<64x8xf32>
    %c0_19 = arith.constant 0 : index
    %c0_20 = arith.constant 0 : index
    %61 = vector.load %arg4[%c0_19, %c0_20] : memref<1x8xf32, #tpu.memory_space<vmem>>, vector<1x8xf32>
    %62 = vector.broadcast %61 : vector<1x8xf32> to vector<64x8xf32>
    %63 = arith.mulf %60, %62 : vector<64x8xf32>
    %c0_21 = arith.constant 0 : index
    %c0_22 = arith.constant 0 : index
    %64 = vector.load %arg5[%c0_21, %c0_22] : memref<1x8xf32, #tpu.memory_space<vmem>>, vector<1x8xf32>
    %65 = vector.broadcast %64 : vector<1x8xf32> to vector<64x8xf32>
    %66 = arith.addf %63, %65 : vector<64x8xf32>
    %cst_23 = arith.constant 0.000000e+00 : f32
    %67 = vector.broadcast %cst_23 : f32 to vector<64x8xf32>
    %68 = arith.maximumf %66, %67 : vector<64x8xf32>
    %c1_i32_24 = arith.constant 1 : i32
    %69 = tpu.dynamic_rotate %68 by %c1_i32_24 dim 0 : vector<64x8xf32>, i32 -> vector<64x8xf32>
    %70 = vector.broadcast %20 : vector<64x1xf32> to vector<64x8xf32>
    %71 = arith.mulf %69, %70 : vector<64x8xf32>
    %c63_i32_25 = arith.constant 63 : i32
    %72 = tpu.dynamic_rotate %68 by %c63_i32_25 dim 0 : vector<64x8xf32>, i32 -> vector<64x8xf32>
    %73 = vector.broadcast %24 : vector<64x1xf32> to vector<64x8xf32>
    %74 = arith.mulf %72, %73 : vector<64x8xf32>
    %75 = arith.truncf %71 : vector<64x8xf32> to vector<64x8xbf16>
    %c0_26 = arith.constant 0 : index
    %c0_27 = arith.constant 0 : index
    %76 = vector.load %arg6[%c0_26, %c0_27] : memref<8x8xbf16, #tpu.memory_space<vmem>>, vector<8x8xbf16>
    %cst_28 = arith.constant dense<0.000000e+00> : vector<64x8xf32>
    %77 = tpu.matmul %75, %76, %cst_28 {dimension_numbers = #tpu.dot_dimension_numbers<[1], [0], [0], [1], [0, 0, 1, 1], [], []>} : vector<64x8xbf16>, vector<8x8xbf16>, vector<64x8xf32> -> vector<64x8xf32>
    %78 = arith.truncf %68 : vector<64x8xf32> to vector<64x8xbf16>
    %c0_29 = arith.constant 0 : index
    %c0_30 = arith.constant 0 : index
    %79 = vector.load %arg7[%c0_29, %c0_30] : memref<8x8xbf16, #tpu.memory_space<vmem>>, vector<8x8xbf16>
    %cst_31 = arith.constant dense<0.000000e+00> : vector<64x8xf32>
    %80 = tpu.matmul %78, %79, %cst_31 {dimension_numbers = #tpu.dot_dimension_numbers<[1], [0], [0], [1], [0, 0, 1, 1], [], []>} : vector<64x8xbf16>, vector<8x8xbf16>, vector<64x8xf32> -> vector<64x8xf32>
    %81 = arith.addf %77, %80 : vector<64x8xf32>
    %82 = arith.truncf %74 : vector<64x8xf32> to vector<64x8xbf16>
    %c0_32 = arith.constant 0 : index
    %c0_33 = arith.constant 0 : index
    %83 = vector.load %arg8[%c0_32, %c0_33] : memref<8x8xbf16, #tpu.memory_space<vmem>>, vector<8x8xbf16>
    %cst_34 = arith.constant dense<0.000000e+00> : vector<64x8xf32>
    %84 = tpu.matmul %82, %83, %cst_34 {dimension_numbers = #tpu.dot_dimension_numbers<[1], [0], [0], [1], [0, 0, 1, 1], [], []>} : vector<64x8xbf16>, vector<8x8xbf16>, vector<64x8xf32> -> vector<64x8xf32>
    %85 = arith.addf %81, %84 : vector<64x8xf32>
    %cst_35 = arith.constant dense<0.000000e+00> : vector<8xf32>
    %86 = vector.multi_reduction <add>, %85, %cst_35 [0] : vector<64x8xf32> to vector<8xf32>
    %87 = vector.shape_cast %86 : vector<8xf32> to vector<1x8xf32>
    %cst_36 = arith.constant 6.400000e+01 : f32
    %88 = vector.broadcast %cst_36 : f32 to vector<1x8xf32>
    %89 = arith.divf %87, %88 : vector<1x8xf32>
    %90 = vector.broadcast %89 : vector<1x8xf32> to vector<64x8xf32>
    %91 = arith.subf %85, %90 : vector<64x8xf32>
    %92 = arith.mulf %91, %91 : vector<64x8xf32>
    %cst_37 = arith.constant dense<0.000000e+00> : vector<8xf32>
    %93 = vector.multi_reduction <add>, %92, %cst_37 [0] : vector<64x8xf32> to vector<8xf32>
    %94 = vector.shape_cast %93 : vector<8xf32> to vector<1x8xf32>
    %cst_38 = arith.constant 6.400000e+01 : f32
    %95 = vector.broadcast %cst_38 : f32 to vector<1x8xf32>
    %96 = arith.divf %94, %95 : vector<1x8xf32>
    %97 = vector.broadcast %89 : vector<1x8xf32> to vector<64x8xf32>
    %98 = arith.subf %85, %97 : vector<64x8xf32>
    %cst_39 = arith.constant 9.99999974E-6 : f32
    %99 = vector.broadcast %cst_39 : f32 to vector<1x8xf32>
    %100 = arith.addf %96, %99 : vector<1x8xf32>
    %101 = math.rsqrt %100 : vector<1x8xf32>
    %102 = vector.broadcast %101 : vector<1x8xf32> to vector<64x8xf32>
    %103 = arith.mulf %98, %102 : vector<64x8xf32>
    %c0_40 = arith.constant 0 : index
    %c0_41 = arith.constant 0 : index
    %104 = vector.load %arg9[%c0_40, %c0_41] : memref<1x8xf32, #tpu.memory_space<vmem>>, vector<1x8xf32>
    %105 = vector.broadcast %104 : vector<1x8xf32> to vector<64x8xf32>
    %106 = arith.mulf %103, %105 : vector<64x8xf32>
    %c0_42 = arith.constant 0 : index
    %c0_43 = arith.constant 0 : index
    %107 = vector.load %arg10[%c0_42, %c0_43] : memref<1x8xf32, #tpu.memory_space<vmem>>, vector<1x8xf32>
    %108 = vector.broadcast %107 : vector<1x8xf32> to vector<64x8xf32>
    %109 = arith.addf %106, %108 : vector<64x8xf32>
    %cst_44 = arith.constant 0.000000e+00 : f32
    %110 = vector.broadcast %cst_44 : f32 to vector<64x8xf32>
    %111 = arith.maximumf %109, %110 : vector<64x8xf32>
    %112 = arith.truncf %111 : vector<64x8xf32> to vector<64x8xbf16>
    %c0_45 = arith.constant 0 : index
    %c0_46 = arith.constant 0 : index
    %113 = vector.load %arg11[%c0_45, %c0_46] : memref<8x16xbf16, #tpu.memory_space<vmem>>, vector<8x16xbf16>
    %cst_47 = arith.constant dense<0.000000e+00> : vector<64x16xf32>
    %114 = tpu.matmul %112, %113, %cst_47 {dimension_numbers = #tpu.dot_dimension_numbers<[1], [0], [0], [1], [0, 0, 1, 1], [], []>} : vector<64x8xbf16>, vector<8x16xbf16>, vector<64x16xf32> -> vector<64x16xf32>
    %c0_48 = arith.constant 0 : index
    %c0_49 = arith.constant 0 : index
    %115 = vector.load %arg12[%c0_48, %c0_49] : memref<1x16xf32, #tpu.memory_space<vmem>>, vector<1x16xf32>
    %116 = vector.broadcast %115 : vector<1x16xf32> to vector<64x16xf32>
    %117 = arith.addf %114, %116 : vector<64x16xf32>
    %c0_50 = arith.constant 0 : index
    %c0_51 = arith.constant 0 : index
    %118 = vector.load %arg13[%c0_50, %c0_51] : memref<64x16xf32, #tpu.memory_space<vmem>>, vector<64x16xf32>
    tpu.vector_store %arg13[%c0_50, %c0_51], %117 {strides = array<i32>} : memref<64x16xf32, #tpu.memory_space<vmem>>, vector<64x16xf32>,
    return
  }
}

module attributes {stable_mosaic.version = 11 : i64} {
  func.func @_double_conv_tail_kernel(%arg0: memref<32x8xf32, #tpu.memory_space<vmem>>, %arg1: memref<8x8xbf16, #tpu.memory_space<vmem>>, %arg2: memref<8x8xbf16, #tpu.memory_space<vmem>>, %arg3: memref<8x8xbf16, #tpu.memory_space<vmem>>, %arg4: memref<1x8xf32, #tpu.memory_space<vmem>>, %arg5: memref<1x8xf32, #tpu.memory_space<vmem>>, %arg6: memref<8x8xbf16, #tpu.memory_space<vmem>>, %arg7: memref<8x8xbf16, #tpu.memory_space<vmem>>, %arg8: memref<8x8xbf16, #tpu.memory_space<vmem>>, %arg9: memref<1x8xf32, #tpu.memory_space<vmem>>, %arg10: memref<1x8xf32, #tpu.memory_space<vmem>>, %arg11: memref<8x16xbf16, #tpu.memory_space<vmem>>, %arg12: memref<1x16xf32, #tpu.memory_space<vmem>>, %arg13: memref<32x16xf32, #tpu.memory_space<vmem>>) attributes {dimension_semantics = [], scalar_prefetch = 0 : i64, scratch_operands = 0 : i64, tpu.core_type = #tpu.core_type<tc>} {
    %0 = tpu.iota {dimensions = array<i32: 0>} : vector<32x1xi32>
    %c8_i32 = arith.constant 8 : i32
    %c0_i32 = arith.constant 0 : i32
    %1 = arith.cmpi eq, %c8_i32, %c0_i32 : i32
    %c1_i32 = arith.constant 1 : i32
    %2 = arith.select %1, %c1_i32, %c8_i32 : i32
    %3 = vector.broadcast %2 : i32 to vector<32x1xi32>
    %4 = arith.remsi %0, %3 : vector<32x1xi32>
    %c0_i32_0 = arith.constant 0 : i32
    %5 = vector.broadcast %c0_i32_0 : i32 to vector<32x1xi32>
    %6 = arith.cmpi ne, %4, %5 : vector<32x1xi32>
    %c0_i32_1 = arith.constant 0 : i32
    %7 = vector.broadcast %c0_i32_1 : i32 to vector<32x1xi32>
    %8 = arith.cmpi slt, %4, %7 : vector<32x1xi32>
    %c0_i32_2 = arith.constant 0 : i32
    %9 = arith.cmpi slt, %2, %c0_i32_2 : i32
    %10 = vector.broadcast %9 : i1 to vector<32x1xi1>
    %11 = vector.broadcast %10 : vector<32x1xi1> to vector<32x1xi1>
    %12 = arith.xori %8, %11 : vector<32x1xi1>
    %13 = arith.andi %12, %6 : vector<32x1xi1>
    %14 = vector.broadcast %2 : i32 to vector<32x1xi32>
    %15 = arith.addi %4, %14 : vector<32x1xi32>
    %16 = arith.select %13, %15, %4 : vector<32x1xi1>, vector<32x1xi32>
    %c0_i32_3 = arith.constant 0 : i32
    %17 = vector.broadcast %c0_i32_3 : i32 to vector<32x1xi32>
    %18 = arith.cmpi ne, %16, %17 : vector<32x1xi32>
    %19 = arith.extui %18 : vector<32x1xi1> to vector<32x1xi32>
    %20 = arith.sitofp %19 : vector<32x1xi32> to vector<32x1xf32>
    %c7_i32 = arith.constant 7 : i32
    %21 = vector.broadcast %c7_i32 : i32 to vector<32x1xi32>
    %22 = arith.cmpi ne, %16, %21 : vector<32x1xi32>
    %23 = arith.extui %22 : vector<32x1xi1> to vector<32x1xi32>
    %24 = arith.sitofp %23 : vector<32x1xi32> to vector<32x1xf32>
    %c0 = arith.constant 0 : index
    %c0_4 = arith.constant 0 : index
    %25 = vector.load %arg0[%c0, %c0_4] : memref<32x8xf32, #tpu.memory_space<vmem>>, vector<32x8xf32>
    %c1_i32_5 = arith.constant 1 : i32
    %26 = tpu.dynamic_rotate %25 by %c1_i32_5 dim 0 : vector<32x8xf32>, i32 -> vector<32x8xf32>
    %27 = vector.broadcast %20 : vector<32x1xf32> to vector<32x8xf32>
    %28 = arith.mulf %26, %27 : vector<32x8xf32>
    %c31_i32 = arith.constant 31 : i32
    %29 = tpu.dynamic_rotate %25 by %c31_i32 dim 0 : vector<32x8xf32>, i32 -> vector<32x8xf32>
    %30 = vector.broadcast %24 : vector<32x1xf32> to vector<32x8xf32>
    %31 = arith.mulf %29, %30 : vector<32x8xf32>
    %32 = arith.truncf %28 : vector<32x8xf32> to vector<32x8xbf16>
    %c0_6 = arith.constant 0 : index
    %c0_7 = arith.constant 0 : index
    %33 = vector.load %arg1[%c0_6, %c0_7] : memref<8x8xbf16, #tpu.memory_space<vmem>>, vector<8x8xbf16>
    %cst = arith.constant dense<0.000000e+00> : vector<32x8xf32>
    %34 = tpu.matmul %32, %33, %cst {dimension_numbers = #tpu.dot_dimension_numbers<[1], [0], [0], [1], [0, 0, 1, 1], [], []>} : vector<32x8xbf16>, vector<8x8xbf16>, vector<32x8xf32> -> vector<32x8xf32>
    %35 = arith.truncf %25 : vector<32x8xf32> to vector<32x8xbf16>
    %c0_8 = arith.constant 0 : index
    %c0_9 = arith.constant 0 : index
    %36 = vector.load %arg2[%c0_8, %c0_9] : memref<8x8xbf16, #tpu.memory_space<vmem>>, vector<8x8xbf16>
    %cst_10 = arith.constant dense<0.000000e+00> : vector<32x8xf32>
    %37 = tpu.matmul %35, %36, %cst_10 {dimension_numbers = #tpu.dot_dimension_numbers<[1], [0], [0], [1], [0, 0, 1, 1], [], []>} : vector<32x8xbf16>, vector<8x8xbf16>, vector<32x8xf32> -> vector<32x8xf32>
    %38 = arith.addf %34, %37 : vector<32x8xf32>
    %39 = arith.truncf %31 : vector<32x8xf32> to vector<32x8xbf16>
    %c0_11 = arith.constant 0 : index
    %c0_12 = arith.constant 0 : index
    %40 = vector.load %arg3[%c0_11, %c0_12] : memref<8x8xbf16, #tpu.memory_space<vmem>>, vector<8x8xbf16>
    %cst_13 = arith.constant dense<0.000000e+00> : vector<32x8xf32>
    %41 = tpu.matmul %39, %40, %cst_13 {dimension_numbers = #tpu.dot_dimension_numbers<[1], [0], [0], [1], [0, 0, 1, 1], [], []>} : vector<32x8xbf16>, vector<8x8xbf16>, vector<32x8xf32> -> vector<32x8xf32>
    %42 = arith.addf %38, %41 : vector<32x8xf32>
    %cst_14 = arith.constant dense<0.000000e+00> : vector<8xf32>
    %43 = vector.multi_reduction <add>, %42, %cst_14 [0] : vector<32x8xf32> to vector<8xf32>
    %44 = vector.shape_cast %43 : vector<8xf32> to vector<1x8xf32>
    %cst_15 = arith.constant 3.200000e+01 : f32
    %45 = vector.broadcast %cst_15 : f32 to vector<1x8xf32>
    %46 = arith.divf %44, %45 : vector<1x8xf32>
    %47 = vector.broadcast %46 : vector<1x8xf32> to vector<32x8xf32>
    %48 = arith.subf %42, %47 : vector<32x8xf32>
    %49 = arith.mulf %48, %48 : vector<32x8xf32>
    %cst_16 = arith.constant dense<0.000000e+00> : vector<8xf32>
    %50 = vector.multi_reduction <add>, %49, %cst_16 [0] : vector<32x8xf32> to vector<8xf32>
    %51 = vector.shape_cast %50 : vector<8xf32> to vector<1x8xf32>
    %cst_17 = arith.constant 3.200000e+01 : f32
    %52 = vector.broadcast %cst_17 : f32 to vector<1x8xf32>
    %53 = arith.divf %51, %52 : vector<1x8xf32>
    %54 = vector.broadcast %46 : vector<1x8xf32> to vector<32x8xf32>
    %55 = arith.subf %42, %54 : vector<32x8xf32>
    %cst_18 = arith.constant 9.99999974E-6 : f32
    %56 = vector.broadcast %cst_18 : f32 to vector<1x8xf32>
    %57 = arith.addf %53, %56 : vector<1x8xf32>
    %58 = math.rsqrt %57 : vector<1x8xf32>
    %59 = vector.broadcast %58 : vector<1x8xf32> to vector<32x8xf32>
    %60 = arith.mulf %55, %59 : vector<32x8xf32>
    %c0_19 = arith.constant 0 : index
    %c0_20 = arith.constant 0 : index
    %61 = vector.load %arg4[%c0_19, %c0_20] : memref<1x8xf32, #tpu.memory_space<vmem>>, vector<1x8xf32>
    %62 = vector.broadcast %61 : vector<1x8xf32> to vector<32x8xf32>
    %63 = arith.mulf %60, %62 : vector<32x8xf32>
    %c0_21 = arith.constant 0 : index
    %c0_22 = arith.constant 0 : index
    %64 = vector.load %arg5[%c0_21, %c0_22] : memref<1x8xf32, #tpu.memory_space<vmem>>, vector<1x8xf32>
    %65 = vector.broadcast %64 : vector<1x8xf32> to vector<32x8xf32>
    %66 = arith.addf %63, %65 : vector<32x8xf32>
    %cst_23 = arith.constant 0.000000e+00 : f32
    %67 = vector.broadcast %cst_23 : f32 to vector<32x8xf32>
    %68 = arith.maximumf %66, %67 : vector<32x8xf32>
    %c1_i32_24 = arith.constant 1 : i32
    %69 = tpu.dynamic_rotate %68 by %c1_i32_24 dim 0 : vector<32x8xf32>, i32 -> vector<32x8xf32>
    %70 = vector.broadcast %20 : vector<32x1xf32> to vector<32x8xf32>
    %71 = arith.mulf %69, %70 : vector<32x8xf32>
    %c31_i32_25 = arith.constant 31 : i32
    %72 = tpu.dynamic_rotate %68 by %c31_i32_25 dim 0 : vector<32x8xf32>, i32 -> vector<32x8xf32>
    %73 = vector.broadcast %24 : vector<32x1xf32> to vector<32x8xf32>
    %74 = arith.mulf %72, %73 : vector<32x8xf32>
    %75 = arith.truncf %71 : vector<32x8xf32> to vector<32x8xbf16>
    %c0_26 = arith.constant 0 : index
    %c0_27 = arith.constant 0 : index
    %76 = vector.load %arg6[%c0_26, %c0_27] : memref<8x8xbf16, #tpu.memory_space<vmem>>, vector<8x8xbf16>
    %cst_28 = arith.constant dense<0.000000e+00> : vector<32x8xf32>
    %77 = tpu.matmul %75, %76, %cst_28 {dimension_numbers = #tpu.dot_dimension_numbers<[1], [0], [0], [1], [0, 0, 1, 1], [], []>} : vector<32x8xbf16>, vector<8x8xbf16>, vector<32x8xf32> -> vector<32x8xf32>
    %78 = arith.truncf %68 : vector<32x8xf32> to vector<32x8xbf16>
    %c0_29 = arith.constant 0 : index
    %c0_30 = arith.constant 0 : index
    %79 = vector.load %arg7[%c0_29, %c0_30] : memref<8x8xbf16, #tpu.memory_space<vmem>>, vector<8x8xbf16>
    %cst_31 = arith.constant dense<0.000000e+00> : vector<32x8xf32>
    %80 = tpu.matmul %78, %79, %cst_31 {dimension_numbers = #tpu.dot_dimension_numbers<[1], [0], [0], [1], [0, 0, 1, 1], [], []>} : vector<32x8xbf16>, vector<8x8xbf16>, vector<32x8xf32> -> vector<32x8xf32>
    %81 = arith.addf %77, %80 : vector<32x8xf32>
    %82 = arith.truncf %74 : vector<32x8xf32> to vector<32x8xbf16>
    %c0_32 = arith.constant 0 : index
    %c0_33 = arith.constant 0 : index
    %83 = vector.load %arg8[%c0_32, %c0_33] : memref<8x8xbf16, #tpu.memory_space<vmem>>, vector<8x8xbf16>
    %cst_34 = arith.constant dense<0.000000e+00> : vector<32x8xf32>
    %84 = tpu.matmul %82, %83, %cst_34 {dimension_numbers = #tpu.dot_dimension_numbers<[1], [0], [0], [1], [0, 0, 1, 1], [], []>} : vector<32x8xbf16>, vector<8x8xbf16>, vector<32x8xf32> -> vector<32x8xf32>
    %85 = arith.addf %81, %84 : vector<32x8xf32>
    %cst_35 = arith.constant dense<0.000000e+00> : vector<8xf32>
    %86 = vector.multi_reduction <add>, %85, %cst_35 [0] : vector<32x8xf32> to vector<8xf32>
    %87 = vector.shape_cast %86 : vector<8xf32> to vector<1x8xf32>
    %cst_36 = arith.constant 3.200000e+01 : f32
    %88 = vector.broadcast %cst_36 : f32 to vector<1x8xf32>
    %89 = arith.divf %87, %88 : vector<1x8xf32>
    %90 = vector.broadcast %89 : vector<1x8xf32> to vector<32x8xf32>
    %91 = arith.subf %85, %90 : vector<32x8xf32>
    %92 = arith.mulf %91, %91 : vector<32x8xf32>
    %cst_37 = arith.constant dense<0.000000e+00> : vector<8xf32>
    %93 = vector.multi_reduction <add>, %92, %cst_37 [0] : vector<32x8xf32> to vector<8xf32>
    %94 = vector.shape_cast %93 : vector<8xf32> to vector<1x8xf32>
    %cst_38 = arith.constant 3.200000e+01 : f32
    %95 = vector.broadcast %cst_38 : f32 to vector<1x8xf32>
    %96 = arith.divf %94, %95 : vector<1x8xf32>
    %97 = vector.broadcast %89 : vector<1x8xf32> to vector<32x8xf32>
    %98 = arith.subf %85, %97 : vector<32x8xf32>
    %cst_39 = arith.constant 9.99999974E-6 : f32
    %99 = vector.broadcast %cst_39 : f32 to vector<1x8xf32>
    %100 = arith.addf %96, %99 : vector<1x8xf32>
    %101 = math.rsqrt %100 : vector<1x8xf32>
    %102 = vector.broadcast %101 : vector<1x8xf32> to vector<32x8xf32>
    %103 = arith.mulf %98, %102 : vector<32x8xf32>
    %c0_40 = arith.constant 0 : index
    %c0_41 = arith.constant 0 : index
    %104 = vector.load %arg9[%c0_40, %c0_41] : memref<1x8xf32, #tpu.memory_space<vmem>>, vector<1x8xf32>
    %105 = vector.broadcast %104 : vector<1x8xf32> to vector<32x8xf32>
    %106 = arith.mulf %103, %105 : vector<32x8xf32>
    %c0_42 = arith.constant 0 : index
    %c0_43 = arith.constant 0 : index
    %107 = vector.load %arg10[%c0_42, %c0_43] : memref<1x8xf32, #tpu.memory_space<vmem>>, vector<1x8xf32>
    %108 = vector.broadcast %107 : vector<1x8xf32> to vector<32x8xf32>
    %109 = arith.addf %106, %108 : vector<32x8xf32>
    %cst_44 = arith.constant 0.000000e+00 : f32
    %110 = vector.broadcast %cst_44 : f32 to vector<32x8xf32>
    %111 = arith.maximumf %109, %110 : vector<32x8xf32>
    %112 = arith.truncf %111 : vector<32x8xf32> to vector<32x8xbf16>
    %c0_45 = arith.constant 0 : index
    %c0_46 = arith.constant 0 : index
    %113 = vector.load %arg11[%c0_45, %c0_46] : memref<8x16xbf16, #tpu.memory_space<vmem>>, vector<8x16xbf16>
    %cst_47 = arith.constant dense<0.000000e+00> : vector<32x16xf32>
    %114 = tpu.matmul %112, %113, %cst_47 {dimension_numbers = #tpu.dot_dimension_numbers<[1], [0], [0], [1], [0, 0, 1, 1], [], []>} : vector<32x8xbf16>, vector<8x16xbf16>, vector<32x16xf32> -> vector<32x16xf32>
    %c0_48 = arith.constant 0 : index
    %c0_49 = arith.constant 0 : index
    %115 = vector.load %arg12[%c0_48, %c0_49] : memref<1x16xf32, #tpu.memory_space<vmem>>, vector<1x16xf32>
    %116 = vector.broadcast %115 : vector<1x16xf32> to vector<32x16xf32>
    %117 = arith.addf %114, %116 : vector<32x16xf32>
    %c0_50 = arith.constant 0 : index
    %c0_51 = arith.constant 0 : index
    %118 = vector.load %arg13[%c0_50, %c0_51] : memref<32x16xf32, #tpu.memory_space<vmem>>, vector<32x16xf32>
    tpu.vector_store %arg13[%c0_50, %c0_51], %117 {strides = array<i32>} : memref<32x16xf32, #tpu.memory_space<vmem>>, vector<32x16xf32>,
    return
  }
}

module attributes {stable_mosaic.version = 11 : i64} {
  func.func @_double_conv_tail_kernel(%arg0: memref<128x8xf32, #tpu.memory_space<vmem>>, %arg1: memref<8x8xbf16, #tpu.memory_space<vmem>>, %arg2: memref<8x8xbf16, #tpu.memory_space<vmem>>, %arg3: memref<8x8xbf16, #tpu.memory_space<vmem>>, %arg4: memref<1x8xf32, #tpu.memory_space<vmem>>, %arg5: memref<1x8xf32, #tpu.memory_space<vmem>>, %arg6: memref<8x8xbf16, #tpu.memory_space<vmem>>, %arg7: memref<8x8xbf16, #tpu.memory_space<vmem>>, %arg8: memref<8x8xbf16, #tpu.memory_space<vmem>>, %arg9: memref<1x8xf32, #tpu.memory_space<vmem>>, %arg10: memref<1x8xf32, #tpu.memory_space<vmem>>, %arg11: memref<8x16xbf16, #tpu.memory_space<vmem>>, %arg12: memref<1x16xf32, #tpu.memory_space<vmem>>, %arg13: memref<128x16xf32, #tpu.memory_space<vmem>>) attributes {dimension_semantics = [], scalar_prefetch = 0 : i64, scratch_operands = 0 : i64, tpu.core_type = #tpu.core_type<tc>} {
    %0 = tpu.iota {dimensions = array<i32: 0>} : vector<128x1xi32>
    %c32_i32 = arith.constant 32 : i32
    %c0_i32 = arith.constant 0 : i32
    %1 = arith.cmpi eq, %c32_i32, %c0_i32 : i32
    %c1_i32 = arith.constant 1 : i32
    %2 = arith.select %1, %c1_i32, %c32_i32 : i32
    %3 = vector.broadcast %2 : i32 to vector<128x1xi32>
    %4 = arith.remsi %0, %3 : vector<128x1xi32>
    %c0_i32_0 = arith.constant 0 : i32
    %5 = vector.broadcast %c0_i32_0 : i32 to vector<128x1xi32>
    %6 = arith.cmpi ne, %4, %5 : vector<128x1xi32>
    %c0_i32_1 = arith.constant 0 : i32
    %7 = vector.broadcast %c0_i32_1 : i32 to vector<128x1xi32>
    %8 = arith.cmpi slt, %4, %7 : vector<128x1xi32>
    %c0_i32_2 = arith.constant 0 : i32
    %9 = arith.cmpi slt, %2, %c0_i32_2 : i32
    %10 = vector.broadcast %9 : i1 to vector<128x1xi1>
    %11 = vector.broadcast %10 : vector<128x1xi1> to vector<128x1xi1>
    %12 = arith.xori %8, %11 : vector<128x1xi1>
    %13 = arith.andi %12, %6 : vector<128x1xi1>
    %14 = vector.broadcast %2 : i32 to vector<128x1xi32>
    %15 = arith.addi %4, %14 : vector<128x1xi32>
    %16 = arith.select %13, %15, %4 : vector<128x1xi1>, vector<128x1xi32>
    %c0_i32_3 = arith.constant 0 : i32
    %17 = vector.broadcast %c0_i32_3 : i32 to vector<128x1xi32>
    %18 = arith.cmpi ne, %16, %17 : vector<128x1xi32>
    %19 = arith.extui %18 : vector<128x1xi1> to vector<128x1xi32>
    %20 = arith.sitofp %19 : vector<128x1xi32> to vector<128x1xf32>
    %c31_i32 = arith.constant 31 : i32
    %21 = vector.broadcast %c31_i32 : i32 to vector<128x1xi32>
    %22 = arith.cmpi ne, %16, %21 : vector<128x1xi32>
    %23 = arith.extui %22 : vector<128x1xi1> to vector<128x1xi32>
    %24 = arith.sitofp %23 : vector<128x1xi32> to vector<128x1xf32>
    %c0 = arith.constant 0 : index
    %c0_4 = arith.constant 0 : index
    %25 = vector.load %arg0[%c0, %c0_4] : memref<128x8xf32, #tpu.memory_space<vmem>>, vector<128x8xf32>
    %c1_i32_5 = arith.constant 1 : i32
    %26 = tpu.dynamic_rotate %25 by %c1_i32_5 dim 0 : vector<128x8xf32>, i32 -> vector<128x8xf32>
    %27 = vector.broadcast %20 : vector<128x1xf32> to vector<128x8xf32>
    %28 = arith.mulf %26, %27 : vector<128x8xf32>
    %c127_i32 = arith.constant 127 : i32
    %29 = tpu.dynamic_rotate %25 by %c127_i32 dim 0 : vector<128x8xf32>, i32 -> vector<128x8xf32>
    %30 = vector.broadcast %24 : vector<128x1xf32> to vector<128x8xf32>
    %31 = arith.mulf %29, %30 : vector<128x8xf32>
    %32 = arith.truncf %28 : vector<128x8xf32> to vector<128x8xbf16>
    %c0_6 = arith.constant 0 : index
    %c0_7 = arith.constant 0 : index
    %33 = vector.load %arg1[%c0_6, %c0_7] : memref<8x8xbf16, #tpu.memory_space<vmem>>, vector<8x8xbf16>
    %cst = arith.constant dense<0.000000e+00> : vector<128x8xf32>
    %34 = tpu.matmul %32, %33, %cst {dimension_numbers = #tpu.dot_dimension_numbers<[1], [0], [0], [1], [0, 0, 1, 1], [], []>} : vector<128x8xbf16>, vector<8x8xbf16>, vector<128x8xf32> -> vector<128x8xf32>
    %35 = arith.truncf %25 : vector<128x8xf32> to vector<128x8xbf16>
    %c0_8 = arith.constant 0 : index
    %c0_9 = arith.constant 0 : index
    %36 = vector.load %arg2[%c0_8, %c0_9] : memref<8x8xbf16, #tpu.memory_space<vmem>>, vector<8x8xbf16>
    %cst_10 = arith.constant dense<0.000000e+00> : vector<128x8xf32>
    %37 = tpu.matmul %35, %36, %cst_10 {dimension_numbers = #tpu.dot_dimension_numbers<[1], [0], [0], [1], [0, 0, 1, 1], [], []>} : vector<128x8xbf16>, vector<8x8xbf16>, vector<128x8xf32> -> vector<128x8xf32>
    %38 = arith.addf %34, %37 : vector<128x8xf32>
    %39 = arith.truncf %31 : vector<128x8xf32> to vector<128x8xbf16>
    %c0_11 = arith.constant 0 : index
    %c0_12 = arith.constant 0 : index
    %40 = vector.load %arg3[%c0_11, %c0_12] : memref<8x8xbf16, #tpu.memory_space<vmem>>, vector<8x8xbf16>
    %cst_13 = arith.constant dense<0.000000e+00> : vector<128x8xf32>
    %41 = tpu.matmul %39, %40, %cst_13 {dimension_numbers = #tpu.dot_dimension_numbers<[1], [0], [0], [1], [0, 0, 1, 1], [], []>} : vector<128x8xbf16>, vector<8x8xbf16>, vector<128x8xf32> -> vector<128x8xf32>
    %42 = arith.addf %38, %41 : vector<128x8xf32>
    %cst_14 = arith.constant dense<0.000000e+00> : vector<8xf32>
    %43 = vector.multi_reduction <add>, %42, %cst_14 [0] : vector<128x8xf32> to vector<8xf32>
    %44 = vector.shape_cast %43 : vector<8xf32> to vector<1x8xf32>
    %cst_15 = arith.constant 1.280000e+02 : f32
    %45 = vector.broadcast %cst_15 : f32 to vector<1x8xf32>
    %46 = arith.divf %44, %45 : vector<1x8xf32>
    %47 = vector.broadcast %46 : vector<1x8xf32> to vector<128x8xf32>
    %48 = arith.subf %42, %47 : vector<128x8xf32>
    %49 = arith.mulf %48, %48 : vector<128x8xf32>
    %cst_16 = arith.constant dense<0.000000e+00> : vector<8xf32>
    %50 = vector.multi_reduction <add>, %49, %cst_16 [0] : vector<128x8xf32> to vector<8xf32>
    %51 = vector.shape_cast %50 : vector<8xf32> to vector<1x8xf32>
    %cst_17 = arith.constant 1.280000e+02 : f32
    %52 = vector.broadcast %cst_17 : f32 to vector<1x8xf32>
    %53 = arith.divf %51, %52 : vector<1x8xf32>
    %54 = vector.broadcast %46 : vector<1x8xf32> to vector<128x8xf32>
    %55 = arith.subf %42, %54 : vector<128x8xf32>
    %cst_18 = arith.constant 9.99999974E-6 : f32
    %56 = vector.broadcast %cst_18 : f32 to vector<1x8xf32>
    %57 = arith.addf %53, %56 : vector<1x8xf32>
    %58 = math.rsqrt %57 : vector<1x8xf32>
    %59 = vector.broadcast %58 : vector<1x8xf32> to vector<128x8xf32>
    %60 = arith.mulf %55, %59 : vector<128x8xf32>
    %c0_19 = arith.constant 0 : index
    %c0_20 = arith.constant 0 : index
    %61 = vector.load %arg4[%c0_19, %c0_20] : memref<1x8xf32, #tpu.memory_space<vmem>>, vector<1x8xf32>
    %62 = vector.broadcast %61 : vector<1x8xf32> to vector<128x8xf32>
    %63 = arith.mulf %60, %62 : vector<128x8xf32>
    %c0_21 = arith.constant 0 : index
    %c0_22 = arith.constant 0 : index
    %64 = vector.load %arg5[%c0_21, %c0_22] : memref<1x8xf32, #tpu.memory_space<vmem>>, vector<1x8xf32>
    %65 = vector.broadcast %64 : vector<1x8xf32> to vector<128x8xf32>
    %66 = arith.addf %63, %65 : vector<128x8xf32>
    %cst_23 = arith.constant 0.000000e+00 : f32
    %67 = vector.broadcast %cst_23 : f32 to vector<128x8xf32>
    %68 = arith.maximumf %66, %67 : vector<128x8xf32>
    %c1_i32_24 = arith.constant 1 : i32
    %69 = tpu.dynamic_rotate %68 by %c1_i32_24 dim 0 : vector<128x8xf32>, i32 -> vector<128x8xf32>
    %70 = vector.broadcast %20 : vector<128x1xf32> to vector<128x8xf32>
    %71 = arith.mulf %69, %70 : vector<128x8xf32>
    %c127_i32_25 = arith.constant 127 : i32
    %72 = tpu.dynamic_rotate %68 by %c127_i32_25 dim 0 : vector<128x8xf32>, i32 -> vector<128x8xf32>
    %73 = vector.broadcast %24 : vector<128x1xf32> to vector<128x8xf32>
    %74 = arith.mulf %72, %73 : vector<128x8xf32>
    %75 = arith.truncf %71 : vector<128x8xf32> to vector<128x8xbf16>
    %c0_26 = arith.constant 0 : index
    %c0_27 = arith.constant 0 : index
    %76 = vector.load %arg6[%c0_26, %c0_27] : memref<8x8xbf16, #tpu.memory_space<vmem>>, vector<8x8xbf16>
    %cst_28 = arith.constant dense<0.000000e+00> : vector<128x8xf32>
    %77 = tpu.matmul %75, %76, %cst_28 {dimension_numbers = #tpu.dot_dimension_numbers<[1], [0], [0], [1], [0, 0, 1, 1], [], []>} : vector<128x8xbf16>, vector<8x8xbf16>, vector<128x8xf32> -> vector<128x8xf32>
    %78 = arith.truncf %68 : vector<128x8xf32> to vector<128x8xbf16>
    %c0_29 = arith.constant 0 : index
    %c0_30 = arith.constant 0 : index
    %79 = vector.load %arg7[%c0_29, %c0_30] : memref<8x8xbf16, #tpu.memory_space<vmem>>, vector<8x8xbf16>
    %cst_31 = arith.constant dense<0.000000e+00> : vector<128x8xf32>
    %80 = tpu.matmul %78, %79, %cst_31 {dimension_numbers = #tpu.dot_dimension_numbers<[1], [0], [0], [1], [0, 0, 1, 1], [], []>} : vector<128x8xbf16>, vector<8x8xbf16>, vector<128x8xf32> -> vector<128x8xf32>
    %81 = arith.addf %77, %80 : vector<128x8xf32>
    %82 = arith.truncf %74 : vector<128x8xf32> to vector<128x8xbf16>
    %c0_32 = arith.constant 0 : index
    %c0_33 = arith.constant 0 : index
    %83 = vector.load %arg8[%c0_32, %c0_33] : memref<8x8xbf16, #tpu.memory_space<vmem>>, vector<8x8xbf16>
    %cst_34 = arith.constant dense<0.000000e+00> : vector<128x8xf32>
    %84 = tpu.matmul %82, %83, %cst_34 {dimension_numbers = #tpu.dot_dimension_numbers<[1], [0], [0], [1], [0, 0, 1, 1], [], []>} : vector<128x8xbf16>, vector<8x8xbf16>, vector<128x8xf32> -> vector<128x8xf32>
    %85 = arith.addf %81, %84 : vector<128x8xf32>
    %cst_35 = arith.constant dense<0.000000e+00> : vector<8xf32>
    %86 = vector.multi_reduction <add>, %85, %cst_35 [0] : vector<128x8xf32> to vector<8xf32>
    %87 = vector.shape_cast %86 : vector<8xf32> to vector<1x8xf32>
    %cst_36 = arith.constant 1.280000e+02 : f32
    %88 = vector.broadcast %cst_36 : f32 to vector<1x8xf32>
    %89 = arith.divf %87, %88 : vector<1x8xf32>
    %90 = vector.broadcast %89 : vector<1x8xf32> to vector<128x8xf32>
    %91 = arith.subf %85, %90 : vector<128x8xf32>
    %92 = arith.mulf %91, %91 : vector<128x8xf32>
    %cst_37 = arith.constant dense<0.000000e+00> : vector<8xf32>
    %93 = vector.multi_reduction <add>, %92, %cst_37 [0] : vector<128x8xf32> to vector<8xf32>
    %94 = vector.shape_cast %93 : vector<8xf32> to vector<1x8xf32>
    %cst_38 = arith.constant 1.280000e+02 : f32
    %95 = vector.broadcast %cst_38 : f32 to vector<1x8xf32>
    %96 = arith.divf %94, %95 : vector<1x8xf32>
    %97 = vector.broadcast %89 : vector<1x8xf32> to vector<128x8xf32>
    %98 = arith.subf %85, %97 : vector<128x8xf32>
    %cst_39 = arith.constant 9.99999974E-6 : f32
    %99 = vector.broadcast %cst_39 : f32 to vector<1x8xf32>
    %100 = arith.addf %96, %99 : vector<1x8xf32>
    %101 = math.rsqrt %100 : vector<1x8xf32>
    %102 = vector.broadcast %101 : vector<1x8xf32> to vector<128x8xf32>
    %103 = arith.mulf %98, %102 : vector<128x8xf32>
    %c0_40 = arith.constant 0 : index
    %c0_41 = arith.constant 0 : index
    %104 = vector.load %arg9[%c0_40, %c0_41] : memref<1x8xf32, #tpu.memory_space<vmem>>, vector<1x8xf32>
    %105 = vector.broadcast %104 : vector<1x8xf32> to vector<128x8xf32>
    %106 = arith.mulf %103, %105 : vector<128x8xf32>
    %c0_42 = arith.constant 0 : index
    %c0_43 = arith.constant 0 : index
    %107 = vector.load %arg10[%c0_42, %c0_43] : memref<1x8xf32, #tpu.memory_space<vmem>>, vector<1x8xf32>
    %108 = vector.broadcast %107 : vector<1x8xf32> to vector<128x8xf32>
    %109 = arith.addf %106, %108 : vector<128x8xf32>
    %cst_44 = arith.constant 0.000000e+00 : f32
    %110 = vector.broadcast %cst_44 : f32 to vector<128x8xf32>
    %111 = arith.maximumf %109, %110 : vector<128x8xf32>
    %112 = arith.truncf %111 : vector<128x8xf32> to vector<128x8xbf16>
    %c0_45 = arith.constant 0 : index
    %c0_46 = arith.constant 0 : index
    %113 = vector.load %arg11[%c0_45, %c0_46] : memref<8x16xbf16, #tpu.memory_space<vmem>>, vector<8x16xbf16>
    %cst_47 = arith.constant dense<0.000000e+00> : vector<128x16xf32>
    %114 = tpu.matmul %112, %113, %cst_47 {dimension_numbers = #tpu.dot_dimension_numbers<[1], [0], [0], [1], [0, 0, 1, 1], [], []>} : vector<128x8xbf16>, vector<8x16xbf16>, vector<128x16xf32> -> vector<128x16xf32>
    %c0_48 = arith.constant 0 : index
    %c0_49 = arith.constant 0 : index
    %115 = vector.load %arg12[%c0_48, %c0_49] : memref<1x16xf32, #tpu.memory_space<vmem>>, vector<1x16xf32>
    %116 = vector.broadcast %115 : vector<1x16xf32> to vector<128x16xf32>
    %117 = arith.addf %114, %116 : vector<128x16xf32>
    %c0_50 = arith.constant 0 : index
    %c0_51 = arith.constant 0 : index
    %118 = vector.load %arg13[%c0_50, %c0_51] : memref<128x16xf32, #tpu.memory_space<vmem>>, vector<128x16xf32>
    tpu.vector_store %arg13[%c0_50, %c0_51], %117 {strides = array<i32>} : memref<128x16xf32, #tpu.memory_space<vmem>>, vector<128x16xf32>,
    return
  }
}

module attributes {stable_mosaic.version = 11 : i64} {
  func.func @_double_conv_tail_kernel(%arg0: memref<256x8xf32, #tpu.memory_space<vmem>>, %arg1: memref<8x8xbf16, #tpu.memory_space<vmem>>, %arg2: memref<8x8xbf16, #tpu.memory_space<vmem>>, %arg3: memref<8x8xbf16, #tpu.memory_space<vmem>>, %arg4: memref<1x8xf32, #tpu.memory_space<vmem>>, %arg5: memref<1x8xf32, #tpu.memory_space<vmem>>, %arg6: memref<8x8xbf16, #tpu.memory_space<vmem>>, %arg7: memref<8x8xbf16, #tpu.memory_space<vmem>>, %arg8: memref<8x8xbf16, #tpu.memory_space<vmem>>, %arg9: memref<1x8xf32, #tpu.memory_space<vmem>>, %arg10: memref<1x8xf32, #tpu.memory_space<vmem>>, %arg11: memref<8x1xbf16, #tpu.memory_space<vmem>>, %arg12: memref<1x1xf32, #tpu.memory_space<vmem>>, %arg13: memref<256x1xf32, #tpu.memory_space<vmem>>) attributes {dimension_semantics = [], scalar_prefetch = 0 : i64, scratch_operands = 0 : i64, tpu.core_type = #tpu.core_type<tc>} {
    %0 = tpu.iota {dimensions = array<i32: 0>} : vector<256x1xi32>
    %c64_i32 = arith.constant 64 : i32
    %c0_i32 = arith.constant 0 : i32
    %1 = arith.cmpi eq, %c64_i32, %c0_i32 : i32
    %c1_i32 = arith.constant 1 : i32
    %2 = arith.select %1, %c1_i32, %c64_i32 : i32
    %3 = vector.broadcast %2 : i32 to vector<256x1xi32>
    %4 = arith.remsi %0, %3 : vector<256x1xi32>
    %c0_i32_0 = arith.constant 0 : i32
    %5 = vector.broadcast %c0_i32_0 : i32 to vector<256x1xi32>
    %6 = arith.cmpi ne, %4, %5 : vector<256x1xi32>
    %c0_i32_1 = arith.constant 0 : i32
    %7 = vector.broadcast %c0_i32_1 : i32 to vector<256x1xi32>
    %8 = arith.cmpi slt, %4, %7 : vector<256x1xi32>
    %c0_i32_2 = arith.constant 0 : i32
    %9 = arith.cmpi slt, %2, %c0_i32_2 : i32
    %10 = vector.broadcast %9 : i1 to vector<256x1xi1>
    %11 = vector.broadcast %10 : vector<256x1xi1> to vector<256x1xi1>
    %12 = arith.xori %8, %11 : vector<256x1xi1>
    %13 = arith.andi %12, %6 : vector<256x1xi1>
    %14 = vector.broadcast %2 : i32 to vector<256x1xi32>
    %15 = arith.addi %4, %14 : vector<256x1xi32>
    %16 = arith.select %13, %15, %4 : vector<256x1xi1>, vector<256x1xi32>
    %c0_i32_3 = arith.constant 0 : i32
    %17 = vector.broadcast %c0_i32_3 : i32 to vector<256x1xi32>
    %18 = arith.cmpi ne, %16, %17 : vector<256x1xi32>
    %19 = arith.extui %18 : vector<256x1xi1> to vector<256x1xi32>
    %20 = arith.sitofp %19 : vector<256x1xi32> to vector<256x1xf32>
    %c63_i32 = arith.constant 63 : i32
    %21 = vector.broadcast %c63_i32 : i32 to vector<256x1xi32>
    %22 = arith.cmpi ne, %16, %21 : vector<256x1xi32>
    %23 = arith.extui %22 : vector<256x1xi1> to vector<256x1xi32>
    %24 = arith.sitofp %23 : vector<256x1xi32> to vector<256x1xf32>
    %c0 = arith.constant 0 : index
    %c0_4 = arith.constant 0 : index
    %25 = vector.load %arg0[%c0, %c0_4] : memref<256x8xf32, #tpu.memory_space<vmem>>, vector<256x8xf32>
    %c1_i32_5 = arith.constant 1 : i32
    %26 = tpu.dynamic_rotate %25 by %c1_i32_5 dim 0 : vector<256x8xf32>, i32 -> vector<256x8xf32>
    %27 = vector.broadcast %20 : vector<256x1xf32> to vector<256x8xf32>
    %28 = arith.mulf %26, %27 : vector<256x8xf32>
    %c255_i32 = arith.constant 255 : i32
    %29 = tpu.dynamic_rotate %25 by %c255_i32 dim 0 : vector<256x8xf32>, i32 -> vector<256x8xf32>
    %30 = vector.broadcast %24 : vector<256x1xf32> to vector<256x8xf32>
    %31 = arith.mulf %29, %30 : vector<256x8xf32>
    %32 = arith.truncf %28 : vector<256x8xf32> to vector<256x8xbf16>
    %c0_6 = arith.constant 0 : index
    %c0_7 = arith.constant 0 : index
    %33 = vector.load %arg1[%c0_6, %c0_7] : memref<8x8xbf16, #tpu.memory_space<vmem>>, vector<8x8xbf16>
    %cst = arith.constant dense<0.000000e+00> : vector<256x8xf32>
    %34 = tpu.matmul %32, %33, %cst {dimension_numbers = #tpu.dot_dimension_numbers<[1], [0], [0], [1], [0, 0, 1, 1], [], []>} : vector<256x8xbf16>, vector<8x8xbf16>, vector<256x8xf32> -> vector<256x8xf32>
    %35 = arith.truncf %25 : vector<256x8xf32> to vector<256x8xbf16>
    %c0_8 = arith.constant 0 : index
    %c0_9 = arith.constant 0 : index
    %36 = vector.load %arg2[%c0_8, %c0_9] : memref<8x8xbf16, #tpu.memory_space<vmem>>, vector<8x8xbf16>
    %cst_10 = arith.constant dense<0.000000e+00> : vector<256x8xf32>
    %37 = tpu.matmul %35, %36, %cst_10 {dimension_numbers = #tpu.dot_dimension_numbers<[1], [0], [0], [1], [0, 0, 1, 1], [], []>} : vector<256x8xbf16>, vector<8x8xbf16>, vector<256x8xf32> -> vector<256x8xf32>
    %38 = arith.addf %34, %37 : vector<256x8xf32>
    %39 = arith.truncf %31 : vector<256x8xf32> to vector<256x8xbf16>
    %c0_11 = arith.constant 0 : index
    %c0_12 = arith.constant 0 : index
    %40 = vector.load %arg3[%c0_11, %c0_12] : memref<8x8xbf16, #tpu.memory_space<vmem>>, vector<8x8xbf16>
    %cst_13 = arith.constant dense<0.000000e+00> : vector<256x8xf32>
    %41 = tpu.matmul %39, %40, %cst_13 {dimension_numbers = #tpu.dot_dimension_numbers<[1], [0], [0], [1], [0, 0, 1, 1], [], []>} : vector<256x8xbf16>, vector<8x8xbf16>, vector<256x8xf32> -> vector<256x8xf32>
    %42 = arith.addf %38, %41 : vector<256x8xf32>
    %cst_14 = arith.constant dense<0.000000e+00> : vector<8xf32>
    %43 = vector.multi_reduction <add>, %42, %cst_14 [0] : vector<256x8xf32> to vector<8xf32>
    %44 = vector.shape_cast %43 : vector<8xf32> to vector<1x8xf32>
    %cst_15 = arith.constant 2.560000e+02 : f32
    %45 = vector.broadcast %cst_15 : f32 to vector<1x8xf32>
    %46 = arith.divf %44, %45 : vector<1x8xf32>
    %47 = vector.broadcast %46 : vector<1x8xf32> to vector<256x8xf32>
    %48 = arith.subf %42, %47 : vector<256x8xf32>
    %49 = arith.mulf %48, %48 : vector<256x8xf32>
    %cst_16 = arith.constant dense<0.000000e+00> : vector<8xf32>
    %50 = vector.multi_reduction <add>, %49, %cst_16 [0] : vector<256x8xf32> to vector<8xf32>
    %51 = vector.shape_cast %50 : vector<8xf32> to vector<1x8xf32>
    %cst_17 = arith.constant 2.560000e+02 : f32
    %52 = vector.broadcast %cst_17 : f32 to vector<1x8xf32>
    %53 = arith.divf %51, %52 : vector<1x8xf32>
    %54 = vector.broadcast %46 : vector<1x8xf32> to vector<256x8xf32>
    %55 = arith.subf %42, %54 : vector<256x8xf32>
    %cst_18 = arith.constant 9.99999974E-6 : f32
    %56 = vector.broadcast %cst_18 : f32 to vector<1x8xf32>
    %57 = arith.addf %53, %56 : vector<1x8xf32>
    %58 = math.rsqrt %57 : vector<1x8xf32>
    %59 = vector.broadcast %58 : vector<1x8xf32> to vector<256x8xf32>
    %60 = arith.mulf %55, %59 : vector<256x8xf32>
    %c0_19 = arith.constant 0 : index
    %c0_20 = arith.constant 0 : index
    %61 = vector.load %arg4[%c0_19, %c0_20] : memref<1x8xf32, #tpu.memory_space<vmem>>, vector<1x8xf32>
    %62 = vector.broadcast %61 : vector<1x8xf32> to vector<256x8xf32>
    %63 = arith.mulf %60, %62 : vector<256x8xf32>
    %c0_21 = arith.constant 0 : index
    %c0_22 = arith.constant 0 : index
    %64 = vector.load %arg5[%c0_21, %c0_22] : memref<1x8xf32, #tpu.memory_space<vmem>>, vector<1x8xf32>
    %65 = vector.broadcast %64 : vector<1x8xf32> to vector<256x8xf32>
    %66 = arith.addf %63, %65 : vector<256x8xf32>
    %cst_23 = arith.constant 0.000000e+00 : f32
    %67 = vector.broadcast %cst_23 : f32 to vector<256x8xf32>
    %68 = arith.maximumf %66, %67 : vector<256x8xf32>
    %c1_i32_24 = arith.constant 1 : i32
    %69 = tpu.dynamic_rotate %68 by %c1_i32_24 dim 0 : vector<256x8xf32>, i32 -> vector<256x8xf32>
    %70 = vector.broadcast %20 : vector<256x1xf32> to vector<256x8xf32>
    %71 = arith.mulf %69, %70 : vector<256x8xf32>
    %c255_i32_25 = arith.constant 255 : i32
    %72 = tpu.dynamic_rotate %68 by %c255_i32_25 dim 0 : vector<256x8xf32>, i32 -> vector<256x8xf32>
    %73 = vector.broadcast %24 : vector<256x1xf32> to vector<256x8xf32>
    %74 = arith.mulf %72, %73 : vector<256x8xf32>
    %75 = arith.truncf %71 : vector<256x8xf32> to vector<256x8xbf16>
    %c0_26 = arith.constant 0 : index
    %c0_27 = arith.constant 0 : index
    %76 = vector.load %arg6[%c0_26, %c0_27] : memref<8x8xbf16, #tpu.memory_space<vmem>>, vector<8x8xbf16>
    %cst_28 = arith.constant dense<0.000000e+00> : vector<256x8xf32>
    %77 = tpu.matmul %75, %76, %cst_28 {dimension_numbers = #tpu.dot_dimension_numbers<[1], [0], [0], [1], [0, 0, 1, 1], [], []>} : vector<256x8xbf16>, vector<8x8xbf16>, vector<256x8xf32> -> vector<256x8xf32>
    %78 = arith.truncf %68 : vector<256x8xf32> to vector<256x8xbf16>
    %c0_29 = arith.constant 0 : index
    %c0_30 = arith.constant 0 : index
    %79 = vector.load %arg7[%c0_29, %c0_30] : memref<8x8xbf16, #tpu.memory_space<vmem>>, vector<8x8xbf16>
    %cst_31 = arith.constant dense<0.000000e+00> : vector<256x8xf32>
    %80 = tpu.matmul %78, %79, %cst_31 {dimension_numbers = #tpu.dot_dimension_numbers<[1], [0], [0], [1], [0, 0, 1, 1], [], []>} : vector<256x8xbf16>, vector<8x8xbf16>, vector<256x8xf32> -> vector<256x8xf32>
    %81 = arith.addf %77, %80 : vector<256x8xf32>
    %82 = arith.truncf %74 : vector<256x8xf32> to vector<256x8xbf16>
    %c0_32 = arith.constant 0 : index
    %c0_33 = arith.constant 0 : index
    %83 = vector.load %arg8[%c0_32, %c0_33] : memref<8x8xbf16, #tpu.memory_space<vmem>>, vector<8x8xbf16>
    %cst_34 = arith.constant dense<0.000000e+00> : vector<256x8xf32>
    %84 = tpu.matmul %82, %83, %cst_34 {dimension_numbers = #tpu.dot_dimension_numbers<[1], [0], [0], [1], [0, 0, 1, 1], [], []>} : vector<256x8xbf16>, vector<8x8xbf16>, vector<256x8xf32> -> vector<256x8xf32>
    %85 = arith.addf %81, %84 : vector<256x8xf32>
    %cst_35 = arith.constant dense<0.000000e+00> : vector<8xf32>
    %86 = vector.multi_reduction <add>, %85, %cst_35 [0] : vector<256x8xf32> to vector<8xf32>
    %87 = vector.shape_cast %86 : vector<8xf32> to vector<1x8xf32>
    %cst_36 = arith.constant 2.560000e+02 : f32
    %88 = vector.broadcast %cst_36 : f32 to vector<1x8xf32>
    %89 = arith.divf %87, %88 : vector<1x8xf32>
    %90 = vector.broadcast %89 : vector<1x8xf32> to vector<256x8xf32>
    %91 = arith.subf %85, %90 : vector<256x8xf32>
    %92 = arith.mulf %91, %91 : vector<256x8xf32>
    %cst_37 = arith.constant dense<0.000000e+00> : vector<8xf32>
    %93 = vector.multi_reduction <add>, %92, %cst_37 [0] : vector<256x8xf32> to vector<8xf32>
    %94 = vector.shape_cast %93 : vector<8xf32> to vector<1x8xf32>
    %cst_38 = arith.constant 2.560000e+02 : f32
    %95 = vector.broadcast %cst_38 : f32 to vector<1x8xf32>
    %96 = arith.divf %94, %95 : vector<1x8xf32>
    %97 = vector.broadcast %89 : vector<1x8xf32> to vector<256x8xf32>
    %98 = arith.subf %85, %97 : vector<256x8xf32>
    %cst_39 = arith.constant 9.99999974E-6 : f32
    %99 = vector.broadcast %cst_39 : f32 to vector<1x8xf32>
    %100 = arith.addf %96, %99 : vector<1x8xf32>
    %101 = math.rsqrt %100 : vector<1x8xf32>
    %102 = vector.broadcast %101 : vector<1x8xf32> to vector<256x8xf32>
    %103 = arith.mulf %98, %102 : vector<256x8xf32>
    %c0_40 = arith.constant 0 : index
    %c0_41 = arith.constant 0 : index
    %104 = vector.load %arg9[%c0_40, %c0_41] : memref<1x8xf32, #tpu.memory_space<vmem>>, vector<1x8xf32>
    %105 = vector.broadcast %104 : vector<1x8xf32> to vector<256x8xf32>
    %106 = arith.mulf %103, %105 : vector<256x8xf32>
    %c0_42 = arith.constant 0 : index
    %c0_43 = arith.constant 0 : index
    %107 = vector.load %arg10[%c0_42, %c0_43] : memref<1x8xf32, #tpu.memory_space<vmem>>, vector<1x8xf32>
    %108 = vector.broadcast %107 : vector<1x8xf32> to vector<256x8xf32>
    %109 = arith.addf %106, %108 : vector<256x8xf32>
    %cst_44 = arith.constant 0.000000e+00 : f32
    %110 = vector.broadcast %cst_44 : f32 to vector<256x8xf32>
    %111 = arith.maximumf %109, %110 : vector<256x8xf32>
    %112 = arith.truncf %111 : vector<256x8xf32> to vector<256x8xbf16>
    %c0_45 = arith.constant 0 : index
    %c0_46 = arith.constant 0 : index
    %113 = vector.load %arg11[%c0_45, %c0_46] : memref<8x1xbf16, #tpu.memory_space<vmem>>, vector<8x1xbf16>
    %cst_47 = arith.constant dense<0.000000e+00> : vector<256x1xf32>
    %114 = tpu.matmul %112, %113, %cst_47 {dimension_numbers = #tpu.dot_dimension_numbers<[1], [0], [0], [1], [0, 0, 1, 1], [], []>} : vector<256x8xbf16>, vector<8x1xbf16>, vector<256x1xf32> -> vector<256x1xf32>
    %c0_48 = arith.constant 0 : index
    %c0_49 = arith.constant 0 : index
    %115 = vector.load %arg12[%c0_48, %c0_49] : memref<1x1xf32, #tpu.memory_space<vmem>>, vector<1x1xf32>
    %116 = vector.broadcast %115 : vector<1x1xf32> to vector<256x1xf32>
    %117 = arith.addf %114, %116 : vector<256x1xf32>
    %c0_50 = arith.constant 0 : index
    %c0_51 = arith.constant 0 : index
    %118 = vector.load %arg13[%c0_50, %c0_51] : memref<256x1xf32, #tpu.memory_space<vmem>>, vector<256x1xf32>
    tpu.vector_store %arg13[%c0_50, %c0_51], %117 {strides = array<i32>} : memref<256x1xf32, #tpu.memory_space<vmem>>, vector<256x1xf32>,
    return
  }
}

</mosaic_0001>

<bundles_post_ra>
// kernel: tile.26
= control target key start
LH: loop header
LB: loop body
LE: loop exit
PB: predicated region body
PF: predicated region fallthrough
CT: control target
= control target key end

     0   :  { %s22_s0 = inlined_call_operand.vmem [shape: f32[8], index: 0, kind: input, shape index: {}]   ;;  %s23_s1 = inlined_call_operand.vmem [shape: f32[2,8], index: 1, kind: output, shape index: {}]  }
   0x1   :  { %v4_v0 = vld [vmem:[%s22_s0] ss:$0 sm:$0xff] }
   0x2   :  { %5 = vst [vmem:[%s23_s1] sm:$0x3] %v4_v0 }

// kernel: tile.27
= control target key start
LH: loop header
LB: loop body
LE: loop exit
PB: predicated region body
PF: predicated region fallthrough
CT: control target
= control target key end

     0   :  { %vm7_vm0 = vcmask 64512   ;;  %vm13_vm1 = vcmask 130112   ;;  %s39_s0 = inlined_call_operand.vmem [shape: f32[2,8], index: 0, kind: input, shape index: {}]   ;;  %s40_s1 = inlined_call_operand.vmem [shape: f32[1,16], index: 1, kind: output, shape index: {}]  }
   0x1   :  { %v4_v0 = vld [vmem:[%s39_s0] sm:$0x3]  ;;  %s22_s0 = smov 8  }
   0x2   :  { %5 = vst [vmem:[#allocation1] sm:$0x3] %v4_v0 }
   0x9   :  { %v10_v1 = vld [vmem:[#allocation1 + $0x1] sm:$0x1]   ;;  %v6_v2 = vld [vmem:[#allocation1] sm:$0x1]  }
   0xa   :  { %11 = vrot.lane.b32.xlu0 %v10_v1, %s22_s0  ;;  %8 = vst.msk [vmem:[#allocation0] sm:$0x1] %vm7_vm0, %v6_v2  }
  0x7c   :  { %v12_v3 = vpop.permute.xlu0 %11  }
  0x7d   :  { %14 = vst.msk [vmem:[#allocation0] sm:$0x1] %vm13_vm1, %v12_v3  }
  0x84   :  { %v17_v4 = vld [vmem:[#allocation0] sm:$0x1] }
  0x85   :  { %20 = vst [vmem:[%s40_s1] sm:$0x1] %v17_v4 }

// kernel: tile.20
= control target key start
LH: loop header
LB: loop body
LE: loop exit
PB: predicated region body
PF: predicated region fallthrough
CT: control target
= control target key end

     0   :  { %vm7_vm0 = vcmask 64512   ;;  %vm13_vm1 = vcmask 130112   ;;  %s39_s0 = inlined_call_operand.vmem [shape: f32[2,8], index: 0, kind: input, shape index: {}]   ;;  %s40_s1 = inlined_call_operand.vmem [shape: f32[16], index: 1, kind: output, shape index: {}]  }
   0x1   :  { %v4_v0 = vld [vmem:[%s39_s0] sm:$0x3]  ;;  %s22_s0 = smov 8  }
   0x2   :  { %5 = vst [vmem:[#allocation1] sm:$0x3] %v4_v0 }
   0x9   :  { %v10_v1 = vld [vmem:[#allocation1 + $0x1] sm:$0x1]   ;;  %v6_v2 = vld [vmem:[#allocation1] sm:$0x1]  }
   0xa   :  { %11 = vrot.lane.b32.xlu0 %v10_v1, %s22_s0  ;;  %8 = vst.msk [vmem:[#allocation0] sm:$0x1] %vm7_vm0, %v6_v2  }
  0x7c   :  { %v12_v3 = vpop.permute.xlu0 %11  }
  0x7d   :  { %14 = vst.msk [vmem:[#allocation0] sm:$0x1] %vm13_vm1, %v12_v3  }
  0x84   :  { %v17_v4 = vld [vmem:[#allocation0] sm:$0x1] }
  0x85   :  { %20 = vst [vmem:[%s40_s1] sm:$0x1] %v17_v4 }

// kernel: tile.21
= control target key start
LH: loop header
LB: loop body
LE: loop exit
PB: predicated region body
PF: predicated region fallthrough
CT: control target
= control target key end

     0   :  { %s22_s0 = inlined_call_operand.vmem [shape: f32[16], index: 0, kind: input, shape index: {}]   ;;  %s23_s1 = inlined_call_operand.vmem [shape: f32[4,16], index: 1, kind: output, shape index: {}]  }
   0x1   :  { %v4_v0 = vld [vmem:[%s22_s0] ss:$0 sm:$0xff] }
   0x2   :  { %5 = vst [vmem:[%s23_s1] sm:$0xf] %v4_v0 }

// kernel: tile.22
= control target key start
LH: loop header
LB: loop body
LE: loop exit
PB: predicated region body
PF: predicated region fallthrough
CT: control target
= control target key end

     0   :  { %s37_s8 = smov 16   ;;  %s38_s9 = smov 32   ;;  %vm7_vm0 = vcmask 130048   ;;  %vm13_vm1 = vcmask 523648   ;;  %vm19_vm2 = vcmask 392448   ;;  %vm25_vm3 = vcmask 261248   ;;  %s55_s0 = inlined_call_operand.vmem [shape: f32[4,16], index: 0, kind: input, shape index: {}]   ;;  %s56_s1 = inlined_call_operand.vmem [shape: f32[1,64], index: 1, kind: output, shape index: {}]  }
   0x1   :  { %v4_v0 = vld [vmem:[%s55_s0] sm:$0xf]  ;;  %s36_s0 = smov 48  }
   0x2   :  { %5 = vst [vmem:[#allocation1] sm:$0xf] %v4_v0 }
   0x9   :  { %v10_v1 = vld [vmem:[#allocation1 + $0x3] sm:$0x1]   ;;  %v22_v2 = vld [vmem:[#allocation1 + $0x1] sm:$0x1]   ;;  %v16_v3 = vld [vmem:[#allocation1 + $0x2] sm:$0x1]  }
   0xa   :  { %11 = vrot.lane.b32.xlu0 %v10_v1, %s36_s0  ;;  %23 = vrot.lane.b32.xlu1 %v22_v2, %s37_s8  ;;  %v6_v4 = vld [vmem:[#allocation1] sm:$0x1]  }
   0xb   :  { %8 = vst.msk [vmem:[#allocation0] sm:$0x1] %vm7_vm0, %v6_v4  }
  0x12   :  { %17 = vrot.lane.b32.xlu0 %v16_v3, %s38_s9 }
  0x7c   :  { %v12_v5 = vpop.permute.xlu0 %11   ;;  %v24_v6 = vpop.permute.xlu1 %23  }
  0x7d   :  { %14 = vst.msk [vmem:[#allocation0] sm:$0x1] %vm13_vm1, %v12_v5  }
  0x84   :  { %v18_v7 = vpop.permute.xlu0 %17  }
  0x85   :  { %20 = vst.msk [vmem:[#allocation0] sm:$0x1] %vm19_vm2, %v18_v7  }
  0x86   :  { %26 = vst.msk [vmem:[#allocation0] sm:$0x1] %vm25_vm3, %v24_v6  }
  0x8d   :  { %v29_v8 = vld [vmem:[#allocation0] sm:$0x1] }
  0x8e   :  { %32 = vst [vmem:[%s56_s1] sm:$0x1] %v29_v8 }

// kernel: _lambda_.5
= control target key start
LH: loop header
LB: loop body
LE: loop exit
PB: predicated region body
PF: predicated region fallthrough
CT: control target
= control target key end

     0   :  { %vm80_vm0 = vcmask 1043456   ;;  %vm76_vm1 = vcmask 64512   ;;  %v540_v4 = vmov 4.0   ;;  %vm97_vm2 = vcmask 257024   ;;  %s751_s1 = inlined_call_operand.vmem [shape: bf16[8,32], index: 1, kind: input, shape index: {}]   ;;  %s752_s0 = inlined_call_operand.vmem [shape: f32[4,8], index: 0, kind: input, shape index: {}]   ;;  %s753_s2 = inlined_call_operand.vmem [shape: f32[1,32], index: 2, kind: input, shape index: {}]   ;;  %s754_s3 = inlined_call_operand.vmem [shape: f32[1,32], index: 3, kind: input, shape index: {}]   ;;  %s755_s4 = inlined_call_operand.vmem [shape: f32[1,32], index: 4, kind: input, shape index: {}]   ;;  %s756_s6 = inlined_call_operand.vmem [shape: f32[1,32], index: 6, kind: input, shape index: {}]   ;;  %s757_s5 = inlined_call_operand.vmem [shape: bf16[32,32], index: 5, kind: input, shape index: {}]   ;;  %s758_s8 = inlined_call_operand.vmem [shape: f32[1,32], index: 8, kind: input, shape index: {}]   ;;  %s759_s7 = inlined_call_operand.vmem [shape: bf16[32,32], index: 7, kind: input, shape index: {}]   ;;  %s760_s9 = inlined_call_operand.vmem [shape: f32[1,32], index: 9, kind: input, shape index: {}]   ;;  %s761_s10 = inlined_call_operand.vmem [shape: f32[1,32], index: 10, kind: input, shape index: {}]   ;;  %s762_s12 = inlined_call_operand.vmem [shape: f32[1,32], index: 12, kind: input, shape index: {}]   ;;  %s763_s11 = inlined_call_operand.vmem [shape: bf16[32,32], index: 11, kind: input, shape index: {}]   ;;  %s764_s13 = inlined_call_operand.vmem [shape: bf16[32,32], index: 13, kind: input, shape index: {}]   ;;  %s765_s14 = inlined_call_operand.vmem [shape: f32[1,32], index: 14, kind: input, shape index: {}]   ;;  %s766_s15 = inlined_call_operand.vmem [shape: f32[1,32], index: 15, kind: input, shape index: {}]   ;;  %s767_s16 = inlined_call_operand.vmem [shape: f32[1,32], index: 16, kind: input, shape index: {}]   ;;  %s768_s18 = inlined_call_operand.vmem [shape: f32[1,16], index: 18, kind: input, shape index: {}]   ;;  %s769_s17 = inlined_call_operand.vmem [shape: bf16[32,16], index: 17, kind: input, shape index: {}]   ;;  %s770_s19 = inlined_call_operand.vmem [shape: bf16[16,64], index: 19, kind: input, shape index: {}]   ;;  %s771_s20 = inlined_call_operand.vmem [shape: f32[1,64], index: 20, kind: input, shape index: {}]   ;;  %s772_s21 = inlined_call_operand.vmem [shape: f32[4,64], index: 21, kind: output, shape index: {}]  }
   0x1   :  { %773 = sst [smem:[#allocation2_spill]] %s751_s1  ;;  %532 = vrcp.f32 %v540_v4  ;;  %v508_v28 = vld [vmem:[%s757_s5 + $0x8] sm:$0xff]  ;;  %v507_v30 = vld [vmem:[%s757_s5] sm:$0xff]  ;;  %vm167_vm7 = vcmask 261120   ;;  %vm433_vm14 = vcmask 130048   ;;  %vm450_vm15 = vcmask 519168  }
   0x2   :  { %774 = sst [smem:[#allocation3_spill]] %s752_s0  ;;  %177 = vmatpush.bf16.msra.mxu1 %v508_v28  ;;  %v510_v50 = vld [vmem:[%s759_s7 + $0x8] sm:$0xff]  ;;  %v509_v51 = vld [vmem:[%s759_s7] sm:$0xff] }
   0x3   :  { %775 = sst [smem:[#allocation4_spill]] %s753_s2  ;;  %211 = vmatpush.bf16.msra.mxu2 %v510_v50  ;;  %v523_v58 = vld [vmem:[%s758_s8] ss:$0 sm:$0xff] }
   0x4   :  { %776 = sst [smem:[#allocation5_spill]] %s754_s3 }
   0x5   :  { %777 = sst [smem:[#allocation6_spill]] %s755_s4 }
   0x6   :  { %778 = sst [smem:[#allocation7_spill]] %s756_s6  ;;  %178 = vmatpush.bf16.msra.mxu1 %v507_v30 }
   0x7   :  { %s779_s26 = sld [smem:[#allocation2_spill]]  ;;  %v533_v5 = vpop.eup %532  ;;  %212 = vmatpush.bf16.msra.mxu2 %v509_v51 }
   0x8   :  { %s780_s28 = sld [smem:[#allocation3_spill]]  ;;  %v106_v7 = vmul.f32 4.0, %v533_v5  ;;  %vm110_vm3 = vweird.f32 %v533_v5 }
   0x9   :  { %s781_s4 = sld [smem:[#allocation4_spill]] }
   0xa   :  { %v107_v10 = vsub.f32 1.0, %v106_v7  ;;  %s782_s5 = sld [smem:[#allocation5_spill]] }
   0xb   :  { %s784_s30 = sld [smem:[#allocation7_spill]] }
   0xc   :  { %v108_v13 = vmul.f32 %v533_v5, %v107_v10 }
   0xd   :  { %v71_v0 = vld [vmem:[%s779_s26] sm:$0xf]  ;;  %s783_s26 = sld [smem:[#allocation6_spill]] }
   0xe   :  { %v69_v1 = vld [vmem:[%s780_s28] sm:$0xf]  ;;  %v82_v2 = vsel %vm80_vm0, %v71_v0, 0  ;;  %v109_v17 = vadd.f32 %v533_v5, %v108_v13 }
   0xf   :  { %v70_v3 = vpack.c.bf16 %v69_v1, %v69_v1  ;;  %91 = vmatpush.bf16.msra.mxu0 %v82_v2  ;;  %v519_v6 = vld [vmem:[%s781_s4] ss:$0 sm:$0xff] }
  0x10   :  { %v661_v20 = vsel %vm110_vm3, %v533_v5, %v109_v17  ;;  %v520_v42 = vld [vmem:[%s782_s5] ss:$0 sm:$0xff] }
  0x11   :  { %v522_v52 = vld [vmem:[%s784_s30] ss:$0 sm:$0xff] }
  0x12   :  { %456 = vmatmul.msk.bf16.vlgmr.msra.gmra.mxu0 %vm76_vm1, %v70_v3 }
  0x13   :  { %v521_v45 = vld [vmem:[%s783_s26] ss:$0 sm:$0xff] }
  0x8f   :  { %v93_v8 = vpop.f32.mrf.mxu0 }
  0x90   :  { %v94_v9 = vadd.f32 %v519_v6, %v93_v8 }
  0x92   :  { %v98_v11 = vsel %vm97_vm2, %v94_v9, 0.0 }
  0x93   :  { %v99_v12 = vrot.slane %v98_v11, 4 }
  0x95   :  { %v100_v14 = vadd.f32 %v99_v12, %v98_v11  ;;  %v512_v12 = vld [vmem:[%s763_s11 + $0x8] sm:$0xff] }
  0x96   :  { %295 = vmatpush.bf16.msra.mxu3 %v512_v12 }
  0x97   :  { %v101_v15 = vrot.slane %v100_v14, 2  ;;  %v95_v16 = vpop.f32.mrf.mxu0 }
  0x99   :  { %v102_v18 = vadd.f32 %v101_v15, %v100_v14  ;;  %v511_v14 = vld [vmem:[%s763_s11] sm:$0xff] }
  0x9a   :  { %296 = vmatpush.bf16.msra.mxu3 %v511_v14  ;;  %v529_v14 = vld [vmem:[%s767_s16] ss:$0 sm:$0xff] }
  0x9b   :  { %v103_v19 = vrot.slane %v102_v18, 1 }
  0x9d   :  { %v104_v21 = vadd.f32 %v103_v19, %v102_v18  ;;  %v514_v19 = vld [vmem:[%s764_s13 + $0x8] sm:$0xff] }
  0x9e   :  { %329 = vmatpush.bf16.msrb.mxu0 %v514_v19  ;;  %v530_v19 = vld [vmem:[%s768_s18] ss:$0 sm:$0xff] }
  0x9f   :  { %v112_v22 = vmul.f32 %v661_v20, %v104_v21 }
  0xa1   :  { %v113_v23 = vsub.f32 %v94_v9, %v112_v22  ;;  %v513_v22 = vld [vmem:[%s764_s13] sm:$0xff] }
  0xa2   :  { %330 = vmatpush.bf16.msrb.mxu0 %v513_v22 }
  0xa3   :  { %v114_v24 = vmul.f32 %v113_v23, %v113_v23 }
  0xa5   :  { %v115_v25 = vsel %vm97_vm2, %v114_v24, 0.0 }
  0xa6   :  { %v116_v26 = vrot.slane %v115_v25, 4 }
  0xa8   :  { %v117_v27 = vadd.f32 %v116_v26, %v115_v25 }
  0xaa   :  { %v118_v29 = vrot.slane %v117_v27, 2 }
  0xac   :  { %v119_v31 = vadd.f32 %v118_v29, %v117_v27  ;;  %v524_v29 = vld [vmem:[%s760_s9] ss:$0 sm:$0xff] }
  0xae   :  { %v120_v32 = vrot.slane %v119_v31, 1 }
  0xb0   :  { %v121_v33 = vadd.f32 %v120_v32, %v119_v31  ;;  %v525_v32 = vld [vmem:[%s761_s10] ss:$0 sm:$0xff] }
  0xb2   :  { %v122_v34 = vmul.f32 %v121_v33, %v661_v20 }
  0xb4   :  { %v123_v35 = vadd.f32 1e-05, %v122_v34 }
  0xb6   :  { %534 = vrsqrt.f32 %v123_v35  ;;  %vm130_vm5 = vweird.f32 %v123_v35 }
  0xbc   :  { %v535_v36 = vpop.eup %534 }
  0xbd   :  { %v125_v37 = vmul.f32 %v535_v36, %v123_v35  ;;  %vm131_vm4 = vweird.f32 %v535_v36 }
  0xbe   :  { %vm132_vm6 = vmor %vm130_vm5, %vm131_vm4 }
  0xbf   :  { %v126_v38 = vmul.f32 %v535_v36, %v125_v37  ;;  %v526_v37 = vld [vmem:[%s762_s12] ss:$0 sm:$0xff] }
  0xc1   :  { %v127_v39 = vmul.f32 0.5, %v126_v38 }
  0xc3   :  { %v128_v40 = vsub.f32 1.5, %v127_v39 }
  0xc5   :  { %v129_v41 = vmul.f32 %v535_v36, %v128_v40 }
  0xc7   :  { %v133_v43 = vsel %vm132_vm6, %v535_v36, %v129_v41 }
  0xc8   :  { %v134_v44 = vmul.f32 %v133_v43, %v113_v23  ;;  %v527_v43 = vld [vmem:[%s765_s14] ss:$0 sm:$0xff] }
  0xca   :  { %v139_v46 = vmul.f32 %v520_v42, %v134_v44 }
  0xcc   :  { %v144_v47 = vadd.f32 %v521_v45, %v139_v46 }
  0xce   :  { %v145_v48 = vmax.f32 %v144_v47, 0.0 }
  0xd0   :  { %v146_v49 = vpack.c.bf16 %v145_v48, %v145_v48 }
  0xd2   :  { %465 = vmatmul.msk.bf16.vlgmr.msra.gmra.mxu1 %vm167_vm7, %v146_v49 }
 0x14f   :  { %v180_v53 = vpop.f32.mrf.mxu1 }
 0x150   :  { %v181_v54 = vadd.f32 %v522_v52, %v180_v53 }
 0x152   :  { %v184_v55 = vmax.f32 %v181_v54, 0.0 }
 0x154   :  { %v185_v56 = vpack.c.bf16 %v184_v55, %v184_v55 }
 0x156   :  { %474 = vmatmul.msk.bf16.vlgmr.msra.gmra.mxu2 %vm167_vm7, %v185_v56 }
 0x157   :  { %v182_v57 = vpop.f32.mrf.mxu1 }
 0x1d9   :  { %v214_v59 = vpop.f32.mrf.mxu2 }
 0x1da   :  { %v218_v60 = vadd.f32 %v214_v59, %v145_v48 }
 0x1dc   :  { %v223_v61 = vadd.f32 %v523_v58, %v218_v60 }
 0x1de   :  { %v224_v62 = vsel %vm97_vm2, %v223_v61, 0.0 }
 0x1df   :  { %v225_v63 = vrot.slane %v224_v62, 4 }
 0x1e1   :  { %v226_v0 = vadd.f32 %v225_v63, %v224_v62  ;;  %v216_v1 = vpop.f32.mrf.mxu2  ;;  %v515_v63 = vld [vmem:[%s769_s17] sm:$0xff] }
 0x1e3   :  { %v227_v2 = vrot.slane %v226_v0, 2 }
 0x1e5   :  { %v228_v3 = vadd.f32 %v227_v2, %v226_v0 }
 0x1e7   :  { %v229_v4 = vrot.slane %v228_v3, 1 }
 0x1e9   :  { %v230_v5 = vadd.f32 %v229_v4, %v228_v3  ;;  %v517_v4 = vld [vmem:[%s770_s19] sm:$0xff] }
 0x1ea   :  { %444 = vmatpush.bf16.msrb.mxu2 %v517_v4 }
 0x1eb   :  { %v231_v6 = vmul.f32 %v230_v5, %v661_v20 }
 0x1ed   :  { %v232_v7 = vsub.f32 %v223_v61, %v231_v6  ;;  %v516_v61 = vld [vmem:[%s769_s17 + $0x8] sm:$0xff] }
 0x1ee   :  { %413 = vmatpush.bf16.msrb.mxu1 %v516_v61 }
 0x1ef   :  { %v233_v8 = vmul.f32 %v232_v7, %v232_v7 }
 0x1f1   :  { %v234_v9 = vsel %vm97_vm2, %v233_v8, 0.0 }
 0x1f2   :  { %v235_v10 = vrot.slane %v234_v9, 4  ;;  %414 = vmatpush.bf16.msrb.mxu1 %v515_v63 }
 0x1f4   :  { %v236_v11 = vadd.f32 %v235_v10, %v234_v9 }
 0x1f6   :  { %v237_v13 = vrot.slane %v236_v11, 2 }
 0x1f8   :  { %v238_v15 = vadd.f32 %v237_v13, %v236_v11 }
 0x1fa   :  { %v239_v16 = vrot.slane %v238_v15, 1 }
 0x1fc   :  { %v240_v17 = vadd.f32 %v239_v16, %v238_v15 }
 0x1fe   :  { %v241_v18 = vmul.f32 %v240_v17, %v661_v20 }
 0x200   :  { %v242_v21 = vadd.f32 1e-05, %v241_v18 }
 0x202   :  { %536 = vrsqrt.f32 %v242_v21  ;;  %vm249_vm9 = vweird.f32 %v242_v21 }
 0x208   :  { %v537_v23 = vpop.eup %536 }
 0x209   :  { %v244_v24 = vmul.f32 %v537_v23, %v242_v21  ;;  %vm250_vm8 = vweird.f32 %v537_v23 }
 0x20a   :  { %vm251_vm10 = vmor %vm249_vm9, %vm250_vm8 }
 0x20b   :  { %v245_v25 = vmul.f32 %v537_v23, %v244_v24 }
 0x20d   :  { %v246_v26 = vmul.f32 0.5, %v245_v25  ;;  %v531_v25 = vld [vmem:[%s771_s20] ss:$0 sm:$0xff] }
 0x20f   :  { %v247_v27 = vsub.f32 1.5, %v246_v26 }
 0x211   :  { %v248_v28 = vmul.f32 %v537_v23, %v247_v27 }
 0x213   :  { %v252_v30 = vsel %vm251_vm10, %v537_v23, %v248_v28 }
 0x214   :  { %v253_v31 = vmul.f32 %v252_v30, %v232_v7 }
 0x216   :  { %v258_v33 = vmul.f32 %v524_v29, %v253_v31 }
 0x218   :  { %v263_v34 = vadd.f32 %v525_v32, %v258_v33 }
 0x21a   :  { %v264_v35 = vmax.f32 %v263_v34, 0.0 }
 0x21c   :  { %v265_v36 = vpack.c.bf16 %v264_v35, %v264_v35 }
 0x21e   :  { %483 = vmatmul.msk.bf16.vlgmr.msra.gmra.mxu3 %vm167_vm7, %v265_v36 }
 0x2a1   :  { %v298_v38 = vpop.f32.mrf.mxu3 }
 0x2a2   :  { %v299_v39 = vadd.f32 %v526_v37, %v298_v38 }
 0x2a4   :  { %v302_v40 = vmax.f32 %v299_v39, 0.0 }
 0x2a6   :  { %v303_v41 = vpack.c.bf16 %v302_v40, %v302_v40 }
 0x2a8   :  { %492 = vmatmul.msk.bf16.vlgmr.msrb.gmra.mxu0 %vm167_vm7, %v303_v41 }
 0x2a9   :  { %v300_v42 = vpop.f32.mrf.mxu3 }
 0x325   :  { %v332_v44 = vpop.f32.mrf.mxu0 }
 0x326   :  { %v336_v45 = vadd.f32 %v332_v44, %v264_v35 }
 0x328   :  { %v341_v46 = vadd.f32 %v527_v43, %v336_v45 }
 0x32a   :  { %v342_v47 = vsel %vm97_vm2, %v341_v46, 0.0 }
 0x32b   :  { %v343_v48 = vrot.slane %v342_v47, 4 }
 0x32d   :  { %v344_v49 = vadd.f32 %v343_v48, %v342_v47  ;;  %v334_v50 = vpop.f32.mrf.mxu0 }
 0x32f   :  { %v345_v51 = vrot.slane %v344_v49, 2 }
 0x331   :  { %v346_v52 = vadd.f32 %v345_v51, %v344_v49 }
 0x333   :  { %v347_v53 = vrot.slane %v346_v52, 1 }
 0x335   :  { %v348_v54 = vadd.f32 %v347_v53, %v346_v52 }
 0x337   :  { %v349_v55 = vmul.f32 %v348_v54, %v661_v20 }
 0x339   :  { %v350_v56 = vsub.f32 %v341_v46, %v349_v55 }
 0x33b   :  { %v351_v57 = vmul.f32 %v350_v56, %v350_v56 }
 0x33d   :  { %v352_v58 = vsel %vm97_vm2, %v351_v57, 0.0 }
 0x33e   :  { %v353_v59 = vrot.slane %v352_v58, 4 }
 0x340   :  { %v354_v60 = vadd.f32 %v353_v59, %v352_v58 }
 0x342   :  { %v355_v62 = vrot.slane %v354_v60, 2 }
 0x344   :  { %v356_v0 = vadd.f32 %v355_v62, %v354_v60 }
 0x346   :  { %v357_v1 = vrot.slane %v356_v0, 1 }
 0x348   :  { %v358_v2 = vadd.f32 %v357_v1, %v356_v0 }
 0x34a   :  { %v359_v3 = vmul.f32 %v358_v2, %v661_v20  ;;  %v528_v20 = vld [vmem:[%s766_s15] ss:$0 sm:$0xff] }
 0x34c   :  { %v360_v5 = vadd.f32 1e-05, %v359_v3 }
 0x34e   :  { %538 = vrsqrt.f32 %v360_v5  ;;  %vm367_vm12 = vweird.f32 %v360_v5 }
 0x354   :  { %v539_v6 = vpop.eup %538 }
 0x355   :  { %v362_v7 = vmul.f32 %v539_v6, %v360_v5  ;;  %vm368_vm11 = vweird.f32 %v539_v6 }
 0x356   :  { %vm369_vm13 = vmor %vm367_vm12, %vm368_vm11 }
 0x357   :  { %v363_v8 = vmul.f32 %v539_v6, %v362_v7 }
 0x359   :  { %v364_v9 = vmul.f32 0.5, %v363_v8 }
 0x35b   :  { %v365_v10 = vsub.f32 1.5, %v364_v9 }
 0x35d   :  { %v366_v11 = vmul.f32 %v539_v6, %v365_v10 }
 0x35f   :  { %v370_v12 = vsel %vm369_vm13, %v539_v6, %v366_v11 }
 0x360   :  { %v371_v13 = vmul.f32 %v370_v12, %v350_v56 }
 0x362   :  { %v376_v15 = vmul.f32 %v528_v20, %v371_v13 }
 0x364   :  { %v381_v16 = vadd.f32 %v529_v14, %v376_v15 }
 0x366   :  { %v382_v17 = vmax.f32 %v381_v16, 0.0 }
 0x368   :  { %v383_v18 = vpack.c.bf16 %v382_v17, %v382_v17 }
 0x36a   :  { %501 = vmatmul.msk.bf16.vlgmr.msrb.gmra.mxu1 %vm167_vm7, %v383_v18 }
 0x3e7   :  { %v416_v21 = vpop.f32.mrf.mxu1 }
 0x3e8   :  { %v417_v22 = vadd.f32 %v530_v19, %v416_v21 }
 0x3ea   :  { %v420_v23 = vpack.c.bf16 %v417_v22, %v417_v22 }
 0x3ec   :  { %506 = vmatmul.msk.bf16.vlgmr.msrb.gmra.mxu2 %vm433_vm14, %v420_v23 }
 0x3ef   :  { %v418_v24 = vpop.f32.mrf.mxu1 }
 0x46f   :  { %v446_v26 = vpop.f32.mrf.mxu2 }
 0x470   :  { %v447_v27 = vadd.f32 %v531_v25, %v446_v26 }
 0x472   :  { %451 = vst.msk [vmem:[%s772_s21] sm:$0xf] %vm450_vm15, %v447_v27 }
 0x477   :  { %v448_v28 = vpop.f32.mrf.mxu2 }

// kernel: _lambda_.6
= control target key start
LH: loop header
LB: loop body
LE: loop exit
PB: predicated region body
PF: predicated region fallthrough
CT: control target
= control target key end

     0   :  { %vm165_vm0 = vcmask 1043456   ;;  %vm158_vm1 = vcmask 64512   ;;  %v45_v0 = vlaneseq  ;;  %v601_v25 = vmov 0.0   ;;  %s853_s2 = inlined_call_operand.vmem [shape: bf16[8,8], index: 2, kind: input, shape index: {}]   ;;  %s854_s1 = inlined_call_operand.vmem [shape: bf16[8,8], index: 1, kind: input, shape index: {}]   ;;  %s855_s3 = inlined_call_operand.vmem [shape: bf16[8,8], index: 3, kind: input, shape index: {}]   ;;  %s856_s0 = inlined_call_operand.vmem [shape: f32[32,8], index: 0, kind: input, shape index: {}]   ;;  %s857_s4 = inlined_call_operand.vmem [shape: f32[1,8], index: 4, kind: input, shape index: {}]   ;;  %s858_s5 = inlined_call_operand.vmem [shape: f32[1,8], index: 5, kind: input, shape index: {}]   ;;  %s859_s7 = inlined_call_operand.vmem [shape: bf16[8,8], index: 7, kind: input, shape index: {}]   ;;  %s860_s8 = inlined_call_operand.vmem [shape: bf16[8,8], index: 8, kind: input, shape index: {}]   ;;  %s861_s6 = inlined_call_operand.vmem [shape: bf16[8,8], index: 6, kind: input, shape index: {}]   ;;  %s862_s9 = inlined_call_operand.vmem [shape: f32[1,8], index: 9, kind: input, shape index: {}]   ;;  %s863_s10 = inlined_call_operand.vmem [shape: f32[1,8], index: 10, kind: input, shape index: {}]   ;;  %s864_s12 = inlined_call_operand.vmem [shape: f32[1,16], index: 12, kind: input, shape index: {}]   ;;  %s865_s11 = inlined_call_operand.vmem [shape: bf16[8,16], index: 11, kind: input, shape index: {}]   ;;  %s866_s13 = inlined_call_operand.vmem [shape: f32[32,16], index: 13, kind: output, shape index: {}]  }
   0x1   :  { %v157_v1 = vld [vmem:[%s853_s2] sm:$0xf]  ;;  %v123_v8 = vld [vmem:[%s856_s0 + $0x8] sm:$0xff]  ;;  %v125_v14 = vld [vmem:[%s856_s0 + $0x18] sm:$0xff] }
   0x2   :  { %v154_v2 = vld [vmem:[%s854_s1] sm:$0xf]  ;;  %v167_v4 = vsel %vm165_vm0, %v157_v1, 0  ;;  %v693_v9 = vshrl.u32 %v45_v0, 7  ;;  %v127_v11 = vrot.slane %v123_v8, 7  ;;  %v140_v13 = vrot.slane %v123_v8, 1 }
   0x3   :  { %v218_v3 = vld [vmem:[%s855_s3] sm:$0xf]  ;;  %v195_v5 = vsel %vm165_vm0, %v154_v2, 0  ;;  %176 = vmatpush.bf16.msra.mxu0 %v167_v4  ;;  %v124_v15 = vld [vmem:[%s856_s0 + $0x10] sm:$0xff]  ;;  %v129_v19 = vrot.slane %v125_v14, 7  ;;  %587 = vmatpush.bf16.msra.mxu3 %v167_v4  ;;  %v142_v43 = vrot.slane %v125_v14, 1 }
   0x4   :  { %v226_v6 = vsel %vm165_vm0, %v218_v3, 0  ;;  %v688_v7 = vld [vmem:[%s856_s0] sm:$0xff]  ;;  %204 = vmatpush.bf16.msra.mxu1 %v195_v5  ;;  %v47_v17 = vadd.s32 8, %v693_v9  ;;  %v54_v18 = vand.u32 7, %v693_v9  ;;  %vm130_vm2 = vcmp.lt.s32.totalorder %v693_v9, 1 }
   0x5   :  { %v126_v10 = vrot.slane %v688_v7, 7  ;;  %v139_v12 = vrot.slane %v688_v7, 1  ;;  %235 = vmatpush.bf16.msra.mxu2 %v226_v6  ;;  %v155_v16 = vpack.c.bf16 %v123_v8, %v688_v7  ;;  %v141_v20 = vrot.slane %v124_v15, 1 }
   0x6   :  { %vm143_vm3 = vcmp.lt.s32.totalorder %v693_v9, 7  ;;  %v156_v21 = vpack.c.bf16 %v125_v14, %v124_v15  ;;  %v61_v22 = vand.u32 7, %v47_v17  ;;  %vm98_vm4 = vcmp.ne.s32.totalorder %v54_v18, 0 }
   0x7   :  { %573 = vmatmul.msk.bf16.vlgmr.msra.gmra.mxu0 %vm158_vm1, %v155_v16  ;;  %v133_v23 = vsel %vm130_vm2, %v126_v10, %v127_v11  ;;  %v134_v24 = vsel %vm130_vm2, %v129_v19, %v126_v10  ;;  %v713_v26 = vsel %vm98_vm4, 1.0, %v601_v25  ;;  %vm110_vm5 = vcmp.ne.s32.totalorder %v54_v18, 7 }
   0x8   :  { %v145_v27 = vsel %vm143_vm3, %v140_v13, %v141_v20  ;;  %v146_v28 = vsel %vm143_vm3, %v139_v12, %v140_v13  ;;  %574 = vmatmul.msk.bf16.vlgmr.msra.gmra.mxu3 %vm158_vm1, %v156_v21  ;;  %vm99_vm6 = vcmp.ne.s32.totalorder %v61_v22, 0  ;;  %v135_v29 = vmul.f32 %v713_v26, %v134_v24 }
   0x9   :  { %vm111_vm7 = vcmp.ne.s32.totalorder %v61_v22, 7  ;;  %v721_v30 = vsel %vm110_vm5, 1.0, %v601_v25  ;;  %v723_v31 = vsel %vm99_vm6, 1.0, %v601_v25  ;;  %v48_v34 = vadd.s32 16, %v693_v9 }
   0xa   :  { %v725_v32 = vsel %vm111_vm7, 1.0, %v601_v25  ;;  %v148_v33 = vmul.f32 %v721_v30, %v146_v28  ;;  %v136_v35 = vmul.f32 %v723_v31, %v133_v23  ;;  %v49_v37 = vadd.s32 24, %v693_v9 }
   0xb   :  { %v149_v36 = vmul.f32 %v725_v32, %v145_v27  ;;  %v68_v38 = vand.u32 7, %v48_v34  ;;  %v128_v42 = vrot.slane %v124_v15, 7  ;;  %v144_v47 = vsel %vm143_vm3, %v141_v20, %v142_v43 }
   0xc   :  { %v152_v39 = vpack.c.bf16 %v136_v35, %v135_v29  ;;  %v75_v41 = vand.u32 7, %v49_v37  ;;  %v147_v51 = vsel %vm143_vm3, %v142_v43, %v139_v12  ;;  %v602_v2 = vmov 32.0  }
   0xd   :  { %v216_v40 = vpack.c.bf16 %v149_v36, %v148_v33  ;;  %vm100_vm8 = vcmp.ne.s32.totalorder %v68_v38, 0  ;;  %vm112_vm10 = vcmp.ne.s32.totalorder %v68_v38, 7  ;;  %v131_v45 = vsel %vm130_vm2, %v128_v42, %v129_v19 }
   0xe   :  { %575 = vmatmul.msk.bf16.vlgmr.msra.gmra.mxu1 %vm158_vm1, %v152_v39  ;;  %vm101_vm9 = vcmp.ne.s32.totalorder %v75_v41, 0  ;;  %vm113_vm11 = vcmp.ne.s32.totalorder %v75_v41, 7  ;;  %v734_v44 = vsel %vm100_vm8, 1.0, %v601_v25  ;;  %v132_v46 = vsel %vm130_vm2, %v127_v11, %v128_v42 }
   0xf   :  { %577 = vmatmul.msk.bf16.vlgmr.msra.gmra.mxu2 %vm158_vm1, %v216_v40  ;;  %v742_v48 = vsel %vm101_vm9, 1.0, %v601_v25  ;;  %v744_v49 = vsel %vm112_vm10, 1.0, %v601_v25  ;;  %v746_v50 = vsel %vm113_vm11, 1.0, %v601_v25  ;;  %v137_v52 = vmul.f32 %v734_v44, %v132_v46 }
  0x10   :  { %v138_v53 = vmul.f32 %v742_v48, %v131_v45  ;;  %v150_v54 = vmul.f32 %v744_v49, %v144_v47  ;;  %v151_v55 = vmul.f32 %v746_v50, %v147_v51  ;;  %595 = vrcp.f32 %v602_v2 }
  0x12   :  { %v153_v56 = vpack.c.bf16 %v138_v53, %v137_v52  ;;  %v217_v57 = vpack.c.bf16 %v151_v55, %v150_v54 }
  0x16   :  { %v596_v11 = vpop.eup %595 }
  0x17   :  { %v265_v18 = vmul.f32 32.0, %v596_v11  ;;  %vm269_vm12 = vweird.f32 %v596_v11 }
  0x19   :  { %v266_v24 = vsub.f32 1.0, %v265_v18 }
  0x1b   :  { %v267_v28 = vmul.f32 %v596_v11, %v266_v24 }
  0x1d   :  { %v268_v34 = vadd.f32 %v596_v11, %v267_v28 }
  0x1e   :  { %576 = vmatmul.msk.bf16.gmra.mxu1 %vm158_vm1, %v153_v56 }
  0x1f   :  { %578 = vmatmul.msk.bf16.gmra.mxu2 %vm158_vm1, %v217_v57  ;;  %v760_v37 = vsel %vm269_vm12, %v596_v11, %v268_v34 }
  0x84   :  { %v178_v60 = vpop.f32.mrf.mxu0 }
  0x8b   :  { %v206_v58 = vpop.f32.mrf.mxu1  ;;  %v183_v1 = vpop.f32.mrf.mxu3 }
  0x8c   :  { %v180_v0 = vpop.f32.mrf.mxu0  ;;  %v207_v3 = vadd.f32 %v206_v58, %v178_v60 }
  0x92   :  { %v237_v59 = vpop.f32.mrf.mxu2 }
  0x93   :  { %v208_v61 = vpop.f32.mrf.mxu1  ;;  %v247_v8 = vadd.f32 %v237_v59, %v207_v3  ;;  %v185_v14 = vpop.f32.mrf.mxu3  ;;  %v417_v3 = vld [vmem:[%s860_s8] sm:$0xf] }
  0x94   :  { %v209_v4 = vadd.f32 %v208_v61, %v180_v0 }
  0x95   :  { %v251_v15 = vsel %vm158_vm1, %v247_v8, 0.0 }
  0x9a   :  { %v239_v62 = vpop.f32.mrf.mxu2 }
  0x9b   :  { %v211_v63 = vpop.f32.mrf.mxu1  ;;  %v248_v7 = vadd.f32 %v239_v62, %v209_v4  ;;  %v355_v4 = vld [vmem:[%s861_s6] sm:$0xf] }
  0x9c   :  { %v212_v5 = vadd.f32 %v211_v63, %v183_v1  ;;  %v358_v63 = vld [vmem:[%s859_s7] sm:$0xf] }
  0x9d   :  { %v252_v13 = vsel %vm158_vm1, %v248_v7, 0.0  ;;  %v366_v1 = vsel %vm165_vm0, %v358_v63, 0 }
  0x9e   :  { %v253_v19 = vadd.f32 %v252_v13, %v251_v15  ;;  %375 = vmatpush.bf16.msrb.mxu3 %v366_v1 }
  0xa2   :  { %v242_v6 = vpop.f32.mrf.mxu2 }
  0xa3   :  { %v249_v10 = vadd.f32 %v242_v6, %v212_v5  ;;  %v213_v12 = vpop.f32.mrf.mxu1  ;;  %v425_v5 = vsel %vm165_vm0, %v417_v3, 0  ;;  %v394_v6 = vsel %vm165_vm0, %v355_v4, 0 }
  0xa4   :  { %v214_v17 = vadd.f32 %v213_v12, %v185_v14  ;;  %434 = vmatpush.bf16.msrb.mxu1 %v425_v5  ;;  %403 = vmatpush.bf16.msrb.mxu0 %v394_v6 }
  0xa5   :  { %v254_v16 = vsel %vm158_vm1, %v249_v10, 0.0 }
  0xa6   :  { %v255_v22 = vadd.f32 %v254_v16, %v253_v19  ;;  %v590_v16 = vld [vmem:[%s857_s4] ss:$0 sm:$0xff] }
  0xaa   :  { %v244_v20 = vpop.f32.mrf.mxu2 }
  0xab   :  { %v250_v21 = vadd.f32 %v244_v20, %v214_v17 }
  0xad   :  { %v256_v23 = vsel %vm158_vm1, %v250_v21, 0.0 }
  0xae   :  { %v257_v25 = vadd.f32 %v256_v23, %v255_v22  ;;  %v591_v22 = vld [vmem:[%s858_s5] ss:$0 sm:$0xff] }
  0xb0   :  { %v258_v27 = vrot.slane %v257_v25, 4 }
  0xb2   :  { %v259_v29 = vadd.f32 %v258_v27, %v257_v25 }
  0xb4   :  { %v260_v33 = vrot.slane %v259_v29, 2 }
  0xb6   :  { %v261_v35 = vadd.f32 %v260_v33, %v259_v29 }
  0xb8   :  { %v262_v36 = vrot.slane %v261_v35, 1 }
  0xba   :  { %v263_v38 = vadd.f32 %v262_v36, %v261_v35 }
  0xbc   :  { %v271_v39 = vmul.f32 %v760_v37, %v263_v38 }
  0xbe   :  { %v272_v40 = vsub.f32 %v247_v8, %v271_v39  ;;  %v273_v41 = vsub.f32 %v248_v7, %v271_v39  ;;  %v274_v42 = vsub.f32 %v249_v10, %v271_v39  ;;  %v275_v43 = vsub.f32 %v250_v21, %v271_v39 }
  0xc0   :  { %v276_v45 = vmul.f32 %v272_v40, %v272_v40  ;;  %v277_v46 = vmul.f32 %v273_v41, %v273_v41  ;;  %v278_v47 = vmul.f32 %v274_v42, %v274_v42  ;;  %v279_v51 = vmul.f32 %v275_v43, %v275_v43 }
  0xc2   :  { %v280_v52 = vsel %vm158_vm1, %v276_v45, 0.0  ;;  %v281_v53 = vsel %vm158_vm1, %v277_v46, 0.0  ;;  %v283_v55 = vsel %vm158_vm1, %v278_v47, 0.0  ;;  %v285_v57 = vsel %vm158_vm1, %v279_v51, 0.0 }
  0xc3   :  { %v282_v54 = vadd.f32 %v281_v53, %v280_v52 }
  0xc5   :  { %v284_v56 = vadd.f32 %v283_v55, %v282_v54 }
  0xc7   :  { %v286_v58 = vadd.f32 %v285_v57, %v284_v56 }
  0xc9   :  { %v287_v59 = vrot.slane %v286_v58, 4 }
  0xcb   :  { %v288_v60 = vadd.f32 %v287_v59, %v286_v58 }
  0xcd   :  { %v289_v61 = vrot.slane %v288_v60, 2 }
  0xcf   :  { %v290_v62 = vadd.f32 %v289_v61, %v288_v60 }
  0xd1   :  { %v291_v0 = vrot.slane %v290_v62, 1 }
  0xd3   :  { %v292_v2 = vadd.f32 %v291_v0, %v290_v62 }
  0xd5   :  { %v293_v7 = vmul.f32 %v292_v2, %v760_v37 }
  0xd7   :  { %v294_v8 = vadd.f32 1e-05, %v293_v7 }
  0xd9   :  { %597 = vrsqrt.f32 %v294_v8  ;;  %vm301_vm14 = vweird.f32 %v294_v8 }
  0xdf   :  { %v598_v10 = vpop.eup %597 }
  0xe0   :  { %v296_v11 = vmul.f32 %v598_v10, %v294_v8  ;;  %vm302_vm13 = vweird.f32 %v598_v10 }
  0xe1   :  { %vm303_vm15 = vmor %vm301_vm14, %vm302_vm13 }
  0xe2   :  { %v297_v12 = vmul.f32 %v598_v10, %v296_v11 }
  0xe4   :  { %v298_v13 = vmul.f32 0.5, %v297_v12 }
  0xe6   :  { %v299_v14 = vsub.f32 1.5, %v298_v13 }
  0xe8   :  { %v300_v15 = vmul.f32 %v598_v10, %v299_v14 }
  0xea   :  { %v304_v17 = vsel %vm303_vm15, %v598_v10, %v300_v15 }
  0xeb   :  { %v305_v18 = vmul.f32 %v304_v17, %v272_v40  ;;  %v306_v19 = vmul.f32 %v304_v17, %v273_v41  ;;  %v307_v20 = vmul.f32 %v304_v17, %v274_v42  ;;  %v308_v21 = vmul.f32 %v304_v17, %v275_v43 }
  0xed   :  { %v315_v23 = vmul.f32 %v590_v16, %v307_v20  ;;  %v316_v24 = vmul.f32 %v590_v16, %v308_v21  ;;  %v313_v25 = vmul.f32 %v590_v16, %v305_v18  ;;  %v314_v27 = vmul.f32 %v590_v16, %v306_v19 }
  0xef   :  { %v323_v28 = vadd.f32 %v591_v22, %v315_v23  ;;  %v324_v29 = vadd.f32 %v591_v22, %v316_v24  ;;  %v321_v33 = vadd.f32 %v591_v22, %v313_v25  ;;  %v322_v34 = vadd.f32 %v591_v22, %v314_v27 }
  0xf1   :  { %v327_v35 = vmax.f32 %v323_v28, 0.0  ;;  %v328_v36 = vmax.f32 %v324_v29, 0.0  ;;  %v325_v38 = vmax.f32 %v321_v33, 0.0  ;;  %v326_v39 = vmax.f32 %v322_v34, 0.0 }
  0xf3   :  { %v332_v40 = vrot.slane %v328_v36, 7  ;;  %v356_v41 = vpack.c.bf16 %v326_v39, %v325_v38  ;;  %v329_v42 = vrot.slane %v325_v38, 7  ;;  %v330_v43 = vrot.slane %v326_v39, 7 }
  0xf4   :  { %v341_v45 = vrot.slane %v325_v38, 1  ;;  %v342_v46 = vrot.slane %v326_v39, 1  ;;  %v343_v47 = vrot.slane %v327_v35, 1  ;;  %v331_v61 = vrot.slane %v327_v35, 7 }
  0xf5   :  { %579 = vmatmul.msk.bf16.vlgmr.msrb.gmra.mxu3 %vm158_vm1, %v356_v41  ;;  %v335_v51 = vsel %vm130_vm2, %v329_v42, %v330_v43  ;;  %v336_v52 = vsel %vm130_vm2, %v332_v40, %v329_v42 }
  0xf6   :  { %v337_v53 = vmul.f32 %v713_v26, %v336_v52  ;;  %v338_v54 = vmul.f32 %v723_v31, %v335_v51  ;;  %v346_v55 = vsel %vm143_vm3, %v342_v46, %v343_v47  ;;  %v347_v56 = vsel %vm143_vm3, %v341_v45, %v342_v46 }
  0xf7   :  { %v349_v57 = vmul.f32 %v721_v30, %v347_v56  ;;  %v350_v58 = vmul.f32 %v725_v32, %v346_v55  ;;  %v344_v26 = vrot.slane %v328_v36, 1  ;;  %v333_v31 = vsel %vm130_vm2, %v331_v61, %v332_v40 }
  0xf8   :  { %v353_v59 = vpack.c.bf16 %v338_v54, %v337_v53  ;;  %v334_v62 = vsel %vm130_vm2, %v330_v43, %v331_v61  ;;  %v357_v32 = vpack.c.bf16 %v328_v36, %v327_v35  ;;  %v340_v1 = vmul.f32 %v742_v48, %v333_v31 }
  0xf9   :  { %v415_v60 = vpack.c.bf16 %v350_v58, %v349_v57  ;;  %v345_v63 = vsel %vm143_vm3, %v343_v47, %v344_v26  ;;  %v348_v30 = vsel %vm143_vm3, %v344_v26, %v341_v45  ;;  %v339_v0 = vmul.f32 %v734_v44, %v334_v62  ;;  %v523_v26 = vld [vmem:[%s865_s11] sm:$0xf] }
  0xfa   :  { %581 = vmatmul.msk.bf16.vlgmr.msrb.gmra.mxu0 %vm158_vm1, %v353_v59  ;;  %v351_v2 = vmul.f32 %v744_v49, %v345_v63  ;;  %v352_v3 = vmul.f32 %v746_v50, %v348_v30  ;;  %v535_v31 = vsel %vm165_vm0, %v523_v26, 0  ;;  %vm556_vm0 = vcmask 130048  }
  0xfb   :  { %583 = vmatmul.msk.bf16.vlgmr.msrb.gmra.mxu1 %vm158_vm1, %v415_v60  ;;  %v354_v4 = vpack.c.bf16 %v340_v1, %v339_v0  ;;  %544 = vmatpush.bf16.msrb.mxu2 %v535_v31 }
  0xfc   :  { %v416_v5 = vpack.c.bf16 %v352_v3, %v351_v2 }
 0x105   :  { %580 = vmatmul.msk.bf16.gmra.mxu3 %vm158_vm1, %v357_v32 }
 0x10a   :  { %582 = vmatmul.msk.bf16.gmra.mxu0 %vm158_vm1, %v354_v4 }
 0x10b   :  { %584 = vmatmul.msk.bf16.gmra.mxu1 %vm158_vm1, %v416_v5 }
 0x177   :  { %v405_v6 = vpop.f32.mrf.mxu0 }
 0x178   :  { %v436_v9 = vpop.f32.mrf.mxu1  ;;  %v377_v7 = vpop.f32.mrf.mxu3 }
 0x179   :  { %v406_v14 = vadd.f32 %v405_v6, %v377_v7  ;;  %v592_v7 = vld [vmem:[%s862_s9] ss:$0 sm:$0xff] }
 0x17b   :  { %v446_v50 = vadd.f32 %v436_v9, %v406_v14 }
 0x17d   :  { %v450_v20 = vsel %vm158_vm1, %v446_v50, 0.0 }
 0x17f   :  { %v407_v8 = vpop.f32.mrf.mxu0 }
 0x180   :  { %v438_v10 = vpop.f32.mrf.mxu1  ;;  %v379_v44 = vpop.f32.mrf.mxu3 }
 0x181   :  { %v408_v11 = vadd.f32 %v407_v8, %v379_v44 }
 0x183   :  { %v447_v15 = vadd.f32 %v438_v10, %v408_v11 }
 0x185   :  { %v451_v17 = vsel %vm158_vm1, %v447_v15, 0.0 }
 0x186   :  { %v452_v23 = vadd.f32 %v451_v17, %v450_v20 }
 0x187   :  { %v410_v48 = vpop.f32.mrf.mxu0 }
 0x188   :  { %v441_v12 = vpop.f32.mrf.mxu1  ;;  %v382_v13 = vpop.f32.mrf.mxu3 }
 0x189   :  { %v411_v49 = vadd.f32 %v410_v48, %v382_v13 }
 0x18b   :  { %v448_v16 = vadd.f32 %v441_v12, %v411_v49 }
 0x18d   :  { %v453_v21 = vsel %vm158_vm1, %v448_v16, 0.0 }
 0x18e   :  { %v454_v27 = vadd.f32 %v453_v21, %v452_v23 }
 0x18f   :  { %v412_v18 = vpop.f32.mrf.mxu0 }
 0x190   :  { %v384_v19 = vpop.f32.mrf.mxu3  ;;  %v443_v24 = vpop.f32.mrf.mxu1 }
 0x191   :  { %v413_v22 = vadd.f32 %v412_v18, %v384_v19 }
 0x193   :  { %v449_v25 = vadd.f32 %v443_v24, %v413_v22  ;;  %v594_v24 = vld [vmem:[%s864_s12] ss:$0 sm:$0xff] }
 0x195   :  { %v455_v28 = vsel %vm158_vm1, %v449_v25, 0.0 }
 0x196   :  { %v456_v29 = vadd.f32 %v455_v28, %v454_v27 }
 0x198   :  { %v457_v33 = vrot.slane %v456_v29, 4 }
 0x19a   :  { %v458_v34 = vadd.f32 %v457_v33, %v456_v29 }
 0x19c   :  { %v459_v35 = vrot.slane %v458_v34, 2 }
 0x19e   :  { %v460_v36 = vadd.f32 %v459_v35, %v458_v34 }
 0x1a0   :  { %v461_v38 = vrot.slane %v460_v36, 1 }
 0x1a2   :  { %v462_v39 = vadd.f32 %v461_v38, %v460_v36 }
 0x1a4   :  { %v463_v40 = vmul.f32 %v462_v39, %v760_v37 }
 0x1a6   :  { %v464_v41 = vsub.f32 %v446_v50, %v463_v40  ;;  %v465_v42 = vsub.f32 %v447_v15, %v463_v40  ;;  %v466_v43 = vsub.f32 %v448_v16, %v463_v40  ;;  %v467_v45 = vsub.f32 %v449_v25, %v463_v40 }
 0x1a8   :  { %v468_v46 = vmul.f32 %v464_v41, %v464_v41  ;;  %v469_v47 = vmul.f32 %v465_v42, %v465_v42  ;;  %v470_v51 = vmul.f32 %v466_v43, %v466_v43  ;;  %v471_v52 = vmul.f32 %v467_v45, %v467_v45 }
 0x1aa   :  { %v472_v53 = vsel %vm158_vm1, %v468_v46, 0.0  ;;  %v473_v54 = vsel %vm158_vm1, %v469_v47, 0.0  ;;  %v475_v56 = vsel %vm158_vm1, %v470_v51, 0.0  ;;  %v477_v58 = vsel %vm158_vm1, %v471_v52, 0.0 }
 0x1ab   :  { %v474_v55 = vadd.f32 %v473_v54, %v472_v53 }
 0x1ad   :  { %v476_v57 = vadd.f32 %v475_v56, %v474_v55 }
 0x1af   :  { %v478_v59 = vadd.f32 %v477_v58, %v476_v57 }
 0x1b1   :  { %v479_v60 = vrot.slane %v478_v59, 4 }
 0x1b3   :  { %v480_v61 = vadd.f32 %v479_v60, %v478_v59 }
 0x1b5   :  { %v481_v62 = vrot.slane %v480_v61, 2 }
 0x1b7   :  { %v482_v63 = vadd.f32 %v481_v62, %v480_v61 }
 0x1b9   :  { %v483_v30 = vrot.slane %v482_v63, 1 }
 0x1bb   :  { %v484_v32 = vadd.f32 %v483_v30, %v482_v63 }
 0x1bd   :  { %v485_v0 = vmul.f32 %v484_v32, %v760_v37  ;;  %v593_v37 = vld [vmem:[%s863_s10] ss:$0 sm:$0xff] }
 0x1bf   :  { %v486_v1 = vadd.f32 1e-05, %v485_v0 }
 0x1c1   :  { %599 = vrsqrt.f32 %v486_v1  ;;  %vm493_vm3 = vweird.f32 %v486_v1 }
 0x1c7   :  { %v600_v2 = vpop.eup %599 }
 0x1c8   :  { %v488_v3 = vmul.f32 %v600_v2, %v486_v1  ;;  %vm494_vm2 = vweird.f32 %v600_v2 }
 0x1c9   :  { %vm495_vm4 = vmor %vm493_vm3, %vm494_vm2 }
 0x1ca   :  { %v489_v4 = vmul.f32 %v600_v2, %v488_v3 }
 0x1cc   :  { %v490_v5 = vmul.f32 0.5, %v489_v4 }
 0x1ce   :  { %v491_v6 = vsub.f32 1.5, %v490_v5 }
 0x1d0   :  { %v492_v9 = vmul.f32 %v600_v2, %v491_v6 }
 0x1d2   :  { %v496_v8 = vsel %vm495_vm4, %v600_v2, %v492_v9 }
 0x1d3   :  { %v497_v10 = vmul.f32 %v496_v8, %v464_v41  ;;  %v498_v44 = vmul.f32 %v496_v8, %v465_v42  ;;  %v500_v15 = vmul.f32 %v496_v8, %v467_v45  ;;  %v499_v16 = vmul.f32 %v496_v8, %v466_v43 }
 0x1d5   :  { %v505_v11 = vmul.f32 %v592_v7, %v497_v10  ;;  %v506_v48 = vmul.f32 %v592_v7, %v498_v44  ;;  %v507_v17 = vmul.f32 %v592_v7, %v499_v16  ;;  %v508_v18 = vmul.f32 %v592_v7, %v500_v15 }
 0x1d7   :  { %v513_v12 = vadd.f32 %v593_v37, %v505_v11  ;;  %v514_v13 = vadd.f32 %v593_v37, %v506_v48  ;;  %v515_v19 = vadd.f32 %v593_v37, %v507_v17  ;;  %v516_v20 = vadd.f32 %v593_v37, %v508_v18 }
 0x1d9   :  { %v517_v14 = vmax.f32 %v513_v12, 0.0  ;;  %v518_v49 = vmax.f32 %v514_v13, 0.0  ;;  %v519_v21 = vmax.f32 %v515_v19, 0.0  ;;  %v520_v22 = vmax.f32 %v516_v20, 0.0 }
 0x1db   :  { %v521_v50 = vpack.c.bf16 %v518_v49, %v517_v14  ;;  %v522_v23 = vpack.c.bf16 %v520_v22, %v519_v21 }
 0x1dd   :  { %585 = vmatmul.msk.bf16.vlgmr.msrb.gmra.mxu2 %vm158_vm1, %v521_v50 }
 0x1ed   :  { %586 = vmatmul.msk.bf16.gmra.mxu2 %vm158_vm1, %v522_v23 }
 0x260   :  { %v546_v25 = vpop.f32.mrf.mxu2 }
 0x261   :  { %v547_v27 = vadd.f32 %v594_v24, %v546_v25 }
 0x263   :  { %557 = vst.msk [vmem:[%s866_s13] sm:$0xff] %vm556_vm0, %v547_v27 }
 0x268   :  { %v548_v28 = vpop.f32.mrf.mxu2 }
 0x269   :  { %v549_v29 = vadd.f32 %v594_v24, %v548_v28 }
 0x26b   :  { %558 = vst.msk [vmem:[%s866_s13 + $0x8] sm:$0xff] %vm556_vm0, %v549_v29 }
 0x270   :  { %v551_v33 = vpop.f32.mrf.mxu2 }
 0x271   :  { %v552_v34 = vadd.f32 %v594_v24, %v551_v33 }
 0x273   :  { %559 = vst.msk [vmem:[%s866_s13 + $0x10] sm:$0xff] %vm556_vm0, %v552_v34 }
 0x278   :  { %v553_v35 = vpop.f32.mrf.mxu2 }
 0x279   :  { %v554_v36 = vadd.f32 %v594_v24, %v553_v35 }
 0x27b   :  { %560 = vst.msk [vmem:[%s866_s13 + $0x18] sm:$0xff] %vm556_vm0, %v554_v36 }

// kernel: _lambda_.7
= control target key start
LH: loop header
LB: loop body
LE: loop exit
PB: predicated region body
PF: predicated region fallthrough
CT: control target
= control target key end

     0   :  { %vm279_vm0 = vcmask 1043456   ;;  %v45_v0 = vlaneseq  ;;  %vm266_vm1 = vcmask 64512   ;;  %v963_v32 = vmov 0.0   ;;  %s1394_s2 = inlined_call_operand.vmem [shape: bf16[8,8], index: 2, kind: input, shape index: {}]   ;;  %s1395_s0 = inlined_call_operand.vmem [shape: f32[64,8], index: 0, kind: input, shape index: {}]   ;;  %s1396_s1 = inlined_call_operand.vmem [shape: bf16[8,8], index: 1, kind: input, shape index: {}]   ;;  %s1397_s3 = inlined_call_operand.vmem [shape: bf16[8,8], index: 3, kind: input, shape index: {}]   ;;  %s1398_s4 = inlined_call_operand.vmem [shape: f32[1,8], index: 4, kind: input, shape index: {}]   ;;  %s1399_s5 = inlined_call_operand.vmem [shape: f32[1,8], index: 5, kind: input, shape index: {}]   ;;  %s1400_s7 = inlined_call_operand.vmem [shape: bf16[8,8], index: 7, kind: input, shape index: {}]   ;;  %s1401_s8 = inlined_call_operand.vmem [shape: bf16[8,8], index: 8, kind: input, shape index: {}]   ;;  %s1402_s6 = inlined_call_operand.vmem [shape: bf16[8,8], index: 6, kind: input, shape index: {}]   ;;  %s1403_s9 = inlined_call_operand.vmem [shape: f32[1,8], index: 9, kind: input, shape index: {}]   ;;  %s1404_s10 = inlined_call_operand.vmem [shape: f32[1,8], index: 10, kind: input, shape index: {}]   ;;  %s1405_s12 = inlined_call_operand.vmem [shape: f32[1,16], index: 12, kind: input, shape index: {}]   ;;  %s1406_s11 = inlined_call_operand.vmem [shape: bf16[8,16], index: 11, kind: input, shape index: {}]   ;;  %s1407_s13 = inlined_call_operand.vmem [shape: f32[64,16], index: 13, kind: output, shape index: {}]  }
   0x1   :  { %v265_v1 = vld [vmem:[%s1394_s2] sm:$0xf]  ;;  %v1046_v3 = vld [vmem:[%s1395_s0 + $0x8] sm:$0xff]  ;;  %v1052_v5 = vld [vmem:[%s1395_s0 + $0x10] sm:$0xff] }
   0x2   :  { %v1041_v2 = vld [vmem:[%s1395_s0] sm:$0xff]  ;;  %v281_v4 = vsel %vm279_vm0, %v265_v1, 0  ;;  %v1057_v6 = vld [vmem:[%s1395_s0 + $0x18] sm:$0xff]  ;;  %v207_v7 = vrot.slane %v1046_v3, 7  ;;  %v1062_v9 = vshrl.u32 %v45_v0, 7  ;;  %v208_v12 = vrot.slane %v1052_v5, 7 }
   0x3   :  { %290 = vmatpush.bf16.msra.mxu0 %v281_v4  ;;  %947 = vmatpush.bf16.msra.mxu3 %v281_v4  ;;  %v261_v8 = vpack.c.bf16 %v1046_v3, %v1041_v2  ;;  %v260_v10 = vld [vmem:[%s1396_s1] sm:$0xf]  ;;  %v209_v13 = vrot.slane %v1057_v6, 7  ;;  %v233_v14 = vrot.slane %v1052_v5, 1  ;;  %v262_v15 = vpack.c.bf16 %v1057_v6, %v1052_v5  ;;  %v1093_v23 = vld [vmem:[%s1395_s0 + $0x38] sm:$0xff]  ;;  %v204_v46 = vld [vmem:[%s1395_s0 + $0x30] sm:$0xff] }
   0x4   :  { %v1070_v11 = vld [vmem:[%s1395_s0 + $0x20] sm:$0xff]  ;;  %v234_v17 = vrot.slane %v1057_v6, 1  ;;  %v325_v18 = vsel %vm279_vm0, %v260_v10, 0  ;;  %v48_v20 = vadd.s32 16, %v1062_v9  ;;  %vm239_vm2 = vcmp.lt.s32.totalorder %v1062_v9, 7  ;;  %v203_v47 = vld [vmem:[%s1395_s0 + $0x28] sm:$0xff] }
   0x5   :  { %v360_v16 = vld [vmem:[%s1397_s3] sm:$0xf]  ;;  %vm214_vm3 = vcmp.lt.s32.totalorder %v1062_v9, 1  ;;  %v49_v21 = vadd.s32 24, %v1062_v9  ;;  %v235_v22 = vrot.slane %v1070_v11, 1  ;;  %v206_v24 = vrot.slane %v1041_v2, 7  ;;  %948 = vmatpush.bf16.msra.mxu1 %v325_v18 }
   0x6   :  { %v374_v19 = vsel %vm279_vm0, %v360_v16, 0  ;;  %919 = vmatmul.msk.bf16.vlgmr.msra.gmra.mxu0 %vm266_vm1, %v261_v8  ;;  %920 = vmatmul.msk.bf16.vlgmr.msra.gmra.mxu3 %vm266_vm1, %v262_v15  ;;  %v72_v25 = vand.u32 15, %v48_v20  ;;  %v219_v26 = vsel %vm214_vm3, %v208_v12, %v209_v13  ;;  %v220_v27 = vsel %vm214_vm3, %v207_v7, %v208_v12 }
   0x7   :  { %334 = vmatpush.bf16.msrb.mxu0 %v325_v18  ;;  %949 = vmatpush.bf16.msra.mxu2 %v374_v19  ;;  %v79_v28 = vand.u32 15, %v49_v21  ;;  %v243_v29 = vsel %vm239_vm2, %v234_v17, %v235_v22  ;;  %v58_v30 = vand.u32 15, %v1062_v9  ;;  %v213_v31 = vrot.slane %v1093_v23, 7 }
   0x8   :  { %vm152_vm4 = vcmp.ne.s32.totalorder %v72_v25, 0  ;;  %v244_v34 = vsel %vm239_vm2, %v233_v14, %v234_v17  ;;  %v50_v35 = vadd.s32 32, %v1062_v9  ;;  %v51_v43 = vadd.s32 40, %v1062_v9 }
   0x9   :  { %v1105_v33 = vsel %vm152_vm4, 1.0, %v963_v32  ;;  %vm177_vm5 = vcmp.ne.s32.totalorder %v79_v28, 15  ;;  %vm150_vm6 = vcmp.ne.s32.totalorder %v58_v30, 0  ;;  %v222_v38 = vsel %vm214_vm3, %v213_v31, %v206_v24 }
   0xa   :  { %v225_v36 = vmul.f32 %v1105_v33, %v220_v27  ;;  %v1114_v37 = vsel %vm177_vm5, 1.0, %v963_v32  ;;  %v1122_v40 = vsel %vm150_vm6, 1.0, %v963_v32  ;;  %v86_v42 = vand.u32 15, %v50_v35 }
   0xb   :  { %383 = vmatpush.bf16.msra.mxu0 %v374_v19  ;;  %v251_v39 = vmul.f32 %v1114_v37, %v243_v29  ;;  %v223_v45 = vmul.f32 %v1122_v40, %v222_v38  ;;  %v221_v48 = vsel %vm214_vm3, %v206_v24, %v207_v7  ;;  %v93_v49 = vand.u32 15, %v51_v43 }
   0xc   :  { %v257_v41 = vpack.c.bf16 %v219_v26, %v225_v36  ;;  %v210_v50 = vrot.slane %v1070_v11, 7  ;;  %v47_v51 = vadd.s32 8, %v1062_v9  ;;  %v236_v52 = vrot.slane %v203_v47, 1 }
   0xd   :  { %v357_v44 = vpack.c.bf16 %v251_v39, %v244_v34  ;;  %vm154_vm7 = vcmp.ne.s32.totalorder %v86_v42, 0  ;;  %v237_v53 = vrot.slane %v204_v46, 1  ;;  %v263_v54 = vpack.c.bf16 %v203_v47, %v1070_v11 }
   0xe   :  { %924 = vmatmul.msk.bf16.vlgmr.msra.gmra.mxu1 %vm266_vm1, %v257_v41  ;;  %v256_v55 = vpack.c.bf16 %v221_v48, %v223_v45  ;;  %vm179_vm8 = vcmp.ne.s32.totalorder %v93_v49, 15  ;;  %v211_v56 = vrot.slane %v203_v47, 7  ;;  %v1140_v57 = vsel %vm154_vm7, 1.0, %v963_v32 }
   0xf   :  { %928 = vmatmul.msk.bf16.vlgmr.msra.gmra.mxu2 %vm266_vm1, %v357_v44  ;;  %v218_v58 = vsel %vm214_vm3, %v209_v13, %v210_v50  ;;  %v65_v59 = vand.u32 15, %v47_v51  ;;  %v1145_v60 = vsel %vm179_vm8, 1.0, %v963_v32  ;;  %v241_v61 = vsel %vm239_vm2, %v236_v52, %v237_v53 }
  0x10   :  { %v232_v62 = vrot.slane %v1046_v3, 1  ;;  %v227_v63 = vmul.f32 %v1140_v57, %v218_v58  ;;  %v217_v0 = vsel %vm214_vm3, %v210_v50, %v211_v56  ;;  %v253_v1 = vmul.f32 %v1145_v60, %v241_v61 }
  0x11   :  { %vm175_vm9 = vcmp.ne.s32.totalorder %v65_v59, 15  ;;  %v242_v4 = vsel %vm239_vm2, %v235_v22, %v236_v52  ;;  %v52_v6 = vadd.s32 48, %v1062_v9  ;;  %v53_v7 = vadd.s32 56, %v1062_v9 }
  0x12   :  { %v231_v8 = vrot.slane %v1041_v2, 1  ;;  %v245_v3 = vsel %vm239_vm2, %v232_v62, %v233_v14  ;;  %v258_v10 = vpack.c.bf16 %v217_v0, %v227_v63  ;;  %v1166_v11 = vsel %vm175_vm9, 1.0, %v963_v32 }
  0x13   :  { %v358_v12 = vpack.c.bf16 %v253_v1, %v242_v4  ;;  %v100_v13 = vand.u32 15, %v52_v6  ;;  %v249_v15 = vmul.f32 %v1166_v11, %v245_v3  ;;  %v107_v16 = vand.u32 15, %v53_v7 }
  0x14   :  { %v246_v17 = vsel %vm239_vm2, %v231_v8, %v232_v62  ;;  %v212_v2 = vrot.slane %v204_v46, 7  ;;  %v238_v5 = vrot.slane %v1093_v23, 1  ;;  %v264_v14 = vpack.c.bf16 %v1093_v23, %v204_v46 }
  0x15   :  { %vm156_vm10 = vcmp.ne.s32.totalorder %v100_v13, 0  ;;  %v356_v18 = vpack.c.bf16 %v249_v15, %v246_v17  ;;  %vm181_vm11 = vcmp.ne.s32.totalorder %v107_v16, 15 }
  0x16   :  { %921 = vmatmul.msk.bf16.gmra.mxu3 %vm266_vm1, %v263_v54  ;;  %923 = vmatmul.msk.bf16.vlgmr.msrb.gmra.mxu0 %vm266_vm1, %v256_v55  ;;  %v1176_v19 = vsel %vm156_vm10, 1.0, %v963_v32  ;;  %v216_v20 = vsel %vm214_vm3, %v211_v56, %v212_v2  ;;  %v1181_v21 = vsel %vm181_vm11, 1.0, %v963_v32  ;;  %v247_v22 = vsel %vm239_vm2, %v238_v5, %v231_v8 }
  0x17   :  { %v229_v24 = vmul.f32 %v1176_v19, %v216_v20  ;;  %v215_v25 = vsel %vm214_vm3, %v212_v2, %v213_v31  ;;  %v255_v26 = vmul.f32 %v1181_v21, %v247_v22  ;;  %v240_v27 = vsel %vm239_vm2, %v237_v53, %v238_v5 }
  0x18   :  { %v964_v8 = vmov 64.0  }
  0x19   :  { %v259_v28 = vpack.c.bf16 %v215_v25, %v229_v24  ;;  %v359_v29 = vpack.c.bf16 %v255_v26, %v240_v27  ;;  %957 = vrcp.f32 %v964_v8 }
  0x1e   :  { %925 = vmatmul.msk.bf16.gmra.mxu1 %vm266_vm1, %v258_v10 }
  0x1f   :  { %929 = vmatmul.msk.bf16.gmra.mxu2 %vm266_vm1, %v358_v12  ;;  %v958_v5 = vpop.eup %957 }
  0x20   :  { %v435_v26 = vmul.f32 64.0, %v958_v5  ;;  %vm439_vm12 = vweird.f32 %v958_v5 }
  0x26   :  { %922 = vmatmul.msk.bf16.gmra.mxu3 %vm266_vm1, %v264_v14  ;;  %927 = vmatmul.msk.bf16.vlgmr.msra.gmra.mxu0 %vm266_vm1, %v356_v18 }
  0x2e   :  { %926 = vmatmul.msk.bf16.gmra.mxu1 %vm266_vm1, %v259_v28 }
  0x2f   :  { %930 = vmatmul.msk.bf16.gmra.mxu2 %vm266_vm1, %v359_v29 }
  0x83   :  { %v292_v30 = vpop.f32.mrf.mxu0 }
  0x89   :  { %v297_v32 = vpop.f32.mrf.mxu3 }
  0x8b   :  { %v294_v34 = vpop.f32.mrf.mxu0  ;;  %v341_v35 = vpop.f32.mrf.mxu1 }
  0x8c   :  { %v342_v48 = vadd.f32 %v341_v35, %v297_v32 }
  0x91   :  { %v299_v36 = vpop.f32.mrf.mxu3 }
  0x92   :  { %v390_v23 = vpop.f32.mrf.mxu2 }
  0x93   :  { %v336_v38 = vpop.f32.mrf.mxu0  ;;  %v343_v39 = vpop.f32.mrf.mxu1  ;;  %v407_v54 = vadd.f32 %v390_v23, %v342_v48 }
  0x94   :  { %v337_v49 = vadd.f32 %v336_v38, %v292_v30  ;;  %v344_v55 = vadd.f32 %v343_v39, %v299_v36 }
  0x95   :  { %v416_v4 = vsel %vm266_vm1, %v407_v54, 0.0 }
  0x99   :  { %v302_v31 = vpop.f32.mrf.mxu3 }
  0x9a   :  { %v392_v41 = vpop.f32.mrf.mxu2 }
  0x9b   :  { %v338_v42 = vpop.f32.mrf.mxu0  ;;  %v346_v43 = vpop.f32.mrf.mxu1  ;;  %v408_v61 = vadd.f32 %v392_v41, %v344_v55 }
  0x9c   :  { %v339_v50 = vadd.f32 %v338_v42, %v294_v34  ;;  %v347_v56 = vadd.f32 %v346_v43, %v302_v31  ;;  %v436_v34 = vsub.f32 1.0, %v435_v26 }
  0x9d   :  { %v418_v3 = vsel %vm266_vm1, %v408_v61, 0.0 }
  0x9e   :  { %v437_v23 = vmul.f32 %v958_v5, %v436_v34 }
  0xa0   :  { %v438_v31 = vadd.f32 %v958_v5, %v437_v23 }
  0xa1   :  { %v304_v47 = vpop.f32.mrf.mxu3 }
  0xa2   :  { %v395_v44 = vpop.f32.mrf.mxu2  ;;  %v1205_v43 = vsel %vm439_vm12, %v958_v5, %v438_v31 }
  0xa3   :  { %v385_v45 = vpop.f32.mrf.mxu0  ;;  %v348_v46 = vpop.f32.mrf.mxu1  ;;  %v409_v6 = vadd.f32 %v395_v44, %v347_v56 }
  0xa4   :  { %v405_v51 = vadd.f32 %v385_v45, %v337_v49  ;;  %v349_v10 = vadd.f32 %v348_v46, %v304_v47 }
  0xa5   :  { %v420_v15 = vsel %vm266_vm1, %v409_v6, 0.0 }
  0xa6   :  { %v413_v62 = vsel %vm266_vm1, %v405_v51, 0.0 }
  0xa9   :  { %v307_v0 = vpop.f32.mrf.mxu3 }
  0xaa   :  { %v397_v52 = vpop.f32.mrf.mxu2 }
  0xab   :  { %v387_v53 = vpop.f32.mrf.mxu0  ;;  %v351_v59 = vpop.f32.mrf.mxu1  ;;  %v410_v16 = vadd.f32 %v397_v52, %v349_v10 }
  0xac   :  { %v406_v58 = vadd.f32 %v387_v53, %v339_v50  ;;  %v352_v17 = vadd.f32 %v351_v59, %v307_v0 }
  0xad   :  { %v422_v18 = vsel %vm266_vm1, %v410_v16, 0.0 }
  0xae   :  { %v414_v63 = vsel %vm266_vm1, %v406_v58, 0.0 }
  0xaf   :  { %v415_v1 = vadd.f32 %v414_v63, %v413_v62 }
  0xb1   :  { %v417_v7 = vadd.f32 %v416_v4, %v415_v1  ;;  %v309_v22 = vpop.f32.mrf.mxu3 }
  0xb2   :  { %v400_v13 = vpop.f32.mrf.mxu2 }
  0xb3   :  { %v419_v12 = vadd.f32 %v418_v3, %v417_v7  ;;  %v353_v14 = vpop.f32.mrf.mxu1  ;;  %v411_v20 = vadd.f32 %v400_v13, %v352_v17 }
  0xb4   :  { %v354_v25 = vadd.f32 %v353_v14, %v309_v22 }
  0xb5   :  { %v421_v2 = vadd.f32 %v420_v15, %v419_v12  ;;  %v424_v28 = vsel %vm266_vm1, %v411_v20, 0.0 }
  0xb7   :  { %v423_v24 = vadd.f32 %v422_v18, %v421_v2 }
  0xb9   :  { %v425_v30 = vadd.f32 %v424_v28, %v423_v24  ;;  %v681_v28 = vld [vmem:[%s1401_s8] sm:$0xf] }
  0xba   :  { %v402_v27 = vpop.f32.mrf.mxu2 }
  0xbb   :  { %v412_v29 = vadd.f32 %v402_v27, %v354_v25  ;;  %v588_v25 = vld [vmem:[%s1400_s7] sm:$0xf] }
  0xbc   :  { %v602_v27 = vsel %vm279_vm0, %v588_v25, 0 }
  0xbd   :  { %v426_v32 = vsel %vm266_vm1, %v412_v29, 0.0  ;;  %611 = vmatpush.bf16.msrb.mxu3 %v602_v27 }
  0xbe   :  { %v427_v35 = vadd.f32 %v426_v32, %v425_v30  ;;  %v695_v30 = vsel %vm279_vm0, %v681_v28, 0 }
  0xbf   :  { %704 = vmatpush.bf16.msrb.mxu1 %v695_v30 }
  0xc0   :  { %v428_v36 = vrot.slane %v427_v35, 4 }
  0xc2   :  { %v429_v38 = vadd.f32 %v428_v36, %v427_v35 }
  0xc4   :  { %v430_v39 = vrot.slane %v429_v38, 2 }
  0xc6   :  { %v431_v41 = vadd.f32 %v430_v39, %v429_v38 }
  0xc8   :  { %v432_v42 = vrot.slane %v431_v41, 1 }
  0xca   :  { %v433_v44 = vadd.f32 %v432_v42, %v431_v41  ;;  %v952_v42 = vld [vmem:[%s1398_s4] ss:$0 sm:$0xff] }
  0xcc   :  { %v441_v45 = vmul.f32 %v1205_v43, %v433_v44 }
  0xce   :  { %v1208_v46 = vsub.f32 %v405_v51, %v441_v45  ;;  %v1210_v47 = vsub.f32 %v406_v58, %v441_v45  ;;  %v1212_v48 = vsub.f32 %v407_v54, %v441_v45  ;;  %v1214_v49 = vsub.f32 %v408_v61, %v441_v45 }
  0xcf   :  { %v1216_v50 = vsub.f32 %v409_v6, %v441_v45  ;;  %v1224_v56 = vsub.f32 %v410_v16, %v441_v45  ;;  %v448_v61 = vsub.f32 %v411_v20, %v441_v45  ;;  %v449_v1 = vsub.f32 %v412_v29, %v441_v45  ;;  %v583_v29 = vld [vmem:[%s1402_s6] sm:$0xf] }
  0xd0   :  { %v450_v52 = vmul.f32 %v1208_v46, %v1208_v46  ;;  %v451_v53 = vmul.f32 %v1210_v47, %v1210_v47  ;;  %v452_v55 = vmul.f32 %v1212_v48, %v1212_v48  ;;  %v453_v51 = vmul.f32 %v1214_v49, %v1214_v49 }
  0xd1   :  { %v454_v62 = vmul.f32 %v1216_v50, %v1216_v50  ;;  %v455_v4 = vmul.f32 %v1224_v56, %v1224_v56  ;;  %v456_v8 = vmul.f32 %v448_v61, %v448_v61  ;;  %v457_v12 = vmul.f32 %v449_v1, %v449_v1 }
  0xd2   :  { %v458_v54 = vsel %vm266_vm1, %v450_v52, 0.0  ;;  %v459_v58 = vsel %vm266_vm1, %v451_v53, 0.0  ;;  %v461_v63 = vsel %vm266_vm1, %v452_v55, 0.0  ;;  %v463_v6 = vsel %vm266_vm1, %v453_v51, 0.0  ;;  %v953_v53 = vld [vmem:[%s1399_s5] ss:$0 sm:$0xff] }
  0xd3   :  { %v460_v59 = vadd.f32 %v459_v58, %v458_v54  ;;  %v465_v3 = vsel %vm266_vm1, %v454_v62, 0.0  ;;  %v467_v13 = vsel %vm266_vm1, %v455_v4, 0.0  ;;  %v469_v16 = vsel %vm266_vm1, %v456_v8, 0.0 }
  0xd4   :  { %v471_v2 = vsel %vm266_vm1, %v457_v12, 0.0  ;;  %v646_v32 = vsel %vm279_vm0, %v583_v29, 0 }
  0xd5   :  { %v462_v0 = vadd.f32 %v461_v63, %v460_v59  ;;  %655 = vmatpush.bf16.msrb.mxu0 %v646_v32 }
  0xd7   :  { %v464_v7 = vadd.f32 %v463_v6, %v462_v0 }
  0xd9   :  { %v466_v10 = vadd.f32 %v465_v3, %v464_v7 }
  0xdb   :  { %v468_v15 = vadd.f32 %v467_v13, %v466_v10 }
  0xdd   :  { %v470_v17 = vadd.f32 %v469_v16, %v468_v15 }
  0xdf   :  { %v472_v5 = vadd.f32 %v471_v2, %v470_v17 }
  0xe1   :  { %v473_v14 = vrot.slane %v472_v5, 4 }
  0xe3   :  { %v474_v18 = vadd.f32 %v473_v14, %v472_v5 }
  0xe5   :  { %v475_v20 = vrot.slane %v474_v18, 2 }
  0xe7   :  { %v476_v22 = vadd.f32 %v475_v20, %v474_v18 }
  0xe9   :  { %v477_v24 = vrot.slane %v476_v22, 1 }
  0xeb   :  { %v478_v26 = vadd.f32 %v477_v24, %v476_v22 }
  0xed   :  { %v479_v34 = vmul.f32 %v478_v26, %v1205_v43 }
  0xef   :  { %v480_v35 = vadd.f32 1e-05, %v479_v34 }
  0xf1   :  { %959 = vrsqrt.f32 %v480_v35  ;;  %vm487_vm14 = vweird.f32 %v480_v35 }
  0xf7   :  { %v960_v36 = vpop.eup %959 }
  0xf8   :  { %v482_v23 = vmul.f32 %v960_v36, %v480_v35  ;;  %vm488_vm13 = vweird.f32 %v960_v36 }
  0xf9   :  { %vm489_vm15 = vmor %vm487_vm14, %vm488_vm13 }
  0xfa   :  { %v483_v38 = vmul.f32 %v960_v36, %v482_v23 }
  0xfc   :  { %v484_v39 = vmul.f32 0.5, %v483_v38 }
  0xfe   :  { %v485_v31 = vsub.f32 1.5, %v484_v39 }
 0x100   :  { %v486_v41 = vmul.f32 %v960_v36, %v485_v31 }
 0x102   :  { %v490_v44 = vsel %vm489_vm15, %v960_v36, %v486_v41 }
 0x103   :  { %v497_v45 = vmul.f32 %v490_v44, %v448_v61  ;;  %v498_v52 = vmul.f32 %v490_v44, %v449_v1  ;;  %v491_v55 = vmul.f32 %v490_v44, %v1208_v46  ;;  %v492_v51 = vmul.f32 %v490_v44, %v1210_v47 }
 0x104   :  { %v493_v54 = vmul.f32 %v490_v44, %v1212_v48  ;;  %v494_v58 = vmul.f32 %v490_v44, %v1214_v49  ;;  %v495_v59 = vmul.f32 %v490_v44, %v1216_v50  ;;  %v496_v62 = vmul.f32 %v490_v44, %v1224_v56 }
 0x105   :  { %v510_v63 = vmul.f32 %v952_v42, %v498_v52  ;;  %v503_v0 = vmul.f32 %v952_v42, %v491_v55  ;;  %v504_v61 = vmul.f32 %v952_v42, %v492_v51  ;;  %v509_v1 = vmul.f32 %v952_v42, %v497_v45 }
 0x106   :  { %v505_v4 = vmul.f32 %v952_v42, %v493_v54  ;;  %v506_v6 = vmul.f32 %v952_v42, %v494_v58  ;;  %v507_v7 = vmul.f32 %v952_v42, %v495_v59  ;;  %v508_v8 = vmul.f32 %v952_v42, %v496_v62 }
 0x107   :  { %v522_v3 = vadd.f32 %v953_v53, %v510_v63  ;;  %v515_v46 = vadd.f32 %v953_v53, %v503_v0  ;;  %v516_v10 = vadd.f32 %v953_v53, %v504_v61  ;;  %v521_v17 = vadd.f32 %v953_v53, %v509_v1 }
 0x108   :  { %v517_v47 = vadd.f32 %v953_v53, %v505_v4  ;;  %v518_v12 = vadd.f32 %v953_v53, %v506_v6  ;;  %v519_v48 = vadd.f32 %v953_v53, %v507_v7  ;;  %v520_v56 = vadd.f32 %v953_v53, %v508_v8 }
 0x109   :  { %v1265_v13 = vmax.f32 %v522_v3, 0.0  ;;  %v1267_v49 = vmax.f32 %v515_v46, 0.0  ;;  %v524_v50 = vmax.f32 %v516_v10, 0.0  ;;  %v529_v30 = vmax.f32 %v521_v17, 0.0 }
 0x10a   :  { %v525_v15 = vmax.f32 %v517_v47, 0.0  ;;  %v526_v16 = vmax.f32 %v518_v12, 0.0  ;;  %v527_v26 = vmax.f32 %v519_v48, 0.0  ;;  %v528_v27 = vmax.f32 %v520_v56, 0.0 }
 0x10b   :  { %v538_v2 = vrot.slane %v1265_v13, 7  ;;  %v531_v5 = vrot.slane %v1267_v49, 7  ;;  %v532_v14 = vrot.slane %v524_v50, 7  ;;  %v584_v18 = vpack.c.bf16 %v524_v50, %v1267_v49 }
 0x10c   :  { %v555_v20 = vrot.slane %v1267_v49, 1  ;;  %v556_v22 = vrot.slane %v524_v50, 1  ;;  %v557_v24 = vrot.slane %v525_v15, 1  ;;  %v534_v35 = vrot.slane %v526_v16, 7 }
 0x10d   :  { %931 = vmatmul.msk.bf16.vlgmr.msrb.gmra.mxu3 %vm266_vm1, %v584_v18  ;;  %v546_v25 = vsel %vm214_vm3, %v538_v2, %v531_v5  ;;  %v545_v32 = vsel %vm214_vm3, %v531_v5, %v532_v14  ;;  %v535_v39 = vrot.slane %v527_v26, 7  ;;  %v536_v31 = vrot.slane %v528_v27, 7 }
 0x10e   :  { %v547_v28 = vmul.f32 %v1122_v40, %v546_v25  ;;  %v568_v29 = vsel %vm239_vm2, %v556_v22, %v557_v24  ;;  %v569_v23 = vsel %vm239_vm2, %v555_v20, %v556_v22  ;;  %v559_v40 = vrot.slane %v527_v26, 1 }
 0x10f   :  { %v572_v34 = vmul.f32 %v1166_v11, %v568_v29  ;;  %v560_v41 = vrot.slane %v528_v27, 1  ;;  %v561_v42 = vrot.slane %v529_v30, 1  ;;  %v542_v44 = vsel %vm214_vm3, %v534_v35, %v535_v39 }
 0x110   :  { %v579_v36 = vpack.c.bf16 %v545_v32, %v547_v28  ;;  %v537_v45 = vrot.slane %v529_v30, 7  ;;  %v551_v11 = vmul.f32 %v1140_v57, %v542_v44  ;;  %v533_v53 = vrot.slane %v525_v15, 7 }
 0x111   :  { %v677_v38 = vpack.c.bf16 %v572_v34, %v569_v23  ;;  %v564_v52 = vsel %vm239_vm2, %v560_v41, %v561_v42  ;;  %v541_v55 = vsel %vm214_vm3, %v535_v39, %v536_v31  ;;  %v558_v58 = vrot.slane %v526_v16, 1 }
 0x112   :  { %935 = vmatmul.msk.bf16.vlgmr.msrb.gmra.mxu0 %vm266_vm1, %v579_v36  ;;  %v576_v51 = vmul.f32 %v1145_v60, %v564_v52  ;;  %v540_v54 = vsel %vm214_vm3, %v536_v31, %v537_v45  ;;  %v581_v59 = vpack.c.bf16 %v541_v55, %v551_v11  ;;  %v565_v62 = vsel %vm239_vm2, %v559_v40, %v560_v41 }
 0x113   :  { %939 = vmatmul.msk.bf16.vlgmr.msrb.gmra.mxu1 %vm266_vm1, %v677_v38  ;;  %v553_v63 = vmul.f32 %v1176_v19, %v540_v54  ;;  %v539_v0 = vsel %vm214_vm3, %v537_v45, %v538_v2  ;;  %v544_v1 = vsel %vm214_vm3, %v532_v14, %v533_v53  ;;  %v566_v60 = vsel %vm239_vm2, %v558_v58, %v559_v40 }
 0x114   :  { %v679_v57 = vpack.c.bf16 %v576_v51, %v565_v62  ;;  %v585_v4 = vpack.c.bf16 %v526_v16, %v525_v15  ;;  %v549_v6 = vmul.f32 %v1105_v33, %v544_v1  ;;  %v574_v7 = vmul.f32 %v1114_v37, %v566_v60 }
 0x115   :  { %v582_v61 = vpack.c.bf16 %v539_v0, %v553_v63  ;;  %v543_v19 = vsel %vm214_vm3, %v533_v53, %v534_v35  ;;  %v567_v3 = vsel %vm239_vm2, %v557_v24, %v558_v58  ;;  %v586_v10 = vpack.c.bf16 %v528_v27, %v527_v26 }
 0x116   :  { %v580_v8 = vpack.c.bf16 %v543_v19, %v549_v6  ;;  %v678_v46 = vpack.c.bf16 %v574_v7, %v567_v3  ;;  %v562_v33 = vrot.slane %v1265_v13, 1  ;;  %v587_v47 = vpack.c.bf16 %v1265_v13, %v529_v30 }
 0x118   :  { %v570_v37 = vsel %vm239_vm2, %v562_v33, %v555_v20  ;;  %v563_v48 = vsel %vm239_vm2, %v561_v42, %v562_v33 }
 0x119   :  { %v578_v12 = vmul.f32 %v1181_v21, %v570_v37 }
 0x11b   :  { %v680_v49 = vpack.c.bf16 %v578_v12, %v563_v48 }
 0x11d   :  { %932 = vmatmul.msk.bf16.gmra.mxu3 %vm266_vm1, %v585_v4 }
 0x122   :  { %936 = vmatmul.msk.bf16.gmra.mxu0 %vm266_vm1, %v580_v8 }
 0x123   :  { %940 = vmatmul.msk.bf16.gmra.mxu1 %vm266_vm1, %v678_v46 }
 0x12d   :  { %933 = vmatmul.msk.bf16.gmra.mxu3 %vm266_vm1, %v586_v10 }
 0x132   :  { %937 = vmatmul.msk.bf16.gmra.mxu0 %vm266_vm1, %v581_v59 }
 0x133   :  { %941 = vmatmul.msk.bf16.gmra.mxu1 %vm266_vm1, %v679_v57 }
 0x13d   :  { %934 = vmatmul.msk.bf16.gmra.mxu3 %vm266_vm1, %v587_v47 }
 0x142   :  { %938 = vmatmul.msk.bf16.gmra.mxu0 %vm266_vm1, %v582_v61 }
 0x143   :  { %942 = vmatmul.msk.bf16.gmra.mxu1 %vm266_vm1, %v680_v49 }
 0x18f   :  { %v657_v50 = vpop.f32.mrf.mxu0 }
 0x190   :  { %v706_v56 = vpop.f32.mrf.mxu1  ;;  %v613_v15 = vpop.f32.mrf.mxu3 }
 0x191   :  { %v658_v29 = vadd.f32 %v657_v50, %v613_v15 }
 0x193   :  { %v726_v35 = vadd.f32 %v706_v56, %v658_v29 }
 0x195   :  { %v734_v44 = vsel %vm266_vm1, %v726_v35, 0.0 }
 0x197   :  { %v659_v16 = vpop.f32.mrf.mxu0 }
 0x198   :  { %v708_v17 = vpop.f32.mrf.mxu1  ;;  %v615_v2 = vpop.f32.mrf.mxu3 }
 0x199   :  { %v660_v25 = vadd.f32 %v659_v16, %v615_v2 }
 0x19b   :  { %v727_v32 = vadd.f32 %v708_v17, %v660_v25 }
 0x19d   :  { %v735_v38 = vsel %vm266_vm1, %v727_v32, 0.0 }
 0x19e   :  { %v736_v53 = vadd.f32 %v735_v38, %v734_v44  ;;  %v849_v44 = vld [vmem:[%s1406_s11] sm:$0xf] }
 0x19f   :  { %v662_v5 = vpop.f32.mrf.mxu0 }
 0x1a0   :  { %v711_v13 = vpop.f32.mrf.mxu1  ;;  %v618_v14 = vpop.f32.mrf.mxu3 }
 0x1a1   :  { %v663_v30 = vadd.f32 %v662_v5, %v618_v14 }
 0x1a3   :  { %v728_v36 = vadd.f32 %v711_v13, %v663_v30 }
 0x1a5   :  { %v737_v45 = vsel %vm266_vm1, %v728_v36, 0.0 }
 0x1a6   :  { %v738_v54 = vadd.f32 %v737_v45, %v736_v53  ;;  %v867_v45 = vsel %vm279_vm0, %v849_v44, 0  ;;  %vm898_vm0 = vcmask 130048  }
 0x1a7   :  { %v664_v18 = vpop.f32.mrf.mxu0  ;;  %876 = vmatpush.bf16.msrb.mxu2 %v867_v45 }
 0x1a8   :  { %v713_v20 = vpop.f32.mrf.mxu1  ;;  %v620_v21 = vpop.f32.mrf.mxu3 }
 0x1a9   :  { %v665_v34 = vadd.f32 %v664_v18, %v620_v21 }
 0x1ab   :  { %v729_v39 = vadd.f32 %v713_v20, %v665_v34 }
 0x1ad   :  { %v739_v55 = vsel %vm266_vm1, %v729_v39, 0.0 }
 0x1ae   :  { %v740_v62 = vadd.f32 %v739_v55, %v738_v54 }
 0x1af   :  { %v667_v22 = vpop.f32.mrf.mxu0 }
 0x1b0   :  { %v716_v9 = vpop.f32.mrf.mxu1  ;;  %v623_v24 = vpop.f32.mrf.mxu3 }
 0x1b1   :  { %v668_v23 = vadd.f32 %v667_v22, %v623_v24 }
 0x1b3   :  { %v730_v11 = vadd.f32 %v716_v9, %v668_v23 }
 0x1b5   :  { %v741_v58 = vsel %vm266_vm1, %v730_v11, 0.0 }
 0x1b6   :  { %v742_v0 = vadd.f32 %v741_v58, %v740_v62 }
 0x1b7   :  { %v669_v26 = vpop.f32.mrf.mxu0 }
 0x1b8   :  { %v718_v27 = vpop.f32.mrf.mxu1  ;;  %v625_v28 = vpop.f32.mrf.mxu3 }
 0x1b9   :  { %v670_v31 = vadd.f32 %v669_v26, %v625_v28 }
 0x1bb   :  { %v731_v51 = vadd.f32 %v718_v27, %v670_v31 }
 0x1bd   :  { %v743_v63 = vsel %vm266_vm1, %v731_v51, 0.0 }
 0x1be   :  { %v744_v4 = vadd.f32 %v743_v63, %v742_v0 }
 0x1bf   :  { %v672_v40 = vpop.f32.mrf.mxu0 }
 0x1c0   :  { %v721_v41 = vpop.f32.mrf.mxu1  ;;  %v628_v42 = vpop.f32.mrf.mxu3 }
 0x1c1   :  { %v673_v52 = vadd.f32 %v672_v40, %v628_v42 }
 0x1c3   :  { %v732_v59 = vadd.f32 %v721_v41, %v673_v52 }
 0x1c5   :  { %v745_v1 = vsel %vm266_vm1, %v732_v59, 0.0 }
 0x1c6   :  { %v746_v19 = vadd.f32 %v745_v1, %v744_v4 }
 0x1c7   :  { %v674_v57 = vpop.f32.mrf.mxu0 }
 0x1c8   :  { %v630_v61 = vpop.f32.mrf.mxu3  ;;  %v723_v6 = vpop.f32.mrf.mxu1 }
 0x1c9   :  { %v675_v60 = vadd.f32 %v674_v57, %v630_v61  ;;  %v954_v61 = vld [vmem:[%s1403_s9] ss:$0 sm:$0xff] }
 0x1cb   :  { %v733_v7 = vadd.f32 %v723_v6, %v675_v60 }
 0x1cd   :  { %v747_v8 = vsel %vm266_vm1, %v733_v7, 0.0 }
 0x1ce   :  { %v748_v3 = vadd.f32 %v747_v8, %v746_v19 }
 0x1d0   :  { %v749_v46 = vrot.slane %v748_v3, 4 }
 0x1d2   :  { %v750_v10 = vadd.f32 %v749_v46, %v748_v3 }
 0x1d4   :  { %v751_v33 = vrot.slane %v750_v10, 2 }
 0x1d6   :  { %v752_v37 = vadd.f32 %v751_v33, %v750_v10 }
 0x1d8   :  { %v753_v47 = vrot.slane %v752_v37, 1 }
 0x1da   :  { %v754_v12 = vadd.f32 %v753_v47, %v752_v37 }
 0x1dc   :  { %v755_v48 = vmul.f32 %v754_v12, %v1205_v43 }
 0x1de   :  { %v756_v49 = vsub.f32 %v726_v35, %v755_v48  ;;  %v757_v50 = vsub.f32 %v727_v32, %v755_v48  ;;  %v758_v56 = vsub.f32 %v728_v36, %v755_v48  ;;  %v759_v15 = vsub.f32 %v729_v39, %v755_v48 }
 0x1df   :  { %v760_v16 = vsub.f32 %v730_v11, %v755_v48  ;;  %v761_v13 = vsub.f32 %v731_v51, %v755_v48  ;;  %v762_v22 = vsub.f32 %v732_v59, %v755_v48  ;;  %v763_v26 = vsub.f32 %v733_v7, %v755_v48 }
 0x1e0   :  { %v764_v17 = vmul.f32 %v756_v49, %v756_v49  ;;  %v765_v2 = vmul.f32 %v757_v50, %v757_v50  ;;  %v766_v5 = vmul.f32 %v758_v56, %v758_v56  ;;  %v767_v14 = vmul.f32 %v759_v15, %v759_v15 }
 0x1e1   :  { %v768_v9 = vmul.f32 %v760_v16, %v760_v16  ;;  %v769_v27 = vmul.f32 %v761_v13, %v761_v13  ;;  %v770_v30 = vmul.f32 %v762_v22, %v762_v22  ;;  %v771_v35 = vmul.f32 %v763_v26, %v763_v26 }
 0x1e2   :  { %v772_v18 = vsel %vm266_vm1, %v764_v17, 0.0  ;;  %v773_v20 = vsel %vm266_vm1, %v765_v2, 0.0  ;;  %v775_v24 = vsel %vm266_vm1, %v766_v5, 0.0  ;;  %v777_v28 = vsel %vm266_vm1, %v767_v14, 0.0 }
 0x1e3   :  { %v774_v21 = vadd.f32 %v773_v20, %v772_v18  ;;  %v779_v32 = vsel %vm266_vm1, %v768_v9, 0.0  ;;  %v781_v36 = vsel %vm266_vm1, %v769_v27, 0.0  ;;  %v783_v38 = vsel %vm266_vm1, %v770_v30, 0.0 }
 0x1e4   :  { %v785_v31 = vsel %vm266_vm1, %v771_v35, 0.0 }
 0x1e5   :  { %v776_v25 = vadd.f32 %v775_v24, %v774_v21 }
 0x1e7   :  { %v778_v29 = vadd.f32 %v777_v28, %v776_v25 }
 0x1e9   :  { %v780_v34 = vadd.f32 %v779_v32, %v778_v29  ;;  %v956_v32 = vld [vmem:[%s1405_s12] ss:$0 sm:$0xff] }
 0x1eb   :  { %v782_v23 = vadd.f32 %v781_v36, %v780_v34 }
 0x1ed   :  { %v784_v39 = vadd.f32 %v783_v38, %v782_v23 }
 0x1ef   :  { %v786_v40 = vadd.f32 %v785_v31, %v784_v39 }
 0x1f1   :  { %v787_v41 = vrot.slane %v786_v40, 4 }
 0x1f3   :  { %v788_v42 = vadd.f32 %v787_v41, %v786_v40 }
 0x1f5   :  { %v789_v11 = vrot.slane %v788_v42, 2 }
 0x1f7   :  { %v790_v52 = vadd.f32 %v789_v11, %v788_v42 }
 0x1f9   :  { %v791_v53 = vrot.slane %v790_v52, 1 }
 0x1fb   :  { %v792_v55 = vadd.f32 %v791_v53, %v790_v52 }
 0x1fd   :  { %v793_v51 = vmul.f32 %v792_v55, %v1205_v43  ;;  %v955_v43 = vld [vmem:[%s1404_s10] ss:$0 sm:$0xff] }
 0x1ff   :  { %v794_v54 = vadd.f32 1e-05, %v793_v51 }
 0x201   :  { %961 = vrsqrt.f32 %v794_v54  ;;  %vm801_vm3 = vweird.f32 %v794_v54 }
 0x207   :  { %v962_v58 = vpop.eup %961 }
 0x208   :  { %v796_v59 = vmul.f32 %v962_v58, %v794_v54  ;;  %vm802_vm2 = vweird.f32 %v962_v58 }
 0x209   :  { %vm803_vm4 = vmor %vm801_vm3, %vm802_vm2 }
 0x20a   :  { %v797_v62 = vmul.f32 %v962_v58, %v796_v59 }
 0x20c   :  { %v798_v63 = vmul.f32 0.5, %v797_v62 }
 0x20e   :  { %v799_v57 = vsub.f32 1.5, %v798_v63 }
 0x210   :  { %v800_v0 = vmul.f32 %v962_v58, %v799_v57 }
 0x212   :  { %v804_v1 = vsel %vm803_vm4, %v962_v58, %v800_v0 }
 0x213   :  { %v812_v60 = vmul.f32 %v804_v1, %v763_v26  ;;  %v805_v4 = vmul.f32 %v804_v1, %v756_v49  ;;  %v806_v6 = vmul.f32 %v804_v1, %v757_v50  ;;  %v807_v7 = vmul.f32 %v804_v1, %v758_v56 }
 0x214   :  { %v808_v19 = vmul.f32 %v804_v1, %v759_v15  ;;  %v809_v8 = vmul.f32 %v804_v1, %v760_v16  ;;  %v810_v3 = vmul.f32 %v804_v1, %v761_v13  ;;  %v811_v46 = vmul.f32 %v804_v1, %v762_v22 }
 0x215   :  { %v817_v10 = vmul.f32 %v954_v61, %v805_v4  ;;  %v818_v33 = vmul.f32 %v954_v61, %v806_v6  ;;  %v819_v37 = vmul.f32 %v954_v61, %v807_v7  ;;  %v824_v47 = vmul.f32 %v954_v61, %v812_v60 }
 0x216   :  { %v820_v12 = vmul.f32 %v954_v61, %v808_v19  ;;  %v821_v48 = vmul.f32 %v954_v61, %v809_v8  ;;  %v822_v17 = vmul.f32 %v954_v61, %v810_v3  ;;  %v823_v2 = vmul.f32 %v954_v61, %v811_v46 }
 0x217   :  { %v829_v5 = vadd.f32 %v955_v43, %v817_v10  ;;  %v830_v49 = vadd.f32 %v955_v43, %v818_v33  ;;  %v831_v50 = vadd.f32 %v955_v43, %v819_v37  ;;  %v836_v14 = vadd.f32 %v955_v43, %v824_v47 }
 0x218   :  { %v832_v18 = vadd.f32 %v955_v43, %v820_v12  ;;  %v833_v20 = vadd.f32 %v955_v43, %v821_v48  ;;  %v834_v21 = vadd.f32 %v955_v43, %v822_v17  ;;  %v835_v56 = vadd.f32 %v955_v43, %v823_v2 }
 0x219   :  { %v837_v15 = vmax.f32 %v829_v5, 0.0  ;;  %v838_v16 = vmax.f32 %v830_v49, 0.0  ;;  %v839_v13 = vmax.f32 %v831_v50, 0.0  ;;  %v844_v22 = vmax.f32 %v836_v14, 0.0 }
 0x21a   :  { %v840_v9 = vmax.f32 %v832_v18, 0.0  ;;  %v841_v24 = vmax.f32 %v833_v20, 0.0  ;;  %v842_v25 = vmax.f32 %v834_v21, 0.0  ;;  %v843_v26 = vmax.f32 %v835_v56, 0.0 }
 0x21b   :  { %v845_v27 = vpack.c.bf16 %v838_v16, %v837_v15 }
 0x21c   :  { %v846_v28 = vpack.c.bf16 %v840_v9, %v839_v13  ;;  %v847_v29 = vpack.c.bf16 %v842_v25, %v841_v24  ;;  %v848_v30 = vpack.c.bf16 %v844_v22, %v843_v26 }
 0x21d   :  { %943 = vmatmul.msk.bf16.vlgmr.msrb.gmra.mxu2 %vm266_vm1, %v845_v27 }
 0x22d   :  { %944 = vmatmul.msk.bf16.gmra.mxu2 %vm266_vm1, %v846_v28 }
 0x23d   :  { %945 = vmatmul.msk.bf16.gmra.mxu2 %vm266_vm1, %v847_v29 }
 0x24d   :  { %946 = vmatmul.msk.bf16.gmra.mxu2 %vm266_vm1, %v848_v30 }
 0x2a0   :  { %v878_v34 = vpop.f32.mrf.mxu2 }
 0x2a1   :  { %v879_v35 = vadd.f32 %v956_v32, %v878_v34 }
 0x2a3   :  { %899 = vst.msk [vmem:[%s1407_s13] sm:$0xff] %vm898_vm0, %v879_v35 }
 0x2a8   :  { %v880_v36 = vpop.f32.mrf.mxu2 }
 0x2a9   :  { %v881_v23 = vadd.f32 %v956_v32, %v880_v36 }
 0x2ab   :  { %900 = vst.msk [vmem:[%s1407_s13 + $0x8] sm:$0xff] %vm898_vm0, %v881_v23 }
 0x2b0   :  { %v883_v38 = vpop.f32.mrf.mxu2 }
 0x2b1   :  { %v884_v39 = vadd.f32 %v956_v32, %v883_v38 }
 0x2b3   :  { %901 = vst.msk [vmem:[%s1407_s13 + $0x10] sm:$0xff] %vm898_vm0, %v884_v39 }
 0x2b8   :  { %v885_v31 = vpop.f32.mrf.mxu2 }
 0x2b9   :  { %v886_v40 = vadd.f32 %v956_v32, %v885_v31 }
 0x2bb   :  { %902 = vst.msk [vmem:[%s1407_s13 + $0x18] sm:$0xff] %vm898_vm0, %v886_v40 }
 0x2c0   :  { %v888_v41 = vpop.f32.mrf.mxu2 }
 0x2c1   :  { %v889_v42 = vadd.f32 %v956_v32, %v888_v41 }
 0x2c3   :  { %903 = vst.msk [vmem:[%s1407_s13 + $0x20] sm:$0xff] %vm898_vm0, %v889_v42 }
 0x2c8   :  { %v890_v44 = vpop.f32.mrf.mxu2 }
 0x2c9   :  { %v891_v45 = vadd.f32 %v956_v32, %v890_v44 }
 0x2cb   :  { %904 = vst.msk [vmem:[%s1407_s13 + $0x28] sm:$0xff] %vm898_vm0, %v891_v45 }
 0x2d0   :  { %v893_v11 = vpop.f32.mrf.mxu2 }
 0x2d1   :  { %v894_v52 = vadd.f32 %v956_v32, %v893_v11 }
 0x2d3   :  { %905 = vst.msk [vmem:[%s1407_s13 + $0x30] sm:$0xff] %vm898_vm0, %v894_v52 }
 0x2d8   :  { %v895_v53 = vpop.f32.mrf.mxu2 }
 0x2d9   :  { %v896_v55 = vadd.f32 %v956_v32, %v895_v53 }
 0x2db   :  { %906 = vst.msk [vmem:[%s1407_s13 + $0x38] sm:$0xff] %vm898_vm0, %v896_v55 }

// kernel: _lambda_.8
= control target key start
LH: loop header
LB: loop body
LE: loop exit
PB: predicated region body
PF: predicated region fallthrough
CT: control target
= control target key end

     0   :  { %vm507_vm0 = vcmask 1043456   ;;  %v45_v3 = vlaneseq  ;;  %vm482_vm1 = vcmask 64512   ;;  %v1683_v30 = vmov 0.0   ;;  %s2785_s2 = inlined_call_operand.vmem [shape: bf16[8,8], index: 2, kind: input, shape index: {}]   ;;  %s2786_s3 = inlined_call_operand.vmem [shape: bf16[8,8], index: 3, kind: input, shape index: {}]   ;;  %s2787_s0 = inlined_call_operand.vmem [shape: f32[128,8], index: 0, kind: input, shape index: {}]   ;;  %s2788_s1 = inlined_call_operand.vmem [shape: bf16[8,8], index: 1, kind: input, shape index: {}]   ;;  %s2789_s4 = inlined_call_operand.vmem [shape: f32[1,8], index: 4, kind: input, shape index: {}]   ;;  %s2790_s5 = inlined_call_operand.vmem [shape: f32[1,8], index: 5, kind: input, shape index: {}]   ;;  %s2791_s6 = inlined_call_operand.vmem [shape: bf16[8,8], index: 6, kind: input, shape index: {}]   ;;  %s2792_s8 = inlined_call_operand.vmem [shape: bf16[8,8], index: 8, kind: input, shape index: {}]   ;;  %s2793_s7 = inlined_call_operand.vmem [shape: bf16[8,8], index: 7, kind: input, shape index: {}]   ;;  %s2794_s9 = inlined_call_operand.vmem [shape: f32[1,8], index: 9, kind: input, shape index: {}]   ;;  %s2795_s10 = inlined_call_operand.vmem [shape: f32[1,8], index: 10, kind: input, shape index: {}]   ;;  %s2796_s11 = inlined_call_operand.vmem [shape: bf16[8,16], index: 11, kind: input, shape index: {}]   ;;  %s2797_s12 = inlined_call_operand.vmem [shape: f32[1,16], index: 12, kind: input, shape index: {}]   ;;  %s2798_s13 = inlined_call_operand.vmem [shape: f32[128,16], index: 13, kind: output, shape index: {}]  }
   0x1   :  { %v481_v0 = vld [vmem:[%s2785_s2] sm:$0xf]  ;;  %v1771_v6 = vld [vmem:[%s2787_s0 + $0x8] sm:$0xff]  ;;  %v352_v10 = vld [vmem:[%s2787_s0 + $0x10] sm:$0xff] }
   0x2   :  { %v644_v1 = vld [vmem:[%s2786_s3] sm:$0xf]  ;;  %v509_v4 = vsel %vm507_vm0, %v481_v0, 0  ;;  %v1783_v9 = vld [vmem:[%s2787_s0 + $0x68] sm:$0xff]  ;;  %v1791_v11 = vld [vmem:[%s2787_s0 + $0x78] sm:$0xff]  ;;  %v416_v14 = vrot.slane %v1771_v6, 1 }
   0x3   :  { %v1764_v2 = vld [vmem:[%s2787_s0] sm:$0xff]  ;;  %v670_v5 = vsel %vm507_vm0, %v644_v1, 0  ;;  %518 = vmatpush.bf16.msra.mxu0 %v509_v4  ;;  %1667 = vmatpush.bf16.msra.mxu3 %v509_v4  ;;  %v1801_v17 = vshrl.u32 %v45_v3, 7  ;;  %v417_v18 = vrot.slane %v352_v10, 1  ;;  %v381_v20 = vrot.slane %v1791_v11, 7  ;;  %v353_v27 = vld [vmem:[%s2787_s0 + $0x18] sm:$0xff] }
   0x4   :  { %v1776_v7 = vld [vmem:[%s2787_s0 + $0x60] sm:$0xff]  ;;  %v473_v8 = vpack.c.bf16 %v1771_v6, %v1764_v2  ;;  %679 = vmatpush.bf16.msra.mxu2 %v670_v5  ;;  %v366_v12 = vrot.slane %v1764_v2, 7  ;;  %v415_v13 = vrot.slane %v1764_v2, 1  ;;  %v367_v21 = vrot.slane %v1771_v6, 7  ;;  %v1839_v38 = vld [vmem:[%s2787_s0 + $0x70] sm:$0xff]  ;;  %v1855_v49 = vld [vmem:[%s2787_s0 + $0x58] sm:$0xff] }
   0x5   :  { %v479_v15 = vpack.c.bf16 %v1783_v9, %v1776_v7  ;;  %v472_v16 = vld [vmem:[%s2788_s1] sm:$0xf]  ;;  %vm431_vm2 = vcmp.lt.s32.totalorder %v1801_v17, 7  ;;  %v66_v22 = vand.u32 31, %v1801_v17  ;;  %vm382_vm3 = vcmp.lt.s32.totalorder %v1801_v17, 1  ;;  %v1878_v60 = vld [vmem:[%s2787_s0 + $0x28] sm:$0xff] }
   0x6   :  { %v585_v19 = vsel %vm507_vm0, %v472_v16, 0  ;;  %1611 = vmatmul.msk.bf16.vlgmr.msra.gmra.mxu0 %vm482_vm1, %v473_v8  ;;  %v445_v23 = vsel %vm431_vm2, %v416_v14, %v417_v18  ;;  %v446_v24 = vsel %vm431_vm2, %v415_v13, %v416_v14  ;;  %v398_v25 = vsel %vm382_vm3, %v381_v20, %v366_v12  ;;  %v354_v29 = vld [vmem:[%s2787_s0 + $0x20] sm:$0xff]  ;;  %v356_v61 = vld [vmem:[%s2787_s0 + $0x30] sm:$0xff] }
   0x7   :  { %1617 = vmatmul.msk.bf16.vlgmr.msra.gmra.mxu3 %vm482_vm1, %v479_v15  ;;  %594 = vmatpush.bf16.msra.mxu1 %v585_v19  ;;  %v636_v26 = vpack.c.bf16 %v445_v23, %v446_v24  ;;  %vm254_vm4 = vcmp.ne.s32.totalorder %v66_v22, 0  ;;  %v49_v28 = vadd.s32 24, %v1801_v17  ;;  %v397_v32 = vsel %vm382_vm3, %v366_v12, %v367_v21  ;;  %v357_v22 = vld [vmem:[%s2787_s0 + $0x38] sm:$0xff]  ;;  %v1911_v24 = vld [vmem:[%s2787_s0 + $0x40] sm:$0xff] }
   0x8   :  { %1668 = vmatpush.bf16.msrb.mxu3 %v585_v19  ;;  %v1829_v31 = vsel %vm254_vm4, 1.0, %v1683_v30  ;;  %v418_v35 = vrot.slane %v353_v27, 1  ;;  %v419_v36 = vrot.slane %v354_v29, 1  ;;  %v58_v41 = vadd.s32 96, %v1801_v17 }
   0x9   :  { %1627 = vmatmul.msk.bf16.vlgmr.msra.gmra.mxu2 %vm482_vm1, %v636_v26  ;;  %v399_v33 = vmul.f32 %v1829_v31, %v398_v25  ;;  %v87_v34 = vand.u32 31, %v49_v28  ;;  %v474_v42 = vpack.c.bf16 %v353_v27, %v352_v10  ;;  %v480_v43 = vpack.c.bf16 %v1791_v11, %v1839_v38 }
   0xa   :  { %v443_v40 = vsel %vm431_vm2, %v418_v35, %v419_v36  ;;  %v369_v45 = vrot.slane %v353_v27, 7  ;;  %v444_v46 = vsel %vm431_vm2, %v417_v18, %v418_v35  ;;  %v368_v47 = vrot.slane %v352_v10, 7 }
   0xb   :  { %v464_v37 = vpack.c.bf16 %v397_v32, %v399_v33  ;;  %vm305_vm5 = vcmp.ne.s32.totalorder %v87_v34, 31  ;;  %v150_v48 = vand.u32 31, %v58_v41  ;;  %v378_v50 = vrot.slane %v1776_v7, 7 }
   0xc   :  { %1669 = vmatpush.bf16.msra.mxu3 %v670_v5  ;;  %v1842_v39 = vsel %vm305_vm5, 1.0, %v1683_v30  ;;  %v377_v52 = vrot.slane %v1855_v49, 7  ;;  %v395_v53 = vsel %vm382_vm3, %v368_v47, %v369_v45  ;;  %v396_v54 = vsel %vm382_vm3, %v367_v21, %v368_v47 }
   0xd   :  { %1619 = vmatmul.msk.bf16.vlgmr.msra.gmra.mxu1 %vm482_vm1, %v464_v37  ;;  %v451_v44 = vmul.f32 %v1842_v39, %v443_v40  ;;  %vm266_vm6 = vcmp.ne.s32.totalorder %v150_v48, 0  ;;  %v50_v55 = vadd.s32 32, %v1801_v17  ;;  %v379_v56 = vrot.slane %v1783_v9, 7 }
   0xe   :  { %v465_v57 = vpack.c.bf16 %v395_v53, %v396_v54  ;;  %v1869_v58 = vsel %vm266_vm6, 1.0, %v1683_v30  ;;  %v386_v59 = vsel %vm382_vm3, %v377_v52, %v378_v50  ;;  %v420_v1 = vrot.slane %v1878_v60, 1 }
   0xf   :  { %v637_v51 = vpack.c.bf16 %v451_v44, %v444_v46  ;;  %v94_v62 = vand.u32 31, %v50_v55  ;;  %v411_v63 = vmul.f32 %v1869_v58, %v386_v59  ;;  %v385_v0 = vsel %vm382_vm3, %v378_v50, %v379_v56 }
  0x10   :  { %v421_v3 = vrot.slane %v356_v61, 1  ;;  %v370_v4 = vrot.slane %v354_v29, 7  ;;  %v475_v5 = vpack.c.bf16 %v1878_v60, %v354_v29  ;;  %v371_v8 = vrot.slane %v1878_v60, 7  ;;  %v359_v60 = vld [vmem:[%s2787_s0 + $0x48] sm:$0xff] }
  0x11   :  { %vm258_vm7 = vcmp.ne.s32.totalorder %v94_v62, 0  ;;  %v470_v6 = vpack.c.bf16 %v385_v0, %v411_v63  ;;  %v442_v12 = vsel %vm431_vm2, %v419_v36, %v420_v1  ;;  %v53_v16 = vadd.s32 56, %v1801_v17 }
  0x12   :  { %v441_v10 = vsel %vm431_vm2, %v420_v1, %v421_v3  ;;  %v1895_v14 = vsel %vm258_vm7, 1.0, %v1683_v30  ;;  %v394_v15 = vsel %vm382_vm3, %v369_v45, %v370_v4  ;;  %v393_v21 = vsel %vm382_vm3, %v370_v4, %v371_v8 }
  0x13   :  { %v638_v18 = vpack.c.bf16 %v441_v10, %v442_v12  ;;  %v403_v19 = vmul.f32 %v1895_v14, %v394_v15  ;;  %v115_v23 = vand.u32 31, %v53_v16  ;;  %v380_v25 = vrot.slane %v1839_v38, 7 }
  0x14   :  { %v422_v27 = vrot.slane %v357_v22, 1  ;;  %v423_v28 = vrot.slane %v1911_v24, 1  ;;  %v61_v33 = vadd.s32 120, %v1801_v17  ;;  %v57_v37 = vadd.s32 88, %v1801_v17 }
  0x15   :  { %v466_v26 = vpack.c.bf16 %v393_v21, %v403_v19  ;;  %vm309_vm8 = vcmp.ne.s32.totalorder %v115_v23, 31  ;;  %v383_v29 = vsel %vm382_vm3, %v380_v25, %v381_v20  ;;  %v384_v32 = vsel %vm382_vm3, %v379_v56, %v380_v25 }
  0x16   :  { %1612 = vmatmul.msk.bf16.gmra.mxu0 %vm482_vm1, %v474_v42  ;;  %v1925_v34 = vsel %vm309_vm8, 1.0, %v1683_v30  ;;  %v439_v35 = vsel %vm431_vm2, %v422_v27, %v423_v28  ;;  %v171_v36 = vand.u32 31, %v61_v33  ;;  %v429_v40 = vrot.slane %v1839_v38, 1 }
  0x17   :  { %1618 = vmatmul.msk.bf16.gmra.mxu3 %vm482_vm1, %v480_v43  ;;  %v476_v41 = vpack.c.bf16 %v357_v22, %v356_v61  ;;  %v471_v42 = vpack.c.bf16 %v383_v29, %v384_v32  ;;  %v430_v20 = vrot.slane %v1791_v11, 1  ;;  %v373_v43 = vrot.slane %v357_v22, 7 }
  0x18   :  { %v455_v44 = vmul.f32 %v1925_v34, %v439_v35  ;;  %vm317_vm9 = vcmp.ne.s32.totalorder %v171_v36, 31  ;;  %v143_v45 = vand.u32 31, %v57_v37  ;;  %v440_v46 = vsel %vm431_vm2, %v421_v3, %v422_v27 }
  0x19   :  { %1628 = vmatmul.msk.bf16.gmra.mxu2 %vm482_vm1, %v637_v51  ;;  %v372_v47 = vrot.slane %v356_v61, 7  ;;  %v1936_v48 = vsel %vm317_vm9, 1.0, %v1683_v30  ;;  %v447_v38 = vsel %vm431_vm2, %v430_v20, %v415_v13  ;;  %v432_v11 = vsel %vm431_vm2, %v429_v40, %v430_v20  ;;  %v360_v61 = vld [vmem:[%s2787_s0 + $0x50] sm:$0xff] }
  0x1a   :  { %v463_v50 = vmul.f32 %v1936_v48, %v447_v38  ;;  %vm313_vm10 = vcmp.ne.s32.totalorder %v143_v45, 31  ;;  %v639_v53 = vpack.c.bf16 %v455_v44, %v440_v46  ;;  %v54_v55 = vadd.s32 64, %v1801_v17 }
  0x1b   :  { %v1948_v51 = vsel %vm313_vm10, 1.0, %v1683_v30  ;;  %v391_v2 = vsel %vm382_vm3, %v372_v47, %v373_v43  ;;  %v392_v13 = vsel %vm382_vm3, %v371_v8, %v372_v47  ;;  %v427_v56 = vrot.slane %v1776_v7, 1 }
  0x1c   :  { %v643_v54 = vpack.c.bf16 %v463_v50, %v432_v11  ;;  %v467_v59 = vpack.c.bf16 %v391_v2, %v392_v13  ;;  %v122_v62 = vand.u32 31, %v54_v55  ;;  %v425_v0 = vrot.slane %v360_v61, 1 }
  0x1d   :  { %1620 = vmatmul.msk.bf16.gmra.mxu1 %vm482_vm1, %v465_v57  ;;  %v428_v57 = vrot.slane %v1783_v9, 1  ;;  %v424_v9 = vrot.slane %v359_v60, 1  ;;  %v374_v1 = vrot.slane %v1911_v24, 7  ;;  %v477_v3 = vpack.c.bf16 %v359_v60, %v1911_v24 }
  0x1e   :  { %vm262_vm11 = vcmp.ne.s32.totalorder %v122_v62, 0  ;;  %v426_v21 = vrot.slane %v1855_v49, 1  ;;  %v478_v22 = vpack.c.bf16 %v1855_v49, %v360_v61  ;;  %v376_v25 = vrot.slane %v360_v61, 7 }
  0x1f   :  { %v433_v63 = vsel %vm431_vm2, %v428_v57, %v429_v40  ;;  %v434_v7 = vsel %vm431_vm2, %v427_v56, %v428_v57  ;;  %v438_v8 = vsel %vm431_vm2, %v423_v28, %v424_v9  ;;  %v1976_v10 = vsel %vm262_vm11, 1.0, %v1683_v30 }
  0x20   :  { %v642_v4 = vpack.c.bf16 %v433_v63, %v434_v7  ;;  %v390_v12 = vsel %vm382_vm3, %v373_v43, %v374_v1  ;;  %v435_v30 = vsel %vm431_vm2, %v426_v21, %v427_v56  ;;  %v436_v24 = vsel %vm431_vm2, %v425_v0, %v426_v21 }
  0x21   :  { %v407_v16 = vmul.f32 %v1976_v10, %v390_v12  ;;  %v459_v23 = vmul.f32 %v1948_v51, %v435_v30  ;;  %v387_v27 = vsel %vm382_vm3, %v376_v25, %v377_v52 }
  0x26   :  { %1613 = vmatmul.msk.bf16.gmra.mxu0 %vm482_vm1, %v475_v5  ;;  %v375_v5 = vrot.slane %v359_v60, 7 }
  0x27   :  { %1625 = vmatmul.msk.bf16.vlgmr.msrb.gmra.mxu3 %vm482_vm1, %v470_v6  ;;  %v437_v6 = vsel %vm431_vm2, %v424_v9, %v425_v0 }
  0x28   :  { %v640_v15 = vpack.c.bf16 %v437_v6, %v438_v8  ;;  %v388_v28 = vsel %vm382_vm3, %v375_v5, %v376_v25 }
  0x29   :  { %1629 = vmatmul.msk.bf16.gmra.mxu2 %vm482_vm1, %v638_v18  ;;  %v389_v18 = vsel %vm382_vm3, %v374_v1, %v375_v5  ;;  %v469_v29 = vpack.c.bf16 %v387_v27, %v388_v28 }
  0x2a   :  { %v468_v19 = vpack.c.bf16 %v389_v18, %v407_v16 }
  0x2d   :  { %1621 = vmatmul.msk.bf16.gmra.mxu1 %vm482_vm1, %v466_v26  ;;  %v641_v26 = vpack.c.bf16 %v459_v23, %v436_v24 }
  0x36   :  { %1614 = vmatmul.msk.bf16.gmra.mxu0 %vm482_vm1, %v476_v41 }
  0x37   :  { %1626 = vmatmul.msk.bf16.gmra.mxu3 %vm482_vm1, %v471_v42 }
  0x39   :  { %1630 = vmatmul.msk.bf16.gmra.mxu2 %vm482_vm1, %v639_v53 }
  0x3d   :  { %1622 = vmatmul.msk.bf16.gmra.mxu1 %vm482_vm1, %v467_v59 }
  0x46   :  { %1615 = vmatmul.msk.bf16.gmra.mxu0 %vm482_vm1, %v477_v3 }
  0x47   :  { %1633 = vmatmul.msk.bf16.vlgmr.msra.gmra.mxu3 %vm482_vm1, %v642_v4 }
  0x49   :  { %1631 = vmatmul.msk.bf16.gmra.mxu2 %vm482_vm1, %v640_v15 }
  0x4d   :  { %1623 = vmatmul.msk.bf16.gmra.mxu1 %vm482_vm1, %v468_v19 }
  0x56   :  { %1616 = vmatmul.msk.bf16.gmra.mxu0 %vm482_vm1, %v478_v22 }
  0x57   :  { %1634 = vmatmul.msk.bf16.gmra.mxu3 %vm482_vm1, %v643_v54 }
  0x59   :  { %1632 = vmatmul.msk.bf16.gmra.mxu2 %vm482_vm1, %v641_v26 }
  0x5d   :  { %1624 = vmatmul.msk.bf16.gmra.mxu1 %vm482_vm1, %v469_v29 }
  0x83   :  { %v520_v32 = vpop.f32.mrf.mxu0 }
  0x8a   :  { %v2004_v33 = vpop.f32.mrf.mxu3  ;;  %v596_v36 = vpop.f32.mrf.mxu1 }
  0x8b   :  { %v522_v35 = vpop.f32.mrf.mxu0  ;;  %v597_v37 = vadd.f32 %v596_v36, %v520_v32 }
  0x8c   :  { %v681_v40 = vpop.f32.mrf.mxu2 }
  0x8d   :  { %v2006_v41 = vadd.f32 %v681_v40, %v597_v37 }
  0x8f   :  { %v737_v24 = vsel %vm482_vm1, %v2006_v41, 0.0 }
  0x92   :  { %v2008_v49 = vpop.f32.mrf.mxu3  ;;  %v598_v42 = vpop.f32.mrf.mxu1 }
  0x93   :  { %v525_v52 = vpop.f32.mrf.mxu0  ;;  %v599_v3 = vadd.f32 %v598_v42, %v522_v35 }
  0x94   :  { %v683_v20 = vpop.f32.mrf.mxu2 }
  0x95   :  { %v2022_v12 = vadd.f32 %v683_v20, %v599_v3 }
  0x97   :  { %v738_v21 = vsel %vm482_vm1, %v2022_v12, 0.0 }
  0x98   :  { %v739_v28 = vadd.f32 %v738_v21, %v737_v24 }
  0x9a   :  { %v2010_v43 = vpop.f32.mrf.mxu3  ;;  %v601_v45 = vpop.f32.mrf.mxu1 }
  0x9b   :  { %v527_v44 = vpop.f32.mrf.mxu0  ;;  %v602_v6 = vadd.f32 %v601_v45, %v525_v52 }
  0x9c   :  { %v686_v46 = vpop.f32.mrf.mxu2 }
  0x9d   :  { %v2024_v18 = vadd.f32 %v686_v46, %v602_v6 }
  0x9f   :  { %v740_v25 = vsel %vm482_vm1, %v2024_v18, 0.0 }
  0xa0   :  { %v741_v40 = vadd.f32 %v740_v25, %v739_v28 }
  0xa2   :  { %v2012_v47 = vpop.f32.mrf.mxu3  ;;  %v603_v50 = vpop.f32.mrf.mxu1 }
  0xa3   :  { %v530_v38 = vpop.f32.mrf.mxu0  ;;  %v604_v15 = vadd.f32 %v603_v50, %v527_v44 }
  0xa4   :  { %v688_v11 = vpop.f32.mrf.mxu2 }
  0xa5   :  { %v2028_v30 = vadd.f32 %v688_v11, %v604_v15 }
  0xa7   :  { %v742_v35 = vsel %vm482_vm1, %v2028_v30, 0.0 }
  0xa8   :  { %v743_v44 = vadd.f32 %v742_v35, %v741_v40 }
  0xaa   :  { %v2014_v53 = vpop.f32.mrf.mxu3  ;;  %v606_v2 = vpop.f32.mrf.mxu1 }
  0xab   :  { %v532_v54 = vpop.f32.mrf.mxu0  ;;  %v607_v19 = vadd.f32 %v606_v2, %v530_v38 }
  0xac   :  { %v691_v13 = vpop.f32.mrf.mxu2 }
  0xad   :  { %v2034_v26 = vadd.f32 %v691_v13, %v607_v19  ;;  %v627_v19 = vadd.f32 %v2014_v53, %v2004_v33 }
  0xaf   :  { %v744_v52 = vsel %vm482_vm1, %v2034_v26, 0.0 }
  0xb0   :  { %v745_v11 = vadd.f32 %v744_v52, %v743_v44 }
  0xb2   :  { %v2016_v55 = vpop.f32.mrf.mxu3  ;;  %v608_v57 = vpop.f32.mrf.mxu1 }
  0xb3   :  { %v535_v56 = vpop.f32.mrf.mxu0  ;;  %v609_v22 = vadd.f32 %v608_v57, %v532_v54  ;;  %v629_v25 = vadd.f32 %v2016_v55, %v2008_v49 }
  0xb4   :  { %v693_v59 = vpop.f32.mrf.mxu2 }
  0xb5   :  { %v2038_v36 = vadd.f32 %v693_v59, %v609_v22 }
  0xb7   :  { %v746_v46 = vsel %vm482_vm1, %v2038_v36, 0.0 }
  0xb8   :  { %v747_v57 = vadd.f32 %v746_v46, %v745_v11 }
  0xba   :  { %v2018_v60 = vpop.f32.mrf.mxu3  ;;  %v611_v61 = vpop.f32.mrf.mxu1 }
  0xbb   :  { %v537_v62 = vpop.f32.mrf.mxu0  ;;  %v612_v27 = vadd.f32 %v611_v61, %v535_v56  ;;  %v632_v35 = vadd.f32 %v2018_v60, %v2010_v43 }
  0xbc   :  { %v696_v63 = vpop.f32.mrf.mxu2 }
  0xbd   :  { %v2042_v42 = vadd.f32 %v696_v63, %v612_v27 }
  0xbf   :  { %v748_v2 = vsel %vm482_vm1, %v2042_v42, 0.0 }
  0xc0   :  { %v749_v63 = vadd.f32 %v748_v2, %v747_v57 }
  0xc2   :  { %v2020_v7 = vpop.f32.mrf.mxu3  ;;  %v613_v9 = vpop.f32.mrf.mxu1 }
  0xc3   :  { %v540_v0 = vpop.f32.mrf.mxu0  ;;  %v614_v37 = vadd.f32 %v613_v9, %v537_v62 }
  0xc4   :  { %v698_v1 = vpop.f32.mrf.mxu2 }
  0xc5   :  { %v2046_v38 = vadd.f32 %v698_v1, %v614_v37 }
  0xc7   :  { %v750_v61 = vsel %vm482_vm1, %v2046_v38, 0.0 }
  0xc8   :  { %v751_v3 = vadd.f32 %v750_v61, %v749_v63 }
  0xca   :  { %v616_v4 = vpop.f32.mrf.mxu1  ;;  %v711_v5 = vpop.f32.mrf.mxu3 }
  0xcb   :  { %v542_v16 = vpop.f32.mrf.mxu0  ;;  %v617_v20 = vadd.f32 %v616_v4, %v540_v0  ;;  %v733_v27 = vadd.f32 %v711_v5, %v627_v19 }
  0xcc   :  { %v701_v8 = vpop.f32.mrf.mxu2 }
  0xcd   :  { %v2050_v13 = vadd.f32 %v701_v8, %v617_v20  ;;  %v634_v20 = vadd.f32 %v2020_v7, %v2012_v47  ;;  %v760_v49 = vsel %vm482_vm1, %v733_v27, 0.0 }
  0xcf   :  { %v752_v0 = vsel %vm482_vm1, %v2050_v13, 0.0 }
  0xd0   :  { %v753_v6 = vadd.f32 %v752_v0, %v751_v3 }
  0xd2   :  { %v618_v23 = vpop.f32.mrf.mxu1  ;;  %v713_v29 = vpop.f32.mrf.mxu3 }
  0xd3   :  { %v545_v45 = vpop.f32.mrf.mxu0  ;;  %v619_v50 = vadd.f32 %v618_v23, %v542_v16  ;;  %v1684_v16 = vmov 128.0   ;;  %v2072_v37 = vadd.f32 %v713_v29, %v629_v25 }
  0xd4   :  { %v703_v32 = vpop.f32.mrf.mxu2  ;;  %1677 = vrcp.f32 %v1684_v16 }
  0xd5   :  { %v2054_v62 = vadd.f32 %v703_v32, %v619_v50  ;;  %v762_v44 = vsel %vm482_vm1, %v2072_v37, 0.0 }
  0xd7   :  { %v754_v4 = vsel %vm482_vm1, %v2054_v62, 0.0 }
  0xd8   :  { %v755_v23 = vadd.f32 %v754_v4, %v753_v6 }
  0xda   :  { %v621_v54 = vpop.f32.mrf.mxu1  ;;  %v716_v9 = vpop.f32.mrf.mxu3 }
  0xdb   :  { %v622_v56 = vadd.f32 %v621_v54, %v545_v45  ;;  %v547_v8 = vpop.f32.mrf.mxu0  ;;  %v1678_v53 = vpop.eup %1677  ;;  %v735_v55 = vadd.f32 %v716_v9, %v632_v35 }
  0xdc   :  { %v706_v59 = vpop.f32.mrf.mxu2  ;;  %v775_v43 = vmul.f32 128.0, %v1678_v53  ;;  %vm779_vm12 = vweird.f32 %v1678_v53 }
  0xdd   :  { %v2058_v1 = vadd.f32 %v706_v59, %v622_v56  ;;  %v764_v29 = vsel %vm482_vm1, %v735_v55, 0.0 }
  0xde   :  { %v776_v11 = vsub.f32 1.0, %v775_v43 }
  0xdf   :  { %v756_v21 = vsel %vm482_vm1, %v2058_v1, 0.0 }
  0xe0   :  { %v757_v32 = vadd.f32 %v756_v21, %v755_v23  ;;  %v777_v7 = vmul.f32 %v1678_v53, %v776_v11 }
  0xe2   :  { %v623_v15 = vpop.f32.mrf.mxu1  ;;  %v718_v40 = vpop.f32.mrf.mxu3  ;;  %v778_v57 = vadd.f32 %v1678_v53, %v777_v7 }
  0xe3   :  { %v624_v22 = vadd.f32 %v623_v15, %v547_v8  ;;  %v2081_v45 = vadd.f32 %v718_v40, %v634_v20 }
  0xe4   :  { %v708_v24 = vpop.f32.mrf.mxu2  ;;  %v2086_v63 = vsel %vm779_vm12, %v1678_v53, %v778_v57 }
  0xe5   :  { %v2068_v28 = vadd.f32 %v708_v24, %v624_v22  ;;  %v766_v50 = vsel %vm482_vm1, %v2081_v45, 0.0 }
  0xe7   :  { %v758_v33 = vsel %vm482_vm1, %v2068_v28, 0.0 }
  0xe8   :  { %v759_v52 = vadd.f32 %v758_v33, %v757_v32 }
  0xea   :  { %v761_v5 = vadd.f32 %v760_v49, %v759_v52 }
  0xec   :  { %v763_v60 = vadd.f32 %v762_v44, %v761_v5 }
  0xee   :  { %v765_v46 = vadd.f32 %v764_v29, %v763_v60 }
  0xf0   :  { %v767_v54 = vadd.f32 %v766_v50, %v765_v46 }
  0xf2   :  { %v768_v47 = vrot.slane %v767_v54, 4 }
  0xf4   :  { %v769_v2 = vadd.f32 %v768_v47, %v767_v54 }
  0xf6   :  { %v770_v56 = vrot.slane %v769_v2, 2 }
  0xf8   :  { %v771_v59 = vadd.f32 %v770_v56, %v769_v2 }
  0xfa   :  { %v772_v61 = vrot.slane %v771_v59, 1 }
  0xfc   :  { %v773_v9 = vadd.f32 %v772_v61, %v771_v59 }
  0xfe   :  { %v781_v0 = vmul.f32 %v2086_v63, %v773_v9 }
 0x100   :  { %v2090_v3 = vsub.f32 %v2006_v41, %v781_v0  ;;  %v2093_v4 = vsub.f32 %v2022_v12, %v781_v0  ;;  %v2096_v6 = vsub.f32 %v2024_v18, %v781_v0  ;;  %v2098_v8 = vsub.f32 %v733_v27, %v781_v0 }
 0x101   :  { %v2100_v15 = vsub.f32 %v735_v55, %v781_v0  ;;  %v2103_v16 = vsub.f32 %v2028_v30, %v781_v0  ;;  %v2110_v21 = vsub.f32 %v2034_v26, %v781_v0  ;;  %v2115_v18 = vsub.f32 %v2038_v36, %v781_v0 }
 0x102   :  { %v798_v19 = vmul.f32 %v2090_v3, %v2090_v3  ;;  %v799_v41 = vmul.f32 %v2093_v4, %v2093_v4  ;;  %v800_v12 = vmul.f32 %v2096_v6, %v2096_v6  ;;  %v2122_v25 = vsub.f32 %v2042_v42, %v781_v0 }
 0x103   :  { %v801_v22 = vmul.f32 %v2103_v16, %v2103_v16  ;;  %v802_v26 = vmul.f32 %v2110_v21, %v2110_v21  ;;  %v2128_v36 = vsub.f32 %v2046_v38, %v781_v0  ;;  %v803_v35 = vmul.f32 %v2115_v18, %v2115_v18 }
 0x104   :  { %v814_v30 = vsel %vm482_vm1, %v798_v19, 0.0  ;;  %v815_v23 = vsel %vm482_vm1, %v799_v41, 0.0  ;;  %v817_v27 = vsel %vm482_vm1, %v800_v12, 0.0  ;;  %v2134_v40 = vsub.f32 %v2050_v13, %v781_v0 }
 0x105   :  { %v816_v24 = vadd.f32 %v815_v23, %v814_v30  ;;  %v819_v33 = vsel %vm482_vm1, %v801_v22, 0.0  ;;  %v804_v42 = vmul.f32 %v2122_v25, %v2122_v25  ;;  %v821_v52 = vsel %vm482_vm1, %v802_v26, 0.0 }
 0x106   :  { %v2140_v49 = vsub.f32 %v2054_v62, %v781_v0  ;;  %v805_v38 = vmul.f32 %v2128_v36, %v2128_v36  ;;  %v823_v55 = vsel %vm482_vm1, %v803_v35, 0.0  ;;  %v2146_v44 = vsub.f32 %v2058_v1, %v781_v0 }
 0x107   :  { %v818_v32 = vadd.f32 %v817_v27, %v816_v24  ;;  %v806_v13 = vmul.f32 %v2134_v40, %v2134_v40  ;;  %v825_v43 = vsel %vm482_vm1, %v804_v42, 0.0  ;;  %v793_v29 = vsub.f32 %v2068_v28, %v781_v0  ;;  %v1039_v42 = vld [vmem:[%s2791_s6] sm:$0xf] }
 0x108   :  { %v807_v62 = vmul.f32 %v2140_v49, %v2140_v49  ;;  %v827_v46 = vsel %vm482_vm1, %v805_v38, 0.0  ;;  %v808_v11 = vmul.f32 %v2146_v44, %v2146_v44  ;;  %v2159_v47 = vsub.f32 %v2072_v37, %v781_v0 }
 0x109   :  { %v820_v53 = vadd.f32 %v819_v33, %v818_v32  ;;  %v829_v1 = vsel %vm482_vm1, %v806_v13, 0.0  ;;  %v809_v7 = vmul.f32 %v793_v29, %v793_v29  ;;  %v810_v28 = vmul.f32 %v2098_v8, %v2098_v8 }
 0x10a   :  { %v831_v2 = vsel %vm482_vm1, %v807_v62, 0.0  ;;  %v833_v57 = vsel %vm482_vm1, %v808_v11, 0.0  ;;  %v797_v61 = vsub.f32 %v2081_v45, %v781_v0  ;;  %v811_v9 = vmul.f32 %v2159_v47, %v2159_v47 }
 0x10b   :  { %v822_v20 = vadd.f32 %v821_v52, %v820_v53  ;;  %v835_v19 = vsel %vm482_vm1, %v809_v7, 0.0  ;;  %v812_v37 = vmul.f32 %v2100_v15, %v2100_v15  ;;  %v837_v12 = vsel %vm482_vm1, %v810_v28, 0.0  ;;  %v1209_v52 = vld [vmem:[%s2792_s8] sm:$0xf] }
 0x10c   :  { %v813_v30 = vmul.f32 %v797_v61, %v797_v61  ;;  %v839_v23 = vsel %vm482_vm1, %v811_v9, 0.0  ;;  %v1150_v38 = vsel %vm507_vm0, %v1039_v42, 0 }
 0x10d   :  { %v824_v5 = vadd.f32 %v823_v55, %v822_v20  ;;  %v841_v26 = vsel %vm482_vm1, %v812_v37, 0.0  ;;  %v1048_v20 = vld [vmem:[%s2793_s7] sm:$0xf]  ;;  %v1235_v55 = vsel %vm507_vm0, %v1209_v52, 0  ;;  %1159 = vmatpush.bf16.msrb.mxu0 %v1150_v38 }
 0x10e   :  { %v843_v45 = vsel %vm482_vm1, %v813_v30, 0.0  ;;  %1244 = vmatpush.bf16.msrb.mxu1 %v1235_v55 }
 0x10f   :  { %v826_v60 = vadd.f32 %v825_v43, %v824_v5  ;;  %v1074_v5 = vsel %vm507_vm0, %v1048_v20, 0 }
 0x110   :  { %1083 = vmatpush.bf16.msrb.mxu3 %v1074_v5 }
 0x111   :  { %v828_v50 = vadd.f32 %v827_v46, %v826_v60 }
 0x113   :  { %v830_v54 = vadd.f32 %v829_v1, %v828_v50 }
 0x115   :  { %v832_v56 = vadd.f32 %v831_v2, %v830_v54  ;;  %v2191_v2 = vld [vmem:[%s2789_s4] ss:$0 sm:$0xff] }
 0x117   :  { %v834_v59 = vadd.f32 %v833_v57, %v832_v56  ;;  %v2199_v57 = vld [vmem:[%s2790_s5] ss:$0 sm:$0xff] }
 0x119   :  { %v836_v41 = vadd.f32 %v835_v19, %v834_v59 }
 0x11b   :  { %v838_v22 = vadd.f32 %v837_v12, %v836_v41 }
 0x11d   :  { %v840_v24 = vadd.f32 %v839_v23, %v838_v22 }
 0x11f   :  { %v842_v27 = vadd.f32 %v841_v26, %v840_v24 }
 0x121   :  { %v844_v0 = vadd.f32 %v843_v45, %v842_v27 }
 0x123   :  { %v845_v32 = vrot.slane %v844_v0, 4 }
 0x125   :  { %v846_v35 = vadd.f32 %v845_v32, %v844_v0 }
 0x127   :  { %v847_v33 = vrot.slane %v846_v35, 2 }
 0x129   :  { %v848_v53 = vadd.f32 %v847_v33, %v846_v35 }
 0x12b   :  { %v849_v13 = vrot.slane %v848_v53, 1 }
 0x12d   :  { %v850_v43 = vadd.f32 %v849_v13, %v848_v53 }
 0x12f   :  { %v851_v60 = vmul.f32 %v850_v43, %v2086_v63 }
 0x131   :  { %v852_v62 = vadd.f32 1e-05, %v851_v60 }
 0x133   :  { %1679 = vrsqrt.f32 %v852_v62  ;;  %vm859_vm14 = vweird.f32 %v852_v62 }
 0x139   :  { %v1680_v46 = vpop.eup %1679 }
 0x13a   :  { %v854_v50 = vmul.f32 %v1680_v46, %v852_v62  ;;  %vm860_vm13 = vweird.f32 %v1680_v46 }
 0x13b   :  { %vm861_vm15 = vmor %vm859_vm14, %vm860_vm13 }
 0x13c   :  { %v855_v11 = vmul.f32 %v1680_v46, %v854_v50 }
 0x13e   :  { %v856_v1 = vmul.f32 0.5, %v855_v11 }
 0x140   :  { %v857_v54 = vsub.f32 1.5, %v856_v1 }
 0x142   :  { %v858_v7 = vmul.f32 %v1680_v46, %v857_v54 }
 0x144   :  { %v2193_v56 = vsel %vm861_vm15, %v1680_v46, %v858_v7 }
 0x145   :  { %v874_v28 = vmul.f32 %v2193_v56, %v793_v29  ;;  %v878_v59 = vmul.f32 %v2193_v56, %v797_v61  ;;  %v863_v9 = vmul.f32 %v2193_v56, %v2090_v3  ;;  %v864_v19 = vmul.f32 %v2193_v56, %v2093_v4 }
 0x146   :  { %v865_v41 = vmul.f32 %v2193_v56, %v2096_v6  ;;  %v866_v29 = vmul.f32 %v2193_v56, %v2103_v16  ;;  %v867_v12 = vmul.f32 %v2193_v56, %v2110_v21  ;;  %v868_v42 = vmul.f32 %v2193_v56, %v2115_v18 }
 0x147   :  { %v894_v37 = vmul.f32 %v2191_v2, %v874_v28  ;;  %v883_v22 = vmul.f32 %v2191_v2, %v863_v9  ;;  %v884_v61 = vmul.f32 %v2191_v2, %v864_v19  ;;  %v898_v30 = vmul.f32 %v2191_v2, %v878_v59 }
 0x148   :  { %v885_v3 = vmul.f32 %v2191_v2, %v865_v41  ;;  %v886_v6 = vmul.f32 %v2191_v2, %v866_v29  ;;  %v887_v23 = vmul.f32 %v2191_v2, %v867_v12  ;;  %v888_v11 = vmul.f32 %v2191_v2, %v868_v42 }
 0x149   :  { %v914_v4 = vadd.f32 %v2199_v57, %v894_v37  ;;  %v903_v24 = vadd.f32 %v2199_v57, %v883_v22  ;;  %v904_v16 = vadd.f32 %v2199_v57, %v884_v61  ;;  %v918_v26 = vadd.f32 %v2199_v57, %v898_v30 }
 0x14a   :  { %v905_v21 = vadd.f32 %v2199_v57, %v885_v3  ;;  %v906_v27 = vadd.f32 %v2199_v57, %v886_v6  ;;  %v907_v45 = vadd.f32 %v2199_v57, %v887_v23  ;;  %v873_v59 = vmul.f32 %v2193_v56, %v2146_v44 }
 0x14b   :  { %v2226_v0 = vmax.f32 %v903_v24, 0.0  ;;  %v920_v32 = vmax.f32 %v904_v16, 0.0  ;;  %v2230_v33 = vmax.f32 %v918_v26, 0.0  ;;  %v908_v19 = vadd.f32 %v2199_v57, %v888_v11 }
 0x14c   :  { %v2228_v35 = vmax.f32 %v905_v21, 0.0  ;;  %v2232_v53 = vmax.f32 %v906_v27, 0.0  ;;  %v2241_v60 = vmax.f32 %v907_v45, 0.0  ;;  %v869_v41 = vmul.f32 %v2193_v56, %v2122_v25 }
 0x14d   :  { %v1040_v52 = vpack.c.bf16 %v920_v32, %v2226_v0  ;;  %v983_v20 = vrot.slane %v2226_v0, 1  ;;  %v984_v38 = vrot.slane %v920_v32, 1  ;;  %v935_v5 = vrot.slane %v2226_v0, 7 }
 0x14e   :  { %v985_v55 = vrot.slane %v2228_v35, 1  ;;  %v936_v13 = vrot.slane %v920_v32, 7  ;;  %v950_v43 = vrot.slane %v2230_v33, 7  ;;  %v986_v7 = vrot.slane %v2232_v53, 1 }
 0x14f   :  { %1635 = vmatmul.msk.bf16.vlgmr.msrb.gmra.mxu3 %vm482_vm1, %v1040_v52  ;;  %v1013_v18 = vsel %vm431_vm2, %v983_v20, %v984_v38  ;;  %v987_v28 = vrot.slane %v2241_v60, 1  ;;  %v871_v37 = vmul.f32 %v2193_v56, %v2134_v40  ;;  %v875_v29 = vmul.f32 %v2193_v56, %v2098_v8 }
 0x150   :  { %v1012_v62 = vsel %vm431_vm2, %v984_v38, %v985_v55  ;;  %v966_v50 = vsel %vm382_vm3, %v950_v43, %v935_v5  ;;  %v965_v54 = vsel %vm382_vm3, %v935_v5, %v936_v13  ;;  %v877_v44 = vmul.f32 %v2193_v56, %v2100_v15 }
 0x151   :  { %v1201_v46 = vpack.c.bf16 %v1012_v62, %v1013_v18  ;;  %v967_v1 = vmul.f32 %v1829_v31, %v966_v50  ;;  %v870_v31 = vmul.f32 %v2193_v56, %v2128_v36  ;;  %v1010_v12 = vsel %vm431_vm2, %v986_v7, %v987_v28 }
 0x152   :  { %v937_v25 = vrot.slane %v2228_v35, 7  ;;  %v891_v36 = vmul.f32 %v2191_v2, %v871_v37  ;;  %v872_v40 = vmul.f32 %v2193_v56, %v2140_v49  ;;  %v893_v61 = vmul.f32 %v2191_v2, %v873_v59 }
 0x153   :  { %1651 = vmatmul.msk.bf16.vlgmr.msrb.gmra.mxu1 %vm482_vm1, %v1201_v46  ;;  %v1031_v9 = vpack.c.bf16 %v965_v54, %v967_v1  ;;  %v890_v22 = vmul.f32 %v2191_v2, %v870_v31  ;;  %v1041_v8 = vpack.c.bf16 %v2232_v53, %v2228_v35  ;;  %v938_v15 = vrot.slane %v2232_v53, 7 }
 0x154   :  { %v2288_v3 = vmax.f32 %v908_v19, 0.0  ;;  %v889_v30 = vmul.f32 %v2191_v2, %v869_v41  ;;  %v911_v23 = vadd.f32 %v2199_v57, %v891_v36  ;;  %v892_v24 = vmul.f32 %v2191_v2, %v872_v40 }
 0x155   :  { %1643 = vmatmul.msk.bf16.vlgmr.msrb.gmra.mxu0 %vm482_vm1, %v1031_v9  ;;  %v910_v6 = vadd.f32 %v2199_v57, %v890_v22  ;;  %v2294_v16 = vmax.f32 %v914_v4, 0.0  ;;  %v1011_v49 = vsel %vm431_vm2, %v985_v55, %v986_v7  ;;  %v1018_v21 = vmul.f32 %v1842_v39, %v1010_v12 }
 0x156   :  { %v913_v26 = vadd.f32 %v2199_v57, %v893_v61  ;;  %v895_v27 = vmul.f32 %v2191_v2, %v875_v29  ;;  %v964_v45 = vsel %vm382_vm3, %v936_v13, %v937_v25  ;;  %v2305_v35 = vmax.f32 %v911_v23, 0.0 }
 0x157   :  { %v2303_v32 = vmax.f32 %v910_v6, 0.0  ;;  %v912_v42 = vadd.f32 %v2199_v57, %v892_v24  ;;  %v963_v4 = vsel %vm382_vm3, %v937_v25, %v938_v15  ;;  %v897_v38 = vmul.f32 %v2191_v2, %v877_v44 }
 0x158   :  { %v2312_v52 = vmax.f32 %v913_v26, 0.0  ;;  %v915_v39 = vadd.f32 %v2199_v57, %v895_v27  ;;  %v909_v55 = vadd.f32 %v2199_v57, %v889_v30  ;;  %v991_v5 = vrot.slane %v2305_v35, 1 }
 0x159   :  { %v942_v13 = vrot.slane %v2303_v32, 7  ;;  %v994_v62 = vrot.slane %v2294_v16, 1  ;;  %v2320_v18 = vmax.f32 %v912_v42, 0.0  ;;  %v943_v50 = vrot.slane %v2305_v35, 7 }
 0x15a   :  { %v993_v46 = vrot.slane %v2312_v52, 1  ;;  %v1045_v11 = vpack.c.bf16 %v2294_v16, %v2312_v52  ;;  %v1202_v1 = vpack.c.bf16 %v1018_v21, %v1011_v49  ;;  %v1032_v54 = vpack.c.bf16 %v963_v4, %v964_v45 }
 0x15b   :  { %v2327_v7 = vmax.f32 %v915_v39, 0.0  ;;  %v946_v59 = vrot.slane %v2294_v16, 7  ;;  %v1044_v9 = vpack.c.bf16 %v2320_v18, %v2305_v35  ;;  %v992_v19 = vrot.slane %v2320_v18, 1 }
 0x15c   :  { %v876_v41 = vmul.f32 %v2193_v56, %v2159_v47  ;;  %v998_v31 = vrot.slane %v2230_v33, 1  ;;  %v944_v37 = vrot.slane %v2320_v18, 7  ;;  %v958_v29 = vsel %vm382_vm3, %v942_v13, %v943_v50 }
 0x15d   :  { %v995_v44 = vrot.slane %v2327_v7, 1  ;;  %v2344_v12 = vsel %vm431_vm2, %v993_v46, %v994_v62  ;;  %v2347_v25 = vmax.f32 %v909_v55, 0.0  ;;  %v2351_v47 = vsel %vm431_vm2, %v992_v19, %v993_v46 }
 0x15e   :  { %v2357_v56 = vsel %vm431_vm2, %v991_v5, %v992_v19  ;;  %v2360_v22 = vmul.f32 %v1976_v10, %v958_v29  ;;  %v2366_v40 = vsel %vm382_vm3, %v943_v50, %v944_v37  ;;  %v896_v10 = vmul.f32 %v2191_v2, %v876_v41 }
 0x15f   :  { %1636 = vmatmul.msk.bf16.gmra.mxu3 %vm482_vm1, %v1041_v8  ;;  %v1205_v36 = vpack.c.bf16 %v2351_v47, %v2357_v56  ;;  %v1002_v61 = vsel %vm431_vm2, %v994_v62, %v995_v44  ;;  %v945_v8 = vrot.slane %v2312_v52, 7  ;;  %v917_v23 = vadd.f32 %v2199_v57, %v897_v38 }
 0x160   :  { %v1035_v30 = vpack.c.bf16 %v2366_v40, %v2360_v22  ;;  %v2374_v6 = vmul.f32 %v1948_v51, %v1002_v61  ;;  %v947_v21 = vrot.slane %v2327_v7, 7  ;;  %v1014_v51 = vsel %vm431_vm2, %v998_v31, %v983_v20 }
 0x161   :  { %v955_v24 = vsel %vm382_vm3, %v945_v8, %v946_v59  ;;  %v956_v49 = vsel %vm382_vm3, %v944_v37, %v945_v8  ;;  %v916_v27 = vadd.f32 %v2199_v57, %v896_v10  ;;  %v933_v45 = vmax.f32 %v917_v23, 0.0 }
 0x162   :  { %v1206_v2 = vpack.c.bf16 %v2374_v6, %v2344_v12  ;;  %v1036_v26 = vpack.c.bf16 %v955_v24, %v956_v49  ;;  %v988_v42 = vrot.slane %v2288_v3, 1  ;;  %v939_v4 = vrot.slane %v2241_v60, 7 }
 0x163   :  { %1652 = vmatmul.msk.bf16.gmra.mxu1 %vm482_vm1, %v1202_v1  ;;  %v954_v39 = vsel %vm382_vm3, %v946_v59, %v947_v21  ;;  %v1030_v38 = vmul.f32 %v1936_v48, %v1014_v51  ;;  %v932_v0 = vmax.f32 %v916_v27, 0.0  ;;  %v997_v55 = vrot.slane %v933_v45, 1 }
 0x164   :  { %v1047_v20 = vpack.c.bf16 %v2230_v33, %v933_v45  ;;  %v1042_v62 = vpack.c.bf16 %v2288_v3, %v2241_v60  ;;  %v989_v46 = vrot.slane %v2347_v25, 1  ;;  %v979_v57 = vmul.f32 %v1869_v58, %v954_v39 }
 0x165   :  { %1644 = vmatmul.msk.bf16.gmra.mxu0 %vm482_vm1, %v1032_v54  ;;  %v949_v50 = vrot.slane %v933_v45, 7  ;;  %v1046_v1 = vpack.c.bf16 %v932_v0, %v2327_v7  ;;  %v996_v54 = vrot.slane %v932_v0, 1  ;;  %v948_v19 = vrot.slane %v932_v0, 7 }
 0x166   :  { %v999_v59 = vsel %vm431_vm2, %v997_v55, %v998_v31  ;;  %v1009_v48 = vsel %vm431_vm2, %v987_v28, %v988_v42  ;;  %v962_v41 = vsel %vm382_vm3, %v938_v15, %v939_v4  ;;  %v1008_v15 = vsel %vm431_vm2, %v988_v42, %v989_v46 }
 0x167   :  { %v1208_v37 = vpack.c.bf16 %v1030_v38, %v999_v59  ;;  %v951_v58 = vsel %vm382_vm3, %v949_v50, %v950_v43  ;;  %v1000_v7 = vsel %vm431_vm2, %v996_v54, %v997_v55  ;;  %v1001_v60 = vsel %vm431_vm2, %v995_v44, %v996_v54 }
 0x168   :  { %v953_v28 = vsel %vm382_vm3, %v947_v21, %v948_v19  ;;  %v952_v53 = vsel %vm382_vm3, %v948_v19, %v949_v50  ;;  %v1207_v31 = vpack.c.bf16 %v1000_v7, %v1001_v60  ;;  %v940_v43 = vrot.slane %v2288_v3, 7 }
 0x169   :  { %v1037_v33 = vpack.c.bf16 %v953_v28, %v979_v57  ;;  %v1038_v29 = vpack.c.bf16 %v951_v58, %v952_v53  ;;  %v971_v12 = vmul.f32 %v1895_v14, %v962_v41  ;;  %v1203_v61 = vpack.c.bf16 %v1008_v15, %v1009_v48 }
 0x16a   :  { %v961_v44 = vsel %vm382_vm3, %v939_v4, %v940_v43  ;;  %v990_v6 = vrot.slane %v2303_v32, 1  ;;  %v941_v14 = vrot.slane %v2347_v25, 7  ;;  %v1043_v23 = vpack.c.bf16 %v2303_v32, %v2347_v25 }
 0x16b   :  { %v1033_v8 = vpack.c.bf16 %v961_v44, %v971_v12 }
 0x16c   :  { %v1006_v3 = vsel %vm431_vm2, %v990_v6, %v991_v5  ;;  %v1007_v24 = vsel %vm431_vm2, %v989_v46, %v990_v6  ;;  %v959_v21 = vsel %vm382_vm3, %v941_v14, %v942_v13  ;;  %v960_v5 = vsel %vm382_vm3, %v940_v43, %v941_v14 }
 0x16d   :  { %v1022_v10 = vmul.f32 %v1925_v34, %v1006_v3  ;;  %v1034_v34 = vpack.c.bf16 %v959_v21, %v960_v5 }
 0x16f   :  { %1637 = vmatmul.msk.bf16.gmra.mxu3 %vm482_vm1, %v1042_v62  ;;  %v1204_v49 = vpack.c.bf16 %v1022_v10, %v1007_v24 }
 0x173   :  { %1653 = vmatmul.msk.bf16.gmra.mxu1 %vm482_vm1, %v1203_v61 }
 0x175   :  { %1645 = vmatmul.msk.bf16.gmra.mxu0 %vm482_vm1, %v1033_v8 }
 0x17f   :  { %1638 = vmatmul.msk.bf16.gmra.mxu3 %vm482_vm1, %v1043_v23 }
 0x183   :  { %1654 = vmatmul.msk.bf16.gmra.mxu1 %vm482_vm1, %v1204_v49 }
 0x185   :  { %1646 = vmatmul.msk.bf16.gmra.mxu0 %vm482_vm1, %v1034_v34 }
 0x18f   :  { %1639 = vmatmul.msk.bf16.gmra.mxu3 %vm482_vm1, %v1044_v9 }
 0x193   :  { %1655 = vmatmul.msk.bf16.gmra.mxu1 %vm482_vm1, %v1205_v36 }
 0x195   :  { %1647 = vmatmul.msk.bf16.gmra.mxu0 %vm482_vm1, %v1035_v30 }
 0x19f   :  { %1640 = vmatmul.msk.bf16.gmra.mxu3 %vm482_vm1, %v1045_v11 }
 0x1a3   :  { %1656 = vmatmul.msk.bf16.gmra.mxu1 %vm482_vm1, %v1206_v2 }
 0x1a5   :  { %1648 = vmatmul.msk.bf16.gmra.mxu0 %vm482_vm1, %v1036_v26 }
 0x1af   :  { %1641 = vmatmul.msk.bf16.gmra.mxu3 %vm482_vm1, %v1046_v1 }
 0x1b3   :  { %1657 = vmatmul.msk.bf16.gmra.mxu1 %vm482_vm1, %v1207_v31 }
 0x1b5   :  { %1649 = vmatmul.msk.bf16.gmra.mxu0 %vm482_vm1, %v1037_v33 }
 0x1bf   :  { %1642 = vmatmul.msk.bf16.gmra.mxu3 %vm482_vm1, %v1047_v20 }
 0x1c3   :  { %1658 = vmatmul.msk.bf16.gmra.mxu1 %vm482_vm1, %v1208_v37 }
 0x1c5   :  { %1650 = vmatmul.msk.bf16.gmra.mxu0 %vm482_vm1, %v1038_v29 }
 0x1d0   :  { %v1246_v17 = vpop.f32.mrf.mxu1 }
 0x1d2   :  { %v1161_v16 = vpop.f32.mrf.mxu0  ;;  %v1085_v32 = vpop.f32.mrf.mxu3 }
 0x1d3   :  { %v1162_v35 = vadd.f32 %v1161_v16, %v1085_v32 }
 0x1d5   :  { %v2477_v52 = vadd.f32 %v1246_v17, %v1162_v35 }
 0x1d7   :  { %v1302_v47 = vsel %vm482_vm1, %v2477_v52, 0.0 }
 0x1d8   :  { %v1248_v13 = vpop.f32.mrf.mxu1 }
 0x1da   :  { %v1163_v18 = vpop.f32.mrf.mxu0  ;;  %v1087_v11 = vpop.f32.mrf.mxu3 }
 0x1db   :  { %v1164_v9 = vadd.f32 %v1163_v18, %v1087_v11 }
 0x1dd   :  { %v2479_v25 = vadd.f32 %v1248_v13, %v1164_v9 }
 0x1df   :  { %v1303_v56 = vsel %vm482_vm1, %v2479_v25, 0.0 }
 0x1e0   :  { %v1251_v22 = vpop.f32.mrf.mxu1  ;;  %v1304_v36 = vadd.f32 %v1303_v56, %v1302_v47 }
 0x1e2   :  { %v1166_v40 = vpop.f32.mrf.mxu0  ;;  %v1090_v30 = vpop.f32.mrf.mxu3 }
 0x1e3   :  { %v1167_v51 = vadd.f32 %v1166_v40, %v1090_v30 }
 0x1e5   :  { %v2485_v2 = vadd.f32 %v1251_v22, %v1167_v51 }
 0x1e7   :  { %v1305_v26 = vsel %vm482_vm1, %v2485_v2, 0.0 }
 0x1e8   :  { %v1253_v27 = vpop.f32.mrf.mxu1  ;;  %v1306_v45 = vadd.f32 %v1305_v26, %v1304_v36 }
 0x1ea   :  { %v1168_v42 = vpop.f32.mrf.mxu0  ;;  %v1092_v4 = vpop.f32.mrf.mxu3 }
 0x1eb   :  { %v1169_v39 = vadd.f32 %v1168_v42, %v1092_v4 }
 0x1ed   :  { %v2489_v38 = vadd.f32 %v1253_v27, %v1169_v39 }
 0x1ef   :  { %v1307_v0 = vsel %vm482_vm1, %v2489_v38, 0.0 }
 0x1f0   :  { %v1256_v55 = vpop.f32.mrf.mxu1  ;;  %v1308_v20 = vadd.f32 %v1307_v0, %v1306_v45 }
 0x1f2   :  { %v1171_v62 = vpop.f32.mrf.mxu0  ;;  %v1095_v46 = vpop.f32.mrf.mxu3 }
 0x1f3   :  { %v1172_v57 = vadd.f32 %v1171_v62, %v1095_v46 }
 0x1f5   :  { %v2493_v50 = vadd.f32 %v1256_v55, %v1172_v57 }
 0x1f7   :  { %v1309_v1 = vsel %vm482_vm1, %v2493_v50, 0.0 }
 0x1f8   :  { %v1258_v54 = vpop.f32.mrf.mxu1  ;;  %v1310_v19 = vadd.f32 %v1309_v1, %v1308_v20 }
 0x1fa   :  { %v1173_v59 = vpop.f32.mrf.mxu0  ;;  %v1097_v48 = vpop.f32.mrf.mxu3 }
 0x1fb   :  { %v1174_v14 = vadd.f32 %v1173_v59, %v1097_v48 }
 0x1fd   :  { %v2497_v21 = vadd.f32 %v1258_v54, %v1174_v14 }
 0x1ff   :  { %v1311_v32 = vsel %vm482_vm1, %v2497_v21, 0.0 }
 0x200   :  { %v1261_v41 = vpop.f32.mrf.mxu1  ;;  %v1312_v22 = vadd.f32 %v1311_v32, %v1310_v19 }
 0x202   :  { %v1176_v37 = vpop.f32.mrf.mxu0  ;;  %v1100_v58 = vpop.f32.mrf.mxu3 }
 0x203   :  { %v1177_v49 = vadd.f32 %v1176_v37, %v1100_v58 }
 0x205   :  { %v2499_v34 = vadd.f32 %v1261_v41, %v1177_v49 }
 0x207   :  { %v1313_v9 = vsel %vm482_vm1, %v2499_v34, 0.0 }
 0x208   :  { %v1263_v7 = vpop.f32.mrf.mxu1  ;;  %v1314_v51 = vadd.f32 %v1313_v9, %v1312_v22 }
 0x20a   :  { %v1178_v60 = vpop.f32.mrf.mxu0  ;;  %v1102_v28 = vpop.f32.mrf.mxu3 }
 0x20b   :  { %v1179_v5 = vadd.f32 %v1178_v60, %v1102_v28 }
 0x20d   :  { %v2503_v35 = vadd.f32 %v1263_v7, %v1179_v5 }
 0x20f   :  { %v1315_v36 = vsel %vm482_vm1, %v2503_v35, 0.0 }
 0x210   :  { %v1266_v53 = vpop.f32.mrf.mxu1  ;;  %v1316_v42 = vadd.f32 %v1315_v36, %v1314_v51 }
 0x212   :  { %v1181_v15 = vpop.f32.mrf.mxu0  ;;  %v1105_v31 = vpop.f32.mrf.mxu3 }
 0x213   :  { %v1182_v17 = vadd.f32 %v1181_v15, %v1105_v31 }
 0x215   :  { %v2507_v47 = vadd.f32 %v1266_v53, %v1182_v17 }
 0x217   :  { %v1317_v26 = vsel %vm482_vm1, %v2507_v47, 0.0 }
 0x218   :  { %v1268_v33 = vpop.f32.mrf.mxu1  ;;  %v1318_v20 = vadd.f32 %v1317_v26, %v1316_v42 }
 0x21a   :  { %v1183_v29 = vpop.f32.mrf.mxu0  ;;  %v1107_v43 = vpop.f32.mrf.mxu3 }
 0x21b   :  { %v1184_v13 = vadd.f32 %v1183_v29, %v1107_v43 }
 0x21d   :  { %v2511_v40 = vadd.f32 %v1268_v33, %v1184_v13 }
 0x21f   :  { %v1319_v4 = vsel %vm482_vm1, %v2511_v40, 0.0 }
 0x220   :  { %v1271_v12 = vpop.f32.mrf.mxu1  ;;  %v1320_v19 = vadd.f32 %v1319_v4, %v1318_v20 }
 0x222   :  { %v1186_v61 = vpop.f32.mrf.mxu0  ;;  %v1110_v44 = vpop.f32.mrf.mxu3 }
 0x223   :  { %v1187_v56 = vadd.f32 %v1186_v61, %v1110_v44 }
 0x225   :  { %v2515_v27 = vadd.f32 %v1271_v12, %v1187_v56 }
 0x227   :  { %v1321_v57 = vsel %vm482_vm1, %v2515_v27, 0.0 }
 0x228   :  { %v1273_v8 = vpop.f32.mrf.mxu1  ;;  %v1322_v41 = vadd.f32 %v1321_v57, %v1320_v19 }
 0x22a   :  { %v1188_v6 = vpop.f32.mrf.mxu0  ;;  %v1112_v3 = vpop.f32.mrf.mxu3 }
 0x22b   :  { %v1189_v30 = vadd.f32 %v1188_v6, %v1112_v3 }
 0x22d   :  { %v2519_v39 = vadd.f32 %v1273_v8, %v1189_v30 }
 0x22f   :  { %v1323_v59 = vsel %vm482_vm1, %v2519_v39, 0.0 }
 0x230   :  { %v1276_v10 = vpop.f32.mrf.mxu1  ;;  %v1324_v7 = vadd.f32 %v1323_v59, %v1322_v41 }
 0x232   :  { %v1191_v23 = vpop.f32.mrf.mxu0  ;;  %v1115_v24 = vpop.f32.mrf.mxu3 }
 0x233   :  { %v1192_v45 = vadd.f32 %v1191_v23, %v1115_v24 }
 0x235   :  { %v2523_v1 = vadd.f32 %v1276_v10, %v1192_v45 }
 0x237   :  { %v1325_v37 = vsel %vm482_vm1, %v2523_v1, 0.0 }
 0x238   :  { %v1278_v16 = vpop.f32.mrf.mxu1  ;;  %v1326_v28 = vadd.f32 %v1325_v37, %v1324_v7 }
 0x23a   :  { %v1193_v18 = vpop.f32.mrf.mxu0  ;;  %v1117_v11 = vpop.f32.mrf.mxu3 }
 0x23b   :  { %v1194_v0 = vadd.f32 %v1193_v18, %v1117_v11 }
 0x23d   :  { %v2527_v48 = vadd.f32 %v1278_v16, %v1194_v0 }
 0x23f   :  { %v1327_v60 = vsel %vm482_vm1, %v2527_v48, 0.0 }
 0x240   :  { %v1281_v55 = vpop.f32.mrf.mxu1  ;;  %v1328_v29 = vadd.f32 %v1327_v60, %v1326_v28 }
 0x242   :  { %v1196_v62 = vpop.f32.mrf.mxu0  ;;  %v1120_v46 = vpop.f32.mrf.mxu3 }
 0x243   :  { %v1197_v54 = vadd.f32 %v1196_v62, %v1120_v46 }
 0x245   :  { %v2531_v58 = vadd.f32 %v1281_v55, %v1197_v54 }
 0x247   :  { %v1329_v31 = vsel %vm482_vm1, %v2531_v58, 0.0 }
 0x248   :  { %v1283_v43 = vpop.f32.mrf.mxu1  ;;  %v1330_v61 = vadd.f32 %v1329_v31, %v1328_v29 }
 0x24a   :  { %v1198_v53 = vpop.f32.mrf.mxu0  ;;  %v1122_v15 = vpop.f32.mrf.mxu3 }
 0x24b   :  { %v1199_v33 = vadd.f32 %v1198_v53, %v1122_v15 }
 0x24d   :  { %v1301_v12 = vadd.f32 %v1283_v43, %v1199_v33 }
 0x24f   :  { %v1331_v44 = vsel %vm482_vm1, %v1301_v12, 0.0 }
 0x250   :  { %v1332_v8 = vadd.f32 %v1331_v44, %v1330_v61 }
 0x252   :  { %v1333_v6 = vrot.slane %v1332_v8, 4 }
 0x254   :  { %v1334_v3 = vadd.f32 %v1333_v6, %v1332_v8 }
 0x256   :  { %v1335_v10 = vrot.slane %v1334_v3, 2 }
 0x258   :  { %v1336_v14 = vadd.f32 %v1335_v10, %v1334_v3 }
 0x25a   :  { %v1337_v23 = vrot.slane %v1336_v14, 1 }
 0x25c   :  { %v1338_v24 = vadd.f32 %v1337_v23, %v1336_v14 }
 0x25e   :  { %v1339_v49 = vmul.f32 %v1338_v24, %v2086_v63 }
 0x260   :  { %v2540_v5 = vsub.f32 %v2477_v52, %v1339_v49  ;;  %v2543_v17 = vsub.f32 %v2479_v25, %v1339_v49  ;;  %v2546_v16 = vsub.f32 %v2485_v2, %v1339_v49  ;;  %v2549_v32 = vsub.f32 %v2489_v38, %v1339_v49 }
 0x261   :  { %v2552_v13 = vsub.f32 %v2493_v50, %v1339_v49  ;;  %v2561_v25 = vsub.f32 %v2497_v21, %v1339_v49  ;;  %v2568_v56 = vsub.f32 %v2499_v34, %v1339_v49  ;;  %v2574_v21 = vsub.f32 %v2503_v35, %v1339_v49 }
 0x262   :  { %v1356_v18 = vmul.f32 %v2540_v5, %v2540_v5  ;;  %v1357_v11 = vmul.f32 %v2543_v17, %v2543_v17  ;;  %v1358_v52 = vmul.f32 %v2546_v16, %v2546_v16  ;;  %v1359_v2 = vmul.f32 %v2549_v32, %v2549_v32 }
 0x263   :  { %v1360_v22 = vmul.f32 %v2552_v13, %v2552_v13  ;;  %v1361_v51 = vmul.f32 %v2561_v25, %v2561_v25  ;;  %v2580_v42 = vsub.f32 %v2507_v47, %v1339_v49  ;;  %v1362_v34 = vmul.f32 %v2568_v56, %v2568_v56 }
 0x264   :  { %v1372_v38 = vsel %vm482_vm1, %v1356_v18, 0.0  ;;  %v1373_v50 = vsel %vm482_vm1, %v1357_v11, 0.0  ;;  %v1375_v36 = vsel %vm482_vm1, %v1358_v52, 0.0  ;;  %v1377_v26 = vsel %vm482_vm1, %v1359_v2, 0.0  ;;  %v1501_v2 = vld [vmem:[%s2796_s11] sm:$0xf] }
 0x265   :  { %v1374_v9 = vadd.f32 %v1373_v50, %v1372_v38  ;;  %v1379_v4 = vsel %vm482_vm1, %v1360_v22, 0.0  ;;  %v2586_v55 = vsub.f32 %v2511_v40, %v1339_v49  ;;  %v1363_v35 = vmul.f32 %v2574_v21, %v2574_v21 }
 0x266   :  { %v1381_v20 = vsel %vm482_vm1, %v1361_v51, 0.0  ;;  %v2592_v46 = vsub.f32 %v2515_v27, %v1339_v49  ;;  %v1364_v47 = vmul.f32 %v2580_v42, %v2580_v42  ;;  %v1383_v57 = vsel %vm482_vm1, %v1362_v34, 0.0 }
 0x267   :  { %v1376_v30 = vadd.f32 %v1375_v36, %v1374_v9  ;;  %v2598_v19 = vsub.f32 %v2519_v39, %v1339_v49  ;;  %v1365_v40 = vmul.f32 %v2586_v55, %v2586_v55  ;;  %v1385_v59 = vsel %vm482_vm1, %v1363_v35, 0.0  ;;  %v2638_v35 = vld [vmem:[%s2794_s9] ss:$0 sm:$0xff] }
 0x268   :  { %v2604_v37 = vsub.f32 %v2523_v1, %v1339_v49  ;;  %v1366_v27 = vmul.f32 %v2592_v46, %v2592_v46  ;;  %v1387_v7 = vsel %vm482_vm1, %v1364_v47, 0.0  ;;  %v2610_v28 = vsub.f32 %v2527_v48, %v1339_v49 }
 0x269   :  { %v1378_v45 = vadd.f32 %v1377_v26, %v1376_v30  ;;  %v1367_v39 = vmul.f32 %v2598_v19, %v2598_v19  ;;  %v1389_v53 = vsel %vm482_vm1, %v1365_v40, 0.0  ;;  %v2616_v31 = vsub.f32 %v2531_v58, %v1339_v49 }
 0x26a   :  { %v1368_v1 = vmul.f32 %v2604_v37, %v2604_v37  ;;  %v1391_v33 = vsel %vm482_vm1, %v1366_v27, 0.0  ;;  %v1355_v43 = vsub.f32 %v1301_v12, %v1339_v49  ;;  %v1369_v48 = vmul.f32 %v2610_v28, %v2610_v28 }
 0x26b   :  { %v1380_v0 = vadd.f32 %v1379_v4, %v1378_v45  ;;  %v1393_v61 = vsel %vm482_vm1, %v1367_v39, 0.0  ;;  %v1370_v8 = vmul.f32 %v2616_v31, %v2616_v31  ;;  %v1531_v38 = vsel %vm507_vm0, %v1501_v2, 0 }
 0x26c   :  { %v1395_v6 = vsel %vm482_vm1, %v1368_v1, 0.0  ;;  %v1371_v3 = vmul.f32 %v1355_v43, %v1355_v43  ;;  %v1397_v10 = vsel %vm482_vm1, %v1369_v48, 0.0  ;;  %1540 = vmatpush.bf16.msrb.mxu2 %v1531_v38  ;;  %vm1582_vm0 = vcmask 130048  }
 0x26d   :  { %v1382_v62 = vadd.f32 %v1381_v20, %v1380_v0  ;;  %v1399_v23 = vsel %vm482_vm1, %v1370_v8, 0.0 }
 0x26e   :  { %v1401_v12 = vsel %vm482_vm1, %v1371_v3, 0.0 }
 0x26f   :  { %v1384_v54 = vadd.f32 %v1383_v57, %v1382_v62  ;;  %v2650_v57 = vld [vmem:[%s2795_s10] ss:$0 sm:$0xff] }
 0x271   :  { %v1386_v41 = vadd.f32 %v1385_v59, %v1384_v54 }
 0x273   :  { %v1388_v60 = vadd.f32 %v1387_v7, %v1386_v41 }
 0x275   :  { %v1390_v15 = vadd.f32 %v1389_v53, %v1388_v60 }
 0x277   :  { %v1392_v29 = vadd.f32 %v1391_v33, %v1390_v15 }
 0x279   :  { %v1394_v44 = vadd.f32 %v1393_v61, %v1392_v29 }
 0x27b   :  { %v1396_v58 = vadd.f32 %v1395_v6, %v1394_v44 }
 0x27d   :  { %v1398_v14 = vadd.f32 %v1397_v10, %v1396_v58 }
 0x27f   :  { %v1400_v24 = vadd.f32 %v1399_v23, %v1398_v14 }
 0x281   :  { %v1402_v49 = vadd.f32 %v1401_v12, %v1400_v24 }
 0x283   :  { %v1403_v18 = vrot.slane %v1402_v49, 4 }
 0x285   :  { %v1404_v11 = vadd.f32 %v1403_v18, %v1402_v49 }
 0x287   :  { %v1405_v52 = vrot.slane %v1404_v11, 2 }
 0x289   :  { %v1406_v50 = vadd.f32 %v1405_v52, %v1404_v11 }
 0x28b   :  { %v1407_v9 = vrot.slane %v1406_v50, 1 }
 0x28d   :  { %v1408_v22 = vadd.f32 %v1407_v9, %v1406_v50 }
 0x28f   :  { %v1409_v36 = vmul.f32 %v1408_v22, %v2086_v63 }
 0x291   :  { %v1410_v30 = vadd.f32 1e-05, %v1409_v36 }
 0x293   :  { %1681 = vrsqrt.f32 %v1410_v30  ;;  %vm1417_vm3 = vweird.f32 %v1410_v30 }
 0x299   :  { %v1682_v51 = vpop.eup %1681 }
 0x29a   :  { %v1412_v26 = vmul.f32 %v1682_v51, %v1410_v30  ;;  %vm1418_vm2 = vweird.f32 %v1682_v51 }
 0x29b   :  { %vm1419_vm4 = vmor %vm1417_vm3, %vm1418_vm2 }
 0x29c   :  { %v1413_v45 = vmul.f32 %v1682_v51, %v1412_v26 }
 0x29e   :  { %v1414_v34 = vmul.f32 0.5, %v1413_v45 }
 0x2a0   :  { %v1415_v4 = vsub.f32 1.5, %v1414_v34 }
 0x2a2   :  { %v1416_v0 = vmul.f32 %v1682_v51, %v1415_v4 }
 0x2a4   :  { %v2640_v20 = vsel %vm1419_vm4, %v1682_v51, %v1416_v0 }
 0x2a5   :  { %v1436_v63 = vmul.f32 %v2640_v20, %v1355_v43  ;;  %v1421_v62 = vmul.f32 %v2640_v20, %v2540_v5  ;;  %v1422_v47 = vmul.f32 %v2640_v20, %v2543_v17  ;;  %v1423_v41 = vmul.f32 %v2640_v20, %v2546_v16 }
 0x2a6   :  { %v1424_v17 = vmul.f32 %v2640_v20, %v2549_v32  ;;  %v1429_v15 = vmul.f32 %v2640_v20, %v2580_v42  ;;  %v1430_v1 = vmul.f32 %v2640_v20, %v2586_v55  ;;  %v1431_v33 = vmul.f32 %v2640_v20, %v2592_v46 }
 0x2a7   :  { %v1456_v54 = vmul.f32 %v2638_v35, %v1436_v63  ;;  %v1441_v40 = vmul.f32 %v2638_v35, %v1421_v62  ;;  %v1442_v59 = vmul.f32 %v2638_v35, %v1422_v47  ;;  %v1443_v39 = vmul.f32 %v2638_v35, %v1423_v41 }
 0x2a8   :  { %v1444_v16 = vmul.f32 %v2638_v35, %v1424_v17  ;;  %v1449_v32 = vmul.f32 %v2638_v35, %v1429_v15  ;;  %v1450_v29 = vmul.f32 %v2638_v35, %v1430_v1  ;;  %v1432_v43 = vmul.f32 %v2640_v20, %v2598_v19 }
 0x2a9   :  { %v1461_v27 = vadd.f32 %v2650_v57, %v1441_v40  ;;  %v1462_v5 = vadd.f32 %v2650_v57, %v1442_v59  ;;  %v1433_v42 = vmul.f32 %v2640_v20, %v2604_v37  ;;  %v1463_v48 = vadd.f32 %v2650_v57, %v1443_v39 }
 0x2aa   :  { %v1451_v55 = vmul.f32 %v2638_v35, %v1431_v33  ;;  %v1434_v61 = vmul.f32 %v2640_v20, %v2610_v28  ;;  %v1435_v46 = vmul.f32 %v2640_v20, %v2616_v31  ;;  %v1469_v44 = vadd.f32 %v2650_v57, %v1449_v32 }
 0x2ab   :  { %v1477_v7 = vmax.f32 %v1461_v27, 0.0  ;;  %v1478_v60 = vmax.f32 %v1462_v5, 0.0  ;;  %v1470_v8 = vadd.f32 %v2650_v57, %v1450_v29  ;;  %v1452_v6 = vmul.f32 %v2638_v35, %v1432_v43 }
 0x2ac   :  { %v1453_v19 = vmul.f32 %v2638_v35, %v1433_v42  ;;  %v1471_v37 = vadd.f32 %v2650_v57, %v1451_v55  ;;  %v1454_v58 = vmul.f32 %v2638_v35, %v1434_v61  ;;  %v1455_v3 = vmul.f32 %v2638_v35, %v1435_v46 }
 0x2ad   :  { %v1493_v53 = vpack.c.bf16 %v1478_v60, %v1477_v7  ;;  %v1476_v10 = vadd.f32 %v2650_v57, %v1456_v54  ;;  %v1485_v28 = vmax.f32 %v1469_v44, 0.0  ;;  %v1486_v14 = vmax.f32 %v1470_v8, 0.0 }
 0x2ae   :  { %v1472_v31 = vadd.f32 %v2650_v57, %v1452_v6  ;;  %v1473_v23 = vadd.f32 %v2650_v57, %v1453_v19  ;;  %v1487_v24 = vmax.f32 %v1471_v37, 0.0  ;;  %v1474_v12 = vadd.f32 %v2650_v57, %v1454_v58 }
 0x2af   :  { %1659 = vmatmul.msk.bf16.vlgmr.msrb.gmra.mxu2 %vm482_vm1, %v1493_v53  ;;  %v1475_v49 = vadd.f32 %v2650_v57, %v1455_v3  ;;  %v1492_v18 = vmax.f32 %v1476_v10, 0.0  ;;  %v1464_v11 = vadd.f32 %v2650_v57, %v1444_v16  ;;  %v1497_v52 = vpack.c.bf16 %v1486_v14, %v1485_v28 }
 0x2b0   :  { %v1488_v2 = vmax.f32 %v1472_v31, 0.0  ;;  %v1489_v38 = vmax.f32 %v1473_v23, 0.0  ;;  %v1490_v50 = vmax.f32 %v1474_v12, 0.0  ;;  %v1479_v51 = vmax.f32 %v1463_v48, 0.0 }
 0x2b1   :  { %v1491_v9 = vmax.f32 %v1475_v49, 0.0  ;;  %v1480_v26 = vmax.f32 %v1464_v11, 0.0  ;;  %v1425_v34 = vmul.f32 %v2640_v20, %v2552_v13  ;;  %v1426_v4 = vmul.f32 %v2640_v20, %v2561_v25 }
 0x2b2   :  { %v1498_v22 = vpack.c.bf16 %v1488_v2, %v1487_v24  ;;  %v1499_v36 = vpack.c.bf16 %v1490_v50, %v1489_v38  ;;  %v1427_v41 = vmul.f32 %v2640_v20, %v2568_v56  ;;  %v1428_v13 = vmul.f32 %v2640_v20, %v2574_v21  ;;  %v1676_v56 = vld [vmem:[%s2797_s12] ss:$0 sm:$0xff] }
 0x2b3   :  { %v1500_v30 = vpack.c.bf16 %v1492_v18, %v1491_v9  ;;  %v1494_v45 = vpack.c.bf16 %v1480_v26, %v1479_v51  ;;  %v1445_v0 = vmul.f32 %v2638_v35, %v1425_v34  ;;  %v1446_v63 = vmul.f32 %v2638_v35, %v1426_v4 }
 0x2b4   :  { %v1447_v25 = vmul.f32 %v2638_v35, %v1427_v41  ;;  %v1448_v27 = vmul.f32 %v2638_v35, %v1428_v13 }
 0x2b5   :  { %v1465_v62 = vadd.f32 %v2650_v57, %v1445_v0  ;;  %v1466_v47 = vadd.f32 %v2650_v57, %v1446_v63 }
 0x2b6   :  { %v1467_v5 = vadd.f32 %v2650_v57, %v1447_v25  ;;  %v1468_v17 = vadd.f32 %v2650_v57, %v1448_v27 }
 0x2b7   :  { %v1481_v54 = vmax.f32 %v1465_v62, 0.0  ;;  %v1482_v40 = vmax.f32 %v1466_v47, 0.0 }
 0x2b8   :  { %v1483_v7 = vmax.f32 %v1467_v5, 0.0  ;;  %v1484_v60 = vmax.f32 %v1468_v17, 0.0 }
 0x2b9   :  { %v1495_v59 = vpack.c.bf16 %v1482_v40, %v1481_v54 }
 0x2ba   :  { %v1496_v39 = vpack.c.bf16 %v1484_v60, %v1483_v7 }
 0x2bf   :  { %1660 = vmatmul.msk.bf16.gmra.mxu2 %vm482_vm1, %v1494_v45 }
 0x2cf   :  { %1661 = vmatmul.msk.bf16.gmra.mxu2 %vm482_vm1, %v1495_v59 }
 0x2df   :  { %1662 = vmatmul.msk.bf16.gmra.mxu2 %vm482_vm1, %v1496_v39 }
 0x2ef   :  { %1663 = vmatmul.msk.bf16.gmra.mxu2 %vm482_vm1, %v1497_v52 }
 0x2ff   :  { %1664 = vmatmul.msk.bf16.gmra.mxu2 %vm482_vm1, %v1498_v22 }
 0x30f   :  { %1665 = vmatmul.msk.bf16.gmra.mxu2 %vm482_vm1, %v1499_v36 }
 0x31f   :  { %1666 = vmatmul.msk.bf16.gmra.mxu2 %vm482_vm1, %v1500_v30 }
 0x332   :  { %v1542_v21 = vpop.f32.mrf.mxu2 }
 0x333   :  { %v1543_v35 = vadd.f32 %v1676_v56, %v1542_v21 }
 0x335   :  { %1583 = vst.msk [vmem:[%s2798_s13] sm:$0xff] %vm1582_vm0, %v1543_v35 }
 0x33a   :  { %v1544_v20 = vpop.f32.mrf.mxu2 }
 0x33b   :  { %v1545_v57 = vadd.f32 %v1676_v56, %v1544_v20 }
 0x33d   :  { %1584 = vst.msk [vmem:[%s2798_s13 + $0x8] sm:$0xff] %vm1582_vm0, %v1545_v57 }
 0x342   :  { %v1547_v53 = vpop.f32.mrf.mxu2 }
 0x343   :  { %v1548_v15 = vadd.f32 %v1676_v56, %v1547_v53 }
 0x345   :  { %1585 = vst.msk [vmem:[%s2798_s13 + $0x10] sm:$0xff] %vm1582_vm0, %v1548_v15 }
 0x34a   :  { %v1549_v1 = vpop.f32.mrf.mxu2 }
 0x34b   :  { %v1550_v16 = vadd.f32 %v1676_v56, %v1549_v1 }
 0x34d   :  { %1586 = vst.msk [vmem:[%s2798_s13 + $0x18] sm:$0xff] %vm1582_vm0, %v1550_v16 }
 0x352   :  { %v1552_v33 = vpop.f32.mrf.mxu2 }
 0x353   :  { %v1553_v32 = vadd.f32 %v1676_v56, %v1552_v33 }
 0x355   :  { %1587 = vst.msk [vmem:[%s2798_s13 + $0x20] sm:$0xff] %vm1582_vm0, %v1553_v32 }
 0x35a   :  { %v1554_v29 = vpop.f32.mrf.mxu2 }
 0x35b   :  { %v1555_v43 = vadd.f32 %v1676_v56, %v1554_v29 }
 0x35d   :  { %1588 = vst.msk [vmem:[%s2798_s13 + $0x28] sm:$0xff] %vm1582_vm0, %v1555_v43 }
 0x362   :  { %v1557_v42 = vpop.f32.mrf.mxu2 }
 0x363   :  { %v1558_v48 = vadd.f32 %v1676_v56, %v1557_v42 }
 0x365   :  { %1589 = vst.msk [vmem:[%s2798_s13 + $0x30] sm:$0xff] %vm1582_vm0, %v1558_v48 }
 0x36a   :  { %v1559_v55 = vpop.f32.mrf.mxu2 }
 0x36b   :  { %v1560_v61 = vadd.f32 %v1676_v56, %v1559_v55 }
 0x36d   :  { %1590 = vst.msk [vmem:[%s2798_s13 + $0x38] sm:$0xff] %vm1582_vm0, %v1560_v61 }
 0x372   :  { %v1562_v46 = vpop.f32.mrf.mxu2 }
 0x373   :  { %v1563_v44 = vadd.f32 %v1676_v56, %v1562_v46 }
 0x375   :  { %1591 = vst.msk [vmem:[%s2798_s13 + $0x40] sm:$0xff] %vm1582_vm0, %v1563_v44 }
 0x37a   :  { %v1564_v8 = vpop.f32.mrf.mxu2 }
 0x37b   :  { %v1565_v6 = vadd.f32 %v1676_v56, %v1564_v8 }
 0x37d   :  { %1592 = vst.msk [vmem:[%s2798_s13 + $0x48] sm:$0xff] %vm1582_vm0, %v1565_v6 }
 0x382   :  { %v1567_v19 = vpop.f32.mrf.mxu2 }
 0x383   :  { %v1568_v37 = vadd.f32 %v1676_v56, %v1567_v19 }
 0x385   :  { %1593 = vst.msk [vmem:[%s2798_s13 + $0x50] sm:$0xff] %vm1582_vm0, %v1568_v37 }
 0x38a   :  { %v1569_v58 = vpop.f32.mrf.mxu2 }
 0x38b   :  { %v1570_v3 = vadd.f32 %v1676_v56, %v1569_v58 }
 0x38d   :  { %1594 = vst.msk [vmem:[%s2798_s13 + $0x58] sm:$0xff] %vm1582_vm0, %v1570_v3 }
 0x392   :  { %v1572_v10 = vpop.f32.mrf.mxu2 }
 0x393   :  { %v1573_v28 = vadd.f32 %v1676_v56, %v1572_v10 }
 0x395   :  { %1595 = vst.msk [vmem:[%s2798_s13 + $0x60] sm:$0xff] %vm1582_vm0, %v1573_v28 }
 0x39a   :  { %v1574_v14 = vpop.f32.mrf.mxu2 }
 0x39b   :  { %v1575_v31 = vadd.f32 %v1676_v56, %v1574_v14 }
 0x39d   :  { %1596 = vst.msk [vmem:[%s2798_s13 + $0x68] sm:$0xff] %vm1582_vm0, %v1575_v31 }
 0x3a2   :  { %v1577_v23 = vpop.f32.mrf.mxu2 }
 0x3a3   :  { %v1578_v24 = vadd.f32 %v1676_v56, %v1577_v23 }
 0x3a5   :  { %1597 = vst.msk [vmem:[%s2798_s13 + $0x70] sm:$0xff] %vm1582_vm0, %v1578_v24 }
 0x3aa   :  { %v1579_v12 = vpop.f32.mrf.mxu2 }
 0x3ab   :  { %v1580_v49 = vadd.f32 %v1676_v56, %v1579_v12 }
 0x3ad   :  { %1598 = vst.msk [vmem:[%s2798_s13 + $0x78] sm:$0xff] %vm1582_vm0, %v1580_v49 }

// kernel: _lambda_.9
= control target key start
LH: loop header
LB: loop body
LE: loop exit
PB: predicated region body
PF: predicated region fallthrough
CT: control target
= control target key end

     0   :  { %vm965_vm0 = vcmask 1043456   ;;  %v47_v3 = vlaneseq  ;;  %vm916_vm1 = vcmask 64512   ;;  %v3125_v27 = vmov 0.0   ;;  %s5593_s2 = inlined_call_operand.vmem [shape: bf16[8,8], index: 2, kind: input, shape index: {}]   ;;  %s5594_s3 = inlined_call_operand.vmem [shape: bf16[8,8], index: 3, kind: input, shape index: {}]   ;;  %s5595_s0 = inlined_call_operand.vmem [shape: f32[256,8], index: 0, kind: input, shape index: {}]   ;;  %s5596_s1 = inlined_call_operand.vmem [shape: bf16[8,8], index: 1, kind: input, shape index: {}]   ;;  %s5597_s4 = inlined_call_operand.vmem [shape: f32[1,8], index: 4, kind: input, shape index: {}]   ;;  %s5598_s5 = inlined_call_operand.vmem [shape: f32[1,8], index: 5, kind: input, shape index: {}]   ;;  %s5599_s6 = inlined_call_operand.vmem [shape: bf16[8,8], index: 6, kind: input, shape index: {}]   ;;  %s5600_s8 = inlined_call_operand.vmem [shape: bf16[8,8], index: 8, kind: input, shape index: {}]   ;;  %s5601_s7 = inlined_call_operand.vmem [shape: bf16[8,8], index: 7, kind: input, shape index: {}]   ;;  %s5602_s9 = inlined_call_operand.vmem [shape: f32[1,8], index: 9, kind: input, shape index: {}]   ;;  %s5603_s10 = inlined_call_operand.vmem [shape: f32[1,8], index: 10, kind: input, shape index: {}]   ;;  %s5604_s11 = inlined_call_operand.vmem [shape: bf16[8,1], index: 11, kind: input, shape index: {}]   ;;  %s5605_s12 = inlined_call_operand.<no memory space> [shape: f32[1,1], index: 12, kind: input, shape index: {}]   ;;  %s5606_s13 = inlined_call_operand.vmem [shape: f32[256,1], index: 13, kind: output, shape index: {}]  }
   0x1   :  { %v915_v0 = vld [vmem:[%s5593_s2] sm:$0xf]  ;;  %v657_v6 = vld [vmem:[%s5595_s0 + $0x8] sm:$0xff]  ;;  %v658_v10 = vld [vmem:[%s5595_s0 + $0x10] sm:$0xff] }
   0x2   :  { %v1214_v1 = vld [vmem:[%s5594_s3] sm:$0xf]  ;;  %v967_v4 = vsel %vm965_vm0, %v915_v0, 0  ;;  %v3222_v9 = vld [vmem:[%s5595_s0 + $0xc8] sm:$0xff]  ;;  %v3230_v11 = vld [vmem:[%s5595_s0 + $0xf8] sm:$0xff]  ;;  %v786_v14 = vrot.slane %v657_v6, 1 }
   0x3   :  { %v3206_v2 = vld [vmem:[%s5595_s0] sm:$0xff]  ;;  %v1264_v5 = vsel %vm965_vm0, %v1214_v1, 0  ;;  %976 = vmatpush.bf16.msra.mxu0 %v967_v4  ;;  %3109 = vmatpush.bf16.msra.mxu3 %v967_v4  ;;  %v3239_v17 = vshrl.u32 %v47_v3, 7  ;;  %v787_v18 = vrot.slane %v658_v10, 1  ;;  %v719_v20 = vrot.slane %v3230_v11, 7  ;;  %v659_v32 = vld [vmem:[%s5595_s0 + $0x18] sm:$0xff] }
   0x4   :  { %v3216_v7 = vld [vmem:[%s5595_s0 + $0xc0] sm:$0xff]  ;;  %v899_v8 = vpack.c.bf16 %v657_v6, %v3206_v2  ;;  %1273 = vmatpush.bf16.msra.mxu2 %v1264_v5  ;;  %v688_v12 = vrot.slane %v3206_v2, 7  ;;  %v785_v13 = vrot.slane %v3206_v2, 1  ;;  %v689_v21 = vrot.slane %v657_v6, 7  ;;  %v3275_v34 = vld [vmem:[%s5595_s0 + $0xd0] sm:$0xff]  ;;  %v3280_v35 = vld [vmem:[%s5595_s0 + $0xd8] sm:$0xff] }
   0x5   :  { %v911_v15 = vpack.c.bf16 %v3222_v9, %v3216_v7  ;;  %v898_v16 = vld [vmem:[%s5596_s1] sm:$0xf]  ;;  %5650 = vst [vmem:[#allocation3_spill] sm:$0xff] %v3239_v17  ;;  %vm817_vm2 = vcmp.lt.s32.totalorder %v3239_v17, 7  ;;  %v84_v22 = vand.u32 63, %v3239_v17  ;;  %vm720_vm3 = vcmp.lt.s32.totalorder %v3239_v17, 1 }
   0x6   :  { %v1107_v19 = vsel %vm965_vm0, %v898_v16, 0  ;;  %2997 = vmatmul.msk.bf16.vlgmr.msra.gmra.mxu0 %vm916_vm1, %v899_v8  ;;  %v847_v23 = vsel %vm817_vm2, %v786_v14, %v787_v18  ;;  %v848_v24 = vsel %vm817_vm2, %v785_v13, %v786_v14  ;;  %v752_v25 = vsel %vm720_vm3, %v719_v20, %v688_v12  ;;  %v660_v33 = vld [vmem:[%s5595_s0 + $0x20] sm:$0xff]  ;;  %v661_v48 = vld [vmem:[%s5595_s0 + $0x28] sm:$0xff]  ;;  %v662_v49 = vld [vmem:[%s5595_s0 + $0x30] sm:$0xff] }
   0x7   :  { %3009 = vmatmul.msk.bf16.vlgmr.msra.gmra.mxu3 %vm916_vm1, %v911_v15  ;;  %1116 = vmatpush.bf16.msra.mxu1 %v1107_v19  ;;  %v1198_v26 = vpack.c.bf16 %v847_v23, %v848_v24  ;;  %vm464_vm4 = vcmp.ne.s32.totalorder %v84_v22, 0  ;;  %v751_v29 = vsel %vm720_vm3, %v688_v12, %v689_v21  ;;  %v788_v36 = vrot.slane %v659_v32, 1  ;;  %v3305_v50 = vld [vmem:[%s5595_s0 + $0xe0] sm:$0xff]  ;;  %v3310_v51 = vld [vmem:[%s5595_s0 + $0xe8] sm:$0xff]  ;;  %v663_v0 = vld [vmem:[%s5595_s0 + $0x38] sm:$0xff] }
   0x8   :  { %3110 = vmatpush.bf16.msrb.mxu3 %v1107_v19  ;;  %v3259_v28 = vsel %vm464_vm4, 1.0, %v3125_v27  ;;  %v789_v37 = vrot.slane %v660_v33, 1  ;;  %v900_v38 = vpack.c.bf16 %v659_v32, %v658_v10  ;;  %v912_v39 = vpack.c.bf16 %v3280_v35, %v3275_v34  ;;  %v664_v3 = vld [vmem:[%s5595_s0 + $0x40] sm:$0xff]  ;;  %v3336_v8 = vld [vmem:[%s5595_s0 + $0xf0] sm:$0xff]  ;;  %v3352_v24 = vld [vmem:[%s5595_s0 + $0xb8] sm:$0xff] }
   0x9   :  { %5651 = vst [vmem:[#allocation4_spill] sm:$0xff] %v3259_v28  ;;  %3029 = vmatmul.msk.bf16.vlgmr.msra.gmra.mxu2 %vm916_vm1, %v1198_v26  ;;  %v753_v30 = vmul.f32 %v3259_v28, %v752_v25  ;;  %v691_v40 = vrot.slane %v659_v32, 7  ;;  %v846_v42 = vsel %vm817_vm2, %v787_v18, %v788_v36  ;;  %v690_v43 = vrot.slane %v658_v10, 7 }
   0xa   :  { %v845_v41 = vsel %vm817_vm2, %v788_v36, %v789_v37  ;;  %v790_v52 = vrot.slane %v661_v48, 1  ;;  %v791_v53 = vrot.slane %v662_v49, 1  ;;  %v901_v54 = vpack.c.bf16 %v661_v48, %v660_v33 }
   0xb   :  { %v882_v31 = vpack.c.bf16 %v751_v29, %v753_v30  ;;  %v1199_v44 = vpack.c.bf16 %v845_v41, %v846_v42  ;;  %v749_v45 = vsel %vm720_vm3, %v690_v43, %v691_v40  ;;  %v750_v46 = vsel %vm720_vm3, %v689_v21, %v690_v43 }
   0xc   :  { %3111 = vmatpush.bf16.msra.mxu3 %v1264_v5  ;;  %v883_v47 = vpack.c.bf16 %v749_v45, %v750_v46  ;;  %v913_v55 = vpack.c.bf16 %v3310_v51, %v3305_v50  ;;  %v693_v56 = vrot.slane %v661_v48, 7  ;;  %v843_v57 = vsel %vm817_vm2, %v790_v52, %v791_v53 }
   0xd   :  { %3013 = vmatmul.msk.bf16.vlgmr.msra.gmra.mxu1 %vm916_vm1, %v882_v31  ;;  %v844_v58 = vsel %vm817_vm2, %v789_v37, %v790_v52  ;;  %v692_v59 = vrot.slane %v660_v33, 7  ;;  %v55_v60 = vadd.s32 56, %v3239_v17  ;;  %v792_v5 = vrot.slane %v663_v0, 1 }
   0xe   :  { %v1200_v61 = vpack.c.bf16 %v843_v57, %v844_v58  ;;  %v793_v6 = vrot.slane %v664_v3, 1  ;;  %v72_v14 = vadd.s32 192, %v3239_v17  ;;  %v902_v15 = vpack.c.bf16 %v663_v0, %v662_v49 }
   0xf   :  { %v747_v62 = vsel %vm720_vm3, %v692_v59, %v693_v56  ;;  %v748_v63 = vsel %vm720_vm3, %v691_v40, %v692_v59  ;;  %v133_v1 = vand.u32 63, %v55_v60  ;;  %v914_v16 = vpack.c.bf16 %v3230_v11, %v3336_v8  ;;  %v666_v40 = vld [vmem:[%s5595_s0 + $0x50] sm:$0xff] }
  0x10   :  { %v884_v4 = vpack.c.bf16 %v747_v62, %v748_v63  ;;  %v841_v12 = vsel %vm817_vm2, %v792_v5, %v793_v6  ;;  %v695_v19 = vrot.slane %v663_v0, 7  ;;  %v842_v21 = vsel %vm817_vm2, %v791_v53, %v792_v5  ;;  %v667_v62 = vld [vmem:[%s5595_s0 + $0x58] sm:$0xff]  ;;  %v668_v63 = vld [vmem:[%s5595_s0 + $0x60] sm:$0xff] }
  0x11   :  { %vm567_vm5 = vcmp.ne.s32.totalorder %v133_v1, 63  ;;  %v694_v22 = vrot.slane %v662_v49, 7  ;;  %v252_v23 = vand.u32 63, %v72_v14  ;;  %v712_v25 = vrot.slane %v3216_v7, 7 }
  0x12   :  { %v3339_v10 = vsel %vm567_vm5, 1.0, %v3125_v27  ;;  %v711_v29 = vrot.slane %v3352_v24, 7  ;;  %v56_v32 = vadd.s32 64, %v3239_v17  ;;  %v713_v33 = vrot.slane %v3222_v9, 7 }
  0x13   :  { %5652 = vst [vmem:[#allocation5_spill] sm:$0xff] %v3339_v10  ;;  %v857_v18 = vmul.f32 %v3339_v10, %v841_v12  ;;  %v745_v30 = vsel %vm720_vm3, %v694_v22, %v695_v19  ;;  %v746_v31 = vsel %vm720_vm3, %v693_v56, %v694_v22  ;;  %vm488_vm6 = vcmp.ne.s32.totalorder %v252_v23, 0 }
  0x14   :  { %v885_v36 = vpack.c.bf16 %v745_v30, %v746_v31  ;;  %v3366_v37 = vsel %vm488_vm6, 1.0, %v3125_v27  ;;  %v140_v41 = vand.u32 63, %v56_v32  ;;  %v727_v43 = vsel %vm720_vm3, %v712_v25, %v713_v33  ;;  %v670_v30 = vld [vmem:[%s5595_s0 + $0x70] sm:$0xff] }
  0x15   :  { %v1201_v26 = vpack.c.bf16 %v857_v18, %v842_v21  ;;  %5653 = vst [vmem:[#allocation6_spill] sm:$0xff] %v3366_v37  ;;  %v795_v45 = vrot.slane %v666_v40, 1  ;;  %v696_v46 = vrot.slane %v664_v3, 7  ;;  %v714_v59 = vrot.slane %v3275_v34, 7 }
  0x16   :  { %2998 = vmatmul.msk.bf16.gmra.mxu0 %vm916_vm1, %v900_v38  ;;  %v728_v38 = vsel %vm720_vm3, %v711_v29, %v712_v25  ;;  %vm472_vm7 = vcmp.ne.s32.totalorder %v140_v41, 0  ;;  %v715_v60 = vrot.slane %v3280_v35, 7  ;;  %v904_v5 = vpack.c.bf16 %v667_v62, %v666_v40 }
  0x17   :  { %3010 = vmatmul.msk.bf16.gmra.mxu3 %vm916_vm1, %v912_v39  ;;  %v665_v39 = vld [vmem:[%s5595_s0 + $0x48] sm:$0xff]  ;;  %v777_v42 = vmul.f32 %v3366_v37, %v728_v38  ;;  %v726_v1 = vsel %vm720_vm3, %v713_v33, %v714_v59  ;;  %v699_v12 = vrot.slane %v667_v62, 7  ;;  %v716_v22 = vrot.slane %v3305_v50, 7 }
  0x18   :  { %v697_v49 = vrot.slane %v665_v39, 7  ;;  %v725_v0 = vsel %vm720_vm3, %v714_v59, %v715_v60  ;;  %v717_v23 = vrot.slane %v3310_v51, 7  ;;  %v809_v38 = vrot.slane %v3216_v7, 1 }
  0x19   :  { %3030 = vmatmul.msk.bf16.gmra.mxu2 %vm916_vm1, %v1199_v44  ;;  %v794_v44 = vrot.slane %v665_v39, 1  ;;  %v894_v48 = vpack.c.bf16 %v727_v43, %v777_v42  ;;  %v724_v32 = vsel %vm720_vm3, %v715_v60, %v716_v22  ;;  %vm2952_vm4 = vcmask 7168  }
  0x1a   :  { %v743_v58 = vsel %vm720_vm3, %v696_v46, %v697_v49  ;;  %v723_v31 = vsel %vm720_vm3, %v716_v22, %v717_v23  ;;  %v64_v22 = vadd.s32 128, %v3239_v17 }
  0x1b   :  { %v839_v52 = vsel %vm817_vm2, %v794_v44, %v795_v45  ;;  %v840_v53 = vsel %vm817_vm2, %v793_v6, %v794_v44  ;;  %v895_v6 = vpack.c.bf16 %v725_v0, %v726_v1  ;;  %v896_v42 = vpack.c.bf16 %v723_v31, %v724_v32 }
  0x1c   :  { %v1202_v56 = vpack.c.bf16 %v839_v52, %v840_v53 }
  0x1d   :  { %3014 = vmatmul.msk.bf16.gmra.mxu1 %vm916_vm1, %v883_v47  ;;  %v903_v47 = vpack.c.bf16 %v665_v39, %v664_v3  ;;  %v796_v3 = vrot.slane %v667_v62, 1  ;;  %v810_v39 = vrot.slane %v3222_v9, 1 }
  0x26   :  { %2999 = vmatmul.msk.bf16.gmra.mxu0 %vm916_vm1, %v901_v54  ;;  %v3387_v54 = vsel %vm472_vm7, 1.0, %v3125_v27 }
  0x27   :  { %3011 = vmatmul.msk.bf16.gmra.mxu3 %vm916_vm1, %v913_v55  ;;  %5654 = vst [vmem:[#allocation7_spill] sm:$0xff] %v3387_v54  ;;  %v744_v55 = vsel %vm720_vm3, %v695_v19, %v696_v46  ;;  %v700_v46 = vrot.slane %v668_v63, 7 }
  0x28   :  { %v761_v57 = vmul.f32 %v3387_v54, %v744_v55  ;;  %v671_v55 = vld [vmem:[%s5595_s0 + $0x78] sm:$0xff] }
  0x29   :  { %3031 = vmatmul.msk.bf16.gmra.mxu2 %vm916_vm1, %v1200_v61  ;;  %v740_v53 = vsel %vm720_vm3, %v699_v12, %v700_v46  ;;  %v800_v60 = vrot.slane %v671_v55, 1 }
  0x2a   :  { %v886_v61 = vpack.c.bf16 %v743_v58, %v761_v57  ;;  %v672_v57 = vld [vmem:[%s5595_s0 + $0x80] sm:$0xff]  ;;  %v718_v58 = vrot.slane %v3336_v8, 7 }
  0x2c   :  { %v721_v62 = vsel %vm720_vm3, %v718_v58, %v719_v20 }
  0x2d   :  { %3015 = vmatmul.msk.bf16.gmra.mxu1 %vm916_vm1, %v884_v4  ;;  %v797_v4 = vrot.slane %v668_v63, 1 }
  0x2f   :  { %v837_v14 = vsel %vm817_vm2, %v796_v3, %v797_v4 }
  0x36   :  { %3000 = vmatmul.msk.bf16.gmra.mxu0 %vm916_vm1, %v902_v15  ;;  %v838_v15 = vsel %vm817_vm2, %v795_v45, %v796_v3  ;;  %v812_v3 = vrot.slane %v3280_v35, 1 }
  0x37   :  { %3012 = vmatmul.msk.bf16.gmra.mxu3 %vm916_vm1, %v914_v16  ;;  %v698_v16 = vrot.slane %v666_v40, 7  ;;  %v1203_v18 = vpack.c.bf16 %v837_v14, %v838_v15  ;;  %v811_v40 = vrot.slane %v3275_v34, 1  ;;  %v824_v34 = vsel %vm817_vm2, %v809_v38, %v810_v39 }
  0x38   :  { %v703_v14 = vrot.slane %v671_v55, 7  ;;  %v702_v15 = vrot.slane %v670_v30, 7 }
  0x39   :  { %3032 = vmatmul.msk.bf16.gmra.mxu2 %vm916_vm1, %v1201_v26  ;;  %v741_v19 = vsel %vm720_vm3, %v698_v16, %v699_v12  ;;  %v742_v21 = vsel %vm720_vm3, %v697_v49, %v698_v16  ;;  %v669_v26 = vld [vmem:[%s5595_s0 + $0x68] sm:$0xff]  ;;  %v823_v9 = vsel %vm817_vm2, %v810_v39, %v811_v40  ;;  %v822_v35 = vsel %vm817_vm2, %v811_v40, %v812_v3 }
  0x3a   :  { %v887_v25 = vpack.c.bf16 %v741_v19, %v742_v21  ;;  %v798_v33 = vrot.slane %v669_v26, 1  ;;  %v905_v41 = vpack.c.bf16 %v669_v26, %v668_v63  ;;  %v701_v43 = vrot.slane %v669_v26, 7  ;;  %v674_v26 = vld [vmem:[%s5595_s0 + $0x90] sm:$0xff] }
  0x3b   :  { %v1210_v49 = vpack.c.bf16 %v823_v9, %v824_v34  ;;  %v722_v63 = vsel %vm720_vm3, %v717_v23, %v718_v58  ;;  %v737_v19 = vsel %vm720_vm3, %v702_v15, %v703_v14  ;;  %v803_v32 = vrot.slane %v674_v26, 1  ;;  %v675_v58 = vld [vmem:[%s5595_s0 + $0x98] sm:$0xff] }
  0x3c   :  { %v836_v45 = vsel %vm817_vm2, %v797_v4, %v798_v33  ;;  %v739_v52 = vsel %vm720_vm3, %v700_v46, %v701_v43  ;;  %v813_v4 = vrot.slane %v3305_v50, 1  ;;  %v738_v21 = vsel %vm720_vm3, %v701_v43, %v702_v15 }
  0x3d   :  { %3016 = vmatmul.msk.bf16.gmra.mxu1 %vm916_vm1, %v885_v36  ;;  %v799_v36 = vrot.slane %v670_v30, 1  ;;  %v888_v59 = vpack.c.bf16 %v739_v52, %v740_v53  ;;  %v889_v23 = vpack.c.bf16 %v737_v19, %v738_v21  ;;  %v815_v39 = vrot.slane %v3336_v8, 1 }
  0x3e   :  { %v821_v16 = vsel %vm817_vm2, %v812_v3, %v813_v4  ;;  %v908_v3 = vpack.c.bf16 %v675_v58, %v674_v26 }
  0x3f   :  { %v835_v44 = vsel %vm817_vm2, %v798_v33, %v799_v36  ;;  %v834_v20 = vsel %vm817_vm2, %v799_v36, %v800_v60  ;;  %v704_v33 = vrot.slane %v672_v57, 7  ;;  %v814_v36 = vrot.slane %v3310_v51, 1 }
  0x41   :  { %v736_v46 = vsel %vm720_vm3, %v703_v14, %v704_v33  ;;  %v819_v51 = vsel %vm817_vm2, %v814_v36, %v815_v39 }
  0x46   :  { %3001 = vmatmul.msk.bf16.gmra.mxu0 %vm916_vm1, %v903_v47  ;;  %v63_v47 = vadd.s32 120, %v3239_v17 }
  0x47   :  { %3025 = vmatmul.msk.bf16.vlgmr.msrb.gmra.mxu3 %vm916_vm1, %v894_v48  ;;  %v1204_v48 = vpack.c.bf16 %v835_v44, %v836_v45 }
  0x49   :  { %3033 = vmatmul.msk.bf16.gmra.mxu2 %vm916_vm1, %v1202_v56  ;;  %v189_v56 = vand.u32 63, %v63_v47  ;;  %v820_v47 = vsel %vm817_vm2, %v813_v4, %v814_v36  ;;  %v79_v36 = vadd.s32 248, %v3239_v17 }
  0x4b   :  { %vm575_vm8 = vcmp.ne.s32.totalorder %v189_v56, 63 }
  0x4c   :  { %v3470_v0 = vsel %vm575_vm8, 1.0, %v3125_v27 }
  0x4d   :  { %3017 = vmatmul.msk.bf16.gmra.mxu1 %vm916_vm1, %v886_v61  ;;  %v801_v61 = vrot.slane %v672_v57, 1  ;;  %5655 = vst [vmem:[#allocation8_spill] sm:$0xff] %v3470_v0 }
  0x4f   :  { %v833_v1 = vsel %vm817_vm2, %v800_v60, %v801_v61 }
  0x50   :  { %v865_v12 = vmul.f32 %v3470_v0, %v833_v1 }
  0x52   :  { %v1205_v50 = vpack.c.bf16 %v865_v12, %v834_v20  ;;  %v706_v20 = vrot.slane %v674_v26, 7 }
  0x56   :  { %3002 = vmatmul.msk.bf16.gmra.mxu0 %vm916_vm1, %v904_v5  ;;  %v906_v5 = vpack.c.bf16 %v671_v55, %v670_v30  ;;  %v196_v30 = vand.u32 63, %v64_v22 }
  0x57   :  { %3026 = vmatmul.msk.bf16.gmra.mxu3 %vm916_vm1, %v895_v6  ;;  %v897_v6 = vpack.c.bf16 %v721_v62, %v722_v63  ;;  %v804_v62 = vrot.slane %v675_v58, 1 }
  0x58   :  { %vm480_vm9 = vcmp.ne.s32.totalorder %v196_v30, 0 }
  0x59   :  { %3034 = vmatmul.msk.bf16.gmra.mxu2 %vm916_vm1, %v1203_v18  ;;  %v1211_v18 = vpack.c.bf16 %v821_v16, %v822_v35  ;;  %v3505_v45 = vsel %vm480_vm9, 1.0, %v3125_v27  ;;  %v830_v14 = vsel %vm817_vm2, %v803_v32, %v804_v62 }
  0x5a   :  { %5656 = vst [vmem:[#allocation9_spill] sm:$0xff] %v3505_v45  ;;  %v769_v34 = vmul.f32 %v3505_v45, %v736_v46 }
  0x5d   :  { %3018 = vmatmul.msk.bf16.gmra.mxu1 %vm916_vm1, %v887_v25  ;;  %v673_v25 = vld [vmem:[%s5595_s0 + $0x88] sm:$0xff] }
  0x5e   :  { %v802_v31 = vrot.slane %v673_v25, 1  ;;  %v907_v40 = vpack.c.bf16 %v673_v25, %v672_v57 }
  0x60   :  { %v831_v43 = vsel %vm817_vm2, %v802_v31, %v803_v32  ;;  %v832_v44 = vsel %vm817_vm2, %v801_v61, %v802_v31 }
  0x61   :  { %v1206_v9 = vpack.c.bf16 %v831_v43, %v832_v44 }
  0x66   :  { %3003 = vmatmul.msk.bf16.gmra.mxu0 %vm916_vm1, %v905_v41 }
  0x67   :  { %3027 = vmatmul.msk.bf16.gmra.mxu3 %vm916_vm1, %v896_v42  ;;  %v705_v42 = vrot.slane %v673_v25, 7  ;;  %v677_v25 = vld [vmem:[%s5595_s0 + $0xa8] sm:$0xff] }
  0x68   :  { %v806_v32 = vrot.slane %v677_v25, 1  ;;  %v709_v46 = vrot.slane %v677_v25, 7 }
  0x69   :  { %3035 = vmatmul.msk.bf16.gmra.mxu2 %vm916_vm1, %v1204_v48  ;;  %v1212_v48 = vpack.c.bf16 %v819_v51, %v820_v47  ;;  %v735_v52 = vsel %vm720_vm3, %v704_v33, %v705_v42 }
  0x6a   :  { %v890_v55 = vpack.c.bf16 %v735_v52, %v769_v34  ;;  %v71_v34 = vadd.s32 184, %v3239_v17 }
  0x6d   :  { %3019 = vmatmul.msk.bf16.gmra.mxu1 %vm916_vm1, %v888_v59  ;;  %v676_v59 = vld [vmem:[%s5595_s0 + $0xa0] sm:$0xff] }
  0x6e   :  { %v805_v63 = vrot.slane %v676_v59, 1  ;;  %v708_v47 = vrot.slane %v676_v59, 7 }
  0x70   :  { %v829_v12 = vsel %vm817_vm2, %v804_v62, %v805_v63  ;;  %v828_v51 = vsel %vm817_vm2, %v805_v63, %v806_v32 }
  0x71   :  { %v1207_v16 = vpack.c.bf16 %v829_v12, %v830_v14 }
  0x76   :  { %3004 = vmatmul.msk.bf16.gmra.mxu0 %vm916_vm1, %v906_v5 }
  0x77   :  { %3028 = vmatmul.msk.bf16.gmra.mxu3 %vm916_vm1, %v897_v6  ;;  %v707_v6 = vrot.slane %v675_v58, 7 }
  0x79   :  { %3036 = vmatmul.msk.bf16.gmra.mxu2 %vm916_vm1, %v1205_v50  ;;  %v733_v35 = vsel %vm720_vm3, %v706_v20, %v707_v6  ;;  %v734_v50 = vsel %vm720_vm3, %v705_v42, %v706_v20  ;;  %v732_v58 = vsel %vm720_vm3, %v707_v6, %v708_v47 }
  0x7a   :  { %v891_v22 = vpack.c.bf16 %v733_v35, %v734_v50 }
  0x7d   :  { %3020 = vmatmul.msk.bf16.gmra.mxu1 %vm916_vm1, %v889_v23 }
  0x83   :  { %v978_v41 = vpop.f32.mrf.mxu0 }
  0x86   :  { %3005 = vmatmul.msk.bf16.gmra.mxu0 %vm916_vm1, %v907_v40 }
  0x87   :  { %3041 = vmatmul.msk.bf16.vlgmr.msra.gmra.mxu3 %vm916_vm1, %v1210_v49 }
  0x89   :  { %3037 = vmatmul.msk.bf16.gmra.mxu2 %vm916_vm1, %v1206_v9  ;;  %v301_v9 = vand.u32 63, %v79_v36 }
  0x8a   :  { %v3520_v53 = vpop.f32.mrf.mxu3  ;;  %v1118_v56 = vpop.f32.mrf.mxu1 }
  0x8b   :  { %v3523_v49 = vpop.f32.mrf.mxu0  ;;  %v1119_v57 = vadd.f32 %v1118_v56, %v978_v41  ;;  %v909_v41 = vpack.c.bf16 %v677_v25, %v676_v59  ;;  %v816_v56 = vrot.slane %v3230_v11, 1  ;;  %vm591_vm10 = vcmp.ne.s32.totalorder %v301_v9, 63 }
  0x8c   :  { %v1275_v60 = vpop.f32.mrf.mxu2 }
  0x8d   :  { %v3531_v61 = vadd.f32 %v1275_v60, %v1119_v57  ;;  %3021 = vmatmul.msk.bf16.gmra.mxu1 %vm916_vm1, %v890_v55  ;;  %v731_v57 = vsel %vm720_vm3, %v708_v47, %v709_v46  ;;  %v245_v60 = vand.u32 63, %v71_v34  ;;  %v849_v11 = vsel %vm817_vm2, %v816_v56, %v785_v13 }
  0x8e   :  { %v892_v63 = vpack.c.bf16 %v731_v57, %v732_v58  ;;  %v818_v2 = vsel %vm817_vm2, %v815_v39, %v816_v56 }
  0x8f   :  { %vm583_vm11 = vcmp.ne.s32.totalorder %v245_v60, 63  ;;  %v1387_v54 = vsel %vm916_vm1, %v3531_v61, 0.0 }
  0x92   :  { %v3534_v1 = vpop.f32.mrf.mxu3  ;;  %v3536_v5 = vpop.f32.mrf.mxu1 }
  0x93   :  { %v983_v4 = vpop.f32.mrf.mxu0  ;;  %v1121_v10 = vadd.f32 %v3536_v5, %v3523_v49 }
  0x94   :  { %v3542_v15 = vpop.f32.mrf.mxu2 }
  0x96   :  { %3006 = vmatmul.msk.bf16.gmra.mxu0 %vm916_vm1, %v908_v3 }
  0x97   :  { %3042 = vmatmul.msk.bf16.gmra.mxu3 %vm916_vm1, %v1211_v18  ;;  %v678_v18 = vld [vmem:[%s5595_s0 + $0xb0] sm:$0xff] }
  0x98   :  { %v807_v33 = vrot.slane %v678_v18, 1  ;;  %v910_v50 = vpack.c.bf16 %v3352_v24, %v678_v18 }
  0x99   :  { %3038 = vmatmul.msk.bf16.gmra.mxu2 %vm916_vm1, %v1207_v16  ;;  %v3605_v16 = vsel %vm583_vm11, 1.0, %v3125_v27 }
  0x9a   :  { %v3550_v19 = vpop.f32.mrf.mxu3  ;;  %v1123_v23 = vpop.f32.mrf.mxu1  ;;  %v827_v43 = vsel %vm817_vm2, %v806_v32, %v807_v33  ;;  %5658 = vst [vmem:[#allocation11_spill] sm:$0xff] %v3605_v16 }
  0x9b   :  { %v3553_v21 = vpop.f32.mrf.mxu0  ;;  %v1124_v26 = vadd.f32 %v1123_v23, %v983_v4  ;;  %v1208_v55 = vpack.c.bf16 %v827_v43, %v828_v51  ;;  %v808_v4 = vrot.slane %v3352_v24, 1 }
  0x9c   :  { %v1280_v30 = vpop.f32.mrf.mxu2 }
  0x9d   :  { %v3561_v31 = vadd.f32 %v1280_v30, %v1124_v26  ;;  %3022 = vmatmul.msk.bf16.gmra.mxu1 %vm916_vm1, %v891_v22  ;;  %v825_v13 = vsel %vm817_vm2, %v808_v4, %v809_v38  ;;  %v826_v39 = vsel %vm817_vm2, %v807_v33, %v808_v4 }
  0x9e   :  { %v873_v25 = vmul.f32 %v3605_v16, %v825_v13 }
  0xa0   :  { %v1209_v7 = vpack.c.bf16 %v873_v25, %v826_v39 }
  0xa2   :  { %v3565_v40 = vpop.f32.mrf.mxu3  ;;  %v3569_v44 = vpop.f32.mrf.mxu1 }
  0xa3   :  { %v988_v42 = vpop.f32.mrf.mxu0 }
  0xa4   :  { %v3574_v52 = vpop.f32.mrf.mxu2 }
  0xa6   :  { %3007 = vmatmul.msk.bf16.gmra.mxu0 %vm916_vm1, %v909_v41 }
  0xa7   :  { %3043 = vmatmul.msk.bf16.gmra.mxu3 %vm916_vm1, %v1212_v48  ;;  %v3589_v48 = vsel %vm591_vm10, 1.0, %v3125_v27  ;;  %v710_v27 = vrot.slane %v678_v18, 7 }
  0xa8   :  { %5657 = vst [vmem:[#allocation10_spill] sm:$0xff] %v3589_v48  ;;  %v881_v14 = vmul.f32 %v3589_v48, %v849_v11 }
  0xa9   :  { %3039 = vmatmul.msk.bf16.gmra.mxu2 %vm916_vm1, %v1208_v55  ;;  %v729_v38 = vsel %vm720_vm3, %v710_v27, %v711_v29  ;;  %v730_v30 = vsel %vm720_vm3, %v709_v46, %v710_v27 }
  0xaa   :  { %v3583_v59 = vpop.f32.mrf.mxu3  ;;  %v1128_v3 = vpop.f32.mrf.mxu1  ;;  %v1213_v22 = vpack.c.bf16 %v881_v14, %v818_v2  ;;  %v893_v18 = vpack.c.bf16 %v729_v38, %v730_v30 }
  0xab   :  { %v3586_v62 = vpop.f32.mrf.mxu0  ;;  %v1129_v6 = vadd.f32 %v1128_v3, %v988_v42 }
  0xac   :  { %v1285_v12 = vpop.f32.mrf.mxu2 }
  0xad   :  { %v3597_v20 = vadd.f32 %v1285_v12, %v1129_v6  ;;  %3023 = vmatmul.msk.bf16.gmra.mxu1 %vm916_vm1, %v892_v63 }
  0xb2   :  { %v3611_v35 = vpop.f32.mrf.mxu3  ;;  %v3615_v8 = vpop.f32.mrf.mxu1 }
  0xb3   :  { %v993_v23 = vpop.f32.mrf.mxu0  ;;  %v1131_v49 = vadd.f32 %v3615_v8, %v3586_v62 }
  0xb4   :  { %v3619_v26 = vpop.f32.mrf.mxu2 }
  0xb6   :  { %3008 = vmatmul.msk.bf16.gmra.mxu0 %vm916_vm1, %v910_v50 }
  0xb7   :  { %3044 = vmatmul.msk.bf16.gmra.mxu3 %vm916_vm1, %v1213_v22 }
  0xb9   :  { %3040 = vmatmul.msk.bf16.gmra.mxu2 %vm916_vm1, %v1209_v7 }
  0xba   :  { %v1053_v32 = vpop.f32.mrf.mxu3  ;;  %v1133_v36 = vpop.f32.mrf.mxu1 }
  0xbb   :  { %v3630_v33 = vpop.f32.mrf.mxu0  ;;  %v1134_v41 = vadd.f32 %v1133_v36, %v993_v23 }
  0xbc   :  { %v1290_v42 = vpop.f32.mrf.mxu2 }
  0xbd   :  { %v3632_v43 = vadd.f32 %v1290_v42, %v1134_v41  ;;  %3024 = vmatmul.msk.bf16.gmra.mxu1 %vm916_vm1, %v893_v18 }
  0xc2   :  { %v3635_v24 = vpop.f32.mrf.mxu3  ;;  %v3637_v29 = vpop.f32.mrf.mxu1 }
  0xc3   :  { %v998_v51 = vpop.f32.mrf.mxu0 }
  0xc4   :  { %v3639_v47 = vpop.f32.mrf.mxu2 }
  0xca   :  { %v1178_v46 = vpop.f32.mrf.mxu3  ;;  %v1138_v55 = vpop.f32.mrf.mxu1 }
  0xcb   :  { %v3642_v9 = vadd.f32 %v1178_v46, %v3520_v53  ;;  %v3644_v34 = vpop.f32.mrf.mxu0  ;;  %v1139_v56 = vadd.f32 %v1138_v55, %v998_v51 }
  0xcc   :  { %v1295_v57 = vpop.f32.mrf.mxu2 }
  0xcd   :  { %v3646_v58 = vadd.f32 %v1295_v57, %v1139_v56 }
  0xd2   :  { %v3648_v60 = vpop.f32.mrf.mxu3  ;;  %v3650_v11 = vpop.f32.mrf.mxu1 }
  0xd3   :  { %v1003_v63 = vpop.f32.mrf.mxu0 }
  0xd4   :  { %v3652_v3 = vpop.f32.mrf.mxu2 }
  0xda   :  { %v1183_v4 = vpop.f32.mrf.mxu3  ;;  %v1143_v12 = vpop.f32.mrf.mxu1 }
  0xdb   :  { %v3655_v6 = vadd.f32 %v1183_v4, %v3550_v19  ;;  %v3657_v53 = vpop.f32.mrf.mxu0  ;;  %v1144_v14 = vadd.f32 %v1143_v12, %v1003_v63  ;;  %v1953_v4 = vld [vmem:[%s5599_s6] sm:$0xf] }
  0xdc   :  { %v1300_v2 = vpop.f32.mrf.mxu2  ;;  %v2267_v12 = vld [vmem:[%s5600_s8] sm:$0xf] }
  0xdd   :  { %v3659_v13 = vadd.f32 %v1300_v2, %v1144_v14  ;;  %v2317_v2 = vsel %vm965_vm0, %v2267_v12, 0 }
  0xde   :  { %2326 = vmatpush.bf16.msrb.mxu1 %v2317_v2  ;;  %v1126_v2 = vadd.f32 %v3569_v44, %v3553_v21  ;;  %v3737_v44 = vadd.f32 %v3619_v26, %v1131_v49  ;;  %v1141_v26 = vadd.f32 %v3650_v11, %v3644_v34 }
  0xe0   :  { %v3726_v45 = vadd.f32 %v3574_v52, %v1126_v2  ;;  %v1136_v52 = vadd.f32 %v3637_v29, %v3630_v33  ;;  %v1394_v2 = vsel %vm916_vm1, %v3597_v20, 0.0  ;;  %v1398_v33 = vsel %vm916_vm1, %v3632_v43, 0.0 }
  0xe2   :  { %v3661_v50 = vpop.f32.mrf.mxu3  ;;  %v3663_v23 = vpop.f32.mrf.mxu1  ;;  %5659 = vst [vmem:[#allocation12_spill] sm:$0xff] %v3726_v45  ;;  %v1392_v21 = vsel %vm916_vm1, %v3726_v45, 0.0 }
  0xe3   :  { %v1008_v22 = vpop.f32.mrf.mxu0 }
  0xe4   :  { %v3665_v25 = vpop.f32.mrf.mxu2 }
  0xea   :  { %v1188_v39 = vpop.f32.mrf.mxu3  ;;  %v1148_v7 = vpop.f32.mrf.mxu1 }
  0xeb   :  { %v3668_v27 = vadd.f32 %v1188_v39, %v3583_v59  ;;  %v3670_v19 = vpop.f32.mrf.mxu0  ;;  %v1149_v38 = vadd.f32 %v1148_v7, %v1008_v22 }
  0xec   :  { %v1305_v30 = vpop.f32.mrf.mxu2 }
  0xed   :  { %v3672_v18 = vadd.f32 %v1305_v30, %v1149_v38 }
  0xf2   :  { %v3674_v36 = vpop.f32.mrf.mxu3  ;;  %v3678_v42 = vpop.f32.mrf.mxu1 }
  0xf3   :  { %v3676_v41 = vpop.f32.mrf.mxu0 }
  0xf4   :  { %v3680_v51 = vpop.f32.mrf.mxu2 }
  0xfa   :  { %v1193_v46 = vpop.f32.mrf.mxu3  ;;  %v3686_v56 = vpop.f32.mrf.mxu1 }
  0xfb   :  { %v3682_v55 = vadd.f32 %v1193_v46, %v1053_v32  ;;  %v3684_v59 = vpop.f32.mrf.mxu0  ;;  %v2160_v32 = vsel %vm965_vm0, %v1953_v4, 0 }
  0xfc   :  { %v3688_v57 = vpop.f32.mrf.mxu2  ;;  %2169 = vmatpush.bf16.msrb.mxu0 %v2160_v32  ;;  %v3719_v32 = vadd.f32 %v3542_v15, %v1121_v10  ;;  %v1390_v10 = vsel %vm916_vm1, %v3561_v31, 0.0 }
  0xfe   :  { %v1388_v16 = vsel %vm916_vm1, %v3719_v32, 0.0 }
  0xff   :  { %v1389_v15 = vadd.f32 %v1388_v16, %v1387_v54  ;;  %v1396_v54 = vsel %vm916_vm1, %v3737_v44, 0.0  ;;  %v3748_v16 = vadd.f32 %v3639_v47, %v1136_v52  ;;  %v1146_v47 = vadd.f32 %v3663_v23, %v3657_v53 }
 0x100   :  { %v1406_v53 = vsel %vm916_vm1, %v3659_v13, 0.0  ;;  %v1154_v23 = vadd.f32 %v3686_v56, %v3676_v41 }
 0x101   :  { %v1391_v62 = vadd.f32 %v1390_v10, %v1389_v15 }
 0x102   :  { %v3690_v63 = vpop.f32.mrf.mxu3  ;;  %v1155_v22 = vpop.f32.mrf.mxu1 }
 0x103   :  { %v3698_v14 = vpop.f32.mrf.mxu0  ;;  %v1393_v17 = vadd.f32 %v1392_v21, %v1391_v62  ;;  %v1400_v21 = vsel %vm916_vm1, %v3748_v16, 0.0  ;;  %v3757_v62 = vadd.f32 %v3652_v3, %v1141_v26  ;;  %v1151_v3 = vadd.f32 %v3678_v42, %v3670_v19 }
 0x104   :  { %v3702_v39 = vpop.f32.mrf.mxu2  ;;  %v1410_v42 = vsel %vm916_vm1, %v3672_v18, 0.0 }
 0x105   :  { %v1395_v49 = vadd.f32 %v1394_v2, %v1393_v17  ;;  %v1402_v17 = vsel %vm916_vm1, %v3646_v58, 0.0  ;;  %v1404_v2 = vsel %vm916_vm1, %v3757_v62, 0.0 }
 0x107   :  { %v1397_v29 = vadd.f32 %v1396_v54, %v1395_v49  ;;  %v3768_v54 = vadd.f32 %v3665_v25, %v1146_v47  ;;  %v1156_v25 = vadd.f32 %v1155_v22, %v3684_v59 }
 0x109   :  { %v1399_v52 = vadd.f32 %v1398_v33, %v1397_v29 }
 0x10a   :  { %v1158_v38 = vpop.f32.mrf.mxu1  ;;  %v3706_v30 = vpop.f32.mrf.mxu3 }
 0x10b   :  { %v3704_v7 = vpop.f32.mrf.mxu0  ;;  %v1401_v34 = vadd.f32 %v1400_v21, %v1399_v52  ;;  %v1408_v21 = vsel %vm916_vm1, %v3768_v54, 0.0  ;;  %v3779_v52 = vadd.f32 %v3680_v51, %v1151_v3  ;;  %v1159_v41 = vadd.f32 %v1158_v38, %v3698_v14 }
 0x10c   :  { %v3708_v46 = vpop.f32.mrf.mxu2 }
 0x10d   :  { %v1403_v26 = vadd.f32 %v1402_v17, %v1401_v34  ;;  %v3785_v17 = vadd.f32 %v3688_v57, %v1154_v23  ;;  %v1412_v34 = vsel %vm916_vm1, %v3779_v52, 0.0  ;;  %v3797_v57 = vadd.f32 %v3708_v46, %v1159_v41 }
 0x10f   :  { %v1405_v33 = vadd.f32 %v1404_v2, %v1403_v26  ;;  %v3791_v2 = vadd.f32 %v3702_v39, %v1156_v25  ;;  %v1414_v26 = vsel %vm916_vm1, %v3785_v17, 0.0 }
 0x111   :  { %v1407_v47 = vadd.f32 %v1406_v53, %v1405_v33  ;;  %v1416_v23 = vsel %vm916_vm1, %v3791_v2, 0.0  ;;  %v1418_v33 = vsel %vm916_vm1, %v3797_v57, 0.0 }
 0x112   :  { %v1160_v4 = vpop.f32.mrf.mxu1  ;;  %v3714_v37 = vpop.f32.mrf.mxu3 }
 0x113   :  { %v3712_v48 = vpop.f32.mrf.mxu0  ;;  %v1409_v56 = vadd.f32 %v1408_v21, %v1407_v47  ;;  %v1161_v51 = vadd.f32 %v1160_v4, %v3704_v7 }
 0x114   :  { %v3716_v12 = vpop.f32.mrf.mxu2 }
 0x115   :  { %v1411_v59 = vadd.f32 %v1410_v42, %v1409_v56  ;;  %v3803_v39 = vadd.f32 %v3716_v12, %v1161_v51 }
 0x117   :  { %v1413_v38 = vadd.f32 %v1412_v34, %v1411_v59 }
 0x119   :  { %v1415_v4 = vadd.f32 %v1414_v26, %v1413_v38 }
 0x11a   :  { %v1163_v5 = vpop.f32.mrf.mxu1  ;;  %v3741_v8 = vpop.f32.mrf.mxu3 }
 0x11b   :  { %v1025_v0 = vpop.f32.mrf.mxu0  ;;  %v1164_v14 = vadd.f32 %v1163_v5, %v3712_v48  ;;  %v1417_v46 = vadd.f32 %v1416_v23, %v1415_v4  ;;  %v1420_v48 = vsel %vm916_vm1, %v3803_v39, 0.0 }
 0x11c   :  { %v1320_v28 = vpop.f32.mrf.mxu2 }
 0x11d   :  { %v3807_v21 = vadd.f32 %v1320_v28, %v1164_v14  ;;  %v1419_v41 = vadd.f32 %v1418_v33, %v1417_v46 }
 0x11f   :  { %v1421_v34 = vadd.f32 %v1420_v48, %v1419_v41 }
 0x122   :  { %v1165_v45 = vpop.f32.mrf.mxu1  ;;  %v3763_v11 = vpop.f32.mrf.mxu3 }
 0x123   :  { %v1028_v10 = vpop.f32.mrf.mxu0  ;;  %v1166_v7 = vadd.f32 %v1165_v45, %v1025_v0  ;;  %v1422_v0 = vsel %vm916_vm1, %v3807_v21, 0.0 }
 0x124   :  { %v1322_v15 = vpop.f32.mrf.mxu2  ;;  %v1423_v59 = vadd.f32 %v1422_v0, %v1421_v34  ;;  %v1186_v0 = vadd.f32 %v3661_v50, %v3565_v40  ;;  %v1191_v34 = vadd.f32 %v3674_v36, %v3611_v35 }
 0x125   :  { %v3811_v5 = vadd.f32 %v1322_v15, %v1166_v7 }
 0x12a   :  { %v1168_v49 = vpop.f32.mrf.mxu1  ;;  %v1345_v22 = vpop.f32.mrf.mxu3 }
 0x12b   :  { %v1030_v19 = vpop.f32.mrf.mxu0  ;;  %v1169_v25 = vadd.f32 %v1168_v49, %v1028_v10  ;;  %v1424_v10 = vsel %vm916_vm1, %v3811_v5, 0.0  ;;  %v3854_v50 = vadd.f32 %v1345_v22, %v3668_v27 }
 0x12c   :  { %v1325_v29 = vpop.f32.mrf.mxu2 }
 0x12d   :  { %v3815_v45 = vadd.f32 %v1325_v29, %v1169_v25  ;;  %v3830_v25 = vadd.f32 %v3706_v30, %v3642_v9  ;;  %v1442_v35 = vsel %vm916_vm1, %v3854_v50, 0.0 }
 0x12f   :  { %v1426_v15 = vsel %vm916_vm1, %v3815_v45, 0.0 }
 0x132   :  { %v1170_v3 = vpop.f32.mrf.mxu1  ;;  %v1347_v28 = vpop.f32.mrf.mxu3 }
 0x133   :  { %v1033_v47 = vpop.f32.mrf.mxu0  ;;  %v1171_v42 = vadd.f32 %v1170_v3, %v1030_v19  ;;  %v1425_v3 = vadd.f32 %v1424_v10, %v1423_v59  ;;  %v1384_v10 = vadd.f32 %v1347_v28, %v1191_v34 }
 0x134   :  { %v1327_v53 = vpop.f32.mrf.mxu2 }
 0x135   :  { %v3819_v49 = vadd.f32 %v1327_v53, %v1171_v42  ;;  %v1427_v29 = vadd.f32 %v1426_v15, %v1425_v3  ;;  %v1181_v53 = vadd.f32 %v3648_v60, %v3534_v1  ;;  %v3842_v1 = vadd.f32 %v3741_v8, %v3655_v6 }
 0x136   :  { %v1196_v15 = vadd.f32 %v3690_v63, %v3635_v24  ;;  %v1444_v22 = vsel %vm916_vm1, %v1384_v10, 0.0 }
 0x137   :  { %v1428_v26 = vsel %vm916_vm1, %v3819_v49, 0.0  ;;  %v3833_v42 = vadd.f32 %v3714_v37, %v1181_v53  ;;  %v3847_v37 = vadd.f32 %v3763_v11, %v1186_v0  ;;  %v1438_v40 = vsel %vm916_vm1, %v3842_v1, 0.0 }
 0x138   :  { %v1429_v4 = vadd.f32 %v1428_v26, %v1427_v29 }
 0x139   :  { %v1436_v60 = vsel %vm916_vm1, %v3833_v42, 0.0  ;;  %v1440_v8 = vsel %vm916_vm1, %v3847_v37, 0.0 }
 0x13a   :  { %v1173_v56 = vpop.f32.mrf.mxu1 }
 0x13b   :  { %v1174_v12 = vadd.f32 %v1173_v56, %v1033_v47  ;;  %v1035_v14 = vpop.f32.mrf.mxu0  ;;  %v1350_v47 = vpop.f32.mrf.mxu3 }
 0x13c   :  { %v1330_v51 = vpop.f32.mrf.mxu2  ;;  %v1385_v36 = vadd.f32 %v1350_v47, %v3682_v55 }
 0x13d   :  { %v1377_v19 = vadd.f32 %v1330_v51, %v1174_v12  ;;  %v1434_v12 = vsel %vm916_vm1, %v3830_v25, 0.0  ;;  %v3126_v51 = vmov 256.0  }
 0x13e   :  { %3119 = vrcp.f32 %v3126_v51 }
 0x13f   :  { %v1430_v23 = vsel %vm916_vm1, %v1377_v19, 0.0 }
 0x140   :  { %v1431_v48 = vadd.f32 %v1430_v23, %v1429_v4 }
 0x142   :  { %v1175_v38 = vpop.f32.mrf.mxu1 }
 0x143   :  { %v1176_v7 = vadd.f32 %v1175_v38, %v1035_v14  ;;  %v1352_v59 = vpop.f32.mrf.mxu3  ;;  %v1446_v14 = vsel %vm916_vm1, %v1385_v36, 0.0 }
 0x144   :  { %v1332_v33 = vpop.f32.mrf.mxu2  ;;  %v3120_v27 = vpop.eup %3119  ;;  %v1386_v26 = vadd.f32 %v1352_v59, %v1196_v15 }
 0x145   :  { %v1378_v46 = vadd.f32 %v1332_v33, %v1176_v7  ;;  %v1457_v28 = vmul.f32 256.0, %v3120_v27  ;;  %vm1461_vm12 = vweird.f32 %v3120_v27 }
 0x146   :  { %v1448_v23 = vsel %vm916_vm1, %v1386_v26, 0.0 }
 0x147   :  { %v1432_v41 = vsel %vm916_vm1, %v1378_v46, 0.0  ;;  %v1458_v24 = vsub.f32 1.0, %v1457_v28 }
 0x148   :  { %v1433_v56 = vadd.f32 %v1432_v41, %v1431_v48 }
 0x149   :  { %v1459_v53 = vmul.f32 %v3120_v27, %v1458_v24 }
 0x14a   :  { %v1435_v9 = vadd.f32 %v1434_v12, %v1433_v56 }
 0x14b   :  { %v1460_v47 = vadd.f32 %v3120_v27, %v1459_v53 }
 0x14c   :  { %v1437_v30 = vadd.f32 %v1436_v60, %v1435_v9 }
 0x14d   :  { %v3866_v56 = vsel %vm1461_vm12, %v3120_v27, %v1460_v47 }
 0x14e   :  { %v1439_v6 = vadd.f32 %v1438_v40, %v1437_v30  ;;  %5660 = vst [vmem:[#allocation13_spill] sm:$0xff] %v3866_v56 }
 0x150   :  { %v1441_v11 = vadd.f32 %v1440_v8, %v1439_v6 }
 0x152   :  { %v1443_v3 = vadd.f32 %v1442_v35, %v1441_v11 }
 0x154   :  { %v1445_v29 = vadd.f32 %v1444_v22, %v1443_v3 }
 0x156   :  { %v1447_v38 = vadd.f32 %v1446_v14, %v1445_v29 }
 0x158   :  { %v1449_v7 = vadd.f32 %v1448_v23, %v1447_v38 }
 0x15a   :  { %v1450_v4 = vrot.slane %v1449_v7, 4 }
 0x15c   :  { %v1451_v63 = vadd.f32 %v1450_v4, %v1449_v7 }
 0x15e   :  { %v1452_v33 = vrot.slane %v1451_v63, 2 }
 0x160   :  { %v1453_v48 = vadd.f32 %v1452_v33, %v1451_v63 }
 0x162   :  { %v1454_v55 = vrot.slane %v1453_v48, 1 }
 0x164   :  { %v1455_v41 = vadd.f32 %v1454_v55, %v1453_v48 }
 0x166   :  { %v3869_v0 = vmul.f32 %v3866_v56, %v1455_v41 }
 0x168   :  { %v3873_v12 = vsub.f32 %v3815_v45, %v3869_v0  ;;  %v3877_v9 = vsub.f32 %v3819_v49, %v3869_v0  ;;  %v3880_v60 = vsub.f32 %v1377_v19, %v3869_v0  ;;  %v3883_v30 = vsub.f32 %v1378_v46, %v3869_v0  ;;  %v5661_v46 = vld [vmem:[#allocation12_spill] sm:$0xff] }
 0x169   :  { %v3886_v34 = vsub.f32 %v1384_v10, %v3869_v0  ;;  %v3889_v40 = vsub.f32 %v1385_v36, %v3869_v0  ;;  %v3892_v51 = vsub.f32 %v1386_v26, %v3869_v0  ;;  %v3896_v45 = vsub.f32 %v3531_v61, %v3869_v0 }
 0x16a   :  { %v3900_v49 = vsub.f32 %v3719_v32, %v3869_v0  ;;  %v3904_v19 = vsub.f32 %v3561_v31, %v3869_v0  ;;  %v3908_v6 = vsub.f32 %v5661_v46, %v3869_v0  ;;  %v3916_v61 = vsub.f32 %v3597_v20, %v3869_v0 }
 0x16b   :  { %v1496_v8 = vmul.f32 %v3896_v45, %v3896_v45  ;;  %v3922_v31 = vsub.f32 %v3737_v44, %v3869_v0  ;;  %v3930_v36 = vsub.f32 %v3632_v43, %v3869_v0  ;;  %v3937_v44 = vsub.f32 %v3748_v16, %v3869_v0 }
 0x16c   :  { %v1497_v10 = vmul.f32 %v3900_v49, %v3900_v49  ;;  %v1498_v32 = vmul.f32 %v3904_v19, %v3904_v19  ;;  %v1499_v59 = vmul.f32 %v3908_v6, %v3908_v6  ;;  %v1500_v20 = vmul.f32 %v3916_v61, %v3916_v61 }
 0x16d   :  { %v1528_v11 = vsel %vm916_vm1, %v1496_v8, 0.0  ;;  %v1501_v22 = vmul.f32 %v3922_v31, %v3922_v31  ;;  %v3944_v43 = vsub.f32 %v3646_v58, %v3869_v0  ;;  %v1502_v14 = vmul.f32 %v3930_v36, %v3930_v36 }
 0x16e   :  { %v1529_v15 = vsel %vm916_vm1, %v1497_v10, 0.0  ;;  %v1531_v3 = vsel %vm916_vm1, %v1498_v32, 0.0  ;;  %v1533_v26 = vsel %vm916_vm1, %v1499_v59, 0.0  ;;  %v1535_v38 = vsel %vm916_vm1, %v1500_v20, 0.0 }
 0x16f   :  { %v1530_v35 = vadd.f32 %v1529_v15, %v1528_v11  ;;  %v3951_v16 = vsub.f32 %v3757_v62, %v3869_v0  ;;  %v1503_v23 = vmul.f32 %v3937_v44, %v3937_v44  ;;  %v1537_v7 = vsel %vm916_vm1, %v1501_v22, 0.0 }
 0x170   :  { %v3958_v58 = vsub.f32 %v3659_v13, %v3869_v0  ;;  %v1504_v24 = vmul.f32 %v3944_v43, %v3944_v43  ;;  %v1539_v63 = vsel %vm916_vm1, %v1502_v14, 0.0  ;;  %v3965_v62 = vsub.f32 %v3768_v54, %v3869_v0 }
 0x171   :  { %v1532_v27 = vadd.f32 %v1531_v3, %v1530_v35  ;;  %v1505_v53 = vmul.f32 %v3951_v16, %v3951_v16  ;;  %v1541_v48 = vsel %vm916_vm1, %v1503_v23, 0.0  ;;  %v3972_v13 = vsub.f32 %v3672_v18, %v3869_v0 }
 0x172   :  { %v1506_v47 = vmul.f32 %v3958_v58, %v3958_v58  ;;  %v1543_v41 = vsel %vm916_vm1, %v1504_v24, 0.0  ;;  %v3979_v54 = vsub.f32 %v3779_v52, %v3869_v0  ;;  %v1507_v8 = vmul.f32 %v3965_v62, %v3965_v62 }
 0x173   :  { %v1534_v29 = vadd.f32 %v1533_v26, %v1532_v27  ;;  %v1545_v10 = vsel %vm916_vm1, %v1505_v53, 0.0  ;;  %v3986_v18 = vsub.f32 %v3785_v17, %v3869_v0  ;;  %v1508_v59 = vmul.f32 %v3972_v13, %v3972_v13 }
 0x174   :  { %v1547_v11 = vsel %vm916_vm1, %v1506_v47, 0.0  ;;  %v3993_v52 = vsub.f32 %v3791_v2, %v3869_v0  ;;  %v1509_v35 = vmul.f32 %v3979_v54, %v3979_v54  ;;  %v1549_v20 = vsel %vm916_vm1, %v1507_v8, 0.0 }
 0x175   :  { %v1536_v28 = vadd.f32 %v1535_v38, %v1534_v29  ;;  %v4000_v17 = vsub.f32 %v3797_v57, %v3869_v0  ;;  %v1510_v27 = vmul.f32 %v3986_v18, %v3986_v18  ;;  %v1551_v22 = vsel %vm916_vm1, %v1508_v59, 0.0 }
 0x176   :  { %v4007_v2 = vsub.f32 %v3803_v39, %v3869_v0  ;;  %v1511_v29 = vmul.f32 %v3993_v52, %v3993_v52  ;;  %v1553_v14 = vsel %vm916_vm1, %v1509_v35, 0.0  ;;  %v4014_v57 = vsub.f32 %v3807_v21, %v3869_v0 }
 0x177   :  { %v1538_v4 = vadd.f32 %v1537_v7, %v1536_v28  ;;  %v1512_v28 = vmul.f32 %v4000_v17, %v4000_v17  ;;  %v1555_v23 = vsel %vm916_vm1, %v1510_v27, 0.0  ;;  %v4021_v39 = vsub.f32 %v3811_v5, %v3869_v0 }
 0x178   :  { %v1557_v24 = vsel %vm916_vm1, %v1511_v29, 0.0  ;;  %v1514_v21 = vmul.f32 %v4014_v57, %v4014_v57  ;;  %v1516_v5 = vmul.f32 %v3873_v12, %v3873_v12  ;;  %v1517_v8 = vmul.f32 %v3877_v9, %v3877_v9 }
 0x179   :  { %v1540_v33 = vadd.f32 %v1539_v63, %v1538_v4  ;;  %v1513_v4 = vmul.f32 %v4007_v2, %v4007_v2  ;;  %v4040_v59 = vsub.f32 %v3830_v25, %v3869_v0  ;;  %v4054_v25 = vsub.f32 %v3842_v1, %v3869_v0 }
 0x17a   :  { %v1569_v27 = vsel %vm916_vm1, %v1517_v8, 0.0  ;;  %v4068_v1 = vsub.f32 %v3854_v50, %v3869_v0  ;;  %v1525_v50 = vmul.f32 %v3886_v34, %v3886_v34 }
 0x17b   :  { %v1542_v55 = vadd.f32 %v1541_v48, %v1540_v33  ;;  %v1559_v33 = vsel %vm916_vm1, %v1512_v28, 0.0  ;;  %v1515_v48 = vmul.f32 %v4021_v39, %v4021_v39 }
 0x17c   :  { %v1585_v8 = vsel %vm916_vm1, %v1525_v50, 0.0 }
 0x17d   :  { %v1544_v46 = vadd.f32 %v1543_v41, %v1542_v55  ;;  %v1561_v55 = vsel %vm916_vm1, %v1513_v4, 0.0  ;;  %v1563_v41 = vsel %vm916_vm1, %v1514_v21, 0.0 }
 0x17f   :  { %v1546_v32 = vadd.f32 %v1545_v10, %v1544_v46  ;;  %v1565_v10 = vsel %vm916_vm1, %v1515_v48, 0.0 }
 0x181   :  { %v1548_v15 = vadd.f32 %v1547_v11, %v1546_v32  ;;  %v1518_v11 = vmul.f32 %v3880_v60, %v3880_v60 }
 0x183   :  { %v1550_v3 = vadd.f32 %v1549_v20, %v1548_v15  ;;  %v1567_v15 = vsel %vm916_vm1, %v1516_v5, 0.0  ;;  %v4047_v20 = vsub.f32 %v3833_v42, %v3869_v0  ;;  %v1571_v29 = vsel %vm916_vm1, %v1518_v11, 0.0 }
 0x184   :  { %v4061_v42 = vsub.f32 %v3847_v37, %v3869_v0 }
 0x185   :  { %v1552_v26 = vadd.f32 %v1551_v22, %v1550_v3  ;;  %v1519_v3 = vmul.f32 %v3883_v30, %v3883_v30 }
 0x186   :  { %v1523_v37 = vmul.f32 %v4061_v42, %v4061_v42 }
 0x187   :  { %v1554_v38 = vadd.f32 %v1553_v14, %v1552_v26  ;;  %v1520_v26 = vmul.f32 %v4040_v59, %v4040_v59  ;;  %v1573_v28 = vsel %vm916_vm1, %v1519_v3, 0.0 }
 0x188   :  { %v1581_v0 = vsel %vm916_vm1, %v1523_v37, 0.0 }
 0x189   :  { %v1556_v7 = vadd.f32 %v1555_v23, %v1554_v38  ;;  %v1521_v38 = vmul.f32 %v4047_v20, %v4047_v20  ;;  %v1575_v4 = vsel %vm916_vm1, %v1520_v26, 0.0 }
 0x18b   :  { %v1558_v63 = vadd.f32 %v1557_v24, %v1556_v7  ;;  %v1522_v7 = vmul.f32 %v4054_v25, %v4054_v25 }
 0x18d   :  { %v1560_v53 = vadd.f32 %v1559_v33, %v1558_v63  ;;  %v1577_v63 = vsel %vm916_vm1, %v1521_v38, 0.0  ;;  %v1524_v33 = vmul.f32 %v4068_v1, %v4068_v1 }
 0x18f   :  { %v1562_v47 = vadd.f32 %v1561_v55, %v1560_v53  ;;  %v1579_v53 = vsel %vm916_vm1, %v1522_v7, 0.0  ;;  %v1583_v5 = vsel %vm916_vm1, %v1524_v33, 0.0 }
 0x191   :  { %v1564_v46 = vadd.f32 %v1563_v41, %v1562_v47  ;;  %v1526_v47 = vmul.f32 %v3889_v40, %v3889_v40 }
 0x193   :  { %v1566_v32 = vadd.f32 %v1565_v10, %v1564_v46  ;;  %v1527_v46 = vmul.f32 %v3892_v51, %v3892_v51 }
 0x195   :  { %v1568_v35 = vadd.f32 %v1567_v15, %v1566_v32  ;;  %v1587_v32 = vsel %vm916_vm1, %v1526_v47, 0.0  ;;  %v1589_v15 = vsel %vm916_vm1, %v1527_v46, 0.0 }
 0x197   :  { %v1570_v22 = vadd.f32 %v1569_v27, %v1568_v35 }
 0x199   :  { %v1572_v14 = vadd.f32 %v1571_v29, %v1570_v22 }
 0x19b   :  { %v1574_v23 = vadd.f32 %v1573_v28, %v1572_v14 }
 0x19d   :  { %v1576_v24 = vadd.f32 %v1575_v4, %v1574_v23 }
 0x19f   :  { %v1578_v21 = vadd.f32 %v1577_v63, %v1576_v24 }
 0x1a1   :  { %v1580_v48 = vadd.f32 %v1579_v53, %v1578_v21  ;;  %v4094_v21 = vld [vmem:[%s5597_s4] ss:$0 sm:$0xff] }
 0x1a2   :  { %v4099_v53 = vld [vmem:[%s5598_s5] ss:$0 sm:$0xff] }
 0x1a3   :  { %v1582_v55 = vadd.f32 %v1581_v0, %v1580_v48 }
 0x1a5   :  { %v1584_v41 = vadd.f32 %v1583_v5, %v1582_v55 }
 0x1a7   :  { %v1586_v10 = vadd.f32 %v1585_v8, %v1584_v41 }
 0x1a9   :  { %v1588_v11 = vadd.f32 %v1587_v32, %v1586_v10 }
 0x1ab   :  { %v1590_v35 = vadd.f32 %v1589_v15, %v1588_v11 }
 0x1ad   :  { %v1591_v3 = vrot.slane %v1590_v35, 4 }
 0x1af   :  { %v1592_v27 = vadd.f32 %v1591_v3, %v1590_v35 }
 0x1b1   :  { %v1593_v22 = vrot.slane %v1592_v27, 2 }
 0x1b3   :  { %v1594_v26 = vadd.f32 %v1593_v22, %v1592_v27 }
 0x1b5   :  { %v1595_v29 = vrot.slane %v1594_v26, 1 }
 0x1b7   :  { %v1596_v14 = vadd.f32 %v1595_v29, %v1594_v26 }
 0x1b9   :  { %v1597_v38 = vmul.f32 %v1596_v14, %v3866_v56 }
 0x1bb   :  { %v1598_v28 = vadd.f32 1e-05, %v1597_v38 }
 0x1bd   :  { %3121 = vrsqrt.f32 %v1598_v28  ;;  %vm1605_vm14 = vweird.f32 %v1598_v28 }
 0x1c3   :  { %v3122_v23 = vpop.eup %3121 }
 0x1c4   :  { %v1600_v7 = vmul.f32 %v3122_v23, %v1598_v28  ;;  %vm1606_vm13 = vweird.f32 %v3122_v23 }
 0x1c5   :  { %vm1607_vm15 = vmor %vm1605_vm14, %vm1606_vm13 }
 0x1c6   :  { %v1601_v4 = vmul.f32 %v3122_v23, %v1600_v7 }
 0x1c8   :  { %v1602_v24 = vmul.f32 0.5, %v1601_v4 }
 0x1ca   :  { %v1603_v37 = vsub.f32 1.5, %v1602_v24 }
 0x1cc   :  { %v1604_v63 = vmul.f32 %v3122_v23, %v1603_v37 }
 0x1ce   :  { %v1608_v33 = vsel %vm1607_vm15, %v3122_v23, %v1604_v63 }
 0x1cf   :  { %v1632_v48 = vmul.f32 %v1608_v33, %v3883_v30  ;;  %v1609_v50 = vmul.f32 %v1608_v33, %v3896_v45  ;;  %v1610_v0 = vmul.f32 %v1608_v33, %v3900_v49  ;;  %v1611_v55 = vmul.f32 %v1608_v33, %v3904_v19 }
 0x1d0   :  { %v1612_v47 = vmul.f32 %v1608_v33, %v3908_v6  ;;  %v1613_v5 = vmul.f32 %v1608_v33, %v3916_v61  ;;  %v1614_v46 = vmul.f32 %v1608_v33, %v3922_v31  ;;  %v1615_v8 = vmul.f32 %v1608_v33, %v3930_v36 }
 0x1d1   :  { %v1668_v41 = vmul.f32 %v4094_v21, %v1632_v48  ;;  %v1616_v10 = vmul.f32 %v1608_v33, %v3937_v44  ;;  %v1617_v30 = vmul.f32 %v1608_v33, %v3944_v43  ;;  %v1618_v45 = vmul.f32 %v1608_v33, %v3951_v16 }
 0x1d2   :  { %v1619_v49 = vmul.f32 %v1608_v33, %v3958_v58  ;;  %v1620_v19 = vmul.f32 %v1608_v33, %v3965_v62  ;;  %v1621_v61 = vmul.f32 %v1608_v33, %v3972_v13  ;;  %v1622_v32 = vmul.f32 %v1608_v33, %v3979_v54 }
 0x1d3   :  { %v4116_v6 = vadd.f32 %v4099_v53, %v1668_v41  ;;  %v1623_v31 = vmul.f32 %v1608_v33, %v3986_v18  ;;  %v1624_v36 = vmul.f32 %v1608_v33, %v3993_v52  ;;  %v1625_v44 = vmul.f32 %v1608_v33, %v4000_v17 }
 0x1d4   :  { %v1626_v43 = vmul.f32 %v1608_v33, %v4007_v2  ;;  %v1627_v16 = vmul.f32 %v1608_v33, %v4014_v57  ;;  %v1628_v58 = vmul.f32 %v1608_v33, %v4021_v39  ;;  %v1629_v62 = vmul.f32 %v1608_v33, %v3873_v12 }
 0x1d5   :  { %v1630_v11 = vmul.f32 %v1608_v33, %v3877_v9  ;;  %v1631_v13 = vmul.f32 %v1608_v33, %v3880_v60  ;;  %v1633_v54 = vmul.f32 %v1608_v33, %v4040_v59  ;;  %v1634_v18 = vmul.f32 %v1608_v33, %v4047_v20 }
 0x1d6   :  { %v1635_v52 = vmul.f32 %v1608_v33, %v4054_v25  ;;  %v1636_v17 = vmul.f32 %v1608_v33, %v4061_v42  ;;  %v1637_v2 = vmul.f32 %v1608_v33, %v4068_v1  ;;  %v1638_v57 = vmul.f32 %v1608_v33, %v3886_v34 }
 0x1d7   :  { %v1639_v39 = vmul.f32 %v1608_v33, %v3889_v40  ;;  %v1640_v12 = vmul.f32 %v1608_v33, %v3892_v51  ;;  %v1645_v9 = vmul.f32 %v4094_v21, %v1609_v50  ;;  %v1646_v60 = vmul.f32 %v4094_v21, %v1610_v0 }
 0x1d8   :  { %v1647_v59 = vmul.f32 %v4094_v21, %v1611_v55  ;;  %v1648_v20 = vmul.f32 %v4094_v21, %v1612_v47  ;;  %v1649_v25 = vmul.f32 %v4094_v21, %v1613_v5  ;;  %v1650_v42 = vmul.f32 %v4094_v21, %v1614_v46 }
 0x1d9   :  { %v1651_v1 = vmul.f32 %v4094_v21, %v1615_v8  ;;  %v1652_v34 = vmul.f32 %v4094_v21, %v1616_v10  ;;  %v1654_v40 = vmul.f32 %v4094_v21, %v1618_v45  ;;  %v1655_v51 = vmul.f32 %v4094_v21, %v1619_v49 }
 0x1da   :  { %v1656_v15 = vmul.f32 %v4094_v21, %v1620_v19  ;;  %v1657_v35 = vmul.f32 %v4094_v21, %v1621_v61  ;;  %v1658_v3 = vmul.f32 %v4094_v21, %v1622_v32  ;;  %v1659_v27 = vmul.f32 %v4094_v21, %v1623_v31 }
 0x1db   :  { %v1660_v22 = vmul.f32 %v4094_v21, %v1624_v36  ;;  %v1661_v26 = vmul.f32 %v4094_v21, %v1625_v44  ;;  %v1662_v29 = vmul.f32 %v4094_v21, %v1626_v43  ;;  %v1663_v14 = vmul.f32 %v4094_v21, %v1627_v16 }
 0x1dc   :  { %v1664_v38 = vmul.f32 %v4094_v21, %v1628_v58  ;;  %v1665_v28 = vmul.f32 %v4094_v21, %v1629_v62  ;;  %v1666_v23 = vmul.f32 %v4094_v21, %v1630_v11  ;;  %v1667_v7 = vmul.f32 %v4094_v21, %v1631_v13 }
 0x1dd   :  { %v1669_v4 = vmul.f32 %v4094_v21, %v1633_v54  ;;  %v1670_v24 = vmul.f32 %v4094_v21, %v1634_v18  ;;  %v1671_v37 = vmul.f32 %v4094_v21, %v1635_v52  ;;  %v1672_v63 = vmul.f32 %v4094_v21, %v1636_v17 }
 0x1de   :  { %v1673_v33 = vmul.f32 %v4094_v21, %v1637_v2  ;;  %v1674_v48 = vmul.f32 %v4094_v21, %v1638_v57  ;;  %v1653_v50 = vmul.f32 %v4094_v21, %v1617_v30  ;;  %v1675_v0 = vmul.f32 %v4094_v21, %v1639_v39 }
 0x1df   :  { %v1676_v55 = vmul.f32 %v4094_v21, %v1640_v12  ;;  %v1681_v47 = vadd.f32 %v4099_v53, %v1645_v9  ;;  %v1682_v5 = vadd.f32 %v4099_v53, %v1646_v60  ;;  %v1683_v41 = vadd.f32 %v4099_v53, %v1647_v59 }
 0x1e0   :  { %v1684_v46 = vadd.f32 %v4099_v53, %v1648_v20  ;;  %v1685_v8 = vadd.f32 %v4099_v53, %v1649_v25  ;;  %v1686_v10 = vadd.f32 %v4099_v53, %v1650_v42  ;;  %v1687_v45 = vadd.f32 %v4099_v53, %v1651_v1 }
 0x1e1   :  { %v1688_v30 = vadd.f32 %v4099_v53, %v1652_v34  ;;  %v1690_v49 = vadd.f32 %v4099_v53, %v1654_v40  ;;  %v1691_v21 = vadd.f32 %v4099_v53, %v1655_v51  ;;  %v1692_v19 = vadd.f32 %v4099_v53, %v1656_v15 }
 0x1e2   :  { %v1693_v61 = vadd.f32 %v4099_v53, %v1657_v35  ;;  %v1694_v32 = vadd.f32 %v4099_v53, %v1658_v3  ;;  %v1695_v31 = vadd.f32 %v4099_v53, %v1659_v27  ;;  %v1696_v36 = vadd.f32 %v4099_v53, %v1660_v22 }
 0x1e3   :  { %v1697_v44 = vadd.f32 %v4099_v53, %v1661_v26  ;;  %v1698_v43 = vadd.f32 %v4099_v53, %v1662_v29  ;;  %v1699_v16 = vadd.f32 %v4099_v53, %v1663_v14  ;;  %v1700_v58 = vadd.f32 %v4099_v53, %v1664_v38 }
 0x1e4   :  { %v1701_v62 = vadd.f32 %v4099_v53, %v1665_v28  ;;  %v1702_v11 = vadd.f32 %v4099_v53, %v1666_v23  ;;  %v1703_v13 = vadd.f32 %v4099_v53, %v1667_v7  ;;  %v1705_v54 = vadd.f32 %v4099_v53, %v1669_v4 }
 0x1e5   :  { %v1706_v18 = vadd.f32 %v4099_v53, %v1670_v24  ;;  %v1707_v52 = vadd.f32 %v4099_v53, %v1671_v37  ;;  %v1708_v17 = vadd.f32 %v4099_v53, %v1672_v63  ;;  %v1709_v2 = vadd.f32 %v4099_v53, %v1673_v33  ;;  %v1970_v37 = vld [vmem:[%s5601_s7] sm:$0xf] }
 0x1e6   :  { %v1710_v57 = vadd.f32 %v4099_v53, %v1674_v48  ;;  %v1711_v39 = vadd.f32 %v4099_v53, %v1675_v0  ;;  %v1689_v12 = vadd.f32 %v4099_v53, %v1653_v50  ;;  %v4199_v9 = vmax.f32 %v4116_v6, 0.0 }
 0x1e7   :  { %v1712_v60 = vadd.f32 %v4099_v53, %v1676_v55  ;;  %v4202_v59 = vmax.f32 %v1681_v47, 0.0  ;;  %v4204_v20 = vmax.f32 %v1682_v5, 0.0  ;;  %v4206_v25 = vmax.f32 %v1683_v41, 0.0 }
 0x1e8   :  { %5662 = vst [vmem:[#allocation12_spill] sm:$0xff] %v4199_v9  ;;  %v4208_v42 = vmax.f32 %v1684_v46, 0.0  ;;  %v4210_v1 = vmax.f32 %v1685_v8, 0.0  ;;  %v4212_v34 = vmax.f32 %v1686_v10, 0.0  ;;  %v4214_v40 = vmax.f32 %v1687_v45, 0.0 }
 0x1e9   :  { %v4216_v51 = vmax.f32 %v1688_v30, 0.0  ;;  %v4218_v6 = vmax.f32 %v1689_v12, 0.0  ;;  %v4220_v15 = vmax.f32 %v1690_v49, 0.0  ;;  %v4222_v53 = vmax.f32 %v1691_v21, 0.0 }
 0x1ea   :  { %v4224_v35 = vmax.f32 %v1692_v19, 0.0  ;;  %v4226_v3 = vmax.f32 %v1693_v61, 0.0  ;;  %v4228_v27 = vmax.f32 %v1694_v32, 0.0  ;;  %v4230_v22 = vmax.f32 %v1695_v31, 0.0  ;;  %v5674_v32 = vld [vmem:[#allocation4_spill] sm:$0xff] }
 0x1eb   :  { %v4232_v26 = vmax.f32 %v1696_v36, 0.0  ;;  %v4234_v29 = vmax.f32 %v1697_v44, 0.0  ;;  %v4236_v14 = vmax.f32 %v1698_v43, 0.0  ;;  %v4238_v38 = vmax.f32 %v1699_v16, 0.0 }
 0x1ec   :  { %v4240_v28 = vmax.f32 %v1700_v58, 0.0  ;;  %v4242_v23 = vmax.f32 %v1701_v62, 0.0  ;;  %v4244_v7 = vmax.f32 %v1702_v11, 0.0  ;;  %v4246_v4 = vmax.f32 %v1703_v13, 0.0 }
 0x1ed   :  { %5663 = vst [vmem:[#allocation14_spill] sm:$0xff] %v4234_v29  ;;  %v4248_v24 = vmax.f32 %v1712_v60, 0.0  ;;  %v4253_v63 = vmax.f32 %v1705_v54, 0.0  ;;  %v1745_v33 = vrot.slane %v4202_v59, 7  ;;  %v5622_v48 = vrot.slane %v4202_v59, 1 }
 0x1ee   :  { %5664 = vst [vmem:[#allocation15_spill] sm:$0xff] %v4238_v38  ;;  %v1842_v50 = vrot.slane %v4204_v20, 1  ;;  %v4258_v0 = vmax.f32 %v1706_v18, 0.0  ;;  %v1746_v55 = vrot.slane %v4204_v20, 7  ;;  %v1843_v5 = vrot.slane %v4206_v25, 1 }
 0x1ef   :  { %5665 = vst [vmem:[#allocation16_spill] sm:$0xff] %v4240_v28  ;;  %v5621_v47 = vrot.slane %v4248_v24, 7  ;;  %v4263_v41 = vmax.f32 %v1707_v52, 0.0  ;;  %v1954_v46 = vpack.c.bf16 %v4204_v20, %v4202_v59  ;;  %v2020_v8 = vsel %vm965_vm0, %v1970_v37, 0 }
 0x1f0   :  { %5666 = vst [vmem:[#allocation17_spill] sm:$0xff] %v4242_v23  ;;  %v1903_v45 = vsel %vm817_vm2, %v5622_v48, %v1842_v50  ;;  %v4272_v30 = vmax.f32 %v1708_v17, 0.0  ;;  %v4274_v49 = vmax.f32 %v1709_v2, 0.0  ;;  %2029 = vmatpush.bf16.msrb.mxu3 %v2020_v8  ;;  %v1902_v21 = vsel %vm817_vm2, %v1842_v50, %v1843_v5 }
 0x1f1   :  { %5667 = vst [vmem:[#allocation18_spill] sm:$0xff] %v4244_v7  ;;  %v1808_v19 = vsel %vm720_vm3, %v5621_v47, %v1745_v33  ;;  %v2251_v61 = vpack.c.bf16 %v1902_v21, %v1903_v45  ;;  %v1844_v36 = vrot.slane %v4208_v42, 1  ;;  %v1845_v44 = vrot.slane %v4210_v1, 1 }
 0x1f2   :  { %5668 = vst [vmem:[#allocation19_spill] sm:$0xff] %v4246_v4  ;;  %v1809_v31 = vmul.f32 %v5674_v32, %v1808_v19  ;;  %v1807_v43 = vsel %vm720_vm3, %v1745_v33, %v1746_v55  ;;  %v1747_v16 = vrot.slane %v4206_v25, 7  ;;  %v1748_v58 = vrot.slane %v4208_v42, 7 }
 0x1f3   :  { %5669 = vst [vmem:[#allocation20_spill] sm:$0xff] %v4248_v24  ;;  %v1846_v62 = vrot.slane %v4212_v34, 1  ;;  %v4290_v11 = vmax.f32 %v1710_v57, 0.0  ;;  %v4292_v13 = vmax.f32 %v1711_v39, 0.0  ;;  %3045 = vmatmul.msk.bf16.vlgmr.msrb.gmra.mxu3 %vm916_vm1, %v1954_v46  ;;  %3077 = vmatmul.msk.bf16.vlgmr.msrb.gmra.mxu1 %vm916_vm1, %v2251_v61  ;;  %v5620_v18 = vrot.slane %v4214_v40, 1 }
 0x1f4   :  { %5670 = vst [vmem:[#allocation21_spill] sm:$0xff] %v4253_v63  ;;  %v1937_v54 = vpack.c.bf16 %v1807_v43, %v1809_v31  ;;  %v5623_v52 = vrot.slane %v4218_v6, 1  ;;  %v1857_v17 = vrot.slane %v4234_v29, 1  ;;  %v1900_v2 = vsel %vm817_vm2, %v1844_v36, %v1845_v44 }
 0x1f5   :  { %5671 = vst [vmem:[#allocation22_spill] sm:$0xff] %v4258_v0  ;;  %v1901_v57 = vsel %vm817_vm2, %v1843_v5, %v1844_v36  ;;  %v1749_v39 = vrot.slane %v4210_v1, 7  ;;  %v5618_v12 = vrot.slane %v4212_v34, 7  ;;  %v4308_v60 = vsel %vm720_vm3, %v1747_v16, %v1748_v58 }
 0x1f6   :  { %5673 = vst [vmem:[#allocation3_spill] sm:$0xff] %v4274_v49  ;;  %3061 = vmatmul.msk.bf16.vlgmr.msrb.gmra.mxu0 %vm916_vm1, %v1937_v54  ;;  %v1806_v20 = vsel %vm720_vm3, %v1746_v55, %v1747_v16  ;;  %v4316_v37 = vsel %vm817_vm2, %v1846_v62, %v5620_v18  ;;  %v4320_v33 = vsel %vm817_vm2, %v1845_v44, %v1846_v62  ;;  %v5619_v19 = vrot.slane %v4216_v51, 7 }
 0x1f7   :  { %5675 = vst [vmem:[#allocation4_spill] sm:$0xff] %v4290_v11  ;;  %v1955_v5 = vpack.c.bf16 %v4208_v42, %v4206_v25  ;;  %v2252_v8 = vpack.c.bf16 %v1900_v2, %v1901_v57  ;;  %v4333_v45 = vsel %vm720_vm3, %v1749_v39, %v5618_v12  ;;  %v4337_v21 = vsel %vm720_vm3, %v1748_v58, %v1749_v39 }
 0x1f8   :  { %5676 = vst [vmem:[#allocation23_spill] sm:$0xff] %v4292_v13  ;;  %v1938_v25 = vpack.c.bf16 %v4308_v60, %v1806_v20  ;;  %v1850_v61 = vrot.slane %v4220_v15, 1  ;;  %v1851_v32 = vrot.slane %v4222_v53, 1  ;;  %v1753_v36 = vrot.slane %v4218_v6, 7  ;;  %v5677_v20 = vld [vmem:[#allocation7_spill] sm:$0xff] }
 0x1f9   :  { %v1754_v44 = vrot.slane %v4220_v15, 7  ;;  %v1852_v54 = vrot.slane %v4224_v35, 1  ;;  %v1853_v60 = vrot.slane %v4226_v3, 1  ;;  %v1755_v2 = vrot.slane %v4222_v53, 7 }
 0x1fa   :  { %v4354_v58 = vsel %vm817_vm2, %v1850_v61, %v1851_v32  ;;  %v4360_v62 = vsel %vm817_vm2, %v5623_v52, %v1850_v61  ;;  %v1800_v39 = vsel %vm720_vm3, %v5619_v19, %v1753_v36  ;;  %v1756_v55 = vrot.slane %v4224_v35, 7 }
 0x1fb   :  { %v4367_v57 = vsel %vm720_vm3, %v1753_v36, %v1754_v44  ;;  %v4375_v43 = vmul.f32 %v5677_v20, %v1800_v39  ;;  %v4379_v61 = vsel %vm817_vm2, %v1851_v32, %v1852_v54  ;;  %v4385_v12 = vsel %vm817_vm2, %v1852_v54, %v1853_v60 }
 0x1fc   :  { %v1854_v19 = vrot.slane %v4228_v27, 1  ;;  %v1855_v39 = vrot.slane %v4230_v22, 1  ;;  %v4397_v18 = vsel %vm720_vm3, %v1755_v2, %v1756_v55  ;;  %v4401_v54 = vsel %vm720_vm3, %v1754_v44, %v1755_v2 }
 0x1fd   :  { %v1757_v32 = vrot.slane %v4226_v3, 7  ;;  %v1758_v31 = vrot.slane %v4228_v27, 7  ;;  %v1856_v2 = vrot.slane %v4232_v26, 1  ;;  %v1759_v52 = vrot.slane %v4230_v22, 7 }
 0x1fe   :  { %v4407_v47 = vsel %vm817_vm2, %v1854_v19, %v1855_v39  ;;  %v4411_v20 = vsel %vm817_vm2, %v1853_v60, %v1854_v19  ;;  %v1760_v19 = vrot.slane %v4232_v26, 7  ;;  %v1858_v16 = vrot.slane %v4236_v14, 1  ;;  %v5678_v60 = vld [vmem:[#allocation8_spill] sm:$0xff] }
 0x1ff   :  { %v4422_v36 = vsel %vm720_vm3, %v1756_v55, %v1757_v32  ;;  %v4432_v44 = vsel %vm720_vm3, %v1757_v32, %v1758_v31  ;;  %v1888_v55 = vsel %vm817_vm2, %v1856_v2, %v1857_v17  ;;  %v4440_v48 = vsel %vm817_vm2, %v1855_v39, %v1856_v2 }
 0x200   :  { %v4450_v32 = vsel %vm720_vm3, %v1759_v52, %v1760_v19  ;;  %v4454_v42 = vsel %vm720_vm3, %v1758_v31, %v1759_v52  ;;  %v1859_v2 = vrot.slane %v4238_v38, 1  ;;  %v1762_v52 = vrot.slane %v4236_v14, 7 }
 0x201   :  { %v1860_v31 = vrot.slane %v4240_v28, 1  ;;  %v1861_v46 = vrot.slane %v4242_v23, 1  ;;  %v1763_v50 = vrot.slane %v4238_v38, 7  ;;  %v1764_v38 = vrot.slane %v4240_v28, 7 }
 0x202   :  { %v4475_v39 = vsel %vm817_vm2, %v1858_v16, %v1859_v2  ;;  %v5714_v10 = vpack.c.bf16 %v4228_v27, %v4226_v3  ;;  %v5719_v27 = vpack.c.bf16 %v4450_v32, %v4454_v42  ;;  %v5725_v32 = vld [vmem:[#allocation16_spill] sm:$0xff] }
 0x203   :  { %3046 = vmatmul.msk.bf16.gmra.mxu3 %vm916_vm1, %v1955_v5  ;;  %3078 = vmatmul.msk.bf16.gmra.mxu1 %vm916_vm1, %v2252_v8  ;;  %v4446_v8 = vmul.f32 %v5678_v60, %v1888_v55  ;;  %v4464_v60 = vsel %vm817_vm2, %v1857_v17, %v1858_v16  ;;  %v1761_v55 = vrot.slane %v4234_v29, 7  ;;  %v4492_v16 = vsel %vm817_vm2, %v1859_v2, %v1860_v31 }
 0x204   :  { %5679 = vst [vmem:[#allocation7_spill] sm:$0xff] %v4464_v60  ;;  %v4501_v5 = vsel %vm720_vm3, %v1762_v52, %v1763_v50  ;;  %v4513_v28 = vsel %vm720_vm3, %v1763_v50, %v1764_v38  ;;  %v1766_v60 = vrot.slane %v4244_v7, 7  ;;  %v1864_v50 = vrot.slane %v4199_v9, 1 }
 0x205   :  { %v1792_v17 = vsel %vm720_vm3, %v1760_v19, %v1761_v55  ;;  %v4485_v56 = vsel %vm720_vm3, %v1761_v55, %v1762_v52  ;;  %5681 = vst [vmem:[#allocation8_spill] sm:$0xff] %v4492_v16  ;;  %v4496_v19 = vsel %vm817_vm2, %v1860_v31, %v1861_v46  ;;  %v1863_v31 = vrot.slane %v4246_v4, 1 }
 0x206   :  { %3062 = vmatmul.msk.bf16.gmra.mxu0 %vm916_vm1, %v1938_v25  ;;  %v5680_v25 = vld [vmem:[#allocation9_spill] sm:$0xff]  ;;  %5683 = vst [vmem:[#allocation24_spill] sm:$0xff] %v4513_v28  ;;  %v1765_v52 = vrot.slane %v4242_v23, 7  ;;  %v5718_v3 = vpack.c.bf16 %v4446_v8, %v4440_v48 }
 0x207   :  { %v4488_v29 = vmul.f32 %v5680_v25, %v1792_v17  ;;  %5682 = vst [vmem:[#allocation9_spill] sm:$0xff] %v4501_v5  ;;  %v1862_v17 = vrot.slane %v4244_v7, 1  ;;  %v1767_v25 = vrot.slane %v4246_v4, 7  ;;  %v4549_v23 = vsel %vm817_vm2, %v1863_v31, %v1864_v50 }
 0x208   :  { %v4534_v7 = vsel %vm720_vm3, %v1765_v52, %v1766_v60  ;;  %v4538_v55 = vsel %vm720_vm3, %v1764_v38, %v1765_v52  ;;  %v1866_v5 = vrot.slane %v4258_v0, 1  ;;  %v5689_v52 = vrot.slane %v4253_v63, 1 }
 0x209   :  { %v4523_v2 = vsel %vm817_vm2, %v1862_v17, %v1863_v31  ;;  %v4527_v16 = vsel %vm817_vm2, %v1861_v46, %v1862_v17  ;;  %v5686_v46 = vrot.slane %v4253_v63, 1  ;;  %v4557_v38 = vsel %vm720_vm3, %v1766_v60, %v1767_v25 }
 0x20a   :  { %5684 = vst [vmem:[#allocation25_spill] sm:$0xff] %v4523_v2  ;;  %v5687_v2 = vld [vmem:[#allocation11_spill] sm:$0xff]  ;;  %v1867_v31 = vrot.slane %v4263_v41, 1  ;;  %v4577_v4 = vsel %vm817_vm2, %v5689_v52, %v1866_v5  ;;  %v5690_v52 = vpack.c.bf16 %v4212_v34, %v4210_v1  ;;  %v5724_v48 = vpack.c.bf16 %v4485_v56, %v4488_v29 }
 0x20b   :  { %5685 = vst [vmem:[#allocation26_spill] sm:$0xff] %v4527_v16  ;;  %v1880_v17 = vsel %vm817_vm2, %v1864_v50, %v5686_v46  ;;  %v1768_v16 = vrot.slane %v4199_v9, 7  ;;  %v1769_v50 = vrot.slane %v4253_v63, 7  ;;  %v5692_v63 = vld [vmem:[#allocation6_spill] sm:$0xff] }
 0x20c   :  { %v4553_v28 = vmul.f32 %v5687_v2, %v1880_v17  ;;  %5688 = vst [vmem:[#allocation11_spill] sm:$0xff] %v4557_v38  ;;  %v1770_v2 = vrot.slane %v4258_v0, 7  ;;  %v4583_v9 = vsel %vm817_vm2, %v1866_v5, %v1867_v31  ;;  %v1868_v17 = vrot.slane %v4272_v30, 1  ;;  %v5728_v56 = vld [vmem:[#allocation8_spill] sm:$0xff] }
 0x20d   :  { %v4564_v46 = vsel %vm720_vm3, %v1767_v25, %v1768_v16  ;;  %v1784_v60 = vsel %vm720_vm3, %v1768_v16, %v1769_v50  ;;  %v5691_v25 = vpack.c.bf16 %v4316_v37, %v4320_v33  ;;  %v1869_v16 = vrot.slane %v4274_v49, 1 }
 0x20e   :  { %v4587_v0 = vsel %vm720_vm3, %v1769_v50, %v1770_v2  ;;  %v4603_v38 = vmul.f32 %v5692_v63, %v1784_v60  ;;  %v1771_v50 = vrot.slane %v4263_v41, 7  ;;  %v4609_v1 = vsel %vm817_vm2, %v1867_v31, %v1868_v17 }
 0x20f   :  { %v1870_v33 = vrot.slane %v4290_v11, 1  ;;  %v4623_v60 = vsel %vm817_vm2, %v1868_v17, %v1869_v16  ;;  %v1871_v37 = vrot.slane %v4292_v13, 1  ;;  %v1773_v17 = vrot.slane %v4274_v49, 7 }
 0x210   :  { %v4627_v31 = vsel %vm720_vm3, %v1770_v2, %v1771_v50  ;;  %v1774_v63 = vrot.slane %v4290_v11, 7  ;;  %v1872_v49 = vrot.slane %v4248_v24, 1  ;;  %v5729_v29 = vpack.c.bf16 %v4496_v19, %v5728_v56  ;;  %v5733_v19 = vld [vmem:[#allocation18_spill] sm:$0xff] }
 0x211   :  { %5694 = vst [vmem:[#allocation6_spill] sm:$0xff] %v4627_v31  ;;  %v4645_v2 = vsel %vm817_vm2, %v1870_v33, %v1871_v37  ;;  %v5698_v31 = vrot.slane %v4218_v6, 1 }
 0x212   :  { %5696 = vst [vmem:[#allocation28_spill] sm:$0xff] %v4645_v2  ;;  %v4666_v5 = vsel %vm720_vm3, %v1773_v17, %v1774_v63  ;;  %v5701_v2 = vrot.slane %v4248_v24, 7  ;;  %v5705_v24 = vrot.slane %v4214_v40, 1 }
 0x213   :  { %3047 = vmatmul.msk.bf16.gmra.mxu3 %vm916_vm1, %v5690_v52  ;;  %3079 = vmatmul.msk.bf16.gmra.mxu1 %vm916_vm1, %v5691_v25  ;;  %v1772_v52 = vrot.slane %v4272_v30, 7  ;;  %v5693_v25 = vpack.c.bf16 %v4333_v45, %v4337_v21  ;;  %v4638_v21 = vsel %vm817_vm2, %v1869_v16, %v1870_v33  ;;  %v5699_v33 = vrot.slane %v4216_v51, 1 }
 0x214   :  { %5695 = vst [vmem:[#allocation27_spill] sm:$0xff] %v4638_v21 }
 0x215   :  { %v4634_v45 = vsel %vm720_vm3, %v1771_v50, %v1772_v52  ;;  %v4654_v16 = vsel %vm720_vm3, %v1772_v52, %v1773_v17  ;;  %v1896_v11 = vsel %vm817_vm2, %v5699_v33, %v5698_v31  ;;  %v4672_v52 = vsel %vm817_vm2, %v1871_v37, %v1872_v49  ;;  %v5702_v17 = vld [vmem:[#allocation10_spill] sm:$0xff] }
 0x216   :  { %3063 = vmatmul.msk.bf16.gmra.mxu0 %vm916_vm1, %v5693_v25  ;;  %5697 = vst [vmem:[#allocation29_spill] sm:$0xff] %v4654_v16  ;;  %v1775_v25 = vrot.slane %v4292_v13, 7  ;;  %v5700_v13 = vrot.slane %v4202_v59, 1  ;;  %v1751_v37 = vrot.slane %v4214_v40, 7  ;;  %v5703_v16 = vld [vmem:[#allocation5_spill] sm:$0xff] }
 0x218   :  { %v1904_v21 = vsel %vm817_vm2, %v1872_v49, %v5700_v13  ;;  %v4682_v31 = vsel %vm720_vm3, %v1775_v25, %v5701_v2  ;;  %v4689_v50 = vsel %vm720_vm3, %v1774_v63, %v1775_v25  ;;  %v1912_v49 = vmul.f32 %v5703_v16, %v1896_v11 }
 0x219   :  { %v4685_v33 = vmul.f32 %v5702_v17, %v1904_v21  ;;  %v5704_v2 = vrot.slane %v4216_v51, 1  ;;  %v5706_v63 = vrot.slane %v4216_v51, 7  ;;  %v5707_v17 = vrot.slane %v4212_v34, 7 }
 0x21a   :  { %v1957_v16 = vpack.c.bf16 %v4216_v51, %v4214_v40  ;;  %v5709_v34 = vpack.c.bf16 %v4354_v58, %v4360_v62  ;;  %v5710_v40 = vpack.c.bf16 %v4367_v57, %v4375_v43  ;;  %v5711_v51 = vpack.c.bf16 %v4224_v35, %v4222_v53  ;;  %v5720_v43 = vld [vmem:[#allocation14_spill] sm:$0xff] }
 0x21b   :  { %v1897_v21 = vsel %vm817_vm2, %v5705_v24, %v5704_v2  ;;  %v1801_v25 = vsel %vm720_vm3, %v1751_v37, %v5706_v63  ;;  %v1802_v11 = vsel %vm720_vm3, %v5707_v17, %v1751_v37  ;;  %v5708_v24 = vpack.c.bf16 %v4220_v15, %v4218_v6 }
 0x21c   :  { %v2254_v59 = vpack.c.bf16 %v1912_v49, %v1897_v21  ;;  %v1940_v13 = vpack.c.bf16 %v1801_v25, %v1802_v11  ;;  %v5712_v6 = vpack.c.bf16 %v4385_v12, %v4379_v61  ;;  %v5713_v15 = vpack.c.bf16 %v4397_v18, %v4401_v54  ;;  %v5731_v49 = vld [vmem:[#allocation9_spill] sm:$0xff] }
 0x21d   :  { %v5715_v53 = vpack.c.bf16 %v4407_v47, %v4411_v20  ;;  %v5716_v35 = vpack.c.bf16 %v4432_v44, %v4422_v36  ;;  %v5717_v18 = vpack.c.bf16 %v4232_v26, %v4230_v22  ;;  %v5721_v58 = vpack.c.bf16 %v4236_v14, %v5720_v43  ;;  %v5722_v22 = vld [vmem:[#allocation7_spill] sm:$0xff] }
 0x21e   :  { %v5723_v26 = vpack.c.bf16 %v4475_v39, %v5722_v22  ;;  %v5726_v39 = vld [vmem:[#allocation15_spill] sm:$0xff] }
 0x21f   :  { %v5727_v37 = vpack.c.bf16 %v5725_v32, %v5726_v39 }
 0x223   :  { %3048 = vmatmul.msk.bf16.gmra.mxu3 %vm916_vm1, %v1957_v16  ;;  %3080 = vmatmul.msk.bf16.gmra.mxu1 %vm916_vm1, %v2254_v59  ;;  %v5730_v59 = vld [vmem:[#allocation24_spill] sm:$0xff] }
 0x226   :  { %3064 = vmatmul.msk.bf16.gmra.mxu0 %vm916_vm1, %v1940_v13  ;;  %v5732_v13 = vpack.c.bf16 %v5730_v59, %v5731_v49 }
 0x233   :  { %3049 = vmatmul.msk.bf16.gmra.mxu3 %vm916_vm1, %v5708_v24  ;;  %3081 = vmatmul.msk.bf16.gmra.mxu1 %vm916_vm1, %v5709_v34 }
 0x236   :  { %3065 = vmatmul.msk.bf16.gmra.mxu0 %vm916_vm1, %v5710_v40 }
 0x243   :  { %3050 = vmatmul.msk.bf16.gmra.mxu3 %vm916_vm1, %v5711_v51  ;;  %3082 = vmatmul.msk.bf16.gmra.mxu1 %vm916_vm1, %v5712_v6  ;;  %v5734_v51 = vld [vmem:[#allocation17_spill] sm:$0xff] }
 0x244   :  { %v5735_v6 = vpack.c.bf16 %v5733_v19, %v5734_v51 }
 0x246   :  { %3066 = vmatmul.msk.bf16.gmra.mxu0 %vm916_vm1, %v5713_v15  ;;  %v5736_v15 = vld [vmem:[#allocation25_spill] sm:$0xff] }
 0x253   :  { %3051 = vmatmul.msk.bf16.gmra.mxu3 %vm916_vm1, %v5714_v10  ;;  %3083 = vmatmul.msk.bf16.gmra.mxu1 %vm916_vm1, %v5715_v53  ;;  %v5737_v10 = vld [vmem:[#allocation26_spill] sm:$0xff] }
 0x254   :  { %v5738_v53 = vpack.c.bf16 %v5736_v15, %v5737_v10 }
 0x256   :  { %3067 = vmatmul.msk.bf16.gmra.mxu0 %vm916_vm1, %v5716_v35  ;;  %v5739_v35 = vpack.c.bf16 %v4534_v7, %v4538_v55  ;;  %v5743_v7 = vpack.c.bf16 %v4553_v28, %v4549_v23  ;;  %v5744_v55 = vld [vmem:[#allocation11_spill] sm:$0xff]  ;;  %v5746_v28 = vld [vmem:[#allocation22_spill] sm:$0xff]  ;;  %v5747_v23 = vld [vmem:[#allocation21_spill] sm:$0xff] }
 0x257   :  { %v5748_v49 = vpack.c.bf16 %v5746_v28, %v5747_v23 }
 0x263   :  { %3052 = vmatmul.msk.bf16.gmra.mxu3 %vm916_vm1, %v5717_v18  ;;  %3084 = vmatmul.msk.bf16.gmra.mxu1 %vm916_vm1, %v5718_v3 }
 0x266   :  { %3068 = vmatmul.msk.bf16.gmra.mxu0 %vm916_vm1, %v5719_v27 }
 0x270   :  { %v2328_v47 = vpop.f32.mrf.mxu1 }
 0x273   :  { %v2171_v12 = vpop.f32.mrf.mxu0  ;;  %3053 = vmatmul.msk.bf16.gmra.mxu3 %vm916_vm1, %v5721_v58  ;;  %3085 = vmatmul.msk.bf16.gmra.mxu1 %vm916_vm1, %v5723_v26 }
 0x276   :  { %3069 = vmatmul.msk.bf16.gmra.mxu0 %vm916_vm1, %v5724_v48  ;;  %v2031_v42 = vpop.f32.mrf.mxu3 }
 0x277   :  { %v2172_v62 = vadd.f32 %v2171_v12, %v2031_v42  ;;  %v5740_v42 = vld [vmem:[#allocation12_spill] sm:$0xff] }
 0x278   :  { %v2330_v57 = vpop.f32.mrf.mxu1 }
 0x279   :  { %v4776_v61 = vadd.f32 %v2328_v47, %v2172_v62  ;;  %v5741_v62 = vld [vmem:[#allocation19_spill] sm:$0xff] }
 0x27b   :  { %v2173_v36 = vpop.f32.mrf.mxu0 }
 0x27e   :  { %v2033_v20 = vpop.f32.mrf.mxu3 }
 0x27f   :  { %v2174_v14 = vadd.f32 %v2173_v36, %v2033_v20  ;;  %v5745_v36 = vpack.c.bf16 %v4564_v46, %v5744_v55  ;;  %v5749_v46 = vpack.c.bf16 %v4583_v9, %v4577_v4  ;;  %v5751_v9 = vpack.c.bf16 %v4272_v30, %v4263_v41 }
 0x280   :  { %v2333_v54 = vpop.f32.mrf.mxu1  ;;  %v5752_v4 = vpack.c.bf16 %v4623_v60, %v4609_v1  ;;  %v5755_v1 = vld [vmem:[#allocation4_spill] sm:$0xff]  ;;  %v5756_v60 = vld [vmem:[#allocation3_spill] sm:$0xff] }
 0x281   :  { %v4778_v44 = vadd.f32 %v2330_v57, %v2174_v14  ;;  %v5742_v57 = vpack.c.bf16 %v5740_v42, %v5741_v62 }
 0x283   :  { %v2176_v8 = vpop.f32.mrf.mxu0  ;;  %3054 = vmatmul.msk.bf16.gmra.mxu3 %vm916_vm1, %v5727_v37  ;;  %3086 = vmatmul.msk.bf16.gmra.mxu1 %vm916_vm1, %v5729_v29 }
 0x286   :  { %3070 = vmatmul.msk.bf16.gmra.mxu0 %vm916_vm1, %v5732_v13  ;;  %v2036_v2 = vpop.f32.mrf.mxu3  ;;  %v5750_v13 = vpack.c.bf16 %v4587_v0, %v4603_v38  ;;  %v5753_v0 = vld [vmem:[#allocation6_spill] sm:$0xff] }
 0x287   :  { %v2177_v21 = vadd.f32 %v2176_v8, %v2036_v2  ;;  %v5754_v38 = vpack.c.bf16 %v4634_v45, %v5753_v0  ;;  %v5758_v45 = vld [vmem:[#allocation28_spill] sm:$0xff] }
 0x288   :  { %v2335_v63 = vpop.f32.mrf.mxu1 }
 0x289   :  { %v4792_v25 = vadd.f32 %v2333_v54, %v2177_v21 }
 0x28b   :  { %v2178_v17 = vpop.f32.mrf.mxu0 }
 0x28e   :  { %v2038_v11 = vpop.f32.mrf.mxu3 }
 0x28f   :  { %v2179_v16 = vadd.f32 %v2178_v17, %v2038_v11 }
 0x290   :  { %v2338_v24 = vpop.f32.mrf.mxu1 }
 0x291   :  { %v4794_v34 = vadd.f32 %v2335_v63, %v2179_v16 }
 0x293   :  { %v2181_v40 = vpop.f32.mrf.mxu0  ;;  %3055 = vmatmul.msk.bf16.gmra.mxu3 %vm916_vm1, %v5735_v6  ;;  %3087 = vmatmul.msk.bf16.gmra.mxu1 %vm916_vm1, %v5738_v53 }
 0x296   :  { %3071 = vmatmul.msk.bf16.gmra.mxu0 %vm916_vm1, %v5739_v35  ;;  %v2041_v18 = vpop.f32.mrf.mxu3 }
 0x297   :  { %v2182_v3 = vadd.f32 %v2181_v40, %v2041_v18 }
 0x298   :  { %v2340_v27 = vpop.f32.mrf.mxu1 }
 0x299   :  { %v4808_v47 = vadd.f32 %v2338_v24, %v2182_v3 }
 0x29b   :  { %v2183_v12 = vpop.f32.mrf.mxu0 }
 0x29e   :  { %v2043_v43 = vpop.f32.mrf.mxu3 }
 0x29f   :  { %v2184_v58 = vadd.f32 %v2183_v12, %v2043_v43  ;;  %v5757_v12 = vpack.c.bf16 %v5755_v1, %v5756_v60  ;;  %v5759_v43 = vld [vmem:[#allocation27_spill] sm:$0xff] }
 0x2a0   :  { %v2343_v22 = vpop.f32.mrf.mxu1  ;;  %v2807_v60 = vld [vmem:[%s5604_s11] sm:$0xf] }
 0x2a1   :  { %v4810_v26 = vadd.f32 %v2340_v27, %v2184_v58  ;;  %v5760_v58 = vpack.c.bf16 %v5758_v45, %v5759_v43 }
 0x2a3   :  { %v2186_v48 = vpop.f32.mrf.mxu0  ;;  %3056 = vmatmul.msk.bf16.gmra.mxu3 %vm916_vm1, %v5742_v57  ;;  %3088 = vmatmul.msk.bf16.gmra.mxu1 %vm916_vm1, %v5743_v7 }
 0x2a6   :  { %3072 = vmatmul.msk.bf16.gmra.mxu0 %vm916_vm1, %v5745_v36  ;;  %v2046_v20 = vpop.f32.mrf.mxu3 }
 0x2a7   :  { %v2187_v14 = vadd.f32 %v2186_v48, %v2046_v20 }
 0x2a8   :  { %v2345_v54 = vpop.f32.mrf.mxu1 }
 0x2a9   :  { %v4824_v8 = vadd.f32 %v2343_v22, %v2187_v14  ;;  %v5761_v22 = vld [vmem:[#allocation29_spill] sm:$0xff] }
 0x2aa   :  { %v5762_v48 = vpack.c.bf16 %v4666_v5, %v5761_v22  ;;  %v5766_v5 = vpack.c.bf16 %v4685_v33, %v4672_v52 }
 0x2ab   :  { %v2188_v32 = vpop.f32.mrf.mxu0 }
 0x2ae   :  { %v2048_v39 = vpop.f32.mrf.mxu3 }
 0x2af   :  { %v2189_v37 = vadd.f32 %v2188_v32, %v2048_v39  ;;  %v5763_v39 = vld [vmem:[#allocation20_spill] sm:$0xff] }
 0x2b0   :  { %v2348_v56 = vpop.f32.mrf.mxu1 }
 0x2b1   :  { %v4826_v29 = vadd.f32 %v2345_v54, %v2189_v37  ;;  %v5764_v37 = vld [vmem:[#allocation23_spill] sm:$0xff] }
 0x2b3   :  { %v2191_v59 = vpop.f32.mrf.mxu0  ;;  %3057 = vmatmul.msk.bf16.gmra.mxu3 %vm916_vm1, %v5748_v49  ;;  %3089 = vmatmul.msk.bf16.gmra.mxu1 %vm916_vm1, %v5749_v46 }
 0x2b6   :  { %3073 = vmatmul.msk.bf16.gmra.mxu0 %vm916_vm1, %v5750_v13  ;;  %v2051_v2 = vpop.f32.mrf.mxu3 }
 0x2b7   :  { %v2192_v21 = vadd.f32 %v2191_v59, %v2051_v2  ;;  %v5767_v59 = vpack.c.bf16 %v4682_v31, %v4689_v50 }
 0x2b8   :  { %v2350_v63 = vpop.f32.mrf.mxu1 }
 0x2b9   :  { %v4840_v17 = vadd.f32 %v2348_v56, %v2192_v21  ;;  %v5765_v56 = vpack.c.bf16 %v5763_v39, %v5764_v37  ;;  %v2441_v37 = vsel %vm916_vm1, %v4778_v44, 0.0 }
 0x2bb   :  { %v2193_v11 = vpop.f32.mrf.mxu0 }
 0x2be   :  { %v2053_v16 = vpop.f32.mrf.mxu3 }
 0x2bf   :  { %v2194_v24 = vadd.f32 %v2193_v11, %v2053_v16 }
 0x2c0   :  { %v2353_v40 = vpop.f32.mrf.mxu1 }
 0x2c1   :  { %v4842_v19 = vadd.f32 %v2350_v63, %v2194_v24 }
 0x2c3   :  { %v2196_v51 = vpop.f32.mrf.mxu0  ;;  %3058 = vmatmul.msk.bf16.gmra.mxu3 %vm916_vm1, %v5751_v9  ;;  %3090 = vmatmul.msk.bf16.gmra.mxu1 %vm916_vm1, %v5752_v4 }
 0x2c6   :  { %3074 = vmatmul.msk.bf16.gmra.mxu0 %vm916_vm1, %v5754_v38  ;;  %v2056_v6 = vpop.f32.mrf.mxu3 }
 0x2c7   :  { %v2197_v15 = vadd.f32 %v2196_v51, %v2056_v6 }
 0x2c8   :  { %v2355_v10 = vpop.f32.mrf.mxu1 }
 0x2c9   :  { %v4856_v53 = vadd.f32 %v2353_v40, %v2197_v15 }
 0x2cb   :  { %v2198_v35 = vpop.f32.mrf.mxu0 }
 0x2ce   :  { %v2058_v18 = vpop.f32.mrf.mxu3 }
 0x2cf   :  { %v2199_v41 = vadd.f32 %v2198_v35, %v2058_v18 }
 0x2d0   :  { %v2358_v30 = vpop.f32.mrf.mxu1 }
 0x2d1   :  { %v4858_v3 = vadd.f32 %v2355_v10, %v2199_v41 }
 0x2d3   :  { %v2201_v27 = vpop.f32.mrf.mxu0  ;;  %3059 = vmatmul.msk.bf16.gmra.mxu3 %vm916_vm1, %v5757_v12  ;;  %3091 = vmatmul.msk.bf16.gmra.mxu1 %vm916_vm1, %v5760_v58  ;;  %v2861_v12 = vsel %vm965_vm0, %v2807_v60, 0  ;;  %v2461_v60 = vsel %vm916_vm1, %v4858_v3, 0.0 }
 0x2d4   :  { %2870 = vmatpush.bf16.msrb.mxu2 %v2861_v12 }
 0x2d6   :  { %3075 = vmatmul.msk.bf16.gmra.mxu0 %vm916_vm1, %v5762_v48  ;;  %v2061_v42 = vpop.f32.mrf.mxu3 }
 0x2d7   :  { %v2202_v62 = vadd.f32 %v2201_v27, %v2061_v42 }
 0x2d8   :  { %v2360_v57 = vpop.f32.mrf.mxu1 }
 0x2d9   :  { %v4872_v7 = vadd.f32 %v2358_v30, %v2202_v62 }
 0x2db   :  { %v2203_v55 = vpop.f32.mrf.mxu0 }
 0x2de   :  { %v2063_v36 = vpop.f32.mrf.mxu3 }
 0x2df   :  { %v2204_v20 = vadd.f32 %v2203_v55, %v2063_v36 }
 0x2e0   :  { %v2363_v14 = vpop.f32.mrf.mxu1 }
 0x2e1   :  { %v4874_v54 = vadd.f32 %v2360_v57, %v2204_v20 }
 0x2e3   :  { %v2206_v32 = vpop.f32.mrf.mxu0  ;;  %3060 = vmatmul.msk.bf16.gmra.mxu3 %vm916_vm1, %v5765_v56  ;;  %3092 = vmatmul.msk.bf16.gmra.mxu1 %vm916_vm1, %v5766_v5  ;;  %v2440_v5 = vsel %vm916_vm1, %v4776_v61, 0.0 }
 0x2e6   :  { %3076 = vmatmul.msk.bf16.gmra.mxu0 %vm916_vm1, %v5767_v59  ;;  %v2066_v28 = vpop.f32.mrf.mxu3  ;;  %v2443_v59 = vsel %vm916_vm1, %v4792_v25, 0.0 }
 0x2e7   :  { %v2207_v23 = vadd.f32 %v2206_v32, %v2066_v28  ;;  %v2442_v28 = vadd.f32 %v2441_v37, %v2440_v5  ;;  %v2465_v5 = vsel %vm916_vm1, %v4874_v54, 0.0 }
 0x2e8   :  { %v2365_v49 = vpop.f32.mrf.mxu1 }
 0x2e9   :  { %v4888_v46 = vadd.f32 %v2363_v14, %v2207_v23 }
 0x2eb   :  { %v2208_v13 = vpop.f32.mrf.mxu0 }
 0x2ee   :  { %v2068_v2 = vpop.f32.mrf.mxu3 }
 0x2ef   :  { %v2209_v21 = vadd.f32 %v2208_v13, %v2068_v2  ;;  %v2444_v13 = vadd.f32 %v2443_v59, %v2442_v28 }
 0x2f0   :  { %v2368_v63 = vpop.f32.mrf.mxu1 }
 0x2f1   :  { %v4890_v11 = vadd.f32 %v2365_v49, %v2209_v21  ;;  %v2445_v49 = vsel %vm916_vm1, %v4794_v34, 0.0  ;;  %v2447_v21 = vsel %vm916_vm1, %v4808_v47, 0.0 }
 0x2f3   :  { %v2211_v16 = vpop.f32.mrf.mxu0 }
 0x2f6   :  { %v2071_v52 = vpop.f32.mrf.mxu3 }
 0x2f7   :  { %v2212_v33 = vadd.f32 %v2211_v16, %v2071_v52  ;;  %v2449_v16 = vsel %vm916_vm1, %v4810_v26, 0.0 }
 0x2f8   :  { %v2370_v24 = vpop.f32.mrf.mxu1 }
 0x2f9   :  { %v4892_v40 = vadd.f32 %v2368_v63, %v2212_v33  ;;  %v2446_v63 = vadd.f32 %v2445_v49, %v2444_v13  ;;  %v2467_v49 = vsel %vm916_vm1, %v4888_v46, 0.0 }
 0x2fb   :  { %v2213_v50 = vpop.f32.mrf.mxu0  ;;  %v2448_v52 = vadd.f32 %v2447_v21, %v2446_v63  ;;  %v2469_v21 = vsel %vm916_vm1, %v4890_v11, 0.0 }
 0x2fe   :  { %v2073_v31 = vpop.f32.mrf.mxu3 }
 0x2ff   :  { %v2214_v51 = vadd.f32 %v2213_v50, %v2073_v31  ;;  %v2450_v50 = vadd.f32 %v2449_v16, %v2448_v52 }
 0x300   :  { %v2373_v9 = vpop.f32.mrf.mxu1 }
 0x301   :  { %v4894_v4 = vadd.f32 %v2370_v24, %v2214_v51  ;;  %v2451_v24 = vsel %vm916_vm1, %v4824_v8, 0.0  ;;  %v2453_v51 = vsel %vm916_vm1, %v4826_v29, 0.0 }
 0x303   :  { %v2216_v0 = vpop.f32.mrf.mxu0 }
 0x306   :  { %v2076_v38 = vpop.f32.mrf.mxu3 }
 0x307   :  { %v2217_v6 = vadd.f32 %v2216_v0, %v2076_v38  ;;  %v2455_v38 = vsel %vm916_vm1, %v4840_v17, 0.0 }
 0x308   :  { %v2375_v15 = vpop.f32.mrf.mxu1 }
 0x309   :  { %v4896_v10 = vadd.f32 %v2373_v9, %v2217_v6  ;;  %v2452_v9 = vadd.f32 %v2451_v24, %v2450_v50  ;;  %v2471_v24 = vsel %vm916_vm1, %v4892_v40, 0.0 }
 0x30b   :  { %v2218_v35 = vpop.f32.mrf.mxu0  ;;  %v2454_v6 = vadd.f32 %v2453_v51, %v2452_v9  ;;  %v2473_v51 = vsel %vm916_vm1, %v4894_v4, 0.0 }
 0x30e   :  { %v2078_v18 = vpop.f32.mrf.mxu3 }
 0x30f   :  { %v2219_v41 = vadd.f32 %v2218_v35, %v2078_v18  ;;  %v2456_v35 = vadd.f32 %v2455_v38, %v2454_v6 }
 0x310   :  { %v2378_v30 = vpop.f32.mrf.mxu1 }
 0x311   :  { %v4898_v27 = vadd.f32 %v2375_v15, %v2219_v41  ;;  %v2457_v15 = vsel %vm916_vm1, %v4842_v19, 0.0  ;;  %v2459_v41 = vsel %vm916_vm1, %v4856_v53, 0.0 }
 0x313   :  { %v2221_v1 = vpop.f32.mrf.mxu0 }
 0x316   :  { %v2081_v45 = vpop.f32.mrf.mxu3 }
 0x317   :  { %v2222_v43 = vadd.f32 %v2221_v1, %v2081_v45 }
 0x318   :  { %v4904_v58 = vpop.f32.mrf.mxu1 }
 0x319   :  { %v4906_v22 = vadd.f32 %v2378_v30, %v2222_v43  ;;  %v2458_v30 = vadd.f32 %v2457_v15, %v2456_v35  ;;  %v2463_v43 = vsel %vm916_vm1, %v4872_v7, 0.0  ;;  %v2475_v15 = vsel %vm916_vm1, %v4896_v10, 0.0 }
 0x31b   :  { %v2223_v48 = vpop.f32.mrf.mxu0  ;;  %v2460_v12 = vadd.f32 %v2459_v41, %v2458_v30  ;;  %v2477_v30 = vsel %vm916_vm1, %v4898_v27, 0.0 }
 0x31d   :  { %v2462_v37 = vadd.f32 %v2461_v60, %v2460_v12 }
 0x31e   :  { %v2083_v42 = vpop.f32.mrf.mxu3 }
 0x31f   :  { %v2464_v59 = vadd.f32 %v2463_v43, %v2462_v37  ;;  %v2224_v9 = vadd.f32 %v2223_v48, %v2083_v42 }
 0x320   :  { %v4908_v62 = vpop.f32.mrf.mxu1 }
 0x321   :  { %v2466_v13 = vadd.f32 %v2465_v5, %v2464_v59  ;;  %v4957_v60 = vadd.f32 %v4904_v58, %v2224_v9  ;;  %v2479_v5 = vsel %vm916_vm1, %v4906_v22, 0.0 }
 0x323   :  { %v2226_v57 = vpop.f32.mrf.mxu0  ;;  %v2468_v63 = vadd.f32 %v2467_v49, %v2466_v13 }
 0x325   :  { %v2470_v50 = vadd.f32 %v2469_v21, %v2468_v63 }
 0x326   :  { %v2086_v55 = vpop.f32.mrf.mxu3 }
 0x327   :  { %v2472_v38 = vadd.f32 %v2471_v24, %v2470_v50  ;;  %v2227_v35 = vadd.f32 %v2226_v57, %v2086_v55  ;;  %v2481_v57 = vsel %vm916_vm1, %v4957_v60, 0.0 }
 0x328   :  { %v4910_v36 = vpop.f32.mrf.mxu1 }
 0x329   :  { %v2474_v41 = vadd.f32 %v2473_v51, %v2472_v38  ;;  %v4962_v48 = vadd.f32 %v4908_v62, %v2227_v35 }
 0x32b   :  { %v2228_v20 = vpop.f32.mrf.mxu0  ;;  %v2476_v43 = vadd.f32 %v2475_v15, %v2474_v41 }
 0x32d   :  { %v2478_v59 = vadd.f32 %v2477_v30, %v2476_v43 }
 0x32e   :  { %v2088_v14 = vpop.f32.mrf.mxu3 }
 0x32f   :  { %v2229_v12 = vadd.f32 %v2228_v20, %v2088_v14  ;;  %v2480_v13 = vadd.f32 %v2479_v5, %v2478_v59  ;;  %v2483_v14 = vsel %vm916_vm1, %v4962_v48, 0.0 }
 0x330   :  { %v4912_v32 = vpop.f32.mrf.mxu1 }
 0x331   :  { %v4967_v55 = vadd.f32 %v4910_v36, %v2229_v12  ;;  %v2482_v63 = vadd.f32 %v2481_v57, %v2480_v13 }
 0x333   :  { %v2231_v39 = vpop.f32.mrf.mxu0  ;;  %v2484_v36 = vadd.f32 %v2483_v14, %v2482_v63 }
 0x336   :  { %v2091_v56 = vpop.f32.mrf.mxu3 }
 0x337   :  { %v2232_v42 = vadd.f32 %v2231_v39, %v2091_v56  ;;  %v2485_v39 = vsel %vm916_vm1, %v4967_v55, 0.0 }
 0x338   :  { %v4920_v23 = vpop.f32.mrf.mxu1  ;;  %v2486_v9 = vadd.f32 %v2485_v39, %v2484_v36 }
 0x339   :  { %v4972_v21 = vadd.f32 %v4912_v32, %v2232_v42 }
 0x33b   :  { %v2233_v2 = vpop.f32.mrf.mxu0 }
 0x33e   :  { %v2093_v33 = vpop.f32.mrf.mxu3 }
 0x33f   :  { %v2234_v58 = vadd.f32 %v2233_v2, %v2093_v33  ;;  %v2487_v2 = vsel %vm916_vm1, %v4972_v21, 0.0 }
 0x340   :  { %v2393_v31 = vpop.f32.mrf.mxu1  ;;  %v2488_v38 = vadd.f32 %v2487_v2, %v2486_v9  ;;  %v5768_v2 = vld [vmem:[#allocation13_spill] sm:$0xff] }
 0x341   :  { %v4977_v56 = vadd.f32 %v4920_v23, %v2234_v58 }
 0x343   :  { %v2236_v0 = vpop.f32.mrf.mxu0  ;;  %v2489_v32 = vsel %vm916_vm1, %v4977_v56, 0.0 }
 0x344   :  { %v2490_v41 = vadd.f32 %v2489_v32, %v2488_v38 }
 0x346   :  { %v2096_v18 = vpop.f32.mrf.mxu3 }
 0x347   :  { %v2237_v62 = vadd.f32 %v2236_v0, %v2096_v18 }
 0x348   :  { %v2395_v1 = vpop.f32.mrf.mxu1 }
 0x349   :  { %v4981_v33 = vadd.f32 %v2393_v31, %v2237_v62 }
 0x34b   :  { %v2238_v45 = vpop.f32.mrf.mxu0 }
 0x34e   :  { %v2098_v28 = vpop.f32.mrf.mxu3 }
 0x34f   :  { %v2239_v24 = vadd.f32 %v2238_v45, %v2098_v28  ;;  %v2491_v45 = vsel %vm916_vm1, %v4981_v33, 0.0 }
 0x350   :  { %v2398_v16 = vpop.f32.mrf.mxu1 }
 0x351   :  { %v4985_v0 = vadd.f32 %v2395_v1, %v2239_v24 }
 0x353   :  { %v2241_v52 = vpop.f32.mrf.mxu0  ;;  %v2493_v31 = vsel %vm916_vm1, %v4985_v0, 0.0 }
 0x356   :  { %v2101_v6 = vpop.f32.mrf.mxu3 }
 0x357   :  { %v2242_v51 = vadd.f32 %v2241_v52, %v2101_v6  ;;  %v2492_v6 = vadd.f32 %v2491_v45, %v2490_v41 }
 0x358   :  { %v2400_v49 = vpop.f32.mrf.mxu1 }
 0x359   :  { %v4989_v28 = vadd.f32 %v2398_v16, %v2242_v51  ;;  %v2494_v12 = vadd.f32 %v2493_v31, %v2492_v6 }
 0x35b   :  { %v2243_v37 = vpop.f32.mrf.mxu0  ;;  %v2495_v1 = vsel %vm916_vm1, %v4989_v28, 0.0 }
 0x35c   :  { %v2496_v16 = vadd.f32 %v2495_v1, %v2494_v12 }
 0x35e   :  { %v2103_v20 = vpop.f32.mrf.mxu3 }
 0x35f   :  { %v2244_v18 = vadd.f32 %v2243_v37, %v2103_v20 }
 0x360   :  { %v2403_v15 = vpop.f32.mrf.mxu1 }
 0x361   :  { %v4993_v52 = vadd.f32 %v2400_v49, %v2244_v18 }
 0x363   :  { %v2246_v50 = vpop.f32.mrf.mxu0  ;;  %v2497_v37 = vsel %vm916_vm1, %v4993_v52, 0.0 }
 0x364   :  { %v2498_v57 = vadd.f32 %v2497_v37, %v2496_v16 }
 0x366   :  { %v2106_v23 = vpop.f32.mrf.mxu3 }
 0x367   :  { %v2247_v35 = vadd.f32 %v2246_v50, %v2106_v23 }
 0x368   :  { %v2405_v49 = vpop.f32.mrf.mxu1 }
 0x369   :  { %v4997_v30 = vadd.f32 %v2403_v15, %v2247_v35 }
 0x36b   :  { %v2248_v43 = vpop.f32.mrf.mxu0  ;;  %v2499_v42 = vsel %vm916_vm1, %v4997_v30, 0.0 }
 0x36c   :  { %v2500_v13 = vadd.f32 %v2499_v42, %v2498_v57 }
 0x36e   :  { %v2108_v5 = vpop.f32.mrf.mxu3 }
 0x36f   :  { %v2249_v59 = vadd.f32 %v2248_v43, %v2108_v5 }
 0x371   :  { %v5003_v58 = vadd.f32 %v2405_v49, %v2249_v59 }
 0x373   :  { %v2501_v20 = vsel %vm916_vm1, %v5003_v58, 0.0 }
 0x374   :  { %v2502_v14 = vadd.f32 %v2501_v20, %v2500_v13 }
 0x376   :  { %v2503_v62 = vrot.slane %v2502_v14, 4 }
 0x378   :  { %v2504_v63 = vadd.f32 %v2503_v62, %v2502_v14 }
 0x37a   :  { %v2505_v39 = vrot.slane %v2504_v63, 2 }
 0x37c   :  { %v2506_v24 = vadd.f32 %v2505_v39, %v2504_v63 }
 0x37e   :  { %v2507_v36 = vrot.slane %v2506_v24, 1 }
 0x380   :  { %v2508_v50 = vadd.f32 %v2507_v36, %v2506_v24 }
 0x382   :  { %v5008_v51 = vmul.f32 %v2508_v50, %v5768_v2 }
 0x384   :  { %v5012_v9 = vsub.f32 %v4776_v61, %v5008_v51  ;;  %v5016_v32 = vsub.f32 %v4778_v44, %v5008_v51  ;;  %v5020_v18 = vsub.f32 %v4792_v25, %v5008_v51  ;;  %v5024_v38 = vsub.f32 %v4794_v34, %v5008_v51 }
 0x385   :  { %v5032_v61 = vsub.f32 %v4808_v47, %v5008_v51  ;;  %v5038_v25 = vsub.f32 %v4810_v26, %v5008_v51  ;;  %v5046_v31 = vsub.f32 %v4824_v8, %v5008_v51  ;;  %v5053_v26 = vsub.f32 %v4826_v29, %v5008_v51 }
 0x386   :  { %v2542_v15 = vmul.f32 %v5012_v9, %v5012_v9  ;;  %v2543_v23 = vmul.f32 %v5016_v32, %v5016_v32  ;;  %v2544_v44 = vmul.f32 %v5020_v18, %v5020_v18  ;;  %v2545_v34 = vmul.f32 %v5024_v38, %v5024_v38 }
 0x387   :  { %v2546_v47 = vmul.f32 %v5032_v61, %v5032_v61  ;;  %v2547_v12 = vmul.f32 %v5038_v25, %v5038_v25  ;;  %v5060_v8 = vsub.f32 %v4840_v17, %v5008_v51  ;;  %v2548_v16 = vmul.f32 %v5046_v31, %v5046_v31 }
 0x388   :  { %v2574_v45 = vsel %vm916_vm1, %v2542_v15, 0.0  ;;  %v2575_v35 = vsel %vm916_vm1, %v2543_v23, 0.0  ;;  %v2577_v6 = vsel %vm916_vm1, %v2544_v44, 0.0  ;;  %v2579_v43 = vsel %vm916_vm1, %v2545_v34, 0.0 }
 0x389   :  { %v2576_v41 = vadd.f32 %v2575_v35, %v2574_v45  ;;  %v2581_v5 = vsel %vm916_vm1, %v2546_v47, 0.0  ;;  %v5067_v29 = vsub.f32 %v4842_v19, %v5008_v51  ;;  %v2549_v59 = vmul.f32 %v5053_v26, %v5053_v26 }
 0x38a   :  { %v2583_v57 = vsel %vm916_vm1, %v2547_v12, 0.0  ;;  %v5074_v17 = vsub.f32 %v4856_v53, %v5008_v51  ;;  %v2550_v13 = vmul.f32 %v5060_v8, %v5060_v8  ;;  %v2585_v20 = vsel %vm916_vm1, %v2548_v16, 0.0 }
 0x38b   :  { %v2578_v1 = vadd.f32 %v2577_v6, %v2576_v41  ;;  %v5081_v19 = vsub.f32 %v4858_v3, %v5008_v51  ;;  %v2551_v62 = vmul.f32 %v5067_v29, %v5067_v29  ;;  %v2587_v63 = vsel %vm916_vm1, %v2549_v59, 0.0 }
 0x38c   :  { %v5088_v53 = vsub.f32 %v4872_v7, %v5008_v51  ;;  %v2552_v24 = vmul.f32 %v5074_v17, %v5074_v17  ;;  %v2589_v36 = vsel %vm916_vm1, %v2550_v13, 0.0  ;;  %v5095_v3 = vsub.f32 %v4874_v54, %v5008_v51 }
 0x38d   :  { %v2580_v37 = vadd.f32 %v2579_v43, %v2578_v1  ;;  %v2553_v15 = vmul.f32 %v5081_v19, %v5081_v19  ;;  %v2591_v23 = vsel %vm916_vm1, %v2551_v62, 0.0  ;;  %v5102_v7 = vsub.f32 %v4888_v46, %v5008_v51 }
 0x38e   :  { %v2554_v34 = vmul.f32 %v5088_v53, %v5088_v53  ;;  %v2593_v45 = vsel %vm916_vm1, %v2552_v24, 0.0  ;;  %v5109_v54 = vsub.f32 %v4890_v11, %v5008_v51  ;;  %v2555_v41 = vmul.f32 %v5095_v3, %v5095_v3 }
 0x38f   :  { %v2582_v42 = vadd.f32 %v2581_v5, %v2580_v37  ;;  %v2595_v47 = vsel %vm916_vm1, %v2553_v15, 0.0  ;;  %v5116_v46 = vsub.f32 %v4892_v40, %v5008_v51  ;;  %v2556_v1 = vmul.f32 %v5102_v7, %v5102_v7 }
 0x390   :  { %v2597_v12 = vsel %vm916_vm1, %v2554_v34, 0.0  ;;  %v5123_v11 = vsub.f32 %v4894_v4, %v5008_v51  ;;  %v2557_v37 = vmul.f32 %v5109_v54, %v5109_v54  ;;  %v2599_v16 = vsel %vm916_vm1, %v2555_v41, 0.0 }
 0x391   :  { %v2584_v49 = vadd.f32 %v2583_v57, %v2582_v42  ;;  %v5130_v40 = vsub.f32 %v4896_v10, %v5008_v51  ;;  %v2558_v42 = vmul.f32 %v5116_v46, %v5116_v46  ;;  %v2601_v59 = vsel %vm916_vm1, %v2556_v1, 0.0 }
 0x392   :  { %v5137_v4 = vsub.f32 %v4898_v27, %v5008_v51  ;;  %v2603_v13 = vsel %vm916_vm1, %v2557_v37, 0.0  ;;  %v5144_v10 = vsub.f32 %v4906_v22, %v5008_v51  ;;  %v5151_v27 = vsub.f32 %v4957_v60, %v5008_v51 }
 0x393   :  { %v2586_v14 = vadd.f32 %v2585_v20, %v2584_v49  ;;  %v2559_v49 = vmul.f32 %v5123_v11, %v5123_v11  ;;  %v2605_v62 = vsel %vm916_vm1, %v2558_v42, 0.0  ;;  %v5158_v22 = vsub.f32 %v4962_v48, %v5008_v51 }
 0x394   :  { %v5165_v60 = vsub.f32 %v4967_v55, %v5008_v51  ;;  %v5172_v48 = vsub.f32 %v4972_v21, %v5008_v51  ;;  %v5179_v55 = vsub.f32 %v4977_v56, %v5008_v51  ;;  %v5186_v21 = vsub.f32 %v4981_v33, %v5008_v51 }
 0x395   :  { %v2588_v39 = vadd.f32 %v2587_v63, %v2586_v14  ;;  %v2560_v14 = vmul.f32 %v5130_v40, %v5130_v40  ;;  %v2607_v24 = vsel %vm916_vm1, %v2559_v49, 0.0  ;;  %v5193_v56 = vsub.f32 %v4985_v0, %v5008_v51 }
 0x396   :  { %v5200_v33 = vsub.f32 %v4989_v28, %v5008_v51  ;;  %v5207_v0 = vsub.f32 %v4993_v52, %v5008_v51  ;;  %v5214_v28 = vsub.f32 %v4997_v30, %v5008_v51  ;;  %v2541_v52 = vsub.f32 %v5003_v58, %v5008_v51 }
 0x397   :  { %v2590_v50 = vadd.f32 %v2589_v36, %v2588_v39  ;;  %v2561_v39 = vmul.f32 %v5137_v4, %v5137_v4  ;;  %v2609_v15 = vsel %vm916_vm1, %v2560_v14, 0.0 }
 0x399   :  { %v2592_v44 = vadd.f32 %v2591_v23, %v2590_v50  ;;  %v2562_v50 = vmul.f32 %v5144_v10, %v5144_v10  ;;  %v2611_v34 = vsel %vm916_vm1, %v2561_v39, 0.0 }
 0x39b   :  { %v2594_v35 = vadd.f32 %v2593_v45, %v2592_v44  ;;  %v2563_v44 = vmul.f32 %v5151_v27, %v5151_v27  ;;  %v2613_v41 = vsel %vm916_vm1, %v2562_v50, 0.0 }
 0x39d   :  { %v2596_v6 = vadd.f32 %v2595_v47, %v2594_v35  ;;  %v2564_v35 = vmul.f32 %v5158_v22, %v5158_v22  ;;  %v2615_v1 = vsel %vm916_vm1, %v2563_v44, 0.0 }
 0x39f   :  { %v2598_v43 = vadd.f32 %v2597_v12, %v2596_v6  ;;  %v2565_v6 = vmul.f32 %v5165_v60, %v5165_v60  ;;  %v2617_v37 = vsel %vm916_vm1, %v2564_v35, 0.0 }
 0x3a1   :  { %v2600_v5 = vadd.f32 %v2599_v16, %v2598_v43  ;;  %v2566_v43 = vmul.f32 %v5172_v48, %v5172_v48  ;;  %v2619_v42 = vsel %vm916_vm1, %v2565_v6, 0.0 }
 0x3a3   :  { %v2602_v57 = vadd.f32 %v2601_v59, %v2600_v5  ;;  %v2567_v5 = vmul.f32 %v5179_v55, %v5179_v55  ;;  %v2621_v49 = vsel %vm916_vm1, %v2566_v43, 0.0 }
 0x3a5   :  { %v2604_v20 = vadd.f32 %v2603_v13, %v2602_v57  ;;  %v2568_v57 = vmul.f32 %v5186_v21, %v5186_v21  ;;  %v2623_v14 = vsel %vm916_vm1, %v2567_v5, 0.0 }
 0x3a7   :  { %v2606_v63 = vadd.f32 %v2605_v62, %v2604_v20  ;;  %v2569_v20 = vmul.f32 %v5193_v56, %v5193_v56  ;;  %v2625_v39 = vsel %vm916_vm1, %v2568_v57, 0.0 }
 0x3a9   :  { %v2608_v36 = vadd.f32 %v2607_v24, %v2606_v63  ;;  %v2570_v63 = vmul.f32 %v5200_v33, %v5200_v33  ;;  %v2627_v50 = vsel %vm916_vm1, %v2569_v20, 0.0 }
 0x3ab   :  { %v2610_v23 = vadd.f32 %v2609_v15, %v2608_v36  ;;  %v2571_v36 = vmul.f32 %v5207_v0, %v5207_v0  ;;  %v2629_v30 = vsel %vm916_vm1, %v2570_v63, 0.0 }
 0x3ad   :  { %v2612_v45 = vadd.f32 %v2611_v34, %v2610_v23  ;;  %v2572_v23 = vmul.f32 %v5214_v28, %v5214_v28  ;;  %v2573_v34 = vmul.f32 %v2541_v52, %v2541_v52 }
 0x3af   :  { %v2614_v47 = vadd.f32 %v2613_v41, %v2612_v45  ;;  %v2631_v45 = vsel %vm916_vm1, %v2571_v36, 0.0  ;;  %v2633_v41 = vsel %vm916_vm1, %v2572_v23, 0.0  ;;  %v2635_v58 = vsel %vm916_vm1, %v2573_v34, 0.0 }
 0x3b1   :  { %v2616_v12 = vadd.f32 %v2615_v1, %v2614_v47 }
 0x3b3   :  { %v2618_v16 = vadd.f32 %v2617_v37, %v2616_v12 }
 0x3b5   :  { %v2620_v59 = vadd.f32 %v2619_v42, %v2618_v16 }
 0x3b7   :  { %v2622_v13 = vadd.f32 %v2621_v49, %v2620_v59 }
 0x3b9   :  { %v2624_v62 = vadd.f32 %v2623_v14, %v2622_v13 }
 0x3bb   :  { %v2626_v24 = vadd.f32 %v2625_v39, %v2624_v62  ;;  %v5234_v62 = vld [vmem:[%s5602_s9] ss:$0 sm:$0xff] }
 0x3bd   :  { %v2628_v15 = vadd.f32 %v2627_v50, %v2626_v24 }
 0x3bf   :  { %v2630_v44 = vadd.f32 %v2629_v30, %v2628_v15 }
 0x3c1   :  { %v2632_v35 = vadd.f32 %v2631_v45, %v2630_v44 }
 0x3c3   :  { %v2634_v47 = vadd.f32 %v2633_v41, %v2632_v35  ;;  %v5310_v41 = vld [vmem:[%s5603_s10] ss:$0 sm:$0xff] }
 0x3c5   :  { %v2636_v51 = vadd.f32 %v2635_v58, %v2634_v47 }
 0x3c7   :  { %v2637_v6 = vrot.slane %v2636_v51, 4 }
 0x3c9   :  { %v2638_v1 = vadd.f32 %v2637_v6, %v2636_v51 }
 0x3cb   :  { %v2639_v12 = vrot.slane %v2638_v1, 2 }
 0x3cd   :  { %v2640_v43 = vadd.f32 %v2639_v12, %v2638_v1 }
 0x3cf   :  { %v2641_v37 = vrot.slane %v2640_v43, 1 }
 0x3d1   :  { %v2642_v16 = vadd.f32 %v2641_v37, %v2640_v43 }
 0x3d3   :  { %v2643_v5 = vmul.f32 %v2642_v16, %v5768_v2 }
 0x3d5   :  { %v2644_v42 = vadd.f32 1e-05, %v2643_v5 }
 0x3d7   :  { %3123 = vrsqrt.f32 %v2644_v42  ;;  %vm2651_vm2 = vweird.f32 %v2644_v42 }
 0x3dd   :  { %v3124_v59 = vpop.eup %3123 }
 0x3de   :  { %v2646_v57 = vmul.f32 %v3124_v59, %v2644_v42  ;;  %vm2652_vm0 = vweird.f32 %v3124_v59 }
 0x3df   :  { %vm2653_vm3 = vmor %vm2651_vm2, %vm2652_vm0 }
 0x3e0   :  { %v2647_v49 = vmul.f32 %v3124_v59, %v2646_v57 }
 0x3e2   :  { %v2648_v13 = vmul.f32 0.5, %v2647_v49 }
 0x3e4   :  { %v2649_v20 = vsub.f32 1.5, %v2648_v13 }
 0x3e6   :  { %v2650_v14 = vmul.f32 %v3124_v59, %v2649_v20 }
 0x3e8   :  { %v5236_v63 = vsel %vm2653_vm3, %v3124_v59, %v2650_v14 }
 0x3e9   :  { %v2686_v2 = vmul.f32 %v5236_v63, %v2541_v52  ;;  %v2655_v24 = vmul.f32 %v5236_v63, %v5012_v9  ;;  %v2656_v36 = vmul.f32 %v5236_v63, %v5016_v32  ;;  %v2657_v50 = vmul.f32 %v5236_v63, %v5020_v18 }
 0x3ea   :  { %v2658_v15 = vmul.f32 %v5236_v63, %v5024_v38  ;;  %v2663_v23 = vmul.f32 %v5236_v63, %v5060_v8  ;;  %v2664_v52 = vmul.f32 %v5236_v63, %v5067_v29  ;;  %v2665_v30 = vmul.f32 %v5236_v63, %v5074_v17 }
 0x3eb   :  { %v5240_v39 = vmul.f32 %v5234_v62, %v2686_v2  ;;  %v2666_v9 = vmul.f32 %v5236_v63, %v5081_v19  ;;  %v2667_v32 = vmul.f32 %v5236_v63, %v5088_v53  ;;  %v2668_v18 = vmul.f32 %v5236_v63, %v5095_v3 }
 0x3ec   :  { %v2669_v38 = vmul.f32 %v5236_v63, %v5102_v7  ;;  %v2670_v8 = vmul.f32 %v5236_v63, %v5109_v54  ;;  %v2671_v29 = vmul.f32 %v5236_v63, %v5116_v46  ;;  %v2672_v17 = vmul.f32 %v5236_v63, %v5123_v11 }
 0x3ed   :  { %v2673_v19 = vmul.f32 %v5236_v63, %v5130_v40  ;;  %v2674_v53 = vmul.f32 %v5236_v63, %v5137_v4  ;;  %v2675_v3 = vmul.f32 %v5236_v63, %v5144_v10  ;;  %v2676_v7 = vmul.f32 %v5236_v63, %v5151_v27 }
 0x3ee   :  { %v2677_v54 = vmul.f32 %v5236_v63, %v5158_v22  ;;  %v2678_v46 = vmul.f32 %v5236_v63, %v5165_v60  ;;  %v2679_v11 = vmul.f32 %v5236_v63, %v5172_v48  ;;  %v2680_v40 = vmul.f32 %v5236_v63, %v5179_v55 }
 0x3ef   :  { %v2681_v4 = vmul.f32 %v5236_v63, %v5186_v21  ;;  %v2682_v10 = vmul.f32 %v5236_v63, %v5193_v56  ;;  %v2683_v27 = vmul.f32 %v5236_v63, %v5200_v33  ;;  %v2684_v22 = vmul.f32 %v5236_v63, %v5207_v0 }
 0x3f0   :  { %v2685_v60 = vmul.f32 %v5236_v63, %v5214_v28  ;;  %v2691_v48 = vmul.f32 %v5234_v62, %v2655_v24  ;;  %v2692_v44 = vmul.f32 %v5234_v62, %v2656_v36  ;;  %v2693_v55 = vmul.f32 %v5234_v62, %v2657_v50 }
 0x3f1   :  { %v2694_v21 = vmul.f32 %v5234_v62, %v2658_v15  ;;  %v2699_v34 = vmul.f32 %v5234_v62, %v2663_v23  ;;  %v2700_v56 = vmul.f32 %v5234_v62, %v2664_v52  ;;  %v2701_v33 = vmul.f32 %v5234_v62, %v2665_v30 }
 0x3f2   :  { %v2702_v45 = vmul.f32 %v5234_v62, %v2666_v9  ;;  %v2703_v0 = vmul.f32 %v5234_v62, %v2667_v32  ;;  %v2704_v28 = vmul.f32 %v5234_v62, %v2668_v18  ;;  %v2705_v35 = vmul.f32 %v5234_v62, %v2669_v38 }
 0x3f3   :  { %v2706_v47 = vmul.f32 %v5234_v62, %v2670_v8  ;;  %v2707_v58 = vmul.f32 %v5234_v62, %v2671_v29  ;;  %v2708_v51 = vmul.f32 %v5234_v62, %v2672_v17  ;;  %v2709_v6 = vmul.f32 %v5234_v62, %v2673_v19 }
 0x3f4   :  { %v2710_v1 = vmul.f32 %v5234_v62, %v2674_v53  ;;  %v2711_v12 = vmul.f32 %v5234_v62, %v2675_v3  ;;  %v2712_v43 = vmul.f32 %v5234_v62, %v2676_v7  ;;  %v2713_v37 = vmul.f32 %v5234_v62, %v2677_v54 }
 0x3f5   :  { %v2714_v16 = vmul.f32 %v5234_v62, %v2678_v46  ;;  %v2715_v5 = vmul.f32 %v5234_v62, %v2679_v11  ;;  %v2716_v42 = vmul.f32 %v5234_v62, %v2680_v40  ;;  %v2717_v59 = vmul.f32 %v5234_v62, %v2681_v4 }
 0x3f6   :  { %v2718_v57 = vmul.f32 %v5234_v62, %v2682_v10  ;;  %v2719_v49 = vmul.f32 %v5234_v62, %v2683_v27  ;;  %v2720_v13 = vmul.f32 %v5234_v62, %v2684_v22  ;;  %v2721_v20 = vmul.f32 %v5234_v62, %v2685_v60 }
 0x3f7   :  { %v2727_v14 = vadd.f32 %v5310_v41, %v2691_v48  ;;  %v2728_v2 = vadd.f32 %v5310_v41, %v2692_v44  ;;  %v5331_v24 = vadd.f32 %v5310_v41, %v2693_v55  ;;  %v5334_v36 = vadd.f32 %v5310_v41, %v2694_v21 }
 0x3f8   :  { %v2735_v52 = vadd.f32 %v5310_v41, %v2699_v34  ;;  %v2736_v30 = vadd.f32 %v5310_v41, %v2700_v56  ;;  %v2737_v18 = vadd.f32 %v5310_v41, %v2701_v33  ;;  %v2738_v38 = vadd.f32 %v5310_v41, %v2702_v45 }
 0x3f9   :  { %v2759_v50 = vmax.f32 %v2727_v14, 0.0  ;;  %v2760_v15 = vmax.f32 %v2728_v2, 0.0  ;;  %v2761_v9 = vmax.f32 %v5331_v24, 0.0  ;;  %v2762_v32 = vmax.f32 %v5334_v36, 0.0 }
 0x3fa   :  { %v2767_v8 = vmax.f32 %v2735_v52, 0.0  ;;  %v2768_v29 = vmax.f32 %v2736_v30, 0.0  ;;  %v2739_v17 = vadd.f32 %v5310_v41, %v2703_v0  ;;  %v2740_v19 = vadd.f32 %v5310_v41, %v2704_v28 }
 0x3fb   :  { %v2791_v23 = vpack.c.bf16 %v2760_v15, %v2759_v50  ;;  %v2769_v53 = vmax.f32 %v2737_v18, 0.0  ;;  %v2770_v3 = vmax.f32 %v2738_v38, 0.0  ;;  %v2741_v7 = vadd.f32 %v5310_v41, %v2705_v35 }
 0x3fc   :  { %v2742_v54 = vadd.f32 %v5310_v41, %v2706_v47  ;;  %v5347_v46 = vpack.c.bf16 %v2768_v29, %v2767_v8  ;;  %v2771_v11 = vmax.f32 %v2739_v17, 0.0  ;;  %v2772_v40 = vmax.f32 %v2740_v19, 0.0 }
 0x3fd   :  { %3093 = vmatmul.msk.bf16.vlgmr.msrb.gmra.mxu2 %vm916_vm1, %v2791_v23  ;;  %v2743_v4 = vadd.f32 %v5310_v41, %v2707_v58  ;;  %v5350_v10 = vpack.c.bf16 %v2770_v3, %v2769_v53  ;;  %v2773_v27 = vmax.f32 %v2741_v7, 0.0  ;;  %v2744_v60 = vadd.f32 %v5310_v41, %v2708_v51 }
 0x3fe   :  { %v2774_v22 = vmax.f32 %v2742_v54, 0.0  ;;  %v5353_v48 = vpack.c.bf16 %v2772_v40, %v2771_v11  ;;  %v2745_v55 = vadd.f32 %v5310_v41, %v2709_v6  ;;  %v2746_v21 = vadd.f32 %v5310_v41, %v2710_v1 }
 0x3ff   :  { %v2775_v44 = vmax.f32 %v2743_v4, 0.0  ;;  %v2776_v56 = vmax.f32 %v2744_v60, 0.0  ;;  %v2747_v33 = vadd.f32 %v5310_v41, %v2711_v12  ;;  %v2748_v45 = vadd.f32 %v5310_v41, %v2712_v43 }
 0x400   :  { %v5357_v34 = vpack.c.bf16 %v2774_v22, %v2773_v27  ;;  %v2777_v0 = vmax.f32 %v2745_v55, 0.0  ;;  %v2778_v28 = vmax.f32 %v2746_v21, 0.0  ;;  %v2749_v35 = vadd.f32 %v5310_v41, %v2713_v37 }
 0x401   :  { %v2750_v47 = vadd.f32 %v5310_v41, %v2714_v16  ;;  %v2799_v58 = vpack.c.bf16 %v2776_v56, %v2775_v44  ;;  %v2779_v51 = vmax.f32 %v2747_v33, 0.0  ;;  %v2780_v14 = vmax.f32 %v2748_v45, 0.0 }
 0x402   :  { %v2751_v6 = vadd.f32 %v5310_v41, %v2715_v5  ;;  %v5364_v2 = vpack.c.bf16 %v2778_v28, %v2777_v0  ;;  %v2781_v1 = vmax.f32 %v2749_v35, 0.0  ;;  %v2752_v36 = vadd.f32 %v5310_v41, %v2716_v42 }
 0x403   :  { %v2782_v24 = vmax.f32 %v2750_v47, 0.0  ;;  %v5367_v12 = vpack.c.bf16 %v2780_v14, %v2779_v51  ;;  %v2753_v50 = vadd.f32 %v5310_v41, %v2717_v59  ;;  %v2754_v37 = vadd.f32 %v5310_v41, %v2718_v57 }
 0x404   :  { %v2783_v43 = vmax.f32 %v2751_v6, 0.0  ;;  %v2784_v16 = vmax.f32 %v2752_v36, 0.0  ;;  %v2755_v23 = vadd.f32 %v5310_v41, %v2719_v49  ;;  %v2756_v5 = vadd.f32 %v5310_v41, %v2720_v13 }
 0x405   :  { %v5371_v15 = vpack.c.bf16 %v2782_v24, %v2781_v1  ;;  %v2785_v52 = vmax.f32 %v2753_v50, 0.0  ;;  %v2786_v30 = vmax.f32 %v2754_v37, 0.0  ;;  %v2757_v18 = vadd.f32 %v5310_v41, %v2721_v20 }
 0x406   :  { %v2758_v42 = vadd.f32 %v5310_v41, %v5240_v39  ;;  %v5378_v38 = vpack.c.bf16 %v2784_v16, %v2783_v43  ;;  %v2787_v8 = vmax.f32 %v2755_v23, 0.0  ;;  %v2788_v59 = vmax.f32 %v2756_v5, 0.0 }
 0x407   :  { %v5380_v29 = vpack.c.bf16 %v2786_v30, %v2785_v52  ;;  %v2789_v57 = vmax.f32 %v2757_v18, 0.0  ;;  %v2659_v49 = vmul.f32 %v5236_v63, %v5032_v61  ;;  %v2660_v13 = vmul.f32 %v5236_v63, %v5038_v25 }
 0x408   :  { %v2790_v17 = vmax.f32 %v2758_v42, 0.0  ;;  %v2792_v19 = vpack.c.bf16 %v2762_v32, %v2761_v9  ;;  %v5386_v53 = vpack.c.bf16 %v2788_v59, %v2787_v8  ;;  %v2661_v25 = vmul.f32 %v5236_v63, %v5046_v31 }
 0x409   :  { %v2695_v39 = vmul.f32 %v5234_v62, %v2659_v49  ;;  %v2696_v3 = vmul.f32 %v5234_v62, %v2660_v13  ;;  %v2662_v9 = vmul.f32 %v5236_v63, %v5053_v26  ;;  %v18_v31 = vstv %s5605_s12 }
 0x40a   :  { %v5388_v20 = vpack.c.bf16 %v2790_v17, %v2789_v57  ;;  %v2697_v40 = vmul.f32 %v5234_v62, %v2661_v25  ;;  %19 = vst [vmem:[#allocation2] sm:$0x1] %v18_v31 }
 0x40b   :  { %v2731_v7 = vadd.f32 %v5310_v41, %v2695_v39  ;;  %v2732_v54 = vadd.f32 %v5310_v41, %v2696_v3  ;;  %v2698_v4 = vmul.f32 %v5234_v62, %v2662_v9 }
 0x40c   :  { %v2733_v27 = vadd.f32 %v5310_v41, %v2697_v40 }
 0x40d   :  { %3094 = vmatmul.msk.bf16.gmra.mxu2 %vm916_vm1, %v2792_v19  ;;  %v2763_v11 = vmax.f32 %v2731_v7, 0.0  ;;  %v2764_v61 = vmax.f32 %v2732_v54, 0.0  ;;  %v2734_v22 = vadd.f32 %v5310_v41, %v2698_v4 }
 0x40e   :  { %v2765_v60 = vmax.f32 %v2733_v27, 0.0 }
 0x40f   :  { %v2793_v32 = vpack.c.bf16 %v2764_v61, %v2763_v11  ;;  %v2766_v44 = vmax.f32 %v2734_v22, 0.0 }
 0x411   :  { %v2794_v55 = vpack.c.bf16 %v2766_v44, %v2765_v60  ;;  %v5417_v26 = vld [vmem:[#allocation2] ss:$0 sm:$0xff] }
 0x41d   :  { %3095 = vmatmul.msk.bf16.gmra.mxu2 %vm916_vm1, %v2793_v32 }
 0x42d   :  { %3096 = vmatmul.msk.bf16.gmra.mxu2 %vm916_vm1, %v2794_v55 }
 0x43d   :  { %3097 = vmatmul.msk.bf16.gmra.mxu2 %vm916_vm1, %v5347_v46 }
 0x44d   :  { %3098 = vmatmul.msk.bf16.gmra.mxu2 %vm916_vm1, %v5350_v10 }
 0x45d   :  { %3099 = vmatmul.msk.bf16.gmra.mxu2 %vm916_vm1, %v5353_v48 }
 0x46d   :  { %3100 = vmatmul.msk.bf16.gmra.mxu2 %vm916_vm1, %v5357_v34 }
 0x47d   :  { %3101 = vmatmul.msk.bf16.gmra.mxu2 %vm916_vm1, %v2799_v58 }
 0x480   :  { %v2872_v62 = vpop.f32.mrf.mxu2 }
 0x481   :  { %v2873_v63 = vadd.f32 %v5417_v26, %v2872_v62 }
 0x483   :  { %2953 = vst.msk [vmem:[%s5606_s13] sm:$0xff] %vm2952_vm4, %v2873_v63 }
 0x488   :  { %v2874_v41 = vpop.f32.mrf.mxu2 }
 0x489   :  { %v2875_v46 = vadd.f32 %v5417_v26, %v2874_v41 }
 0x48b   :  { %2954 = vst.msk [vmem:[%s5606_s13 + $0x8] sm:$0xff] %vm2952_vm4, %v2875_v46 }
 0x48d   :  { %3102 = vmatmul.msk.bf16.gmra.mxu2 %vm916_vm1, %v5364_v2 }
 0x490   :  { %v2877_v10 = vpop.f32.mrf.mxu2 }
 0x491   :  { %v2878_v48 = vadd.f32 %v5417_v26, %v2877_v10 }
 0x493   :  { %2955 = vst.msk [vmem:[%s5606_s13 + $0x10] sm:$0xff] %vm2952_vm4, %v2878_v48 }
 0x498   :  { %v2879_v21 = vpop.f32.mrf.mxu2 }
 0x499   :  { %v2880_v34 = vadd.f32 %v5417_v26, %v2879_v21 }
 0x49b   :  { %2956 = vst.msk [vmem:[%s5606_s13 + $0x18] sm:$0xff] %vm2952_vm4, %v2880_v34 }
 0x49d   :  { %3103 = vmatmul.msk.bf16.gmra.mxu2 %vm916_vm1, %v5367_v12 }
 0x4a0   :  { %v2882_v56 = vpop.f32.mrf.mxu2 }
 0x4a1   :  { %v2883_v33 = vadd.f32 %v5417_v26, %v2882_v56 }
 0x4a3   :  { %2957 = vst.msk [vmem:[%s5606_s13 + $0x20] sm:$0xff] %vm2952_vm4, %v2883_v33 }
 0x4a8   :  { %v2884_v45 = vpop.f32.mrf.mxu2 }
 0x4a9   :  { %v2885_v0 = vadd.f32 %v5417_v26, %v2884_v45 }
 0x4ab   :  { %2958 = vst.msk [vmem:[%s5606_s13 + $0x28] sm:$0xff] %vm2952_vm4, %v2885_v0 }
 0x4ad   :  { %3104 = vmatmul.msk.bf16.gmra.mxu2 %vm916_vm1, %v5371_v15 }
 0x4b0   :  { %v2887_v28 = vpop.f32.mrf.mxu2 }
 0x4b1   :  { %v2888_v35 = vadd.f32 %v5417_v26, %v2887_v28 }
 0x4b3   :  { %2959 = vst.msk [vmem:[%s5606_s13 + $0x30] sm:$0xff] %vm2952_vm4, %v2888_v35 }
 0x4b8   :  { %v2889_v47 = vpop.f32.mrf.mxu2 }
 0x4b9   :  { %v2890_v58 = vadd.f32 %v5417_v26, %v2889_v47 }
 0x4bb   :  { %2960 = vst.msk [vmem:[%s5606_s13 + $0x38] sm:$0xff] %vm2952_vm4, %v2890_v58 }
 0x4bd   :  { %3105 = vmatmul.msk.bf16.gmra.mxu2 %vm916_vm1, %v5378_v38 }
 0x4c0   :  { %v2892_v51 = vpop.f32.mrf.mxu2 }
 0x4c1   :  { %v2893_v14 = vadd.f32 %v5417_v26, %v2892_v51 }
 0x4c3   :  { %2961 = vst.msk [vmem:[%s5606_s13 + $0x40] sm:$0xff] %vm2952_vm4, %v2893_v14 }
 0x4c8   :  { %v2894_v6 = vpop.f32.mrf.mxu2 }
 0x4c9   :  { %v2895_v2 = vadd.f32 %v5417_v26, %v2894_v6 }
 0x4cb   :  { %2962 = vst.msk [vmem:[%s5606_s13 + $0x48] sm:$0xff] %vm2952_vm4, %v2895_v2 }
 0x4cd   :  { %3106 = vmatmul.msk.bf16.gmra.mxu2 %vm916_vm1, %v5380_v29 }
 0x4d0   :  { %v2897_v1 = vpop.f32.mrf.mxu2 }
 0x4d1   :  { %v2898_v24 = vadd.f32 %v5417_v26, %v2897_v1 }
 0x4d3   :  { %2963 = vst.msk [vmem:[%s5606_s13 + $0x50] sm:$0xff] %vm2952_vm4, %v2898_v24 }
 0x4d8   :  { %v2899_v36 = vpop.f32.mrf.mxu2 }
 0x4d9   :  { %v2900_v12 = vadd.f32 %v5417_v26, %v2899_v36 }
 0x4db   :  { %2964 = vst.msk [vmem:[%s5606_s13 + $0x58] sm:$0xff] %vm2952_vm4, %v2900_v12 }
 0x4dd   :  { %3107 = vmatmul.msk.bf16.gmra.mxu2 %vm916_vm1, %v5386_v53 }
 0x4e0   :  { %v2902_v43 = vpop.f32.mrf.mxu2 }
 0x4e1   :  { %v2903_v50 = vadd.f32 %v5417_v26, %v2902_v43 }
 0x4e3   :  { %2965 = vst.msk [vmem:[%s5606_s13 + $0x60] sm:$0xff] %vm2952_vm4, %v2903_v50 }
 0x4e8   :  { %v2904_v37 = vpop.f32.mrf.mxu2 }
 0x4e9   :  { %v2905_v15 = vadd.f32 %v5417_v26, %v2904_v37 }
 0x4eb   :  { %2966 = vst.msk [vmem:[%s5606_s13 + $0x68] sm:$0xff] %vm2952_vm4, %v2905_v15 }
 0x4ed   :  { %3108 = vmatmul.msk.bf16.gmra.mxu2 %vm916_vm1, %v5388_v20 }
 0x4f0   :  { %v2907_v16 = vpop.f32.mrf.mxu2 }
 0x4f1   :  { %v2908_v23 = vadd.f32 %v5417_v26, %v2907_v16 }
 0x4f3   :  { %2967 = vst.msk [vmem:[%s5606_s13 + $0x70] sm:$0xff] %vm2952_vm4, %v2908_v23 }
 0x4f8   :  { %v2909_v5 = vpop.f32.mrf.mxu2 }
 0x4f9   :  { %v2910_v52 = vadd.f32 %v5417_v26, %v2909_v5 }
 0x4fb   :  { %2968 = vst.msk [vmem:[%s5606_s13 + $0x78] sm:$0xff] %vm2952_vm4, %v2910_v52 }
 0x500   :  { %v2912_v30 = vpop.f32.mrf.mxu2 }
 0x501   :  { %v2913_v18 = vadd.f32 %v5417_v26, %v2912_v30 }
 0x503   :  { %2969 = vst.msk [vmem:[%s5606_s13 + $0x80] sm:$0xff] %vm2952_vm4, %v2913_v18 }
 0x508   :  { %v2914_v42 = vpop.f32.mrf.mxu2 }
 0x509   :  { %v2915_v38 = vadd.f32 %v5417_v26, %v2914_v42 }
 0x50b   :  { %2970 = vst.msk [vmem:[%s5606_s13 + $0x88] sm:$0xff] %vm2952_vm4, %v2915_v38 }
 0x510   :  { %v2917_v8 = vpop.f32.mrf.mxu2 }
 0x511   :  { %v2918_v59 = vadd.f32 %v5417_v26, %v2917_v8 }
 0x513   :  { %2971 = vst.msk [vmem:[%s5606_s13 + $0x90] sm:$0xff] %vm2952_vm4, %v2918_v59 }
 0x518   :  { %v2919_v29 = vpop.f32.mrf.mxu2 }
 0x519   :  { %v2920_v57 = vadd.f32 %v5417_v26, %v2919_v29 }
 0x51b   :  { %2972 = vst.msk [vmem:[%s5606_s13 + $0x98] sm:$0xff] %vm2952_vm4, %v2920_v57 }
 0x520   :  { %v2922_v17 = vpop.f32.mrf.mxu2 }
 0x521   :  { %v2923_v49 = vadd.f32 %v5417_v26, %v2922_v17 }
 0x523   :  { %2973 = vst.msk [vmem:[%s5606_s13 + $0xa0] sm:$0xff] %vm2952_vm4, %v2923_v49 }
 0x528   :  { %v2924_v13 = vpop.f32.mrf.mxu2 }
 0x529   :  { %v2925_v19 = vadd.f32 %v5417_v26, %v2924_v13 }
 0x52b   :  { %2974 = vst.msk [vmem:[%s5606_s13 + $0xa8] sm:$0xff] %vm2952_vm4, %v2925_v19 }
 0x530   :  { %v2927_v53 = vpop.f32.mrf.mxu2 }
 0x531   :  { %v2928_v20 = vadd.f32 %v5417_v26, %v2927_v53 }
 0x533   :  { %2975 = vst.msk [vmem:[%s5606_s13 + $0xb0] sm:$0xff] %vm2952_vm4, %v2928_v20 }
 0x538   :  { %v2929_v39 = vpop.f32.mrf.mxu2 }
 0x539   :  { %v2930_v3 = vadd.f32 %v5417_v26, %v2929_v39 }
 0x53b   :  { %2976 = vst.msk [vmem:[%s5606_s13 + $0xb8] sm:$0xff] %vm2952_vm4, %v2930_v3 }
 0x540   :  { %v2932_v7 = vpop.f32.mrf.mxu2 }
 0x541   :  { %v2933_v54 = vadd.f32 %v5417_v26, %v2932_v7 }
 0x543   :  { %2977 = vst.msk [vmem:[%s5606_s13 + $0xc0] sm:$0xff] %vm2952_vm4, %v2933_v54 }
 0x548   :  { %v2934_v11 = vpop.f32.mrf.mxu2 }
 0x549   :  { %v2935_v61 = vadd.f32 %v5417_v26, %v2934_v11 }
 0x54b   :  { %2978 = vst.msk [vmem:[%s5606_s13 + $0xc8] sm:$0xff] %vm2952_vm4, %v2935_v61 }
 0x550   :  { %v2937_v25 = vpop.f32.mrf.mxu2 }
 0x551   :  { %v2938_v9 = vadd.f32 %v5417_v26, %v2937_v25 }
 0x553   :  { %2979 = vst.msk [vmem:[%s5606_s13 + $0xd0] sm:$0xff] %vm2952_vm4, %v2938_v9 }
 0x558   :  { %v2939_v32 = vpop.f32.mrf.mxu2 }
 0x559   :  { %v2940_v40 = vadd.f32 %v5417_v26, %v2939_v32 }
 0x55b   :  { %2980 = vst.msk [vmem:[%s5606_s13 + $0xd8] sm:$0xff] %vm2952_vm4, %v2940_v40 }
 0x560   :  { %v2942_v4 = vpop.f32.mrf.mxu2 }
 0x561   :  { %v2943_v27 = vadd.f32 %v5417_v26, %v2942_v4 }
 0x563   :  { %2981 = vst.msk [vmem:[%s5606_s13 + $0xe0] sm:$0xff] %vm2952_vm4, %v2943_v27 }
 0x568   :  { %v2944_v22 = vpop.f32.mrf.mxu2 }
 0x569   :  { %v2945_v60 = vadd.f32 %v5417_v26, %v2944_v22 }
 0x56b   :  { %2982 = vst.msk [vmem:[%s5606_s13 + $0xe8] sm:$0xff] %vm2952_vm4, %v2945_v60 }
 0x570   :  { %v2947_v44 = vpop.f32.mrf.mxu2 }
 0x571   :  { %v2948_v55 = vadd.f32 %v5417_v26, %v2947_v44 }
 0x573   :  { %2983 = vst.msk [vmem:[%s5606_s13 + $0xf0] sm:$0xff] %vm2952_vm4, %v2948_v55 }
 0x578   :  { %v2949_v31 = vpop.f32.mrf.mxu2 }
 0x579   :  { %v2950_v62 = vadd.f32 %v5417_v26, %v2949_v31 }
 0x57b   :  { %2984 = vst.msk [vmem:[%s5606_s13 + $0xf8] sm:$0xff] %vm2952_vm4, %v2950_v62 }

</bundles_post_ra>
